<compile_context>
chip_gen: v7x
topology: tpu7x:2x2x1
jax: 0.10.0
libtpu: 0.0.40
codegen_flags: <defaults>
</compile_context>

<pallas_src>
import functools

import jax
import jax.numpy as jnp
from jax.experimental import pallas as pl
from jax.experimental.pallas import tpu as pltpu


# ----------------------------------------------------------------------------
# Pallas kernels
# ----------------------------------------------------------------------------
def _conv_tap_kernel(*refs, taps, n_x, Ho, Wo, relu, has_residual):
    """Fused conv (+folded-BN bias) (+residual) (+ReLU) with in-kernel im2col.

    `taps` is a static tuple of (phase, row0, col0).  For each tap we slice the
    (padded / phase-decomposed) input block already resident in VMEM and run a
    bf16 MXU matmul against that tap's (Cin, Cout) weight slice, accumulating
    in f32.
    """
    x_refs = refs[:n_x]
    w_ref = refs[n_x]
    b_ref = refs[n_x + 1]
    r_ref = refs[n_x + 2] if has_residual else None
    o_ref = refs[-1]

    nb = o_ref.shape[0]
    cout = o_ref.shape[-1]
    cin = x_refs[0].shape[-1]
    m = nb * Ho * Wo

    acc = jnp.zeros((m, cout), jnp.float32)
    for t, (ph, r0, c0) in enumerate(taps):
        patch = x_refs[ph][:, r0:r0 + Ho, c0:c0 + Wo, :]          # (nb, Ho, Wo, cin)
        acc = acc + jnp.dot(patch.reshape(m, cin), w_ref[t],
                            preferred_element_type=jnp.float32)

    y = acc + b_ref[...]                                          # folded-BN bias (f32)
    y = y.reshape(nb, Ho, Wo, cout)
    if has_residual:
        y = y + r_ref[...].astype(jnp.float32)
    if relu:
        y = jnp.maximum(y, 0.0)
    o_ref[...] = y.astype(o_ref.dtype)


def _mm_bias_kernel(*refs, relu, has_residual):
    """(tm, K) @ (K, N) + bias [+ residual] [+ ReLU]; bf16 MXU, f32 accumulate."""
    x_ref, w_ref, b_ref = refs[0], refs[1], refs[2]
    r_ref = refs[3] if has_residual else None
    o_ref = refs[-1]
    y = jnp.dot(x_ref[...], w_ref[...], preferred_element_type=jnp.float32)
    y = y + b_ref[...]
    if has_residual:
        y = y + r_ref[...].astype(jnp.float32)
    if relu:
        y = jnp.maximum(y, 0.0)
    o_ref[...] = y.astype(o_ref.dtype)


def _head_kernel(x_ref, w_ref, b_ref, o_ref):
    """Fused 4x4 global average pool + linear; output padded to 128 lanes."""
    x = x_ref[...].astype(jnp.float32)                  # (N, 4, 4, C)
    pooled = x.sum(axis=1).sum(axis=1) * (1.0 / 16.0)   # (N, C)
    y = jnp.dot(pooled.astype(jnp.bfloat16), w_ref[...],
                preferred_element_type=jnp.float32)
    o_ref[...] = y + b_ref[...]


# ----------------------------------------------------------------------------
# Kernel wrappers
# ----------------------------------------------------------------------------
_COMPILER_PARAMS = pltpu.CompilerParams(
    dimension_semantics=("parallel",),
    vmem_limit_bytes=48 * 1024 * 1024,   # fits v7x's 64 MiB, raises v5e default
)


def _batch_tile(n, out_hw):
    """Batch-chunk size: bigger chunks for small feature maps (less per-step
    overhead), bounded so the per-block VMEM footprint stays modest, and the
    grid stays >= 2 whenever N >= 2 (megacore sharding on v7x)."""
    cap = min(32, max(8, 4096 // max(out_hw, 1)))
    nb = 1
    for c in range(2, cap + 1):
        if n % c == 0 and n // c >= 2:
            nb = c
    return nb


def _row_tile(m, cap=512):
    """Largest row tile (multiple of 8, <= cap) that keeps the grid >= 2."""
    if m % 8 != 0:
        return m
    best = None
    for t in range(8, min(m, cap) + 1, 8):
        if m % t == 0 and m // t >= 2:
            best = t
    return best if best is not None else m


def _conv_call(xs, w3, bias, taps, ho, wo, relu, residual):
    n = xs[0].shape[0]
    cout = w3.shape[-1]
    nb = _batch_tile(n, ho * wo)
    grid = (n // nb,)

    in_specs = [pl.BlockSpec((nb,) + a.shape[1:], lambda i: (i, 0, 0, 0)) for a in xs]
    in_specs.append(pl.BlockSpec(w3.shape, lambda i: (0, 0, 0)))   # resident weights
    in_specs.append(pl.BlockSpec((1, cout), lambda i: (0, 0)))
    args = list(xs) + [w3, bias]
    if residual is not None:
        in_specs.append(pl.BlockSpec((nb, ho, wo, cout), lambda i: (i, 0, 0, 0)))
        args.append(residual)

    kernel = functools.partial(
        _conv_tap_kernel, taps=taps, n_x=len(xs), Ho=ho, Wo=wo,
        relu=relu, has_residual=residual is not None)

    return pl.pallas_call(
        kernel,
        out_shape=jax.ShapeDtypeStruct((n, ho, wo, cout), jnp.bfloat16),
        grid=grid,
        in_specs=in_specs,
        out_specs=pl.BlockSpec((nb, ho, wo, cout), lambda i: (i, 0, 0, 0)),
        compiler_params=_COMPILER_PARAMS,
    )(*args)


def _matmul_call(x2d, wmat, bias, relu, residual2d):
    m, k = x2d.shape
    cout = wmat.shape[1]
    tm = _row_tile(m)
    grid = (m // tm,)

    in_specs = [pl.BlockSpec((tm, k), lambda i: (i, 0)),
                pl.BlockSpec((k, cout), lambda i: (0, 0)),
                pl.BlockSpec((1, cout), lambda i: (0, 0))]
    args = [x2d, wmat, bias]
    if residual2d is not None:
        in_specs.append(pl.BlockSpec((tm, cout), lambda i: (i, 0)))
        args.append(residual2d)

    kernel = functools.partial(_mm_bias_kernel, relu=relu,
                               has_residual=residual2d is not None)

    return pl.pallas_call(
        kernel,
        out_shape=jax.ShapeDtypeStruct((m, cout), jnp.bfloat16),
        grid=grid,
        in_specs=in_specs,
        out_specs=pl.BlockSpec((tm, cout), lambda i: (i, 0)),
        compiler_params=_COMPILER_PARAMS,
    )(*args)


def _im2col(x, ksize, stride, pad):
    """NHWC -> (N*Ho*Wo, k*k*C) patches (XLA glue; only used for tiny 4x4 maps)."""
    n, h, w, c = x.shape
    if pad:
        x = jnp.pad(x, ((0, 0), (pad, pad), (pad, pad), (0, 0)))
    ho = (h + 2 * pad - ksize) // stride + 1
    wo = (w + 2 * pad - ksize) // stride + 1
    cols = []
    for i in range(ksize):
        for j in range(ksize):
            cols.append(x[:, i:i + stride * ho:stride, j:j + stride * wo:stride, :])
    patches = jnp.stack(cols, axis=3)                    # (n, ho, wo, k*k, c)
    return patches.reshape(n * ho * wo, ksize * ksize * c), ho, wo


def conv_bn(x, w, bn, stride, relu, residual=None):
    """Conv2d(bias=False) + BatchNorm2d (inference stats) [+residual] [+ReLU].

    x is NHWC (bf16), w is PyTorch layout (Cout, Cin, kh, kw).  The BN scale is
    folded into the bf16 weight matrix; only the bias is applied in-kernel."""
    cout, cin, kh, kw = w.shape
    n, h, wid, _ = x.shape
    scale = bn["gamma"] / jnp.sqrt(bn["var"] + 1e-5)
    bias = (bn["beta"] - bn["mean"] * scale).reshape(1, cout).astype(jnp.float32)
    w3 = (jnp.transpose(w, (2, 3, 1, 0)) * scale)                # (kh, kw, cin, cout)
    w3 = w3.reshape(kh * kw, cin, cout).astype(jnp.bfloat16)
    pad = (kh - 1) // 2                                          # 1 for 3x3, 0 for 1x1
    ho = (h + 2 * pad - kh) // stride + 1
    wo = (wid + 2 * pad - kw) // stride + 1

    x = x.astype(jnp.bfloat16)

    if wo % 8 != 0:
        # Tiny late-stage maps (e.g. 4x4): wrapper im2col + fused bf16 matmul.
        patches, ho, wo = _im2col(x, kh, stride, pad)
        res2d = residual.reshape(-1, cout) if residual is not None else None
        out = _matmul_call(patches, w3.reshape(kh * kw * cin, cout), bias, relu, res2d)
        return out.reshape(n, ho, wo, cout)

    if stride == 1:
        xp = jnp.pad(x, ((0, 0), (pad, pad), (pad, pad), (0, 0))) if pad else x
        xs = [xp]
        taps = tuple((0, i, j) for i in range(kh) for j in range(kw))
    elif kh == 1:
        # 1x1 stride-2 shortcut: pure subsample, single tap.
        xs = [x[:, ::stride, ::stride, :]]
        taps = ((0, 0, 0),)
    else:
        # 3x3 stride-2: decompose padded input into 4 space-to-depth phases so
        # every tap is a contiguous stride-1 slice inside the kernel.
        xp = jnp.pad(x, ((0, 0), (pad, pad), (pad, pad), (0, 0)))
        xs = [xp[:, p::2, q::2, :] for p in range(2) for q in range(2)]
        taps = tuple((2 * (i % 2) + (j % 2), i // 2, j // 2)
                     for i in range(kh) for j in range(kw))

    return _conv_call(xs, w3, bias, taps, ho, wo, relu, residual)


def head(x, lin_w, lin_b):
    """F.avg_pool2d(out, 4) + view + Linear, fused; lane-padded output."""
    n, h, w, c = x.shape
    assert h == 4 and w == 4  # CIFAR-sized 32x32 input -> 4x4 layer4 output
    num_classes = lin_w.shape[0]
    npad = 128
    wp = jnp.zeros((c, npad), jnp.float32).at[:, :num_classes].set(lin_w.T)
    bp = jnp.zeros((1, npad), jnp.float32).at[:, :num_classes].set(lin_b[None, :])
    logits = pl.pallas_call(
        _head_kernel,
        out_shape=jax.ShapeDtypeStruct((n, npad), jnp.float32),
    )(x.astype(jnp.bfloat16), wp.astype(jnp.bfloat16), bp)
    return logits[:, :num_classes]


# ----------------------------------------------------------------------------
# Parameter init (deterministic, synthetic) and forward pass
# ----------------------------------------------------------------------------
def _init_conv(key, cout, cin, k):
    fan_in = cin * k * k
    return jax.random.normal(key, (cout, cin, k, k), jnp.float32) * (2.0 / fan_in) ** 0.5


def _init_bn(c):
    # PyTorch default BN init: gamma=1, beta=0, running_mean=0, running_var=1
    return dict(
        gamma=jnp.ones((c,), jnp.float32),
        beta=jnp.zeros((c,), jnp.float32),
        mean=jnp.zeros((c,), jnp.float32),
        var=jnp.ones((c,), jnp.float32),
    )


def init_resnet18(key, num_classes=10):
    keys = iter(jax.random.split(key, 64))
    params = {
        "conv1": _init_conv(next(keys), 64, 3, 3),
        "bn1": _init_bn(64),
        "layers": [],
    }
    in_planes = 64
    for planes, nb, stride in [(64, 2, 1), (128, 2, 2), (256, 2, 2), (512, 2, 2)]:
        blocks = []
        for s in [stride] + [1] * (nb - 1):
            p = {
                "w1": _init_conv(next(keys), planes, in_planes, 3),
                "bn1": _init_bn(planes),
                "w2": _init_conv(next(keys), planes, planes, 3),
                "bn2": _init_bn(planes),
                "stride": s,
            }
            if s != 1 or in_planes != planes:
                p["sc_w"] = _init_conv(next(keys), planes, in_planes, 1)
                p["sc_bn"] = _init_bn(planes)
            blocks.append(p)
            in_planes = planes
        params["layers"].append(blocks)
    params["lin_w"] = jax.random.normal(
        next(keys), (num_classes, 512), jnp.float32) * (1.0 / 512) ** 0.5
    params["lin_b"] = jnp.zeros((num_classes,), jnp.float32)
    return params


def basic_block(x, p):
    stride = p["stride"]
    if "sc_w" in p:
        shortcut = conv_bn(x, p["sc_w"], p["sc_bn"], stride, relu=False)
    else:
        shortcut = x
    out = conv_bn(x, p["w1"], p["bn1"], stride, relu=True)
    # conv2 + bn2 + residual add + final ReLU fused in one kernel
    out = conv_bn(out, p["w2"], p["bn2"], 1, relu=True, residual=shortcut)
    return out


def resnet_forward(params, x_nchw):
    # External interface is NCHW (PyTorch); compute is NHWC bf16 internally.
    x = jnp.transpose(x_nchw, (0, 2, 3, 1)).astype(jnp.bfloat16)
    out = conv_bn(x, params["conv1"], params["bn1"], stride=1, relu=True)
    for blocks in params["layers"]:
        for p in blocks:
            out = basic_block(out, p)
    return head(out, params["lin_w"], params["lin_b"])            # (N, 10) f32


# TODO(synk): BatchNorm training-mode (batch-statistics) forward not implemented;
# inference-mode (running-stats) BN semantics are used.

if __name__ == "__main__":
    key = jax.random.PRNGKey(0)
    pkey, xkey = jax.random.split(key)
    params = init_resnet18(pkey)
    x = jax.random.normal(xkey, (2, 3, 32, 32), jnp.float32)
    logits = resnet_forward(params, x)
    jax.block_until_ready(logits)
    assert logits.shape == (2, 10) and logits.dtype == jnp.float32
    print("KERNEL_OK")
</pallas_src>

<mosaic_0001>
module attributes {stable_mosaic.version = 11 : i64} {
  func.func @_conv_tap_kernel(%arg0: i32, %arg1: memref<1x34x34x3xbf16, #tpu.memory_space<vmem>>, %arg2: memref<9x3x64xbf16, #tpu.memory_space<vmem>>, %arg3: memref<1x64xf32, #tpu.memory_space<vmem>>, %arg4: memref<1x32x32x64xbf16, #tpu.memory_space<vmem>>) attributes {dimension_semantics = [#tpu.dimension_semantics<parallel>], iteration_bounds = array<i64: 2>, scalar_prefetch = 0 : i64, scratch_operands = 0 : i64, tpu.core_type = #tpu.core_type<tc>, window_params = [{transform_indices = @transform_0, window_bounds = array<i64: 1, 34, 34, 3>}, {pipeline_mode = #tpu.pipeline_mode<synchronous>, transform_indices = @transform_1, window_bounds = array<i64: 9, 3, 64>}, {pipeline_mode = #tpu.pipeline_mode<synchronous>, transform_indices = @transform_2, window_bounds = array<i64: 1, 64>}, {transform_indices = @transform_3, window_bounds = array<i64: 1, 32, 32, 64>}]} {
    %cst = arith.constant 0.000000e+00 : f32
    %0 = vector.broadcast %cst : f32 to vector<1024x64xf32>
    %c0 = arith.constant 0 : index
    %c0_0 = arith.constant 0 : index
    %c0_1 = arith.constant 0 : index
    %c0_2 = arith.constant 0 : index
    %1 = vector.load %arg1[%c0, %c0_0, %c0_1, %c0_2] : memref<1x34x34x3xbf16, #tpu.memory_space<vmem>>, vector<1x32x32x3xbf16>
    %2 = vector.shape_cast %1 : vector<1x32x32x3xbf16> to vector<1024x3xbf16>
    %c0_3 = arith.constant 0 : index
    %c0_4 = arith.constant 0 : index
    %c0_5 = arith.constant 0 : index
    %3 = vector.load %arg2[%c0_3, %c0_4, %c0_5] : memref<9x3x64xbf16, #tpu.memory_space<vmem>>, vector<1x3x64xbf16>
    %4 = vector.shape_cast %3 : vector<1x3x64xbf16> to vector<3x64xbf16>
    %cst_6 = arith.constant dense<0.000000e+00> : vector<1024x64xf32>
    %5 = tpu.matmul %2, %4, %cst_6 {dimension_numbers = #tpu.dot_dimension_numbers<[1], [0], [0], [1], [0, 0, 1, 1], [], []>} : vector<1024x3xbf16>, vector<3x64xbf16>, vector<1024x64xf32> -> vector<1024x64xf32>
    %6 = arith.addf %0, %5 : vector<1024x64xf32>
    %c0_7 = arith.constant 0 : index
    %c0_8 = arith.constant 0 : index
    %c1 = arith.constant 1 : index
    %c0_9 = arith.constant 0 : index
    %7 = vector.load %arg1[%c0_7, %c0_8, %c1, %c0_9] : memref<1x34x34x3xbf16, #tpu.memory_space<vmem>>, vector<1x32x32x3xbf16>
    %8 = vector.shape_cast %7 : vector<1x32x32x3xbf16> to vector<1024x3xbf16>
    %c1_10 = arith.constant 1 : index
    %c0_11 = arith.constant 0 : index
    %c0_12 = arith.constant 0 : index
    %9 = vector.load %arg2[%c1_10, %c0_11, %c0_12] : memref<9x3x64xbf16, #tpu.memory_space<vmem>>, vector<1x3x64xbf16>
    %10 = vector.shape_cast %9 : vector<1x3x64xbf16> to vector<3x64xbf16>
    %cst_13 = arith.constant dense<0.000000e+00> : vector<1024x64xf32>
    %11 = tpu.matmul %8, %10, %cst_13 {dimension_numbers = #tpu.dot_dimension_numbers<[1], [0], [0], [1], [0, 0, 1, 1], [], []>} : vector<1024x3xbf16>, vector<3x64xbf16>, vector<1024x64xf32> -> vector<1024x64xf32>
    %12 = arith.addf %6, %11 : vector<1024x64xf32>
    %c0_14 = arith.constant 0 : index
    %c0_15 = arith.constant 0 : index
    %c2 = arith.constant 2 : index
    %c0_16 = arith.constant 0 : index
    %13 = vector.load %arg1[%c0_14, %c0_15, %c2, %c0_16] : memref<1x34x34x3xbf16, #tpu.memory_space<vmem>>, vector<1x32x32x3xbf16>
    %14 = vector.shape_cast %13 : vector<1x32x32x3xbf16> to vector<1024x3xbf16>
    %c2_17 = arith.constant 2 : index
    %c0_18 = arith.constant 0 : index
    %c0_19 = arith.constant 0 : index
    %15 = vector.load %arg2[%c2_17, %c0_18, %c0_19] : memref<9x3x64xbf16, #tpu.memory_space<vmem>>, vector<1x3x64xbf16>
    %16 = vector.shape_cast %15 : vector<1x3x64xbf16> to vector<3x64xbf16>
    %cst_20 = arith.constant dense<0.000000e+00> : vector<1024x64xf32>
    %17 = tpu.matmul %14, %16, %cst_20 {dimension_numbers = #tpu.dot_dimension_numbers<[1], [0], [0], [1], [0, 0, 1, 1], [], []>} : vector<1024x3xbf16>, vector<3x64xbf16>, vector<1024x64xf32> -> vector<1024x64xf32>
    %18 = arith.addf %12, %17 : vector<1024x64xf32>
    %c0_21 = arith.constant 0 : index
    %c1_22 = arith.constant 1 : index
    %c0_23 = arith.constant 0 : index
    %c0_24 = arith.constant 0 : index
    %19 = vector.load %arg1[%c0_21, %c1_22, %c0_23, %c0_24] : memref<1x34x34x3xbf16, #tpu.memory_space<vmem>>, vector<1x32x32x3xbf16>
    %20 = vector.shape_cast %19 : vector<1x32x32x3xbf16> to vector<1024x3xbf16>
    %c3 = arith.constant 3 : index
    %c0_25 = arith.constant 0 : index
    %c0_26 = arith.constant 0 : index
    %21 = vector.load %arg2[%c3, %c0_25, %c0_26] : memref<9x3x64xbf16, #tpu.memory_space<vmem>>, vector<1x3x64xbf16>
    %22 = vector.shape_cast %21 : vector<1x3x64xbf16> to vector<3x64xbf16>
    %cst_27 = arith.constant dense<0.000000e+00> : vector<1024x64xf32>
    %23 = tpu.matmul %20, %22, %cst_27 {dimension_numbers = #tpu.dot_dimension_numbers<[1], [0], [0], [1], [0, 0, 1, 1], [], []>} : vector<1024x3xbf16>, vector<3x64xbf16>, vector<1024x64xf32> -> vector<1024x64xf32>
    %24 = arith.addf %18, %23 : vector<1024x64xf32>
    %c0_28 = arith.constant 0 : index
    %c1_29 = arith.constant 1 : index
    %c1_30 = arith.constant 1 : index
    %c0_31 = arith.constant 0 : index
    %25 = vector.load %arg1[%c0_28, %c1_29, %c1_30, %c0_31] : memref<1x34x34x3xbf16, #tpu.memory_space<vmem>>, vector<1x32x32x3xbf16>
    %26 = vector.shape_cast %25 : vector<1x32x32x3xbf16> to vector<1024x3xbf16>
    %c4 = arith.constant 4 : index
    %c0_32 = arith.constant 0 : index
    %c0_33 = arith.constant 0 : index
    %27 = vector.load %arg2[%c4, %c0_32, %c0_33] : memref<9x3x64xbf16, #tpu.memory_space<vmem>>, vector<1x3x64xbf16>
    %28 = vector.shape_cast %27 : vector<1x3x64xbf16> to vector<3x64xbf16>
    %cst_34 = arith.constant dense<0.000000e+00> : vector<1024x64xf32>
    %29 = tpu.matmul %26, %28, %cst_34 {dimension_numbers = #tpu.dot_dimension_numbers<[1], [0], [0], [1], [0, 0, 1, 1], [], []>} : vector<1024x3xbf16>, vector<3x64xbf16>, vector<1024x64xf32> -> vector<1024x64xf32>
    %30 = arith.addf %24, %29 : vector<1024x64xf32>
    %c0_35 = arith.constant 0 : index
    %c1_36 = arith.constant 1 : index
    %c2_37 = arith.constant 2 : index
    %c0_38 = arith.constant 0 : index
    %31 = vector.load %arg1[%c0_35, %c1_36, %c2_37, %c0_38] : memref<1x34x34x3xbf16, #tpu.memory_space<vmem>>, vector<1x32x32x3xbf16>
    %32 = vector.shape_cast %31 : vector<1x32x32x3xbf16> to vector<1024x3xbf16>
    %c5 = arith.constant 5 : index
    %c0_39 = arith.constant 0 : index
    %c0_40 = arith.constant 0 : index
    %33 = vector.load %arg2[%c5, %c0_39, %c0_40] : memref<9x3x64xbf16, #tpu.memory_space<vmem>>, vector<1x3x64xbf16>
    %34 = vector.shape_cast %33 : vector<1x3x64xbf16> to vector<3x64xbf16>
    %cst_41 = arith.constant dense<0.000000e+00> : vector<1024x64xf32>
    %35 = tpu.matmul %32, %34, %cst_41 {dimension_numbers = #tpu.dot_dimension_numbers<[1], [0], [0], [1], [0, 0, 1, 1], [], []>} : vector<1024x3xbf16>, vector<3x64xbf16>, vector<1024x64xf32> -> vector<1024x64xf32>
    %36 = arith.addf %30, %35 : vector<1024x64xf32>
    %c0_42 = arith.constant 0 : index
    %c2_43 = arith.constant 2 : index
    %c0_44 = arith.constant 0 : index
    %c0_45 = arith.constant 0 : index
    %37 = vector.load %arg1[%c0_42, %c2_43, %c0_44, %c0_45] : memref<1x34x34x3xbf16, #tpu.memory_space<vmem>>, vector<1x32x32x3xbf16>
    %38 = vector.shape_cast %37 : vector<1x32x32x3xbf16> to vector<1024x3xbf16>
    %c6 = arith.constant 6 : index
    %c0_46 = arith.constant 0 : index
    %c0_47 = arith.constant 0 : index
    %39 = vector.load %arg2[%c6, %c0_46, %c0_47] : memref<9x3x64xbf16, #tpu.memory_space<vmem>>, vector<1x3x64xbf16>
    %40 = vector.shape_cast %39 : vector<1x3x64xbf16> to vector<3x64xbf16>
    %cst_48 = arith.constant dense<0.000000e+00> : vector<1024x64xf32>
    %41 = tpu.matmul %38, %40, %cst_48 {dimension_numbers = #tpu.dot_dimension_numbers<[1], [0], [0], [1], [0, 0, 1, 1], [], []>} : vector<1024x3xbf16>, vector<3x64xbf16>, vector<1024x64xf32> -> vector<1024x64xf32>
    %42 = arith.addf %36, %41 : vector<1024x64xf32>
    %c0_49 = arith.constant 0 : index
    %c2_50 = arith.constant 2 : index
    %c1_51 = arith.constant 1 : index
    %c0_52 = arith.constant 0 : index
    %43 = vector.load %arg1[%c0_49, %c2_50, %c1_51, %c0_52] : memref<1x34x34x3xbf16, #tpu.memory_space<vmem>>, vector<1x32x32x3xbf16>
    %44 = vector.shape_cast %43 : vector<1x32x32x3xbf16> to vector<1024x3xbf16>
    %c7 = arith.constant 7 : index
    %c0_53 = arith.constant 0 : index
    %c0_54 = arith.constant 0 : index
    %45 = vector.load %arg2[%c7, %c0_53, %c0_54] : memref<9x3x64xbf16, #tpu.memory_space<vmem>>, vector<1x3x64xbf16>
    %46 = vector.shape_cast %45 : vector<1x3x64xbf16> to vector<3x64xbf16>
    %cst_55 = arith.constant dense<0.000000e+00> : vector<1024x64xf32>
    %47 = tpu.matmul %44, %46, %cst_55 {dimension_numbers = #tpu.dot_dimension_numbers<[1], [0], [0], [1], [0, 0, 1, 1], [], []>} : vector<1024x3xbf16>, vector<3x64xbf16>, vector<1024x64xf32> -> vector<1024x64xf32>
    %48 = arith.addf %42, %47 : vector<1024x64xf32>
    %c0_56 = arith.constant 0 : index
    %c2_57 = arith.constant 2 : index
    %c2_58 = arith.constant 2 : index
    %c0_59 = arith.constant 0 : index
    %49 = vector.load %arg1[%c0_56, %c2_57, %c2_58, %c0_59] : memref<1x34x34x3xbf16, #tpu.memory_space<vmem>>, vector<1x32x32x3xbf16>
    %50 = vector.shape_cast %49 : vector<1x32x32x3xbf16> to vector<1024x3xbf16>
    %c8 = arith.constant 8 : index
    %c0_60 = arith.constant 0 : index
    %c0_61 = arith.constant 0 : index
    %51 = vector.load %arg2[%c8, %c0_60, %c0_61] : memref<9x3x64xbf16, #tpu.memory_space<vmem>>, vector<1x3x64xbf16>
    %52 = vector.shape_cast %51 : vector<1x3x64xbf16> to vector<3x64xbf16>
    %cst_62 = arith.constant dense<0.000000e+00> : vector<1024x64xf32>
    %53 = tpu.matmul %50, %52, %cst_62 {dimension_numbers = #tpu.dot_dimension_numbers<[1], [0], [0], [1], [0, 0, 1, 1], [], []>} : vector<1024x3xbf16>, vector<3x64xbf16>, vector<1024x64xf32> -> vector<1024x64xf32>
    %54 = arith.addf %48, %53 : vector<1024x64xf32>
    %c0_63 = arith.constant 0 : index
    %c0_64 = arith.constant 0 : index
    %55 = vector.load %arg3[%c0_63, %c0_64] : memref<1x64xf32, #tpu.memory_space<vmem>>, vector<1x64xf32>
    %56 = vector.broadcast %55 : vector<1x64xf32> to vector<1024x64xf32>
    %57 = arith.addf %54, %56 : vector<1024x64xf32>
    %58 = vector.shape_cast %57 : vector<1024x64xf32> to vector<1x32x32x64xf32>
    %cst_65 = arith.constant 0.000000e+00 : f32
    %59 = vector.broadcast %cst_65 : f32 to vector<1x32x32x64xf32>
    %60 = arith.maximumf %58, %59 : vector<1x32x32x64xf32>
    %61 = arith.truncf %60 : vector<1x32x32x64xf32> to vector<1x32x32x64xbf16>
    %c0_66 = arith.constant 0 : index
    %c0_67 = arith.constant 0 : index
    %c0_68 = arith.constant 0 : index
    %c0_69 = arith.constant 0 : index
    %62 = vector.load %arg4[%c0_66, %c0_67, %c0_68, %c0_69] : memref<1x32x32x64xbf16, #tpu.memory_space<vmem>>, vector<1x32x32x64xbf16>
    tpu.vector_store %arg4[%c0_66, %c0_67, %c0_68, %c0_69], %61 {strides = array<i32>} : memref<1x32x32x64xbf16, #tpu.memory_space<vmem>>, vector<1x32x32x64xbf16>,
    return
  }
  func.func @transform_0(%arg0: i32) -> (i32, i32, i32, i32) {
    %c0_i32 = arith.constant 0 : i32
    %c0_i32_0 = arith.constant 0 : i32
    %c0_i32_1 = arith.constant 0 : i32
    %c0_i32_2 = arith.constant 0 : i32
    return %arg0, %c0_i32, %c0_i32_0, %c0_i32_1 : i32, i32, i32, i32
  }
  func.func @transform_1(%arg0: i32) -> (i32, i32, i32) {
    %c0_i32 = arith.constant 0 : i32
    %c0_i32_0 = arith.constant 0 : i32
    %c0_i32_1 = arith.constant 0 : i32
    %c0_i32_2 = arith.constant 0 : i32
    return %c0_i32, %c0_i32_0, %c0_i32_1 : i32, i32, i32
  }
  func.func @transform_2(%arg0: i32) -> (i32, i32) {
    %c0_i32 = arith.constant 0 : i32
    %c0_i32_0 = arith.constant 0 : i32
    %c0_i32_1 = arith.constant 0 : i32
    return %c0_i32, %c0_i32_0 : i32, i32
  }
  func.func @transform_3(%arg0: i32) -> (i32, i32, i32, i32) {
    %c0_i32 = arith.constant 0 : i32
    %c0_i32_0 = arith.constant 0 : i32
    %c0_i32_1 = arith.constant 0 : i32
    %c0_i32_2 = arith.constant 0 : i32
    return %arg0, %c0_i32, %c0_i32_0, %c0_i32_1 : i32, i32, i32, i32
  }
}

</mosaic_0001>

<bundles_post_ra>
// kernel: tpu_custom_call.1
= control target key start
LH: loop header
LB: loop body
LE: loop exit
PB: predicated region body
PF: predicated region fallthrough
CT: control target
= control target key end

     0   :  { %8 = vsyncpa [#allocation3], 0  ;;  %s29402_s0 = inlined_call_operand.vmem [shape: bf16[2,34,34,3], index: 0, kind: input, shape index: {}]   ;;  %s29403_s1 = inlined_call_operand.vmem [shape: bf16[9,3,64], index: 1, kind: input, shape index: {}]   ;;  %s29404_s2 = inlined_call_operand.vmem [shape: f32[1,64], index: 2, kind: input, shape index: {}]   ;;  %s29405_s3 = inlined_call_operand.hbm [shape: bf16[2,32,32,64], index: 3, kind: output, shape index: {}]  }
   0x1   :  { %10 = vsyncpa [#allocation3 + $0x1], 0  ;;  %s23259_s12 = smov 0   ;;  %s23261_s13 = smov 0  }
   0x2   :  { %s23263_s14 = smov 0   ;;  %s23265_s15 = smov 0  }
   0x3 LB: > { %s23280_s16 = sadd.s32 4294967295, %s23233_s15   ;;  %s17536_s17 = sadd.s32 4294967294, %s23233_s15   ;;  %s23233_s15 = sphi %s23265_s15, %s29767_s15   ;;  %s23229_s14 = sphi %s23263_s14, %s29766_s14   ;;  %s23225_s13 = sphi %s23261_s13, %s29765_s13   ;;  %s23221_s12 = sphi %s23259_s12, %s29764_s12  }
   0x4   : > { %s23284_s18 = sadd.s32 1, %s23233_s15   ;;  %s91_s19 = sadd.s32 1, %s23229_s14 }
   0x5   : > { %s88_s20 = ssub.s32 %s23233_s15, %s23284_s18  ;;  %p101_p0 = scmp.ne.s32.totalorder %s23229_s14, %s23225_s13 }
   0x6   : > { %p89_p1 = scmp.eq.s32.totalorder %s88_s20, 0  ;;  %p102_p2 = scmp.eq.s32.totalorder %s23280_s16, 1 }
   0x7   : > { %p107_p3 = scmp.ne.s32.totalorder %s23225_s13, %s23221_s12  ;;  %p108_p4 = scmp.eq.s32.totalorder %s17536_s17, 1 }
   0x8   : > { %s23295_s21 = scalar_select %p89_p1, %s23229_s14, %s91_s19  }
   0x9   : > { %p23297_p5 = por %p102_p2, %p101_p0  ;;  %p23301_p6 = por %p108_p4, %p107_p3 }
   0xa   : > { %p17539_p7 = scmp.ge.s32.totalorder %s23233_s15, 1  ;;  %p140_p8 = scmp.lt.s32.totalorder %s23233_s15, 3 }
   0xc   : > { %p141_p9 = pnand %p17539_p7, %p140_p8 }
   0xe   : > { %144 = sbr.rel (%p141_p9) target bundleno = 1609 (0x649), region = 32 }
  0x15   : > { %v17542_v0 = vld [vmem:[%s29403_s1 + $0x2] sm:$0x3]  ;;  %vm2129_vm0 = vcmask 1040384   ;;  %vm2130_vm1 = vcmask 1041408   ;;  %p164_p10 = scmp.lt.s32.totalorder %s23280_s16, 1  ;;  %v23235_v1 = vmov 65535  }
  0x16   : > { %v2131_v2 = vsel %vm2129_vm0, 4294967295, %v23235_v1  ;;  %v18377_v3 = vld [vmem:[%s29403_s1 + $0x8] sm:$0x3]  ;;  %v298_v5 = vld [vmem:[%s29403_s1] sm:$0x3]  ;;  %vm1936_vm4 = vcmask 23552  }
  0x17   : > { %v23314_v4 = vsel %vm2130_vm1, %v2131_v2, 0  ;;  %s165_s28 = scalar_select %p164_p10, %s23280_s16, 1  ;;  %v18570_v9 = vld [vmem:[%s29403_s1 + $0xa] sm:$0x3]  ;;  %vm331_vm2 = vsmask.f32 3328 }
  0x18   : > { %v2134_v6 = vand.u32 %v17542_v0, %v23314_v4  ;;  %v23322_v7 = vand.u32 %v18377_v3, %v23314_v4  ;;  %v23325_v8 = vand.u32 %v23314_v4, %v298_v5  ;;  %v23331_v10 = vand.u32 %v18570_v9, %v23314_v4  ;;  %s161_s29 = sand.u32 1, %s23225_s13   ;;  %s23236_s24 = smov [#allocation2]  }
  0x19   : > { %s22482_s6 = smul.u32 680, %s165_s28  ;;  %vm332_vm3 = vsmask.f32 7440  ;;  %v29459_v35 = vmov 0  ;;  %vm3837_vm6 = vcmask 1042432   ;;  %vm3838_vm7 = vcmask 1046532  }
  0x1a   : > { %29458 = vst [vmem:[#allocation5_spill] sm:$0xff] %v23322_v7  ;;  %20286 = vmatprep.subr.bf16.mxu1 %v2134_v6  ;;  %20806 = vmatprep.subr.bf16.mxu0 %v23322_v7  ;;  %vm23356_vm5 = vmor %vm331_vm2, %vm332_vm3  ;;  %vm17331_vm9 = vcmask 519168   ;;  %s28792_s5 = sshll.u32 %s161_s29, 9  ;;  %s23175_s25 = sshll.u32 %s23236_s24, 4  ;;  %s23176_s25 = int_to_ptr.vmem [resolvable:$false] %s23175_s25 }
  0x1b   : > { %20287 = vmatpush3.bf16.msra.mxu1 %v2134_v6  ;;  %20807 = vmatpush3.bf16.msra.mxu0 %v23322_v7  ;;  %s23338_s9 = scalar_lea.vmem %s29402_s0, %s22482_s6  ;;  %v29460_v35 = vsel %vm23356_vm5, 4294967295, %v29459_v35  ;;  %vm23862_vm8 = vmor %vm3837_vm6, %vm3838_vm7  ;;  %s28828_s6 = scalar_lea.vmem [#allocation2], %s28792_s5 }
  0x1c   : > { %v170_v11 = vld [vmem:[%s23338_s9] sm:$0xf]  ;;  %v171_v12 = vld [vmem:[%s23338_s9 + $0x4] sm:$0xf]  ;;  %v172_v13 = vld [vmem:[%s23338_s9 + $0x8] sm:$0xf]  ;;  %20416 = vmatprep.subr.bf16.mxu1 %v23325_v8  ;;  %20936 = vmatprep.subr.bf16.mxu0 %v23331_v10 }
  0x1d   : > { %v335_v14 = vshrl.u32 %v170_v11, 16  ;;  %v338_v15 = vshll.u32 %v170_v11, 16  ;;  %v344_v16 = vshll.u32 %v171_v12, 16  ;;  %v348_v17 = vshrl.u32 %v171_v12, 16  ;;  %v18217_v20 = vld [vmem:[%s23338_s9 + $0x14] sm:$0xf] }
  0x1e   : > { %v354_v18 = vshll.u32 %v172_v13, 16  ;;  %v358_v19 = vshrl.u32 %v172_v13, 16  ;;  %v23347_v21 = vld [vmem:[%s23338_s9 + $0x18] sm:$0xf]  ;;  %v23350_v26 = vld [vmem:[%s23338_s9 + $0x1c] sm:$0xf] }
  0x1f   : > { %v337_v22 = vrot.slane %v335_v14, 4  ;;  %v340_v23 = vrot.slane %v338_v15, 5  ;;  %v346_v24 = vrot.slane %v344_v16, 5  ;;  %v350_v25 = vrot.slane %v348_v17, 4  ;;  %29461 = vst [vmem:[#allocation6_spill] sm:$0xff] %v29460_v35  ;;  %s17474_s10 = sshll.u32 %s28828_s6, 4  ;;  %s29351_s10 = int_to_ptr.vmem [resolvable:$true] %s17474_s10 }
  0x20   : > { %v356_v27 = vrot.slane %v354_v18, 5  ;;  %v360_v28 = vrot.slane %v358_v19, 4  ;;  %v6798_v29 = vshrl.u32 %v18217_v20, 16  ;;  %v6801_v30 = vshll.u32 %v18217_v20, 16  ;;  %v173_v44 = vld [vmem:[%s23338_s9 + $0xc] sm:$0xf]  ;;  %p23178_p0 = scmp.lt.s32.totalorder %s29351_s10, %s23176_s25 }
  0x21   : > { %v341_v31 = vor.u32 %v340_v23, %v337_v22  ;;  %v351_v32 = vor.u32 %v350_v25, %v346_v24  ;;  %v6807_v33 = vshll.u32 %v23347_v21, 16  ;;  %v6811_v34 = vshrl.u32 %v23347_v21, 16  ;;  %v299_v48 = vld [vmem:[%s23338_s9 + $0x10] sm:$0x1]  ;;  %v23370_v61 = vld [vmem:[%s23338_s9 + $0x20] sm:$0xf] }
  0x22   : > { %v361_v36 = vor.u32 %v360_v28, %v356_v27  ;;  %v6800_v37 = vrot.slane %v6798_v29, 4  ;;  %v6803_v38 = vrot.slane %v6801_v30, 5  ;;  %v6817_v39 = vshll.u32 %v23350_v26, 16  ;;  %v23381_v2 = vld [vmem:[%s23338_s9 + $0x24] sm:$0x1]  ;;  %s23171_s20 = scalar_lea.vmem %s29351_s10, 8192 }
  0x23   : > { %v342_v40 = vrot.slane %v341_v31, 4  ;;  %v352_v41 = vrot.slane %v351_v32, 4  ;;  %v6809_v42 = vrot.slane %v6807_v33, 5  ;;  %v6813_v43 = vrot.slane %v6811_v34, 4  ;;  %v174_v11 = vld [vmem:[%s23338_s9 + $0x14] sm:$0xf]  ;;  %p23172_p11 = scmp.ne.s32.totalorder %s29351_s10, %s23171_s20 }
  0x24   : > { %v6804_v45 = vor.u32 %v6803_v38, %v6800_v37  ;;  %v6819_v46 = vrot.slane %v6817_v39, 5  ;;  %v6821_v47 = vshrl.u32 %v23350_v26, 16  ;;  %v362_v51 = vrot.slane %v361_v36, 4  ;;  %v175_v20 = vld [vmem:[%s23338_s9 + $0x18] sm:$0xf]  ;;  %s23177_s26 = scalar_lea.vmem %s23176_s25, 16384 }
  0x25   : > { %v347_v49 = vsel %vm23356_vm5, %v342_v40, %v346_v24  ;;  %v357_v50 = vsel %vm23356_vm5, %v352_v41, %v356_v27  ;;  %v6814_v52 = vor.u32 %v6813_v43, %v6809_v42  ;;  %v9464_v56 = vrot.slane %v23350_v26, 5  ;;  %v176_v25 = vld [vmem:[%s23338_s9 + $0x1c] sm:$0xf]  ;;  %v18222_v32 = vld [vmem:[%s23338_s9 + $0x28] sm:$0xf]  ;;  %p23173_p12 = pnand %p23172_p11, %p23297_p5  ;;  %p23179_p1 = scmp.lt.s32.totalorder %s23177_s26, %s23171_s20 }
  0x26   : > { %v17543_v53 = vcombine.low %v347_v49, %v357_v50  ;;  %v6805_v54 = vrot.slane %v6804_v45, 4  ;;  %v6823_v55 = vrot.slane %v6821_v47, 4  ;;  %v364_v58 = vshll.u32 %v173_v44, 16  ;;  %v18224_v50 = vld [vmem:[%s23338_s9 + $0x30] sm:$0xf] }
  0x27   : > { %v6815_v57 = vrot.slane %v6814_v52, 4  ;;  %v368_v59 = vshrl.u32 %v173_v44, 16  ;;  %v374_v60 = vshll.u32 %v299_v48, 16  ;;  %v9461_v0 = vrot.slane %v23347_v21, 5  ;;  %p23174_p13 = pneg %p23173_p12  ;;  %p23180_p2 = por %p23179_p1, %p23178_p0 }
  0x28   : > { %20288 = vmatprep.mubr.msk.bf16.mxu1 %vm1936_vm4, %v17543_v53  ;;  %v6810_v62 = vsel %vm23356_vm5, %v6805_v54, %v6809_v42  ;;  %v6824_v63 = vor.u32 %v6823_v55, %v6819_v46  ;;  %v23378_v1 = vrot.slane %v9464_v56, 4  ;;  %v366_v5 = vrot.slane %v364_v58, 5  ;;  %v18223_v42 = vld [vmem:[%s23338_s9 + $0x2c] sm:$0xf] }
  0x29   : > { %v6820_v3 = vsel %vm23356_vm5, %v6815_v57, %v6819_v46  ;;  %v370_v6 = vrot.slane %v368_v59, 4  ;;  %v376_v9 = vrot.slane %v374_v60, 5  ;;  %v6827_v14 = vshll.u32 %v23370_v61, 16  ;;  %v177_v57 = vld [vmem:[%s23338_s9 + $0x20] sm:$0xf]  ;;  %p23181_p3 = pnand %p23180_p2, %p23174_p13 }
  0x2a   : > { %v6825_v12 = vrot.slane %v6824_v63, 4  ;;  %v18378_v13 = vcombine.low %v6810_v62, %v6820_v3  ;;  %v6831_v15 = vshrl.u32 %v23370_v61, 16  ;;  %v367_v16 = vsel %vm23356_vm5, %v362_v51, %v366_v5 }
  0x2b   : > { %v371_v17 = vor.u32 %v370_v6, %v366_v5  ;;  %v6837_v18 = vshll.u32 %v23381_v2, 16  ;;  %v9467_v19 = vrot.slane %v23370_v61, 5  ;;  %v6829_v22 = vrot.slane %v6827_v14, 5  ;;  %v300_v6 = vld [vmem:[%s23338_s9 + $0x24] sm:$0x1] }
  0x2c   : > { %20808 = vmatprep.mubr.msk.bf16.mxu0 %vm1936_vm4, %v18378_v13  ;;  %v6833_v23 = vrot.slane %v6831_v15, 4  ;;  %v9470_v24 = vrot.slane %v23381_v2, 5  ;;  %v379_v27 = vshrl.u32 %v174_v11, 16  ;;  %v382_v31 = vshll.u32 %v174_v11, 16 }
  0x2d   : > { %v372_v28 = vrot.slane %v371_v17, 4  ;;  %v6839_v29 = vrot.slane %v6837_v18, 5  ;;  %v23398_v30 = vrot.slane %v9467_v19, 4  ;;  %v6830_v33 = vsel %vm23356_vm5, %v6825_v12, %v6829_v22  ;;  %v18225_v18 = vld [vmem:[%s23338_s9 + $0x34] sm:$0xf] }
  0x2e   : > { %v6834_v34 = vor.u32 %v6833_v23, %v6829_v22  ;;  %v381_v36 = vrot.slane %v379_v27, 4  ;;  %v388_v37 = vshll.u32 %v175_v20, 16  ;;  %v384_v39 = vrot.slane %v382_v31, 5 }
  0x2f   : > { %v377_v38 = vsel %vm23356_vm5, %v372_v28, %v376_v9  ;;  %v392_v40 = vshrl.u32 %v175_v20, 16  ;;  %v398_v41 = vshll.u32 %v176_v25, 16  ;;  %v6842_v46 = vshrl.u32 %v18222_v32, 16 }
  0x30   : > { %v17544_v43 = vcombine.low %v367_v16, %v377_v38  ;;  %v6835_v44 = vrot.slane %v6834_v34, 4  ;;  %v390_v45 = vrot.slane %v388_v37, 5  ;;  %v385_v47 = vor.u32 %v384_v39, %v381_v36  ;;  %v178_v37 = vld [vmem:[%s23338_s9 + $0x28] sm:$0xf] }
  0x31   : > { %v394_v48 = vrot.slane %v392_v40, 4  ;;  %v400_v49 = vrot.slane %v398_v41, 5  ;;  %v6845_v51 = vshll.u32 %v18222_v32, 16  ;;  %v6844_v53 = vrot.slane %v6842_v46, 4  ;;  %v18226_v32 = vld [vmem:[%s23338_s9 + $0x38] sm:$0x1] }
  0x32   : > { %20289 = vmatmul.mubr.msk.bf16.vlgmr.msra.gmra.mrb[0].mxu1 %vm1936_vm4, %v17544_v43  ;;  %v6840_v52 = vsel %vm23356_vm5, %v6835_v44, %v6839_v29  ;;  %v6851_v54 = vshll.u32 %v18223_v42, 16  ;;  %v6855_v55 = vshrl.u32 %v18223_v42, 16  ;;  %v386_v59 = vrot.slane %v385_v47, 4  ;;  %v179_v42 = vld [vmem:[%s23338_s9 + $0x2c] sm:$0xf] }
  0x33   : > { %20417 = vmatpush3.bf16.msra.mxu1 %v23325_v8  ;;  %v18379_v58 = vcombine.low %v6830_v33, %v6840_v52  ;;  %v395_v60 = vor.u32 %v394_v48, %v390_v45  ;;  %v6847_v62 = vrot.slane %v6845_v51, 5  ;;  %v6861_v5 = vshll.u32 %v18224_v50, 16 }
  0x34   : > { %v6853_v63 = vrot.slane %v6851_v54, 5  ;;  %v6857_v3 = vrot.slane %v6855_v55, 4  ;;  %v402_v9 = vshrl.u32 %v176_v25, 16  ;;  %v391_v11 = vsel %vm23356_vm5, %v386_v59, %v390_v45 }
  0x35   : > { %20809 = vmatmul.mubr.msk.bf16.vlgmr.msra.gmra.mrb[0].mxu0 %vm1936_vm4, %v18379_v58  ;;  %v396_v12 = vrot.slane %v395_v60, 4  ;;  %v6848_v13 = vor.u32 %v6847_v62, %v6844_v53  ;;  %v408_v14 = vshll.u32 %v177_v57, 16  ;;  %v6863_v15 = vrot.slane %v6861_v5, 5 }
  0x36   : > { %20937 = vmatpush3.bf16.msra.mxu0 %v23331_v10  ;;  %v6858_v8 = vor.u32 %v6857_v3, %v6853_v63  ;;  %v404_v16 = vrot.slane %v402_v9, 4  ;;  %v412_v17 = vshrl.u32 %v177_v57, 16  ;;  %v418_v25 = vshll.u32 %v300_v6, 16  ;;  %v18227_v57 = vld [vmem:[%s23338_s9 + $0x3c] sm:$0xf] }
  0x37   : > { %v401_v20 = vsel %vm23356_vm5, %v396_v12, %v400_v49  ;;  %v6849_v22 = vrot.slane %v6848_v13, 4  ;;  %v410_v23 = vrot.slane %v408_v14, 5  ;;  %v6865_v34 = vshrl.u32 %v18224_v50, 16  ;;  %v180_v50 = vld [vmem:[%s23338_s9 + $0x30] sm:$0xf] }
  0x38   : > { %v17545_v27 = vcombine.low %v391_v11, %v401_v20  ;;  %v6859_v28 = vrot.slane %v6858_v8, 4  ;;  %v405_v29 = vor.u32 %v404_v16, %v400_v49  ;;  %v414_v31 = vrot.slane %v412_v17, 4  ;;  %v18229_v16 = vld [vmem:[%s23338_s9 + $0x44] sm:$0xf] }
  0x39   : > { %v6854_v10 = vsel %vm23356_vm5, %v6849_v22, %v6853_v63  ;;  %v420_v33 = vrot.slane %v418_v25, 5  ;;  %v6871_v36 = vshll.u32 %v18225_v18, 16  ;;  %v6875_v41 = vshrl.u32 %v18225_v18, 16  ;;  %v18228_v63 = vld [vmem:[%s23338_s9 + $0x40] sm:$0xf] }
  0x3a   : > { %20292 = vmatprep.mubr.msk.bf16.mxu1 %vm1936_vm4, %v17545_v27  ;;  %v6864_v38 = vsel %vm23356_vm5, %v6859_v28, %v6863_v15  ;;  %v406_v39 = vrot.slane %v405_v29, 4  ;;  %v415_v40 = vor.u32 %v414_v31, %v410_v23  ;;  %v6867_v44 = vrot.slane %v6865_v34, 4  ;;  %v181_v27 = vld [vmem:[%s23338_s9 + $0x34] sm:$0xf] }
  0x3b   : > { %v18380_v43 = vcombine.low %v6854_v10, %v6864_v38  ;;  %v6873_v45 = vrot.slane %v6871_v36, 5  ;;  %v6881_v46 = vshll.u32 %v18226_v32, 16  ;;  %v6877_v49 = vrot.slane %v6875_v41, 4 }
  0x3c   : > { %v411_v47 = vsel %vm23356_vm5, %v406_v39, %v410_v23  ;;  %v416_v48 = vrot.slane %v415_v40, 4  ;;  %v423_v51 = vshrl.u32 %v178_v37, 16  ;;  %v6868_v52 = vor.u32 %v6867_v44, %v6863_v15  ;;  %v301_v39 = vld [vmem:[%s23338_s9 + $0x38] sm:$0x1] }
  0x3d   : > { %20812 = vmatprep.mubr.msk.bf16.mxu0 %vm1936_vm4, %v18380_v43  ;;  %v6883_v53 = vrot.slane %v6881_v46, 5  ;;  %v426_v54 = vshll.u32 %v178_v37, 16  ;;  %v432_v55 = vshll.u32 %v179_v42, 16  ;;  %v6878_v59 = vor.u32 %v6877_v49, %v6873_v45  ;;  %v18230_v46 = vld [vmem:[%s23338_s9 + $0x48] sm:$0xf] }
  0x3e   : > { %v421_v58 = vsel %vm23356_vm5, %v416_v48, %v420_v33  ;;  %v425_v60 = vrot.slane %v423_v51, 4  ;;  %v436_v62 = vshrl.u32 %v179_v42, 16  ;;  %v6869_v5 = vrot.slane %v6868_v52, 4 }
  0x3f   : > { %v17546_v3 = vcombine.low %v411_v47, %v421_v58  ;;  %v428_v6 = vrot.slane %v426_v54, 5  ;;  %v434_v9 = vrot.slane %v432_v55, 5  ;;  %v6879_v11 = vrot.slane %v6878_v59, 4  ;;  %v18231_v54 = vld [vmem:[%s23338_s9 + $0x4c] sm:$0x1] }
  0x40   : > { %v438_v12 = vrot.slane %v436_v62, 4  ;;  %v442_v13 = vshll.u32 %v180_v50, 16  ;;  %v6886_v14 = vshrl.u32 %v18227_v57, 16  ;;  %v6874_v8 = vsel %vm23356_vm5, %v6869_v5, %v6873_v45  ;;  %v182_v62 = vld [vmem:[%s23338_s9 + $0x3c] sm:$0xf] }
  0x41   : > { %20293 = vmatmul.mubr.msk.bf16.gmra.mrb[4].mxu1 %vm1936_vm4, %v17546_v3  ;;  %v429_v15 = vor.u32 %v428_v6, %v425_v60  ;;  %v6889_v17 = vshll.u32 %v18227_v57, 16  ;;  %v6895_v18 = vshll.u32 %v18228_v63, 16  ;;  %v6884_v20 = vsel %vm23356_vm5, %v6879_v11, %v6883_v53 }
  0x42   : > { %v439_v22 = vor.u32 %v438_v12, %v434_v9  ;;  %v444_v23 = vrot.slane %v442_v13, 5  ;;  %v6888_v25 = vrot.slane %v6886_v14, 4  ;;  %v18381_v28 = vcombine.low %v6874_v8, %v6884_v20 }
  0x43   : > { %v430_v29 = vrot.slane %v429_v15, 4  ;;  %v6891_v31 = vrot.slane %v6889_v17, 5  ;;  %v6897_v32 = vrot.slane %v6895_v18, 5  ;;  %v6899_v33 = vshrl.u32 %v18228_v63, 16  ;;  %v184_v17 = vld [vmem:[%s23338_s9 + $0x44] sm:$0xf] }
  0x44   : > { %v440_v10 = vrot.slane %v439_v22, 4  ;;  %v6905_v34 = vshll.u32 %v18229_v16, 16  ;;  %v446_v36 = vshrl.u32 %v180_v50, 16  ;;  %20813 = vmatmul.mubr.msk.bf16.gmra.mrb[4].mxu0 %vm1936_vm4, %v18381_v28  ;;  %v452_v40 = vshll.u32 %v181_v27, 16 }
  0x45   : > { %v435_v37 = vsel %vm23356_vm5, %v430_v29, %v434_v9  ;;  %v6892_v38 = vor.u32 %v6891_v31, %v6888_v25  ;;  %v456_v41 = vshrl.u32 %v181_v27, 16  ;;  %v6901_v43 = vrot.slane %v6899_v33, 4  ;;  %v18232_v27 = vld [vmem:[%s23338_s9 + $0x50] sm:$0xf] }
  0x46   : > { %v445_v42 = vsel %vm23356_vm5, %v440_v10, %v444_v23  ;;  %v6907_v44 = vrot.slane %v6905_v34, 5  ;;  %v448_v45 = vrot.slane %v446_v36, 4  ;;  %v454_v49 = vrot.slane %v452_v40, 5  ;;  %v18234_v40 = vld [vmem:[%s23338_s9 + $0x58] sm:$0xf] }
  0x47   : > { %v17547_v47 = vcombine.low %v435_v37, %v445_v42  ;;  %v6893_v48 = vrot.slane %v6892_v38, 4  ;;  %v458_v50 = vrot.slane %v456_v41, 4  ;;  %v6902_v51 = vor.u32 %v6901_v43, %v6897_v32  ;;  %v18233_v37 = vld [vmem:[%s23338_s9 + $0x54] sm:$0xf] }
  0x48   : > { %v449_v52 = vor.u32 %v448_v45, %v444_v23  ;;  %v462_v53 = vshll.u32 %v301_v39, 16  ;;  %v6909_v55 = vshrl.u32 %v18229_v16, 16  ;;  %v6915_v59 = vshll.u32 %v18230_v46, 16  ;;  %v183_v16 = vld [vmem:[%s23338_s9 + $0x40] sm:$0xf] }
  0x49   : > { %20296 = vmatprep.mubr.msk.bf16.mxu1 %vm1936_vm4, %v17547_v47  ;;  %v6898_v57 = vsel %vm23356_vm5, %v6893_v48, %v6897_v32  ;;  %v459_v58 = vor.u32 %v458_v50, %v454_v49  ;;  %v6919_v60 = vshrl.u32 %v18230_v46, 16  ;;  %v6903_v63 = vrot.slane %v6902_v51, 4  ;;  %v185_v47 = vld [vmem:[%s23338_s9 + $0x48] sm:$0xf] }
  0x4a   : > { %v450_v3 = vrot.slane %v449_v52, 4  ;;  %v464_v5 = vrot.slane %v462_v53, 5  ;;  %v6911_v6 = vrot.slane %v6909_v55, 4  ;;  %v6917_v11 = vrot.slane %v6915_v59, 5  ;;  %v302_v59 = vld [vmem:[%s23338_s9 + $0x4c] sm:$0x1] }
  0x4b   : > { %v460_v9 = vrot.slane %v459_v58, 4  ;;  %v6921_v12 = vrot.slane %v6919_v60, 4  ;;  %v6925_v13 = vshll.u32 %v18231_v54, 16  ;;  %v6908_v14 = vsel %vm23356_vm5, %v6903_v63, %v6907_v44 }
  0x4c   : > { %v455_v8 = vsel %vm23356_vm5, %v450_v3, %v454_v49  ;;  %v6912_v15 = vor.u32 %v6911_v6, %v6907_v44  ;;  %v467_v18 = vshrl.u32 %v182_v62, 16  ;;  %v18382_v20 = vcombine.low %v6898_v57, %v6908_v14  ;;  %v18235_v14 = vld [vmem:[%s23338_s9 + $0x5c] sm:$0xf] }
  0x4d   : > { %v465_v22 = vsel %vm23356_vm5, %v460_v9, %v464_v5  ;;  %v6922_v23 = vor.u32 %v6921_v12, %v6917_v11  ;;  %v6927_v25 = vrot.slane %v6925_v13, 5  ;;  %v470_v32 = vshll.u32 %v182_v62, 16 }
  0x4e   : > { %v17548_v28 = vcombine.low %v455_v8, %v465_v22  ;;  %v6913_v29 = vrot.slane %v6912_v15, 4  ;;  %v469_v31 = vrot.slane %v467_v18, 4  ;;  %20816 = vmatprep.mubr.msk.bf16.mxu0 %vm1936_vm4, %v18382_v20  ;;  %v476_v33 = vshll.u32 %v183_v16, 16 }
  0x4f   : > { %v6923_v10 = vrot.slane %v6922_v23, 4  ;;  %v480_v34 = vshrl.u32 %v183_v16, 16  ;;  %v486_v36 = vshll.u32 %v184_v17, 16  ;;  %v472_v39 = vrot.slane %v470_v32, 5 }
  0x50   : > { %20297 = vmatmul.mubr.msk.bf16.gmra.mrb[8].mxu1 %vm1936_vm4, %v17548_v28  ;;  %v6918_v38 = vsel %vm23356_vm5, %v6913_v29, %v6917_v11  ;;  %v6930_v41 = vshrl.u32 %v18232_v27, 16  ;;  %v6933_v42 = vshll.u32 %v18232_v27, 16  ;;  %v478_v44 = vrot.slane %v476_v33, 5  ;;  %v186_v27 = vld [vmem:[%s23338_s9 + $0x50] sm:$0xf] }
  0x51   : > { %v6928_v43 = vsel %vm23356_vm5, %v6923_v10, %v6927_v25  ;;  %v482_v45 = vrot.slane %v480_v34, 4  ;;  %v488_v46 = vrot.slane %v486_v36, 5  ;;  %v473_v49 = vor.u32 %v472_v39, %v469_v31 }
  0x52   : > { %v18383_v48 = vcombine.low %v6918_v38, %v6928_v43  ;;  %v6932_v50 = vrot.slane %v6930_v41, 4  ;;  %v6935_v51 = vrot.slane %v6933_v42, 5  ;;  %v6939_v53 = vshll.u32 %v18233_v37, 16  ;;  %v187_v41 = vld [vmem:[%s23338_s9 + $0x54] sm:$0xf] }
  0x53   : > { %v483_v52 = vor.u32 %v482_v45, %v478_v44  ;;  %v6943_v54 = vshrl.u32 %v18233_v37, 16  ;;  %v6949_v55 = vshll.u32 %v18234_v40, 16  ;;  %v474_v57 = vrot.slane %v473_v49, 4 }
  0x54   : > { %20817 = vmatmul.mubr.msk.bf16.gmra.mrb[8].mxu0 %vm1936_vm4, %v18383_v48  ;;  %v6936_v58 = vor.u32 %v6935_v51, %v6932_v50  ;;  %v490_v60 = vshrl.u32 %v184_v17, 16  ;;  %v496_v62 = vshll.u32 %v185_v47, 16  ;;  %v6941_v3 = vrot.slane %v6939_v53, 5  ;;  %v18236_v17 = vld [vmem:[%s23338_s9 + $0x60] sm:$0x1] }
  0x55   : > { %v484_v63 = vrot.slane %v483_v52, 4  ;;  %v6945_v5 = vrot.slane %v6943_v54, 4  ;;  %v6951_v6 = vrot.slane %v6949_v55, 5  ;;  %v479_v9 = vsel %vm23356_vm5, %v474_v57, %v478_v44 }
  0x56   : > { %v6937_v11 = vrot.slane %v6936_v58, 4  ;;  %v492_v12 = vrot.slane %v490_v60, 4  ;;  %v498_v13 = vrot.slane %v496_v62, 5  ;;  %v500_v16 = vshrl.u32 %v185_v47, 16  ;;  %v18237_v47 = vld [vmem:[%s23338_s9 + $0x64] sm:$0xf] }
  0x57   : > { %v489_v8 = vsel %vm23356_vm5, %v484_v63, %v488_v46  ;;  %v6946_v15 = vor.u32 %v6945_v5, %v6941_v3  ;;  %v506_v18 = vshll.u32 %v302_v59, 16  ;;  %v6953_v25 = vshrl.u32 %v18234_v40, 16  ;;  %v18238_v60 = vld [vmem:[%s23338_s9 + $0x68] sm:$0xf] }
  0x58   : > { %v17549_v20 = vcombine.low %v479_v9, %v489_v8  ;;  %v6942_v22 = vsel %vm23356_vm5, %v6937_v11, %v6941_v3  ;;  %v493_v23 = vor.u32 %v492_v12, %v488_v46  ;;  %v502_v29 = vrot.slane %v500_v16, 4  ;;  %v188_v46 = vld [vmem:[%s23338_s9 + $0x58] sm:$0xf]  ;;  %v18239_v9 = vld [vmem:[%s23338_s9 + $0x6c] sm:$0xf] }
  0x59   : > { %v6947_v28 = vrot.slane %v6946_v15, 4  ;;  %v508_v31 = vrot.slane %v506_v18, 5  ;;  %v6959_v32 = vshll.u32 %v18235_v14, 16  ;;  %v6955_v33 = vrot.slane %v6953_v25, 4 }
  0x5a   : > { %20300 = vmatprep.mubr.msk.bf16.mxu1 %vm1936_vm4, %v17549_v20  ;;  %v494_v10 = vrot.slane %v493_v23, 4  ;;  %v6963_v34 = vshrl.u32 %v18235_v14, 16  ;;  %v6969_v36 = vshll.u32 %v18236_v17, 16  ;;  %v503_v38 = vor.u32 %v502_v29, %v498_v13  ;;  %v189_v17 = vld [vmem:[%s23338_s9 + $0x5c] sm:$0xf] }
  0x5b   : > { %v6952_v37 = vsel %vm23356_vm5, %v6947_v28, %v6951_v6  ;;  %v6961_v39 = vrot.slane %v6959_v32, 5  ;;  %v511_v40 = vshrl.u32 %v186_v27, 16  ;;  %v6956_v44 = vor.u32 %v6955_v33, %v6951_v6 }
  0x5c   : > { %v18384_v42 = vcombine.low %v6942_v22, %v6952_v37  ;;  %v499_v43 = vsel %vm23356_vm5, %v494_v10, %v498_v13  ;;  %v6965_v45 = vrot.slane %v6963_v34, 4  ;;  %v504_v48 = vrot.slane %v503_v38, 4 }
  0x5d   : > { %v6971_v49 = vrot.slane %v6969_v36, 5  ;;  %v513_v50 = vrot.slane %v511_v40, 4  ;;  %v514_v51 = vshll.u32 %v186_v27, 16  ;;  %v6957_v52 = vrot.slane %v6956_v44, 4  ;;  %v18240_v40 = vld [vmem:[%s23338_s9 + $0x70] sm:$0xf] }
  0x5e   : > { %20820 = vmatprep.mubr.msk.bf16.mxu0 %vm1936_vm4, %v18384_v42  ;;  %v6966_v53 = vor.u32 %v6965_v45, %v6961_v39  ;;  %v520_v54 = vshll.u32 %v187_v41, 16  ;;  %v524_v55 = vshrl.u32 %v187_v41, 16  ;;  %v509_v57 = vsel %vm23356_vm5, %v504_v48, %v508_v31  ;;  %v303_v31 = vld [vmem:[%s23338_s9 + $0x60] sm:$0x1] }
  0x5f   : > { %v516_v58 = vrot.slane %v514_v51, 5  ;;  %v530_v59 = vshll.u32 %v188_v46, 16  ;;  %v6974_v62 = vshrl.u32 %v18237_v47, 16  ;;  %v17550_v63 = vcombine.low %v499_v43, %v509_v57 }
  0x60   : > { %v6962_v3 = vsel %vm23356_vm5, %v6957_v52, %v6961_v39  ;;  %v6967_v5 = vrot.slane %v6966_v53, 4  ;;  %v522_v6 = vrot.slane %v520_v54, 5  ;;  %v526_v12 = vrot.slane %v524_v55, 4  ;;  %v190_v55 = vld [vmem:[%s23338_s9 + $0x64] sm:$0xf] }
  0x61   : > { %v517_v11 = vor.u32 %v516_v58, %v513_v50  ;;  %v532_v13 = vrot.slane %v530_v59, 5  ;;  %v6976_v14 = vrot.slane %v6974_v62, 4  ;;  %20301 = vmatmul.mubr.msk.bf16.gmra.mrb[12].mxu1 %vm1936_vm4, %v17550_v63  ;;  %v6977_v15 = vshll.u32 %v18237_v47, 16  ;;  %v18241_v50 = vld [vmem:[%s23338_s9 + $0x74] sm:$0x1] }
  0x62   : > { %v6972_v8 = vsel %vm23356_vm5, %v6967_v5, %v6971_v49  ;;  %v6983_v16 = vshll.u32 %v18238_v60, 16  ;;  %v6987_v18 = vshrl.u32 %v18238_v60, 16  ;;  %v527_v23 = vor.u32 %v526_v12, %v522_v6  ;;  %v191_v62 = vld [vmem:[%s23338_s9 + $0x68] sm:$0xf] }
  0x63   : > { %v18385_v20 = vcombine.low %v6962_v3, %v6972_v8  ;;  %v518_v22 = vrot.slane %v517_v11, 4  ;;  %v6993_v25 = vshll.u32 %v18239_v9, 16  ;;  %v6979_v27 = vrot.slane %v6977_v15, 5 }
  0x64   : > { %v6985_v28 = vrot.slane %v6983_v16, 5  ;;  %v6989_v29 = vrot.slane %v6987_v18, 4  ;;  %v534_v32 = vshrl.u32 %v188_v46, 16  ;;  %v528_v33 = vrot.slane %v527_v23, 4 }
  0x65   : > { %20821 = vmatmul.mubr.msk.bf16.gmra.mrb[12].mxu0 %vm1936_vm4, %v18385_v20  ;;  %v523_v10 = vsel %vm23356_vm5, %v518_v22, %v522_v6  ;;  %v6995_v34 = vrot.slane %v6993_v25, 5  ;;  %v540_v36 = vshll.u32 %v189_v17, 16  ;;  %v6980_v37 = vor.u32 %v6979_v27, %v6976_v14  ;;  %v18243_v27 = vld [vmem:[%s23338_s9 + $0x7c] sm:$0xf] }
  0x66   : > { %v6990_v38 = vor.u32 %v6989_v29, %v6985_v28  ;;  %v536_v39 = vrot.slane %v534_v32, 4  ;;  %v544_v41 = vshrl.u32 %v189_v17, 16  ;;  %v533_v42 = vsel %vm23356_vm5, %v528_v33, %v532_v13  ;;  %v18242_v17 = vld [vmem:[%s23338_s9 + $0x78] sm:$0xf] }
  0x67   : > { %v542_v43 = vrot.slane %v540_v36, 5  ;;  %v550_v44 = vshll.u32 %v303_v31, 16  ;;  %v6997_v45 = vshrl.u32 %v18239_v9, 16  ;;  %v17551_v46 = vcombine.low %v523_v10, %v533_v42 }
  0x68   : > { %v6981_v47 = vrot.slane %v6980_v37, 4  ;;  %v6991_v48 = vrot.slane %v6990_v38, 4  ;;  %v537_v49 = vor.u32 %v536_v39, %v532_v13  ;;  %v546_v51 = vrot.slane %v544_v41, 4  ;;  %v192_v13 = vld [vmem:[%s23338_s9 + $0x6c] sm:$0xf] }
  0x69   : > { %v552_v52 = vrot.slane %v550_v44, 5  ;;  %v6999_v53 = vrot.slane %v6997_v45, 4  ;;  %v7003_v54 = vshll.u32 %v18240_v40, 16  ;;  %20304 = vmatprep.mubr.msk.bf16.mxu1 %vm1936_vm4, %v17551_v46  ;;  %v7007_v60 = vshrl.u32 %v18240_v40, 16  ;;  %v18244_v38 = vld [vmem:[%s23338_s9 + $0x80] sm:$0xf] }
  0x6a   : > { %v6986_v57 = vsel %vm23356_vm5, %v6981_v47, %v6985_v28  ;;  %v6996_v58 = vsel %vm23356_vm5, %v6991_v48, %v6995_v34  ;;  %v538_v59 = vrot.slane %v537_v49, 4  ;;  %v547_v3 = vor.u32 %v546_v51, %v542_v43  ;;  %v193_v46 = vld [vmem:[%s23338_s9 + $0x70] sm:$0xf] }
  0x6b   : > { %v18386_v63 = vcombine.low %v6986_v57, %v6996_v58  ;;  %v7000_v5 = vor.u32 %v6999_v53, %v6995_v34  ;;  %v7005_v6 = vrot.slane %v7003_v54, 5  ;;  %v7009_v11 = vrot.slane %v7007_v60, 4  ;;  %v304_v58 = vld [vmem:[%s23338_s9 + $0x74] sm:$0x1] }
  0x6c   : > { %v543_v9 = vsel %vm23356_vm5, %v538_v59, %v542_v43  ;;  %v7013_v12 = vshll.u32 %v18241_v50, 16  ;;  %v555_v14 = vshrl.u32 %v190_v55, 16  ;;  %v548_v8 = vrot.slane %v547_v3, 4 }
  0x6d   : > { %20824 = vmatprep.mubr.msk.bf16.mxu0 %vm1936_vm4, %v18386_v63  ;;  %v7001_v15 = vrot.slane %v7000_v5, 4  ;;  %v558_v16 = vshll.u32 %v190_v55, 16  ;;  %v564_v18 = vshll.u32 %v191_v62, 16  ;;  %v7010_v20 = vor.u32 %v7009_v11, %v7005_v6 }
  0x6e   : > { %v7015_v22 = vrot.slane %v7013_v12, 5  ;;  %v557_v23 = vrot.slane %v555_v14, 4  ;;  %v568_v25 = vshrl.u32 %v191_v62, 16  ;;  %v553_v28 = vsel %vm23356_vm5, %v548_v8, %v552_v52 }
  0x6f   : > { %v7006_v29 = vsel %vm23356_vm5, %v7001_v15, %v7005_v6  ;;  %v560_v31 = vrot.slane %v558_v16, 5  ;;  %v566_v32 = vrot.slane %v564_v18, 5  ;;  %v17552_v10 = vcombine.low %v543_v9, %v553_v28  ;;  %v18245_v6 = vld [vmem:[%s23338_s9 + $0x84] sm:$0xf] }
  0x70   : > { %v7011_v33 = vrot.slane %v7010_v20, 4  ;;  %v570_v34 = vrot.slane %v568_v25, 4  ;;  %v574_v36 = vshll.u32 %v192_v13, 16  ;;  %v7018_v39 = vshrl.u32 %v18242_v17, 16  ;;  %v18246_v20 = vld [vmem:[%s23338_s9 + $0x88] sm:$0x1] }
  0x71   : > { %v561_v37 = vor.u32 %v560_v31, %v557_v23  ;;  %v7021_v41 = vshll.u32 %v18242_v17, 16  ;;  %v7027_v40 = vshll.u32 %v18243_v27, 16  ;;  %20305 = vmatmul.mubr.msk.bf16.gmra.mrb[16].mxu1 %vm1936_vm4, %v17552_v10  ;;  %v7031_v45 = vshrl.u32 %v18243_v27, 16  ;;  %v194_v25 = vld [vmem:[%s23338_s9 + $0x78] sm:$0xf] }
  0x72   : > { %v7016_v42 = vsel %vm23356_vm5, %v7011_v33, %v7015_v22  ;;  %v571_v43 = vor.u32 %v570_v34, %v566_v32  ;;  %v576_v44 = vrot.slane %v574_v36, 5  ;;  %v7020_v49 = vrot.slane %v7018_v39, 4 }
  0x73   : > { %v18387_v47 = vcombine.low %v7006_v29, %v7016_v42  ;;  %v562_v48 = vrot.slane %v561_v37, 4  ;;  %v7023_v50 = vrot.slane %v7021_v41, 5  ;;  %v7029_v52 = vrot.slane %v7027_v40, 5 }
  0x74   : > { %v572_v51 = vrot.slane %v571_v43, 4  ;;  %v7033_v53 = vrot.slane %v7031_v45, 4  ;;  %v7037_v54 = vshll.u32 %v18244_v38, 16  ;;  %v578_v59 = vshrl.u32 %v192_v13, 16  ;;  %v196_v43 = vld [vmem:[%s23338_s9 + $0x80] sm:$0xf] }
  0x75   : > { %20825 = vmatmul.mubr.msk.bf16.gmra.mrb[16].mxu0 %vm1936_vm4, %v18387_v47  ;;  %v567_v55 = vsel %vm23356_vm5, %v562_v48, %v566_v32  ;;  %v7024_v57 = vor.u32 %v7023_v50, %v7020_v49  ;;  %v584_v60 = vshll.u32 %v193_v46, 16  ;;  %v588_v5 = vshrl.u32 %v193_v46, 16  ;;  %v195_v32 = vld [vmem:[%s23338_s9 + $0x7c] sm:$0xf]  ;;  %v18247_v46 = vld [vmem:[%s23338_s9 + $0x8c] sm:$0xf] }
  0x76   : > { %v577_v62 = vsel %vm23356_vm5, %v572_v51, %v576_v44  ;;  %v7034_v63 = vor.u32 %v7033_v53, %v7029_v52  ;;  %v7039_v3 = vrot.slane %v7037_v54, 5  ;;  %v580_v12 = vrot.slane %v578_v59, 4  ;;  %v18248_v51 = vld [vmem:[%s23338_s9 + $0x90] sm:$0xf] }
  0x77   : > { %v17553_v9 = vcombine.low %v567_v55, %v577_v62  ;;  %v7025_v11 = vrot.slane %v7024_v57, 4  ;;  %v586_v14 = vrot.slane %v584_v60, 5  ;;  %v590_v15 = vrot.slane %v588_v5, 4 }
  0x78   : > { %v7035_v8 = vrot.slane %v7034_v63, 4  ;;  %v594_v16 = vshll.u32 %v304_v58, 16  ;;  %v7041_v18 = vshrl.u32 %v18244_v38, 16  ;;  %v581_v17 = vor.u32 %v580_v12, %v576_v44 }
  0x79   : > { %20308 = vmatprep.mubr.msk.bf16.mxu1 %vm1936_vm4, %v17553_v9  ;;  %v7030_v13 = vsel %vm23356_vm5, %v7025_v11, %v7029_v52  ;;  %v7047_v22 = vshll.u32 %v18245_v6, 16  ;;  %v7051_v23 = vshrl.u32 %v18245_v6, 16  ;;  %v591_v28 = vor.u32 %v590_v15, %v586_v14  ;;  %v197_v9 = vld [vmem:[%s23338_s9 + $0x84] sm:$0xf] }
  0x7a   : > { %v7040_v27 = vsel %vm23356_vm5, %v7035_v8, %v7039_v3  ;;  %v596_v29 = vrot.slane %v594_v16, 5  ;;  %v7043_v31 = vrot.slane %v7041_v18, 4  ;;  %v582_v33 = vrot.slane %v581_v17, 4 }
  0x7b   : > { %v18388_v10 = vcombine.low %v7030_v13, %v7040_v27  ;;  %v7049_v34 = vrot.slane %v7047_v22, 5  ;;  %v7053_v36 = vrot.slane %v7051_v23, 4  ;;  %v592_v37 = vrot.slane %v591_v28, 4  ;;  %v305_v22 = vld [vmem:[%s23338_s9 + $0x88] sm:$0x1] }
  0x7c   : > { %v7044_v38 = vor.u32 %v7043_v31, %v7039_v3  ;;  %v7057_v39 = vshll.u32 %v18246_v20, 16  ;;  %v599_v41 = vshrl.u32 %v194_v25, 16  ;;  %v587_v40 = vsel %vm23356_vm5, %v582_v33, %v586_v14  ;;  %v18249_v3 = vld [vmem:[%s23338_s9 + $0x94] sm:$0xf] }
  0x7d   : > { %20828 = vmatprep.mubr.msk.bf16.mxu0 %vm1936_vm4, %v18388_v10  ;;  %v7054_v42 = vor.u32 %v7053_v36, %v7049_v34  ;;  %v602_v44 = vshll.u32 %v194_v25, 16  ;;  %v608_v45 = vshll.u32 %v195_v32, 16  ;;  %v597_v47 = vsel %vm23356_vm5, %v592_v37, %v596_v29 }
  0x7e   : > { %v7045_v48 = vrot.slane %v7044_v38, 4  ;;  %v7059_v49 = vrot.slane %v7057_v39, 5  ;;  %v601_v50 = vrot.slane %v599_v41, 4  ;;  %v17554_v52 = vcombine.low %v587_v40, %v597_v47  ;;  %v18251_v40 = vld [vmem:[%s23338_s9 + $0x9c] sm:$0x1] }
  0x7f   : > { %v7055_v53 = vrot.slane %v7054_v42, 4  ;;  %v604_v54 = vrot.slane %v602_v44, 5  ;;  %v610_v55 = vrot.slane %v608_v45, 5  ;;  %v612_v58 = vshrl.u32 %v195_v32, 16  ;;  %v18250_v32 = vld [vmem:[%s23338_s9 + $0x98] sm:$0xf] }
  0x80   : > { %v7050_v57 = vsel %vm23356_vm5, %v7045_v48, %v7049_v34  ;;  %v618_v59 = vshll.u32 %v196_v43, 16  ;;  %v7062_v60 = vshrl.u32 %v18247_v46, 16  ;;  %20309 = vmatmul.mubr.msk.bf16.gmra.mrb[20].mxu1 %vm1936_vm4, %v17554_v52  ;;  %v7065_v5 = vshll.u32 %v18247_v46, 16  ;;  %v198_v46 = vld [vmem:[%s23338_s9 + $0x8c] sm:$0xf] }
  0x81   : > { %v7060_v62 = vsel %vm23356_vm5, %v7055_v53, %v7059_v49  ;;  %v605_v63 = vor.u32 %v604_v54, %v601_v50  ;;  %v7071_v6 = vshll.u32 %v18248_v51, 16  ;;  %v614_v12 = vrot.slane %v612_v58, 4 }
  0x82   : > { %v18389_v11 = vcombine.low %v7050_v57, %v7060_v62  ;;  %v620_v14 = vrot.slane %v618_v59, 5  ;;  %v7064_v8 = vrot.slane %v7062_v60, 4  ;;  %v7067_v16 = vrot.slane %v7065_v5, 5  ;;  %v200_v57 = vld [vmem:[%s23338_s9 + $0x94] sm:$0xf] }
  0x83   : > { %v606_v15 = vrot.slane %v605_v63, 4  ;;  %v7073_v18 = vrot.slane %v7071_v6, 5  ;;  %v7075_v13 = vshrl.u32 %v18248_v51, 16  ;;  %v615_v17 = vor.u32 %v614_v12, %v610_v55  ;;  %v199_v51 = vld [vmem:[%s23338_s9 + $0x90] sm:$0xf] }
  0x84   : > { %20829 = vmatmul.mubr.msk.bf16.gmra.mrb[20].mxu0 %vm1936_vm4, %v18389_v11  ;;  %v7081_v20 = vshll.u32 %v18249_v3, 16  ;;  %v622_v23 = vshrl.u32 %v196_v43, 16  ;;  %v628_v25 = vshll.u32 %v197_v9, 16  ;;  %v7068_v28 = vor.u32 %v7067_v16, %v7064_v8  ;;  %v18252_v63 = vld [vmem:[%s23338_s9 + $0xa0] sm:$0xf] }
  0x85   : > { %v611_v27 = vsel %vm23356_vm5, %v606_v15, %v610_v55  ;;  %v7077_v29 = vrot.slane %v7075_v13, 4  ;;  %v632_v31 = vshrl.u32 %v197_v9, 16  ;;  %v616_v10 = vrot.slane %v615_v17, 4 }
  0x86   : > { %v7083_v33 = vrot.slane %v7081_v20, 5  ;;  %v624_v34 = vrot.slane %v622_v23, 4  ;;  %v630_v36 = vrot.slane %v628_v25, 5  ;;  %v7069_v37 = vrot.slane %v7068_v28, 4  ;;  %v18253_v25 = vld [vmem:[%s23338_s9 + $0xa4] sm:$0xf] }
  0x87   : > { %v7078_v38 = vor.u32 %v7077_v29, %v7073_v18  ;;  %v634_v39 = vrot.slane %v632_v31, 4  ;;  %v638_v41 = vshll.u32 %v305_v22, 16  ;;  %v621_v42 = vsel %vm23356_vm5, %v616_v10, %v620_v14  ;;  %v18254_v29 = vld [vmem:[%s23338_s9 + $0xa8] sm:$0xf] }
  0x88   : > { %v625_v43 = vor.u32 %v624_v34, %v620_v14  ;;  %v7085_v44 = vshrl.u32 %v18249_v3, 16  ;;  %v7091_v45 = vshll.u32 %v18250_v32, 16  ;;  %v17555_v47 = vcombine.low %v611_v27, %v621_v42 }
  0x89   : > { %v7074_v48 = vsel %vm23356_vm5, %v7069_v37, %v7073_v18  ;;  %v7079_v49 = vrot.slane %v7078_v38, 4  ;;  %v635_v50 = vor.u32 %v634_v39, %v630_v36  ;;  %v640_v53 = vrot.slane %v638_v41, 5 }
  0x8a   : > { %v626_v52 = vrot.slane %v625_v43, 4  ;;  %v7087_v54 = vrot.slane %v7085_v44, 4  ;;  %v7093_v55 = vrot.slane %v7091_v45, 5  ;;  %20312 = vmatprep.mubr.msk.bf16.mxu1 %vm1936_vm4, %v17555_v47  ;;  %v7095_v60 = vshrl.u32 %v18250_v32, 16  ;;  %v201_v45 = vld [vmem:[%s23338_s9 + $0x98] sm:$0xf] }
  0x8b   : > { %v7084_v58 = vsel %vm23356_vm5, %v7079_v49, %v7083_v33  ;;  %v636_v59 = vrot.slane %v635_v50, 4  ;;  %v7101_v62 = vshll.u32 %v18251_v40, 16  ;;  %v643_v9 = vshrl.u32 %v198_v46, 16  ;;  %v306_v50 = vld [vmem:[%s23338_s9 + $0x9c] sm:$0x1] }
  0x8c   : > { %v18390_v3 = vcombine.low %v7074_v48, %v7084_v58  ;;  %v631_v5 = vsel %vm23356_vm5, %v626_v52, %v630_v36  ;;  %v7088_v6 = vor.u32 %v7087_v54, %v7083_v33  ;;  %v7097_v12 = vrot.slane %v7095_v60, 4 }
  0x8d   : > { %v641_v11 = vsel %vm23356_vm5, %v636_v59, %v640_v53  ;;  %v7103_v14 = vrot.slane %v7101_v62, 5  ;;  %v646_v8 = vshll.u32 %v198_v46, 16  ;;  %v645_v18 = vrot.slane %v643_v9, 4 }
  0x8e   : > { %20832 = vmatprep.mubr.msk.bf16.mxu0 %vm1936_vm4, %v18390_v3  ;;  %v17556_v15 = vcombine.low %v631_v5, %v641_v11  ;;  %v7089_v16 = vrot.slane %v7088_v6, 4  ;;  %v652_v13 = vshll.u32 %v199_v51, 16  ;;  %v7098_v17 = vor.u32 %v7097_v12, %v7093_v55  ;;  %v18256_v6 = vld [vmem:[%s23338_s9 + $0xb0] sm:$0x1] }
  0x8f   : > { %v648_v20 = vrot.slane %v646_v8, 5  ;;  %v656_v22 = vshrl.u32 %v199_v51, 16  ;;  %v662_v23 = vshll.u32 %v200_v57, 16  ;;  %v7106_v31 = vshrl.u32 %v18252_v63, 16  ;;  %v202_v8 = vld [vmem:[%s23338_s9 + $0xa0] sm:$0xf] }
  0x90   : > { %20313 = vmatmul.mubr.msk.bf16.gmra.mrb[24].mxu1 %vm1936_vm4, %v17556_v15  ;;  %v7094_v27 = vsel %vm23356_vm5, %v7089_v16, %v7093_v55  ;;  %v654_v28 = vrot.slane %v652_v13, 5  ;;  %v7109_v32 = vshll.u32 %v18252_v63, 16  ;;  %v7099_v10 = vrot.slane %v7098_v17, 4  ;;  %v18255_v55 = vld [vmem:[%s23338_s9 + $0xac] sm:$0xf] }
  0x91   : > { %v649_v33 = vor.u32 %v648_v20, %v645_v18  ;;  %v658_v34 = vrot.slane %v656_v22, 4  ;;  %v664_v36 = vrot.slane %v662_v23, 5  ;;  %v7108_v37 = vrot.slane %v7106_v31, 4  ;;  %v203_v17 = vld [vmem:[%s23338_s9 + $0xa4] sm:$0xf] }
  0x92   : > { %v7111_v38 = vrot.slane %v7109_v32, 5  ;;  %v7115_v39 = vshll.u32 %v18253_v25, 16  ;;  %v7119_v41 = vshrl.u32 %v18253_v25, 16  ;;  %v7104_v40 = vsel %vm23356_vm5, %v7099_v10, %v7103_v14 }
  0x93   : > { %v650_v42 = vrot.slane %v649_v33, 4  ;;  %v659_v43 = vor.u32 %v658_v34, %v654_v28  ;;  %v7125_v44 = vshll.u32 %v18254_v29, 16  ;;  %v18391_v46 = vcombine.low %v7094_v27, %v7104_v40  ;;  %v204_v27 = vld [vmem:[%s23338_s9 + $0xa8] sm:$0xf] }
  0x94   : > { %v7112_v47 = vor.u32 %v7111_v38, %v7108_v37  ;;  %v7117_v48 = vrot.slane %v7115_v39, 5  ;;  %v7121_v49 = vrot.slane %v7119_v41, 4  ;;  %v666_v54 = vshrl.u32 %v200_v57, 16  ;;  %v18257_v37 = vld [vmem:[%s23338_s9 + $0xb4] sm:$0xf] }
  0x95   : > { %v655_v51 = vsel %vm23356_vm5, %v650_v42, %v654_v28  ;;  %v660_v52 = vrot.slane %v659_v43, 4  ;;  %v7127_v53 = vrot.slane %v7125_v44, 5  ;;  %20833 = vmatmul.mubr.msk.bf16.gmra.mrb[24].mxu0 %vm1936_vm4, %v18391_v46  ;;  %v672_v60 = vshll.u32 %v201_v45, 16  ;;  %v18258_v42 = vld [vmem:[%s23338_s9 + $0xb8] sm:$0xf] }
  0x96   : > { %v7113_v58 = vrot.slane %v7112_v47, 4  ;;  %v7122_v59 = vor.u32 %v7121_v49, %v7117_v48  ;;  %v676_v62 = vshrl.u32 %v201_v45, 16  ;;  %v668_v3 = vrot.slane %v666_v54, 4 }
  0x97   : > { %v665_v63 = vsel %vm23356_vm5, %v660_v52, %v664_v36  ;;  %v682_v5 = vshll.u32 %v306_v50, 16  ;;  %v7129_v9 = vshrl.u32 %v18254_v29, 16  ;;  %v674_v14 = vrot.slane %v672_v60, 5 }
  0x98   : > { %v17557_v11 = vcombine.low %v655_v51, %v665_v63  ;;  %v7118_v57 = vsel %vm23356_vm5, %v7113_v58, %v7117_v48  ;;  %v7123_v12 = vrot.slane %v7122_v59, 4  ;;  %v669_v15 = vor.u32 %v668_v3, %v664_v36  ;;  %v18259_v59 = vld [vmem:[%s23338_s9 + $0xbc] sm:$0xf] }
  0x99   : > { %v678_v16 = vrot.slane %v676_v62, 4  ;;  %v684_v18 = vrot.slane %v682_v5, 5  ;;  %v7131_v13 = vrot.slane %v7129_v9, 4  ;;  %v7135_v22 = vshll.u32 %v18255_v55, 16  ;;  %v205_v9 = vld [vmem:[%s23338_s9 + $0xac] sm:$0xf] }
  0x9a   : > { %20316 = vmatprep.mubr.msk.bf16.mxu1 %vm1936_vm4, %v17557_v11  ;;  %v7128_v20 = vsel %vm23356_vm5, %v7123_v12, %v7127_v53  ;;  %v7139_v23 = vshrl.u32 %v18255_v55, 16  ;;  %v7145_v25 = vshll.u32 %v18256_v6, 16  ;;  %v670_v29 = vrot.slane %v669_v15, 4 }
  0x9b   : > { %v18392_v28 = vcombine.low %v7118_v57, %v7128_v20  ;;  %v679_v31 = vor.u32 %v678_v16, %v674_v14  ;;  %v7132_v32 = vor.u32 %v7131_v13, %v7127_v53  ;;  %v7137_v10 = vrot.slane %v7135_v22, 5 }
  0x9c   : > { %v7141_v33 = vrot.slane %v7139_v23, 4  ;;  %v7147_v34 = vrot.slane %v7145_v25, 5  ;;  %v687_v36 = vshrl.u32 %v202_v8, 16  ;;  %v675_v38 = vsel %vm23356_vm5, %v670_v29, %v674_v14 }
  0x9d   : > { %20836 = vmatprep.mubr.msk.bf16.mxu0 %vm1936_vm4, %v18392_v28  ;;  %v680_v39 = vrot.slane %v679_v31, 4  ;;  %v7133_v41 = vrot.slane %v7132_v32, 4  ;;  %v690_v40 = vshll.u32 %v202_v8, 16  ;;  %v696_v45 = vshll.u32 %v203_v17, 16  ;;  %v307_v8 = vld [vmem:[%s23338_s9 + $0xb0] sm:$0x1] }
  0x9e   : > { %v7142_v43 = vor.u32 %v7141_v33, %v7137_v10  ;;  %v689_v44 = vrot.slane %v687_v36, 4  ;;  %v700_v46 = vshrl.u32 %v203_v17, 16  ;;  %v706_v50 = vshll.u32 %v204_v27, 16  ;;  %v18260_v32 = vld [vmem:[%s23338_s9 + $0xc0] sm:$0xf] }
  0x9f   : > { %v685_v47 = vsel %vm23356_vm5, %v680_v39, %v684_v18  ;;  %v7138_v48 = vsel %vm23356_vm5, %v7133_v41, %v7137_v10  ;;  %v692_v49 = vrot.slane %v690_v40, 5  ;;  %v698_v53 = vrot.slane %v696_v45, 5 }
  0xa0   : > { %v17558_v51 = vcombine.low %v675_v38, %v685_v47  ;;  %v7143_v52 = vrot.slane %v7142_v43, 4  ;;  %v702_v54 = vrot.slane %v700_v46, 4  ;;  %v708_v58 = vrot.slane %v706_v50, 5  ;;  %v206_v38 = vld [vmem:[%s23338_s9 + $0xb4] sm:$0xf] }
  0xa1   : > { %v693_v55 = vor.u32 %v692_v49, %v689_v44  ;;  %v7150_v60 = vshrl.u32 %v18257_v37, 16  ;;  %v7153_v62 = vshll.u32 %v18257_v37, 16  ;;  %v7159_v5 = vshll.u32 %v18258_v42, 16  ;;  %v18261_v37 = vld [vmem:[%s23338_s9 + $0xc4] sm:$0x1] }
  0xa2   : > { %20317 = vmatmul.mubr.msk.bf16.gmra.mrb[28].mxu1 %vm1936_vm4, %v17558_v51  ;;  %v7148_v63 = vsel %vm23356_vm5, %v7143_v52, %v7147_v34  ;;  %v703_v3 = vor.u32 %v702_v54, %v698_v53  ;;  %v7163_v6 = vshrl.u32 %v18258_v42, 16  ;;  %v7169_v13 = vshll.u32 %v18259_v59, 16  ;;  %v207_v50 = vld [vmem:[%s23338_s9 + $0xb8] sm:$0xf] }
  0xa3   : > { %v18393_v11 = vcombine.low %v7138_v48, %v7148_v63  ;;  %v694_v57 = vrot.slane %v693_v55, 4  ;;  %v7152_v12 = vrot.slane %v7150_v60, 4  ;;  %v7155_v14 = vrot.slane %v7153_v62, 5 }
  0xa4   : > { %v704_v15 = vrot.slane %v703_v3, 4  ;;  %v7161_v16 = vrot.slane %v7159_v5, 5  ;;  %v7165_v18 = vrot.slane %v7163_v6, 4  ;;  %v710_v22 = vshrl.u32 %v204_v27, 16  ;;  %v208_v3 = vld [vmem:[%s23338_s9 + $0xbc] sm:$0xf] }
  0xa5   : > { %20837 = vmatmul.mubr.msk.bf16.gmra.mrb[28].mxu0 %vm1936_vm4, %v18393_v11  ;;  %v699_v17 = vsel %vm23356_vm5, %v694_v57, %v698_v53  ;;  %v7156_v20 = vor.u32 %v7155_v14, %v7152_v12  ;;  %v716_v23 = vshll.u32 %v205_v9, 16  ;;  %v7171_v29 = vrot.slane %v7169_v13, 5 }
  0xa6   : > { %v709_v25 = vsel %vm23356_vm5, %v704_v15, %v708_v58  ;;  %v7166_v28 = vor.u32 %v7165_v18, %v7161_v16  ;;  %v720_v31 = vshrl.u32 %v205_v9, 16  ;;  %v712_v34 = vrot.slane %v710_v22, 4  ;;  %v18262_v9 = vld [vmem:[%s23338_s9 + $0xc8] sm:$0xf] }
  0xa7   : > { %v17559_v10 = vcombine.low %v699_v17, %v709_v25  ;;  %v7157_v33 = vrot.slane %v7156_v20, 4  ;;  %v718_v36 = vrot.slane %v716_v23, 5  ;;  %v726_v40 = vshll.u32 %v307_v8, 16  ;;  %v18263_v8 = vld [vmem:[%s23338_s9 + $0xcc] sm:$0xf] }
  0xa8   : > { %v7167_v39 = vrot.slane %v7166_v28, 4  ;;  %v722_v41 = vrot.slane %v720_v31, 4  ;;  %v7173_v42 = vshrl.u32 %v18259_v59, 16  ;;  %v713_v43 = vor.u32 %v712_v34, %v708_v58  ;;  %v18264_v17 = vld [vmem:[%s23338_s9 + $0xd0] sm:$0xf] }
  0xa9   : > { %20320 = vmatprep.mubr.msk.bf16.mxu1 %vm1936_vm4, %v17559_v10  ;;  %v7162_v27 = vsel %vm23356_vm5, %v7157_v33, %v7161_v16  ;;  %v7179_v44 = vshll.u32 %v18260_v32, 16  ;;  %v7183_v45 = vshrl.u32 %v18260_v32, 16  ;;  %v728_v48 = vrot.slane %v726_v40, 5  ;;  %v209_v10 = vld [vmem:[%s23338_s9 + $0xc0] sm:$0xf] }
  0xaa   : > { %v7172_v46 = vsel %vm23356_vm5, %v7167_v39, %v7171_v29  ;;  %v723_v47 = vor.u32 %v722_v41, %v718_v36  ;;  %v7175_v49 = vrot.slane %v7173_v42, 4  ;;  %v714_v52 = vrot.slane %v713_v43, 4  ;;  %v308_v43 = vld [vmem:[%s23338_s9 + $0xc4] sm:$0x1] }
  0xab   : > { %v18394_v51 = vcombine.low %v7162_v27, %v7172_v46  ;;  %v7181_v53 = vrot.slane %v7179_v44, 5  ;;  %v7185_v54 = vrot.slane %v7183_v45, 4  ;;  %v7189_v60 = vshll.u32 %v18261_v37, 16 }
  0xac   : > { %v724_v55 = vrot.slane %v723_v47, 4  ;;  %v7176_v59 = vor.u32 %v7175_v49, %v7171_v29  ;;  %v731_v58 = vshrl.u32 %v206_v38, 16  ;;  %v719_v62 = vsel %vm23356_vm5, %v714_v52, %v718_v36 }
  0xad   : > { %20840 = vmatprep.mubr.msk.bf16.mxu0 %vm1936_vm4, %v18394_v51  ;;  %v7186_v63 = vor.u32 %v7185_v54, %v7181_v53  ;;  %v734_v5 = vshll.u32 %v206_v38, 16  ;;  %v740_v6 = vshll.u32 %v207_v50, 16  ;;  %v7191_v12 = vrot.slane %v7189_v60, 5 }
  0xae   : > { %v729_v11 = vsel %vm23356_vm5, %v724_v55, %v728_v48  ;;  %v7177_v57 = vrot.slane %v7176_v59, 4  ;;  %v733_v14 = vrot.slane %v731_v58, 4  ;;  %v744_v22 = vshrl.u32 %v207_v50, 16  ;;  %v18265_v50 = vld [vmem:[%s23338_s9 + $0xd4] sm:$0xf] }
  0xaf   : > { %v17560_v15 = vcombine.low %v719_v62, %v729_v11  ;;  %v7187_v16 = vrot.slane %v7186_v63, 4  ;;  %v736_v18 = vrot.slane %v734_v5, 5  ;;  %v742_v13 = vrot.slane %v740_v6, 5  ;;  %v18266_v55 = vld [vmem:[%s23338_s9 + $0xd8] sm:$0x1] }
  0xb0   : > { %v7182_v20 = vsel %vm23356_vm5, %v7177_v57, %v7181_v53  ;;  %v750_v23 = vshll.u32 %v208_v3, 16  ;;  %v7194_v25 = vshrl.u32 %v18262_v9, 16  ;;  %v7197_v31 = vshll.u32 %v18262_v9, 16  ;;  %v210_v63 = vld [vmem:[%s23338_s9 + $0xc8] sm:$0xf] }
  0xb1   : > { %20321 = vmatmul.mubr.msk.bf16.gmra.mrb[32].mxu1 %vm1936_vm4, %v17560_v15  ;;  %v7192_v28 = vsel %vm23356_vm5, %v7187_v16, %v7191_v12  ;;  %v737_v29 = vor.u32 %v736_v18, %v733_v14  ;;  %v7203_v32 = vshll.u32 %v18263_v8, 16  ;;  %v746_v34 = vrot.slane %v744_v22, 4 }
  0xb2   : > { %v18395_v33 = vcombine.low %v7182_v20, %v7192_v28  ;;  %v752_v36 = vrot.slane %v750_v23, 5  ;;  %v7196_v37 = vrot.slane %v7194_v25, 4  ;;  %v7199_v39 = vrot.slane %v7197_v31, 5  ;;  %v212_v20 = vld [vmem:[%s23338_s9 + $0xd0] sm:$0xf] }
  0xb3   : > { %v738_v38 = vrot.slane %v737_v29, 4  ;;  %v7205_v41 = vrot.slane %v7203_v32, 5  ;;  %v7207_v40 = vshrl.u32 %v18263_v8, 16  ;;  %v747_v42 = vor.u32 %v746_v34, %v742_v13  ;;  %v211_v8 = vld [vmem:[%s23338_s9 + $0xcc] sm:$0xf] }
  0xb4   : > { %20841 = vmatmul.mubr.msk.bf16.gmra.mrb[32].mxu0 %vm1936_vm4, %v18395_v33  ;;  %v7213_v27 = vshll.u32 %v18264_v17, 16  ;;  %v754_v44 = vshrl.u32 %v208_v3, 16  ;;  %v760_v45 = vshll.u32 %v209_v10, 16  ;;  %v7200_v47 = vor.u32 %v7199_v39, %v7196_v37  ;;  %v18267_v28 = vld [vmem:[%s23338_s9 + $0xdc] sm:$0xf] }
  0xb5   : > { %v743_v46 = vsel %vm23356_vm5, %v738_v38, %v742_v13  ;;  %v7209_v48 = vrot.slane %v7207_v40, 4  ;;  %v764_v49 = vshrl.u32 %v209_v10, 16  ;;  %v748_v51 = vrot.slane %v747_v42, 4  ;;  %v18268_v38 = vld [vmem:[%s23338_s9 + $0xe0] sm:$0xf] }
  0xb6   : > { %v7215_v52 = vrot.slane %v7213_v27, 5  ;;  %v756_v53 = vrot.slane %v754_v44, 4  ;;  %v762_v54 = vrot.slane %v760_v45, 5  ;;  %v7201_v59 = vrot.slane %v7200_v47, 4 }
  0xb7   : > { %v7210_v60 = vor.u32 %v7209_v48, %v7205_v41  ;;  %v766_v58 = vrot.slane %v764_v49, 4  ;;  %v770_v62 = vshll.u32 %v308_v43, 16  ;;  %v753_v3 = vsel %vm23356_vm5, %v748_v51, %v752_v36  ;;  %v18269_v48 = vld [vmem:[%s23338_s9 + $0xe4] sm:$0xf] }
  0xb8   : > { %v757_v5 = vor.u32 %v756_v53, %v752_v36  ;;  %v7217_v6 = vshrl.u32 %v18264_v17, 16  ;;  %v7223_v9 = vshll.u32 %v18265_v50, 16  ;;  %v17561_v11 = vcombine.low %v743_v46, %v753_v3 }
  0xb9   : > { %v7206_v57 = vsel %vm23356_vm5, %v7201_v59, %v7205_v41  ;;  %v7211_v12 = vrot.slane %v7210_v60, 4  ;;  %v767_v14 = vor.u32 %v766_v58, %v762_v54  ;;  %v772_v16 = vrot.slane %v770_v62, 5  ;;  %v213_v62 = vld [vmem:[%s23338_s9 + $0xd4] sm:$0xf] }
  0xba   : > { %v758_v15 = vrot.slane %v757_v5, 4  ;;  %v7219_v18 = vrot.slane %v7217_v6, 4  ;;  %v7225_v13 = vrot.slane %v7223_v9, 5  ;;  %20324 = vmatprep.mubr.msk.bf16.mxu1 %vm1936_vm4, %v17561_v11  ;;  %v7227_v23 = vshrl.u32 %v18265_v50, 16  ;;  %v309_v9 = vld [vmem:[%s23338_s9 + $0xd8] sm:$0x1] }
  0xbb   : > { %v7216_v17 = vsel %vm23356_vm5, %v7211_v12, %v7215_v52  ;;  %v768_v22 = vrot.slane %v767_v14, 4  ;;  %v7233_v25 = vshll.u32 %v18266_v55, 16  ;;  %v775_v10 = vshrl.u32 %v210_v63, 16 }
  0xbc   : > { %v18396_v29 = vcombine.low %v7206_v57, %v7216_v17  ;;  %v763_v31 = vsel %vm23356_vm5, %v758_v15, %v762_v54  ;;  %v7220_v32 = vor.u32 %v7219_v18, %v7215_v52  ;;  %v7229_v34 = vrot.slane %v7227_v23, 4 }
  0xbd   : > { %v773_v33 = vsel %vm23356_vm5, %v768_v22, %v772_v16  ;;  %v7235_v36 = vrot.slane %v7233_v25, 5  ;;  %v778_v37 = vshll.u32 %v210_v63, 16  ;;  %v777_v40 = vrot.slane %v775_v10, 4 }
  0xbe   : > { %20844 = vmatprep.mubr.msk.bf16.mxu0 %vm1936_vm4, %v18396_v29  ;;  %v17562_v39 = vcombine.low %v763_v31, %v773_v33  ;;  %v7221_v41 = vrot.slane %v7220_v32, 4  ;;  %v784_v42 = vshll.u32 %v211_v8, 16  ;;  %v7230_v27 = vor.u32 %v7229_v34, %v7225_v13  ;;  %v214_v33 = vld [vmem:[%s23338_s9 + $0xdc] sm:$0xf] }
  0xbf   : > { %v780_v43 = vrot.slane %v778_v37, 5  ;;  %v788_v44 = vshrl.u32 %v211_v8, 16  ;;  %v794_v45 = vshll.u32 %v212_v20, 16  ;;  %v7238_v49 = vshrl.u32 %v18267_v28, 16 }
  0xc0   : > { %20325 = vmatmul.mubr.msk.bf16.gmra.mrb[36].mxu1 %vm1936_vm4, %v17562_v39  ;;  %v7226_v46 = vsel %vm23356_vm5, %v7221_v41, %v7225_v13  ;;  %v786_v47 = vrot.slane %v784_v42, 5  ;;  %v7241_v50 = vshll.u32 %v18267_v28, 16  ;;  %v7231_v51 = vrot.slane %v7230_v27, 4  ;;  %v18270_v13 = vld [vmem:[%s23338_s9 + $0xe8] sm:$0xf] }
  0xc1   : > { %v781_v52 = vor.u32 %v780_v43, %v777_v40  ;;  %v790_v53 = vrot.slane %v788_v44, 4  ;;  %v796_v54 = vrot.slane %v794_v45, 5  ;;  %v7240_v55 = vrot.slane %v7238_v49, 4  ;;  %v18271_v28 = vld [vmem:[%s23338_s9 + $0xec] sm:$0x1] }
  0xc2   : > { %v7243_v59 = vrot.slane %v7241_v50, 5  ;;  %v7247_v60 = vshll.u32 %v18268_v38, 16  ;;  %v7251_v58 = vshrl.u32 %v18268_v38, 16  ;;  %v7236_v63 = vsel %vm23356_vm5, %v7231_v51, %v7235_v36  ;;  %v215_v42 = vld [vmem:[%s23338_s9 + $0xe0] sm:$0xf] }
  0xc3   : > { %v782_v3 = vrot.slane %v781_v52, 4  ;;  %v791_v5 = vor.u32 %v790_v53, %v786_v47  ;;  %v7257_v6 = vshll.u32 %v18269_v48, 16  ;;  %v18397_v11 = vcombine.low %v7226_v46, %v7236_v63  ;;  %v216_v53 = vld [vmem:[%s23338_s9 + $0xe4] sm:$0xf] }
  0xc4   : > { %v7244_v57 = vor.u32 %v7243_v59, %v7240_v55  ;;  %v7249_v12 = vrot.slane %v7247_v60, 5  ;;  %v7253_v14 = vrot.slane %v7251_v58, 4  ;;  %v798_v18 = vshrl.u32 %v212_v20, 16 }
  0xc5   : > { %v787_v8 = vsel %vm23356_vm5, %v782_v3, %v786_v47  ;;  %v792_v15 = vrot.slane %v791_v5, 4  ;;  %v7259_v16 = vrot.slane %v7257_v6, 5  ;;  %20845 = vmatmul.mubr.msk.bf16.gmra.mrb[36].mxu0 %vm1936_vm4, %v18397_v11  ;;  %v804_v23 = vshll.u32 %v213_v62, 16  ;;  %v18272_v6 = vld [vmem:[%s23338_s9 + $0xf0] sm:$0xf] }
  0xc6   : > { %v7245_v17 = vrot.slane %v7244_v57, 4  ;;  %v7254_v22 = vor.u32 %v7253_v14, %v7249_v12  ;;  %v808_v25 = vshrl.u32 %v213_v62, 16  ;;  %v800_v31 = vrot.slane %v798_v18, 4  ;;  %v18273_v14 = vld [vmem:[%s23338_s9 + $0xf4] sm:$0xf] }
  0xc7   : > { %v797_v29 = vsel %vm23356_vm5, %v792_v15, %v796_v54  ;;  %v814_v32 = vshll.u32 %v309_v9, 16  ;;  %v7261_v10 = vshrl.u32 %v18269_v48, 16  ;;  %v806_v37 = vrot.slane %v804_v23, 5 }
  0xc8   : > { %v17563_v34 = vcombine.low %v787_v8, %v797_v29  ;;  %v7250_v20 = vsel %vm23356_vm5, %v7245_v17, %v7249_v12  ;;  %v7255_v36 = vrot.slane %v7254_v22, 4  ;;  %v801_v38 = vor.u32 %v800_v31, %v796_v54  ;;  %v18274_v22 = vld [vmem:[%s23338_s9 + $0xf8] sm:$0xf] }
  0xc9   : > { %v810_v39 = vrot.slane %v808_v25, 4  ;;  %v816_v41 = vrot.slane %v814_v32, 5  ;;  %v7263_v40 = vrot.slane %v7261_v10, 4  ;;  %v7267_v43 = vshll.u32 %v18270_v13, 16  ;;  %v217_v10 = vld [vmem:[%s23338_s9 + $0xe8] sm:$0xf] }
  0xca   : > { %20328 = vmatprep.mubr.msk.bf16.mxu1 %vm1936_vm4, %v17563_v34  ;;  %v7260_v27 = vsel %vm23356_vm5, %v7255_v36, %v7259_v16  ;;  %v7271_v44 = vshrl.u32 %v18270_v13, 16  ;;  %v7277_v45 = vshll.u32 %v18271_v28, 16  ;;  %v802_v47 = vrot.slane %v801_v38, 4 }
  0xcb   : > { %v18398_v46 = vcombine.low %v7250_v20, %v7260_v27  ;;  %v811_v48 = vor.u32 %v810_v39, %v806_v37  ;;  %v7264_v49 = vor.u32 %v7263_v40, %v7259_v16  ;;  %v7269_v50 = vrot.slane %v7267_v43, 5 }
  0xcc   : > { %v7273_v51 = vrot.slane %v7271_v44, 4  ;;  %v7279_v52 = vrot.slane %v7277_v45, 5  ;;  %v819_v54 = vshrl.u32 %v214_v33, 16  ;;  %v807_v55 = vsel %vm23356_vm5, %v802_v47, %v806_v37  ;;  %v310_v37 = vld [vmem:[%s23338_s9 + $0xec] sm:$0x1] }
  0xcd   : > { %20848 = vmatprep.mubr.msk.bf16.mxu0 %vm1936_vm4, %v18398_v46  ;;  %v812_v59 = vrot.slane %v811_v48, 4  ;;  %v7265_v60 = vrot.slane %v7264_v49, 4  ;;  %v822_v58 = vshll.u32 %v214_v33, 16  ;;  %v828_v3 = vshll.u32 %v215_v42, 16 }
  0xce   : > { %v7274_v62 = vor.u32 %v7273_v51, %v7269_v50  ;;  %v821_v63 = vrot.slane %v819_v54, 4  ;;  %v832_v5 = vshrl.u32 %v215_v42, 16  ;;  %v838_v12 = vshll.u32 %v216_v53, 16  ;;  %v18275_v42 = vld [vmem:[%s23338_s9 + $0xfc] sm:$0xf] }
  0xcf   : > { %v817_v9 = vsel %vm23356_vm5, %v812_v59, %v816_v41  ;;  %v7270_v11 = vsel %vm23356_vm5, %v7265_v60, %v7269_v50  ;;  %v824_v57 = vrot.slane %v822_v58, 5  ;;  %v830_v16 = vrot.slane %v828_v3, 5  ;;  %v18276_v58 = vld [vmem:[%s23338_s9 + $0x100] sm:$0x1] }
  0xd0   : > { %v17564_v8 = vcombine.low %v807_v55, %v817_v9  ;;  %v7275_v15 = vrot.slane %v7274_v62, 4  ;;  %v834_v18 = vrot.slane %v832_v5, 4  ;;  %v840_v17 = vrot.slane %v838_v12, 5  ;;  %v219_v9 = vld [vmem:[%s23338_s9 + $0xf4] sm:$0xf] }
  0xd1   : > { %v825_v13 = vor.u32 %v824_v57, %v821_v63  ;;  %v7282_v23 = vshrl.u32 %v18272_v6, 16  ;;  %v7285_v25 = vshll.u32 %v18272_v6, 16  ;;  %v7291_v31 = vshll.u32 %v18273_v14, 16  ;;  %v218_v6 = vld [vmem:[%s23338_s9 + $0xf0] sm:$0xf] }
  0xd2   : > { %20329 = vmatmul.mubr.msk.bf16.gmra.mrb[40].mxu1 %vm1936_vm4, %v17564_v8  ;;  %v7280_v28 = vsel %vm23356_vm5, %v7275_v15, %v7279_v52  ;;  %v835_v29 = vor.u32 %v834_v18, %v830_v16  ;;  %v7295_v32 = vshrl.u32 %v18273_v14, 16  ;;  %v7301_v40 = vshll.u32 %v18274_v22, 16 }
  0xd3   : > { %v18399_v33 = vcombine.low %v7270_v11, %v7280_v28  ;;  %v826_v34 = vrot.slane %v825_v13, 4  ;;  %v7284_v20 = vrot.slane %v7282_v23, 4  ;;  %v7287_v36 = vrot.slane %v7285_v25, 5  ;;  %v220_v13 = vld [vmem:[%s23338_s9 + $0xf8] sm:$0xf] }
  0xd4   : > { %v836_v38 = vrot.slane %v835_v29, 4  ;;  %v7293_v39 = vrot.slane %v7291_v31, 5  ;;  %v7297_v41 = vrot.slane %v7295_v32, 4  ;;  %v842_v44 = vshrl.u32 %v216_v53, 16  ;;  %v18277_v28 = vld [vmem:[%s23338_s9 + $0x104] sm:$0xf] }
  0xd5   : > { %20849 = vmatmul.mubr.msk.bf16.gmra.mrb[40].mxu0 %vm1936_vm4, %v18399_v33  ;;  %v831_v27 = vsel %vm23356_vm5, %v826_v34, %v830_v16  ;;  %v7288_v43 = vor.u32 %v7287_v36, %v7284_v20  ;;  %v848_v45 = vshll.u32 %v217_v10, 16  ;;  %v7303_v48 = vrot.slane %v7301_v40, 5  ;;  %v18278_v33 = vld [vmem:[%s23338_s9 + $0x108] sm:$0xf] }
  0xd6   : > { %v841_v46 = vsel %vm23356_vm5, %v836_v38, %v840_v17  ;;  %v7298_v47 = vor.u32 %v7297_v41, %v7293_v39  ;;  %v852_v49 = vshrl.u32 %v217_v10, 16  ;;  %v844_v52 = vrot.slane %v842_v44, 4 }
  0xd7   : > { %v17565_v50 = vcombine.low %v831_v27, %v841_v46  ;;  %v7289_v51 = vrot.slane %v7288_v43, 4  ;;  %v850_v54 = vrot.slane %v848_v45, 5  ;;  %v858_v60 = vshll.u32 %v310_v37, 16  ;;  %v221_v27 = vld [vmem:[%s23338_s9 + $0xfc] sm:$0xf] }
  0xd8   : > { %v7299_v55 = vrot.slane %v7298_v47, 4  ;;  %v854_v59 = vrot.slane %v852_v49, 4  ;;  %v7305_v62 = vshrl.u32 %v18274_v22, 16  ;;  %v845_v63 = vor.u32 %v844_v52, %v840_v17 }
  0xd9   : > { %20332 = vmatprep.mubr.msk.bf16.mxu1 %vm1936_vm4, %v17565_v50  ;;  %v7294_v53 = vsel %vm23356_vm5, %v7289_v51, %v7293_v39  ;;  %v7311_v3 = vshll.u32 %v18275_v42, 16  ;;  %v7315_v5 = vshrl.u32 %v18275_v42, 16  ;;  %v860_v12 = vrot.slane %v858_v60, 5  ;;  %v18279_v42 = vld [vmem:[%s23338_s9 + $0x10c] sm:$0xf] }
  0xda   : > { %v7304_v11 = vsel %vm23356_vm5, %v7299_v55, %v7303_v48  ;;  %v855_v57 = vor.u32 %v854_v59, %v850_v54  ;;  %v7307_v14 = vrot.slane %v7305_v62, 4  ;;  %v846_v15 = vrot.slane %v845_v63, 4 }
  0xdb   : > { %v18400_v8 = vcombine.low %v7294_v53, %v7304_v11  ;;  %v7313_v16 = vrot.slane %v7311_v3, 5  ;;  %v7317_v18 = vrot.slane %v7315_v5, 4  ;;  %v7321_v17 = vshll.u32 %v18276_v58, 16  ;;  %v311_v3 = vld [vmem:[%s23338_s9 + $0x100] sm:$0x1] }
  0xdc   : > { %v856_v22 = vrot.slane %v855_v57, 4  ;;  %v7308_v23 = vor.u32 %v7307_v14, %v7303_v48  ;;  %v863_v25 = vshrl.u32 %v218_v6, 16  ;;  %v851_v29 = vsel %vm23356_vm5, %v846_v15, %v850_v54  ;;  %v18280_v14 = vld [vmem:[%s23338_s9 + $0x110] sm:$0xf] }
  0xdd   : > { %20852 = vmatprep.mubr.msk.bf16.mxu0 %vm1936_vm4, %v18400_v8  ;;  %v7318_v31 = vor.u32 %v7317_v18, %v7313_v16  ;;  %v866_v32 = vshll.u32 %v218_v6, 16  ;;  %v872_v10 = vshll.u32 %v219_v9, 16  ;;  %v7323_v36 = vrot.slane %v7321_v17, 5 }
  0xde   : > { %v861_v34 = vsel %vm23356_vm5, %v856_v22, %v860_v12  ;;  %v7309_v20 = vrot.slane %v7308_v23, 4  ;;  %v865_v37 = vrot.slane %v863_v25, 4  ;;  %v876_v44 = vshrl.u32 %v219_v9, 16 }
  0xdf   : > { %v17566_v38 = vcombine.low %v851_v29, %v861_v34  ;;  %v7319_v39 = vrot.slane %v7318_v31, 4  ;;  %v868_v41 = vrot.slane %v866_v32, 5  ;;  %v874_v40 = vrot.slane %v872_v10, 5  ;;  %v222_v10 = vld [vmem:[%s23338_s9 + $0x104] sm:$0xf] }
  0xe0   : > { %v7314_v43 = vsel %vm23356_vm5, %v7309_v20, %v7313_v16  ;;  %v882_v45 = vshll.u32 %v220_v13, 16  ;;  %v7326_v46 = vshrl.u32 %v18277_v28, 16  ;;  %v7329_v49 = vshll.u32 %v18277_v28, 16 }
  0xe1   : > { %20333 = vmatmul.mubr.msk.bf16.gmra.mrb[44].mxu1 %vm1936_vm4, %v17566_v38  ;;  %v7324_v47 = vsel %vm23356_vm5, %v7319_v39, %v7323_v36  ;;  %v869_v48 = vor.u32 %v868_v41, %v865_v37  ;;  %v7335_v50 = vshll.u32 %v18278_v33, 16  ;;  %v878_v52 = vrot.slane %v876_v44, 4  ;;  %v223_v37 = vld [vmem:[%s23338_s9 + $0x108] sm:$0xf] }
  0xe2   : > { %v18401_v51 = vcombine.low %v7314_v43, %v7324_v47  ;;  %v884_v54 = vrot.slane %v882_v45, 5  ;;  %v7328_v55 = vrot.slane %v7326_v46, 4  ;;  %v7331_v60 = vrot.slane %v7329_v49, 5  ;;  %v18282_v46 = vld [vmem:[%s23338_s9 + $0x118] sm:$0xf] }
  0xe3   : > { %v870_v59 = vrot.slane %v869_v48, 4  ;;  %v7337_v58 = vrot.slane %v7335_v50, 5  ;;  %v7339_v62 = vshrl.u32 %v18278_v33, 16  ;;  %v879_v53 = vor.u32 %v878_v52, %v874_v40 }
  0xe4   : > { %20853 = vmatmul.mubr.msk.bf16.gmra.mrb[44].mxu0 %vm1936_vm4, %v18401_v51  ;;  %v7345_v63 = vshll.u32 %v18279_v42, 16  ;;  %v886_v5 = vshrl.u32 %v220_v13, 16  ;;  %v892_v6 = vshll.u32 %v221_v27, 16  ;;  %v7332_v11 = vor.u32 %v7331_v60, %v7328_v55  ;;  %v18281_v13 = vld [vmem:[%s23338_s9 + $0x114] sm:$0x1] }
  0xe5   : > { %v875_v9 = vsel %vm23356_vm5, %v870_v59, %v874_v40  ;;  %v7341_v57 = vrot.slane %v7339_v62, 4  ;;  %v896_v12 = vshrl.u32 %v221_v27, 16  ;;  %v880_v8 = vrot.slane %v879_v53, 4  ;;  %v224_v27 = vld [vmem:[%s23338_s9 + $0x10c] sm:$0xf] }
  0xe6   : > { %v7347_v15 = vrot.slane %v7345_v63, 5  ;;  %v888_v16 = vrot.slane %v886_v5, 4  ;;  %v894_v18 = vrot.slane %v892_v6, 5  ;;  %v7333_v22 = vrot.slane %v7332_v11, 4  ;;  %v18283_v6 = vld [vmem:[%s23338_s9 + $0x11c] sm:$0xf] }
  0xe7   : > { %v7342_v23 = vor.u32 %v7341_v57, %v7337_v58  ;;  %v898_v17 = vrot.slane %v896_v12, 4  ;;  %v902_v25 = vshll.u32 %v311_v3, 16  ;;  %v885_v28 = vsel %vm23356_vm5, %v880_v8, %v884_v54  ;;  %v18284_v57 = vld [vmem:[%s23338_s9 + $0x120] sm:$0xf] }
  0xe8   : > { %v889_v29 = vor.u32 %v888_v16, %v884_v54  ;;  %v7349_v31 = vshrl.u32 %v18279_v42, 16  ;;  %v7355_v32 = vshll.u32 %v18280_v14, 16  ;;  %v17567_v33 = vcombine.low %v875_v9, %v885_v28 }
  0xe9   : > { %v7338_v34 = vsel %vm23356_vm5, %v7333_v22, %v7337_v58  ;;  %v7343_v20 = vrot.slane %v7342_v23, 4  ;;  %v899_v36 = vor.u32 %v898_v17, %v894_v18  ;;  %v904_v39 = vrot.slane %v902_v25, 5 }
  0xea   : > { %v890_v38 = vrot.slane %v889_v29, 4  ;;  %v7351_v41 = vrot.slane %v7349_v31, 4  ;;  %v7357_v40 = vrot.slane %v7355_v32, 5  ;;  %20336 = vmatprep.mubr.msk.bf16.mxu1 %vm1936_vm4, %v17567_v33  ;;  %v7359_v44 = vshrl.u32 %v18280_v14, 16  ;;  %v225_v32 = vld [vmem:[%s23338_s9 + $0x110] sm:$0xf] }
  0xeb   : > { %v7348_v42 = vsel %vm23356_vm5, %v7343_v20, %v7347_v15  ;;  %v900_v43 = vrot.slane %v899_v36, 4  ;;  %v7365_v45 = vshll.u32 %v18281_v13, 16  ;;  %v907_v50 = vshrl.u32 %v222_v10, 16  ;;  %v312_v36 = vld [vmem:[%s23338_s9 + $0x114] sm:$0x1] }
  0xec   : > { %v18402_v47 = vcombine.low %v7338_v34, %v7348_v42  ;;  %v895_v48 = vsel %vm23356_vm5, %v890_v38, %v894_v18  ;;  %v7352_v49 = vor.u32 %v7351_v41, %v7347_v15  ;;  %v7361_v52 = vrot.slane %v7359_v44, 4  ;;  %v18286_v42 = vld [vmem:[%s23338_s9 + $0x128] sm:$0x1] }
  0xed   : > { %v905_v51 = vsel %vm23356_vm5, %v900_v43, %v904_v39  ;;  %v7367_v54 = vrot.slane %v7365_v45, 5  ;;  %v910_v55 = vshll.u32 %v222_v10, 16  ;;  %v909_v58 = vrot.slane %v907_v50, 4 }
  0xee   : > { %20856 = vmatprep.mubr.msk.bf16.mxu0 %vm1936_vm4, %v18402_v47  ;;  %v17568_v59 = vcombine.low %v895_v48, %v905_v51  ;;  %v7353_v60 = vrot.slane %v7352_v49, 4  ;;  %v916_v62 = vshll.u32 %v223_v37, 16  ;;  %v7362_v53 = vor.u32 %v7361_v52, %v7357_v40 }
  0xef   : > { %v912_v63 = vrot.slane %v910_v55, 5  ;;  %v920_v3 = vshrl.u32 %v223_v37, 16  ;;  %v926_v5 = vshll.u32 %v224_v27, 16  ;;  %v7370_v12 = vshrl.u32 %v18282_v46, 16 }
  0xf0   : > { %20337 = vmatmul.mubr.msk.bf16.gmra.mrb[48].mxu1 %vm1936_vm4, %v17568_v59  ;;  %v7358_v9 = vsel %vm23356_vm5, %v7353_v60, %v7357_v40  ;;  %v918_v11 = vrot.slane %v916_v62, 5  ;;  %v7373_v14 = vshll.u32 %v18282_v46, 16  ;;  %v7363_v8 = vrot.slane %v7362_v53, 4  ;;  %v18285_v40 = vld [vmem:[%s23338_s9 + $0x124] sm:$0xf] }
  0xf1   : > { %v913_v15 = vor.u32 %v912_v63, %v909_v58  ;;  %v922_v16 = vrot.slane %v920_v3, 4  ;;  %v928_v18 = vrot.slane %v926_v5, 5  ;;  %v7372_v22 = vrot.slane %v7370_v12, 4  ;;  %v226_v62 = vld [vmem:[%s23338_s9 + $0x118] sm:$0xf] }
  0xf2   : > { %v7375_v23 = vrot.slane %v7373_v14, 5  ;;  %v7379_v17 = vshll.u32 %v18283_v6, 16  ;;  %v7383_v25 = vshrl.u32 %v18283_v6, 16  ;;  %v7368_v13 = vsel %vm23356_vm5, %v7363_v8, %v7367_v54  ;;  %v227_v12 = vld [vmem:[%s23338_s9 + $0x11c] sm:$0xf] }
  0xf3   : > { %v914_v28 = vrot.slane %v913_v15, 4  ;;  %v923_v29 = vor.u32 %v922_v16, %v918_v11  ;;  %v7389_v31 = vshll.u32 %v18284_v57, 16  ;;  %v18403_v10 = vcombine.low %v7358_v9, %v7368_v13  ;;  %v228_v14 = vld [vmem:[%s23338_s9 + $0x120] sm:$0xf] }
  0xf4   : > { %v7376_v33 = vor.u32 %v7375_v23, %v7372_v22  ;;  %v7381_v34 = vrot.slane %v7379_v17, 5  ;;  %v7385_v20 = vrot.slane %v7383_v25, 4  ;;  %v930_v41 = vshrl.u32 %v224_v27, 16  ;;  %v18287_v22 = vld [vmem:[%s23338_s9 + $0x12c] sm:$0xf] }
  0xf5   : > { %v919_v37 = vsel %vm23356_vm5, %v914_v28, %v918_v11  ;;  %v924_v38 = vrot.slane %v923_v29, 4  ;;  %v7391_v39 = vrot.slane %v7389_v31, 5  ;;  %20857 = vmatmul.mubr.msk.bf16.gmra.mrb[48].mxu0 %vm1936_vm4, %v18403_v10  ;;  %v936_v45 = vshll.u32 %v225_v32, 16  ;;  %v18288_v10 = vld [vmem:[%s23338_s9 + $0x130] sm:$0xf] }
  0xf6   : > { %v7377_v43 = vrot.slane %v7376_v33, 4  ;;  %v7386_v44 = vor.u32 %v7385_v20, %v7381_v34  ;;  %v940_v46 = vshrl.u32 %v225_v32, 16  ;;  %v932_v48 = vrot.slane %v930_v41, 4 }
  0xf7   : > { %v929_v47 = vsel %vm23356_vm5, %v924_v38, %v928_v18  ;;  %v946_v49 = vshll.u32 %v312_v36, 16  ;;  %v7393_v50 = vshrl.u32 %v18284_v57, 16  ;;  %v938_v54 = vrot.slane %v936_v45, 5 }
  0xf8   : > { %v17569_v51 = vcombine.low %v919_v37, %v929_v47  ;;  %v7382_v52 = vsel %vm23356_vm5, %v7377_v43, %v7381_v34  ;;  %v7387_v27 = vrot.slane %v7386_v44, 4  ;;  %v933_v55 = vor.u32 %v932_v48, %v928_v18  ;;  %v18289_v37 = vld [vmem:[%s23338_s9 + $0x134] sm:$0xf] }
  0xf9   : > { %v942_v59 = vrot.slane %v940_v46, 4  ;;  %v948_v60 = vrot.slane %v946_v49, 5  ;;  %v7395_v58 = vrot.slane %v7393_v50, 4  ;;  %v7399_v63 = vshll.u32 %v18285_v40, 16 }
  0xfa   : > { %20340 = vmatprep.mubr.msk.bf16.mxu1 %vm1936_vm4, %v17569_v51  ;;  %v7392_v53 = vsel %vm23356_vm5, %v7387_v27, %v7391_v39  ;;  %v7403_v3 = vshrl.u32 %v18285_v40, 16  ;;  %v7409_v5 = vshll.u32 %v18286_v42, 16  ;;  %v934_v9 = vrot.slane %v933_v55, 4  ;;  %v229_v42 = vld [vmem:[%s23338_s9 + $0x124] sm:$0xf] }
  0xfb   : > { %v18404_v6 = vcombine.low %v7382_v52, %v7392_v53  ;;  %v943_v11 = vor.u32 %v942_v59, %v938_v54  ;;  %v7396_v57 = vor.u32 %v7395_v58, %v7391_v39  ;;  %v7401_v8 = vrot.slane %v7399_v63, 5  ;;  %v313_v63 = vld [vmem:[%s23338_s9 + $0x128] sm:$0x1] }
  0xfc   : > { %v7405_v15 = vrot.slane %v7403_v3, 4  ;;  %v7411_v16 = vrot.slane %v7409_v5, 5  ;;  %v951_v18 = vshrl.u32 %v226_v62, 16  ;;  %v939_v23 = vsel %vm23356_vm5, %v934_v9, %v938_v54 }
  0xfd   : > { %20860 = vmatprep.mubr.msk.bf16.mxu0 %vm1936_vm4, %v18404_v6  ;;  %v944_v17 = vrot.slane %v943_v11, 4  ;;  %v7397_v25 = vrot.slane %v7396_v57, 4  ;;  %v954_v13 = vshll.u32 %v226_v62, 16  ;;  %v960_v31 = vshll.u32 %v227_v12, 16 }
  0xfe   : > { %v7406_v28 = vor.u32 %v7405_v15, %v7401_v8  ;;  %v953_v29 = vrot.slane %v951_v18, 4  ;;  %v964_v32 = vshrl.u32 %v227_v12, 16  ;;  %v970_v36 = vshll.u32 %v228_v14, 16  ;;  %v18290_v12 = vld [vmem:[%s23338_s9 + $0x138] sm:$0xf] }
  0xff   : > { %v949_v33 = vsel %vm23356_vm5, %v944_v17, %v948_v60  ;;  %v7402_v34 = vsel %vm23356_vm5, %v7397_v25, %v7401_v8  ;;  %v956_v20 = vrot.slane %v954_v13, 5  ;;  %v962_v41 = vrot.slane %v960_v31, 5 }
 0x100   : > { %v17570_v38 = vcombine.low %v939_v23, %v949_v33  ;;  %v7407_v39 = vrot.slane %v7406_v28, 4  ;;  %v966_v40 = vrot.slane %v964_v32, 4  ;;  %v972_v44 = vrot.slane %v970_v36, 5  ;;  %v230_v23 = vld [vmem:[%s23338_s9 + $0x12c] sm:$0xf] }
 0x101   : > { %v957_v43 = vor.u32 %v956_v20, %v953_v29  ;;  %v7414_v45 = vshrl.u32 %v18287_v22, 16  ;;  %v7417_v46 = vshll.u32 %v18287_v22, 16  ;;  %v7423_v49 = vshll.u32 %v18288_v10, 16  ;;  %v18291_v22 = vld [vmem:[%s23338_s9 + $0x13c] sm:$0x1] }
 0x102   : > { %20341 = vmatmul.mubr.msk.bf16.gmra.mrb[52].mxu1 %vm1936_vm4, %v17570_v38  ;;  %v7412_v47 = vsel %vm23356_vm5, %v7407_v39, %v7411_v16  ;;  %v967_v48 = vor.u32 %v966_v40, %v962_v41  ;;  %v7427_v50 = vshrl.u32 %v18288_v10, 16  ;;  %v7433_v58 = vshll.u32 %v18289_v37, 16  ;;  %v231_v36 = vld [vmem:[%s23338_s9 + $0x130] sm:$0xf]  ;;  %v232_v40 = vld [vmem:[%s23338_s9 + $0x134] sm:$0xf] }
 0x103   : > { %v18405_v51 = vcombine.low %v7402_v34, %v7412_v47  ;;  %v958_v52 = vrot.slane %v957_v43, 4  ;;  %v7416_v27 = vrot.slane %v7414_v45, 4  ;;  %v7419_v54 = vrot.slane %v7417_v46, 5  ;;  %v18293_v47 = vld [vmem:[%s23338_s9 + $0x144] sm:$0xf] }
 0x104   : > { %v968_v55 = vrot.slane %v967_v48, 4  ;;  %v7425_v59 = vrot.slane %v7423_v49, 5  ;;  %v7429_v60 = vrot.slane %v7427_v50, 4  ;;  %v974_v3 = vshrl.u32 %v228_v14, 16 }
 0x105   : > { %20861 = vmatmul.mubr.msk.bf16.gmra.mrb[52].mxu0 %vm1936_vm4, %v18405_v51  ;;  %v963_v62 = vsel %vm23356_vm5, %v958_v52, %v962_v41  ;;  %v7420_v53 = vor.u32 %v7419_v54, %v7416_v27  ;;  %v980_v5 = vshll.u32 %v229_v42, 16  ;;  %v7435_v11 = vrot.slane %v7433_v58, 5 }
 0x106   : > { %v973_v6 = vsel %vm23356_vm5, %v968_v55, %v972_v44  ;;  %v7430_v9 = vor.u32 %v7429_v60, %v7425_v59  ;;  %v984_v57 = vshrl.u32 %v229_v42, 16  ;;  %v976_v16 = vrot.slane %v974_v3, 4  ;;  %v18292_v42 = vld [vmem:[%s23338_s9 + $0x140] sm:$0xf] }
 0x107   : > { %v17571_v8 = vcombine.low %v963_v62, %v973_v6  ;;  %v7421_v15 = vrot.slane %v7420_v53, 4  ;;  %v982_v18 = vrot.slane %v980_v5, 5  ;;  %v990_v13 = vshll.u32 %v313_v63, 16 }
 0x108   : > { %v7431_v17 = vrot.slane %v7430_v9, 4  ;;  %v986_v25 = vrot.slane %v984_v57, 4  ;;  %v7437_v14 = vshrl.u32 %v18289_v37, 16  ;;  %v977_v29 = vor.u32 %v976_v16, %v972_v44 }
 0x109   : > { %20344 = vmatprep.mubr.msk.bf16.mxu1 %vm1936_vm4, %v17571_v8  ;;  %v7426_v28 = vsel %vm23356_vm5, %v7421_v15, %v7425_v59  ;;  %v7443_v31 = vshll.u32 %v18290_v12, 16  ;;  %v7447_v32 = vshrl.u32 %v18290_v12, 16  ;;  %v992_v34 = vrot.slane %v990_v13, 5  ;;  %v233_v8 = vld [vmem:[%s23338_s9 + $0x138] sm:$0xf] }
 0x10a   : > { %v7436_v10 = vsel %vm23356_vm5, %v7431_v17, %v7435_v11  ;;  %v987_v33 = vor.u32 %v986_v25, %v982_v18  ;;  %v7439_v20 = vrot.slane %v7437_v14, 4  ;;  %v978_v39 = vrot.slane %v977_v29, 4 }
 0x10b   : > { %v18406_v38 = vcombine.low %v7426_v28, %v7436_v10  ;;  %v7445_v37 = vrot.slane %v7443_v31, 5  ;;  %v7449_v41 = vrot.slane %v7447_v32, 4  ;;  %v7453_v46 = vshll.u32 %v18291_v22, 16 }
 0x10c   : > { %v988_v43 = vrot.slane %v987_v33, 4  ;;  %v7440_v45 = vor.u32 %v7439_v20, %v7435_v11  ;;  %v995_v44 = vshrl.u32 %v230_v23, 16  ;;  %v983_v48 = vsel %vm23356_vm5, %v978_v39, %v982_v18  ;;  %v18294_v11 = vld [vmem:[%s23338_s9 + $0x148] sm:$0xf] }
 0x10d   : > { %20864 = vmatprep.mubr.msk.bf16.mxu0 %vm1936_vm4, %v18406_v38  ;;  %v7450_v49 = vor.u32 %v7449_v41, %v7445_v37  ;;  %v998_v50 = vshll.u32 %v230_v23, 16  ;;  %v1004_v51 = vshll.u32 %v231_v36, 16  ;;  %v7455_v54 = vrot.slane %v7453_v46, 5  ;;  %v314_v23 = vld [vmem:[%s23338_s9 + $0x13c] sm:$0x1] }
 0x10e   : > { %v993_v52 = vsel %vm23356_vm5, %v988_v43, %v992_v34  ;;  %v7441_v27 = vrot.slane %v7440_v45, 4  ;;  %v997_v55 = vrot.slane %v995_v44, 4  ;;  %v1008_v63 = vshrl.u32 %v231_v36, 16  ;;  %v18295_v36 = vld [vmem:[%s23338_s9 + $0x14c] sm:$0xf] }
 0x10f   : > { %v17572_v59 = vcombine.low %v983_v48, %v993_v52  ;;  %v7451_v60 = vrot.slane %v7450_v49, 4  ;;  %v1000_v58 = vrot.slane %v998_v50, 5  ;;  %v1006_v62 = vrot.slane %v1004_v51, 5 }
 0x110   : > { %v7446_v53 = vsel %vm23356_vm5, %v7441_v27, %v7445_v37  ;;  %v1014_v3 = vshll.u32 %v232_v40, 16  ;;  %v7458_v5 = vshrl.u32 %v18292_v42, 16  ;;  %v7461_v57 = vshll.u32 %v18292_v42, 16  ;;  %v18296_v42 = vld [vmem:[%s23338_s9 + $0x150] sm:$0x1] }
 0x111   : > { %20345 = vmatmul.mubr.msk.bf16.gmra.mrb[56].mxu1 %vm1936_vm4, %v17572_v59  ;;  %v7456_v6 = vsel %vm23356_vm5, %v7451_v60, %v7455_v54  ;;  %v1001_v9 = vor.u32 %v1000_v58, %v997_v55  ;;  %v7467_v12 = vshll.u32 %v18293_v47, 16  ;;  %v1010_v16 = vrot.slane %v1008_v63, 4  ;;  %v235_v55 = vld [vmem:[%s23338_s9 + $0x144] sm:$0xf] }
 0x112   : > { %v18407_v15 = vcombine.low %v7446_v53, %v7456_v6  ;;  %v1016_v18 = vrot.slane %v1014_v3, 5  ;;  %v7460_v22 = vrot.slane %v7458_v5, 4  ;;  %v7463_v25 = vrot.slane %v7461_v57, 5  ;;  %v236_v57 = vld [vmem:[%s23338_s9 + $0x148] sm:$0xf] }
 0x113   : > { %v1002_v17 = vrot.slane %v1001_v9, 4  ;;  %v7469_v13 = vrot.slane %v7467_v12, 5  ;;  %v7471_v14 = vshrl.u32 %v18293_v47, 16  ;;  %v1011_v28 = vor.u32 %v1010_v16, %v1006_v62 }
 0x114   : > { %20865 = vmatmul.mubr.msk.bf16.gmra.mrb[56].mxu0 %vm1936_vm4, %v18407_v15  ;;  %v7477_v29 = vshll.u32 %v18294_v11, 16  ;;  %v1018_v31 = vshrl.u32 %v232_v40, 16  ;;  %v1024_v32 = vshll.u32 %v233_v8, 16  ;;  %v7464_v33 = vor.u32 %v7463_v25, %v7460_v22  ;;  %v234_v40 = vld [vmem:[%s23338_s9 + $0x140] sm:$0xf] }
 0x115   : > { %v1007_v10 = vsel %vm23356_vm5, %v1002_v17, %v1006_v62  ;;  %v7473_v34 = vrot.slane %v7471_v14, 4  ;;  %v1028_v20 = vshrl.u32 %v233_v8, 16  ;;  %v1012_v38 = vrot.slane %v1011_v28, 4  ;;  %v18506_v22 = vld [vmem:[%s23338_s9 + $0x14] sm:$0xe] }
 0x116   : > { %v7479_v39 = vrot.slane %v7477_v29, 5  ;;  %v1020_v37 = vrot.slane %v1018_v31, 4  ;;  %v1026_v41 = vrot.slane %v1024_v32, 5  ;;  %v7465_v43 = vrot.slane %v7464_v33, 4  ;;  %v18827_v14 = vld [vmem:[%s29403_s1 + $0xc] sm:$0x3] }
 0x117   : > { %v7474_v45 = vor.u32 %v7473_v34, %v7469_v13  ;;  %v1030_v46 = vrot.slane %v1028_v20, 4  ;;  %v1034_v44 = vshll.u32 %v314_v23, 16  ;;  %v1017_v47 = vsel %vm23356_vm5, %v1012_v38, %v1016_v18  ;;  %v237_v28 = vld [vmem:[%s23338_s9 + $0x14c] sm:$0xf] }
 0x118   : > { %v1021_v48 = vor.u32 %v1020_v37, %v1016_v18  ;;  %v7481_v49 = vshrl.u32 %v18294_v11, 16  ;;  %v7487_v50 = vshll.u32 %v18295_v36, 16  ;;  %v17573_v51 = vcombine.low %v1007_v10, %v1017_v47 }
 0x119   : > { %v7470_v52 = vsel %vm23356_vm5, %v7465_v43, %v7469_v13  ;;  %v7475_v27 = vrot.slane %v7474_v45, 4  ;;  %v1031_v54 = vor.u32 %v1030_v46, %v1026_v41  ;;  %v1036_v60 = vrot.slane %v1034_v44, 5  ;;  %v238_v44 = vld [vmem:[%s23338_s9 + $0x154] sm:$0xf] }
 0x11a   : > { %v1022_v59 = vrot.slane %v1021_v48, 4  ;;  %v7483_v58 = vrot.slane %v7481_v49, 4  ;;  %v7489_v62 = vrot.slane %v7487_v50, 5  ;;  %20348 = vmatprep.mubr.msk.bf16.mxu1 %vm1936_vm4, %v17573_v51  ;;  %v7491_v3 = vshrl.u32 %v18295_v36, 16 }
 0x11b   : > { %v7480_v53 = vsel %vm23356_vm5, %v7475_v27, %v7479_v39  ;;  %v1032_v63 = vrot.slane %v1031_v54, 4  ;;  %v7497_v5 = vshll.u32 %v18296_v42, 16  ;;  %v1039_v12 = vshrl.u32 %v234_v40, 16  ;;  %v239_v54 = vld [vmem:[%s23338_s9 + $0x158] sm:$0xf] }
 0x11c   : > { %v18408_v6 = vcombine.low %v7470_v52, %v7480_v53  ;;  %v1027_v9 = vsel %vm23356_vm5, %v1022_v59, %v1026_v41  ;;  %v7484_v11 = vor.u32 %v7483_v58, %v7479_v39  ;;  %v7493_v15 = vrot.slane %v7491_v3, 4  ;;  %v315_v41 = vld [vmem:[%s23338_s9 + $0x150] sm:$0x1] }
 0x11d   : > { %v1037_v8 = vsel %vm23356_vm5, %v1032_v63, %v1036_v60  ;;  %v7499_v16 = vrot.slane %v7497_v5, 5  ;;  %v1042_v18 = vshll.u32 %v234_v40, 16  ;;  %v1041_v25 = vrot.slane %v1039_v12, 4  ;;  %v240_v63 = vld [vmem:[%s23338_s9 + $0x15c] sm:$0xf] }
 0x11e   : > { %20868 = vmatprep.mubr.msk.bf16.mxu0 %vm1936_vm4, %v18408_v6  ;;  %v17574_v23 = vcombine.low %v1027_v9, %v1037_v8  ;;  %v7485_v17 = vrot.slane %v7484_v11, 4  ;;  %v1048_v13 = vshll.u32 %v235_v55, 16  ;;  %v7494_v29 = vor.u32 %v7493_v15, %v7489_v62  ;;  %v241_v15 = vld [vmem:[%s23338_s9 + $0x160] sm:$0xf] }
 0x11f   : > { %v1044_v31 = vrot.slane %v1042_v18, 5  ;;  %v1052_v32 = vshrl.u32 %v235_v55, 16  ;;  %v1058_v10 = vshll.u32 %v236_v57, 16  ;;  %v18538_v42 = vrot.slane %v18506_v22, 9 }
 0x120   : > { %20349 = vmatmul.mubr.msk.bf16.gmra.mrb[60].mxu1 %vm1936_vm4, %v17574_v23  ;;  %v7490_v33 = vsel %vm23356_vm5, %v7485_v17, %v7489_v62  ;;  %v1050_v34 = vrot.slane %v1048_v13, 5  ;;  %v7495_v20 = vrot.slane %v7494_v29, 4  ;;  %v9463_v43 = vrot.slane %v9461_v0, 4  ;;  %v22717_v17 = vld [vmem:[%s23338_s9 + $0x2c] sm:$0xf] }
 0x121   : > { %v1045_v36 = vor.u32 %v1044_v31, %v1041_v25  ;;  %v1054_v38 = vrot.slane %v1052_v32, 4  ;;  %v1060_v39 = vrot.slane %v1058_v10, 5  ;;  %v23870_v45 = vand.u32 %v18827_v14, %v23314_v4  ;;  %v22718_v29 = vld [vmem:[%s23338_s9 + $0x30] sm:$0xf]  ;;  %v316_v32 = vld [vmem:[%s23338_s9 + $0x164] sm:$0x1] }
 0x122   : > { %v1062_v46 = vshrl.u32 %v236_v57, 16  ;;  %v7500_v40 = vsel %vm23356_vm5, %v7495_v20, %v7499_v16  ;;  %v1068_v49 = vshll.u32 %v237_v28, 16  ;;  %v9462_v51 = vsel %vm23862_vm8, %v18538_v42, %v9461_v0 }
 0x123   : > { %v1046_v47 = vrot.slane %v1045_v36, 4  ;;  %v1055_v48 = vor.u32 %v1054_v38, %v1050_v34  ;;  %v18409_v50 = vcombine.low %v7490_v33, %v7500_v40  ;;  %v9465_v52 = vsel %vm23862_vm8, %v9463_v43, %v9464_v56  ;;  %21066 = vmatprep.subr.bf16.mxu0 %v23870_v45  ;;  %v242_v36 = vld [vmem:[%s23338_s9 + $0x168] sm:$0xf] }
 0x124   : > { %v1064_v27 = vrot.slane %v1062_v46, 4  ;;  %v18571_v60 = vcombine.low %v9462_v51, %v9465_v52  ;;  %v1070_v58 = vrot.slane %v1068_v49, 5  ;;  %v1072_v0 = vshrl.u32 %v237_v28, 16  ;;  %v243_v51 = vld [vmem:[%s23338_s9 + $0x16c] sm:$0xf] }
 0x125   : > { %v1051_v55 = vsel %vm23356_vm5, %v1046_v47, %v1050_v34  ;;  %v1056_v59 = vrot.slane %v1055_v48, 4  ;;  %20869 = vmatmul.mubr.msk.bf16.gmra.mrb[60].mxu0 %vm1936_vm4, %v18409_v50  ;;  %v1078_v26 = vshll.u32 %v315_v41, 16  ;;  %v9468_v56 = vsel %vm23862_vm8, %v23378_v1, %v9467_v19  ;;  %v18507_v19 = vld [vmem:[%s23338_s9 + $0x28] sm:$0xe]  ;;  %v244_v52 = vld [vmem:[%s23338_s9 + $0x170] sm:$0xf] }
 0x126   : > { %v1065_v21 = vor.u32 %v1064_v27, %v1060_v39  ;;  %20938 = vmatprep.mubr.msk.bf16.mxu0 %vm1936_vm4, %v18571_v60  ;;  %v9471_v53 = vsel %vm23862_vm8, %v23398_v30, %v9470_v24  ;;  %v1083_v3 = vshrl.u32 %v238_v44, 16  ;;  %v1086_v5 = vshll.u32 %v238_v44, 16 }
 0x127   : > { %v1061_v62 = vsel %vm23356_vm5, %v1056_v59, %v1060_v39  ;;  %v1074_v9 = vrot.slane %v1072_v0, 4  ;;  %v1080_v1 = vrot.slane %v1078_v26, 5  ;;  %v18572_v11 = vcombine.low %v9468_v56, %v9471_v53 }
 0x128   : > { %v17575_v61 = vcombine.low %v1051_v55, %v1061_v62  ;;  %v1066_v6 = vrot.slane %v1065_v21, 4  ;;  %v1085_v57 = vrot.slane %v1083_v3, 4  ;;  %v1088_v12 = vrot.slane %v1086_v5, 5  ;;  %v22719_v55 = vld [vmem:[%s23338_s9 + $0x34] sm:$0xf] }
 0x129   : > { %v1092_v8 = vshll.u32 %v239_v54, 16  ;;  %v1075_v24 = vor.u32 %v1074_v9, %v1070_v58  ;;  %v1096_v30 = vshrl.u32 %v239_v54, 16  ;;  %v1102_v16 = vshll.u32 %v240_v63, 16  ;;  %v22720_v21 = vld [vmem:[%s23338_s9 + $0x38] sm:$0x1] }
 0x12a   : > { %20352 = vmatprep.mubr.msk.bf16.mxu1 %vm1936_vm4, %v17575_v61  ;;  %v1071_v2 = vsel %vm23356_vm5, %v1066_v6, %v1070_v58  ;;  %v1089_v18 = vor.u32 %v1088_v12, %v1085_v57  ;;  %v18539_v23 = vrot.slane %v18507_v19, 9  ;;  %v9474_v25 = vrot.slane %v22717_v17, 5  ;;  %v18508_v3 = vld [vmem:[%s23338_s9 + $0x3c] sm:$0xe] }
 0x12b   : > { %v1094_v22 = vrot.slane %v1092_v8, 5  ;;  %v1076_v13 = vrot.slane %v1075_v24, 4  ;;  %v1098_v14 = vrot.slane %v1096_v30, 4  ;;  %v1104_v28 = vrot.slane %v1102_v16, 5  ;;  %v317_v8 = vld [vmem:[%s23338_s9 + $0x178] sm:$0x1] }
 0x12c   : > { %v9477_v31 = vrot.slane %v22718_v29, 5  ;;  %v1090_v10 = vrot.slane %v1089_v18, 4  ;;  %v9475_v33 = vsel %vm23862_vm8, %v18539_v23, %v9474_v25  ;;  %v9476_v34 = vrot.slane %v9474_v25, 4 }
 0x12d   : > { %v1106_v20 = vshrl.u32 %v240_v63, 16  ;;  %v1081_v38 = vsel %vm23356_vm5, %v1076_v13, %v1080_v1  ;;  %20939 = vmatmul.mubr.msk.bf16.vlgmr.msra.gmra.mrb[0].mxu0 %vm1936_vm4, %v18572_v11  ;;  %v1099_v39 = vor.u32 %v1098_v14, %v1094_v22  ;;  %v1112_v41 = vshll.u32 %v241_v15, 16  ;;  %v245_v1 = vld [vmem:[%s23338_s9 + $0x174] sm:$0xf]  ;;  %v22721_v13 = vld [vmem:[%s23338_s9 + $0x40] sm:$0xf] }
 0x12e   : > { %v1116_v42 = vshrl.u32 %v241_v15, 16  ;;  %v17576_v43 = vcombine.low %v1071_v2, %v1081_v38  ;;  %21067 = vmatpush3.bf16.msra.mxu0 %v23870_v45  ;;  %v1095_v46 = vsel %vm23356_vm5, %v1090_v10, %v1094_v22  ;;  %v9478_v44 = vsel %vm23862_vm8, %v9476_v34, %v9477_v31  ;;  %v246_v34 = vld [vmem:[%s23338_s9 + $0x17c] sm:$0xf] }
 0x12f   : > { %v1108_v40 = vrot.slane %v1106_v20, 4  ;;  %v1100_v47 = vrot.slane %v1099_v39, 4  ;;  %v18573_v48 = vcombine.low %v9475_v33, %v9478_v44  ;;  %v1114_v49 = vrot.slane %v1112_v41, 5  ;;  %v247_v41 = vld [vmem:[%s23338_s9 + $0x180] sm:$0xf] }
 0x130   : > { %v1118_v50 = vrot.slane %v1116_v42, 4  ;;  %20353 = vmatmul.mubr.msk.bf16.gmra.mrb[64].mxu1 %vm1936_vm4, %v17576_v43  ;;  %v1122_v54 = vshll.u32 %v316_v32, 16  ;;  %v9479_v45 = vrot.slane %v9477_v31, 4  ;;  %v9480_v59 = vrot.slane %v22719_v55, 5 }
 0x131   : > { %v1109_v27 = vor.u32 %v1108_v40, %v1104_v28  ;;  %v1105_v60 = vsel %vm23356_vm5, %v1100_v47, %v1104_v28  ;;  %20942 = vmatprep.mubr.msk.bf16.mxu0 %vm1936_vm4, %v18573_v48  ;;  %v9483_v0 = vrot.slane %v22720_v21, 5  ;;  %v1127_v26 = vshrl.u32 %v242_v36, 16  ;;  %v22722_v28 = vld [vmem:[%s23338_s9 + $0x44] sm:$0xf] }
 0x132   : > { %v1119_v58 = vor.u32 %v1118_v50, %v1114_v49  ;;  %v17577_v56 = vcombine.low %v1095_v46, %v1105_v60  ;;  %v1124_v53 = vrot.slane %v1122_v54, 5  ;;  %v9481_v63 = vsel %vm23862_vm8, %v9479_v45, %v9480_v59  ;;  %v22723_v45 = vld [vmem:[%s23338_s9 + $0x48] sm:$0xf] }
 0x133   : > { %v1110_v62 = vrot.slane %v1109_v27, 4  ;;  %v9482_v61 = vrot.slane %v9480_v59, 4  ;;  %v1129_v6 = vrot.slane %v1127_v26, 4  ;;  %v1130_v9 = vshll.u32 %v242_v36, 16  ;;  %v22724_v59 = vld [vmem:[%s23338_s9 + $0x4c] sm:$0x1] }
 0x134   : > { %v1120_v5 = vrot.slane %v1119_v58, 4  ;;  %20356 = vmatprep.mubr.msk.bf16.mxu1 %vm1936_vm4, %v17577_v56  ;;  %v1136_v11 = vshll.u32 %v243_v51, 16  ;;  %v1140_v57 = vshrl.u32 %v243_v51, 16  ;;  %v1146_v12 = vshll.u32 %v244_v52, 16  ;;  %v248_v26 = vld [vmem:[%s23338_s9 + $0x184] sm:$0xf] }
 0x135   : > { %v1115_v19 = vsel %vm23356_vm5, %v1110_v62, %v1114_v49  ;;  %v9484_v2 = vsel %vm23862_vm8, %v9482_v61, %v9483_v0  ;;  %v1132_v24 = vrot.slane %v1130_v9, 5  ;;  %v18540_v30 = vrot.slane %v18508_v3, 9  ;;  %v18509_v61 = vld [vmem:[%s23338_s9 + $0x50] sm:$0xe] }
 0x136   : > { %v1125_v15 = vsel %vm23356_vm5, %v1120_v5, %v1124_v53  ;;  %v18574_v18 = vcombine.low %v9481_v63, %v9484_v2  ;;  %v1138_v22 = vrot.slane %v1136_v11, 5  ;;  %v1142_v23 = vrot.slane %v1140_v57, 4  ;;  %v249_v11 = vld [vmem:[%s23338_s9 + $0x188] sm:$0xf] }
 0x137   : > { %v17578_v16 = vcombine.low %v1115_v19, %v1125_v15  ;;  %v1133_v17 = vor.u32 %v1132_v24, %v1129_v6  ;;  %v1148_v25 = vrot.slane %v1146_v12, 5  ;;  %v9487_v14 = vrot.slane %v22721_v13, 5 }
 0x138   : > { %v9490_v29 = vrot.slane %v22722_v28, 5  ;;  %20943 = vmatmul.mubr.msk.bf16.gmra.mrb[4].mxu0 %vm1936_vm4, %v18574_v18  ;;  %v1143_v31 = vor.u32 %v1142_v23, %v1138_v22  ;;  %v1150_v32 = vshrl.u32 %v244_v52, 16  ;;  %v1156_v10 = vshll.u32 %v245_v1, 16 }
 0x139   : > { %20357 = vmatmul.mubr.msk.bf16.gmra.mrb[68].mxu1 %vm1936_vm4, %v17578_v16  ;;  %v1160_v33 = vshrl.u32 %v245_v1, 16  ;;  %v1134_v20 = vrot.slane %v1133_v17, 4  ;;  %v9488_v36 = vsel %vm23862_vm8, %v18540_v30, %v9487_v14  ;;  %v9489_v38 = vrot.slane %v9487_v14, 4  ;;  %v22725_v16 = vld [vmem:[%s23338_s9 + $0x54] sm:$0xf] }
 0x13a   : > { %v1166_v39 = vshll.u32 %v317_v8, 16  ;;  %v1144_v42 = vrot.slane %v1143_v31, 4  ;;  %v1152_v43 = vrot.slane %v1150_v32, 4  ;;  %v1158_v46 = vrot.slane %v1156_v10, 5  ;;  %v250_v10 = vld [vmem:[%s23338_s9 + $0x190] sm:$0xf] }
 0x13b   : > { %v1162_v44 = vrot.slane %v1160_v33, 4  ;;  %v1139_v40 = vsel %vm23356_vm5, %v1134_v20, %v1138_v22  ;;  %v9491_v47 = vsel %vm23862_vm8, %v9489_v38, %v9490_v29  ;;  %v9492_v49 = vrot.slane %v9490_v29, 4  ;;  %v318_v22 = vld [vmem:[%s23338_s9 + $0x18c] sm:$0x1]  ;;  %v251_v38 = vld [vmem:[%s23338_s9 + $0x194] sm:$0xf] }
 0x13c   : > { %v1168_v48 = vrot.slane %v1166_v39, 5  ;;  %v1149_v50 = vsel %vm23356_vm5, %v1144_v42, %v1148_v25  ;;  %v18575_v51 = vcombine.low %v9488_v36, %v9491_v47  ;;  %v1153_v52 = vor.u32 %v1152_v43, %v1148_v25  ;;  %v22726_v25 = vld [vmem:[%s23338_s9 + $0x58] sm:$0xf] }
 0x13d   : > { %v1163_v27 = vor.u32 %v1162_v44, %v1158_v46  ;;  %v17579_v54 = vcombine.low %v1139_v40, %v1149_v50  ;;  %v9493_v55 = vrot.slane %v22723_v45, 5  ;;  %v9496_v60 = vrot.slane %v22724_v59, 5  ;;  %v22727_v50 = vld [vmem:[%s23338_s9 + $0x5c] sm:$0xf] }
 0x13e   : > { %v1171_v58 = vshrl.u32 %v246_v34, 16  ;;  %20946 = vmatprep.mubr.msk.bf16.mxu0 %vm1936_vm4, %v18575_v51  ;;  %v1154_v21 = vrot.slane %v1153_v52, 4  ;;  %v1174_v56 = vshll.u32 %v246_v34, 16  ;;  %v1180_v62 = vshll.u32 %v247_v41, 16  ;;  %v22728_v52 = vld [vmem:[%s23338_s9 + $0x60] sm:$0x1] }
 0x13f   : > { %v1164_v0 = vrot.slane %v1163_v27, 4  ;;  %20360 = vmatprep.mubr.msk.bf16.mxu1 %vm1936_vm4, %v17579_v54  ;;  %v9494_v53 = vsel %vm23862_vm8, %v9492_v49, %v9493_v55  ;;  %v9495_v63 = vrot.slane %v9493_v55, 4  ;;  %v1184_v5 = vshrl.u32 %v247_v41, 16  ;;  %v252_v55 = vld [vmem:[%s23338_s9 + $0x198] sm:$0xf] }
 0x140   : > { %v1173_v3 = vrot.slane %v1171_v58, 4  ;;  %v1159_v6 = vsel %vm23356_vm5, %v1154_v21, %v1158_v46  ;;  %v1176_v1 = vrot.slane %v1174_v56, 5  ;;  %v1182_v19 = vrot.slane %v1180_v62, 5  ;;  %v18510_v56 = vld [vmem:[%s23338_s9 + $0x64] sm:$0xe] }
 0x141   : > { %v1169_v9 = vsel %vm23356_vm5, %v1164_v0, %v1168_v48  ;;  %v9497_v12 = vsel %vm23862_vm8, %v9495_v63, %v9496_v60  ;;  %v1186_v8 = vrot.slane %v1184_v5, 4  ;;  %v1190_v15 = vshll.u32 %v248_v26, 16 }
 0x142   : > { %v17580_v57 = vcombine.low %v1159_v6, %v1169_v9  ;;  %v18576_v2 = vcombine.low %v9494_v53, %v9497_v12  ;;  %v1177_v24 = vor.u32 %v1176_v1, %v1173_v3  ;;  %v18541_v30 = vrot.slane %v18509_v61, 9  ;;  %v253_v1 = vld [vmem:[%s23338_s9 + $0x19c] sm:$0xf] }
 0x143   : > { %v9500_v18 = vrot.slane %v22725_v16, 5  ;;  %v1187_v23 = vor.u32 %v1186_v8, %v1182_v19  ;;  %v1192_v17 = vrot.slane %v1190_v15, 5  ;;  %v9503_v13 = vrot.slane %v22726_v25, 5  ;;  %v319_v16 = vld [vmem:[%s23338_s9 + $0x1a0] sm:$0x1] }
 0x144   : > { %20361 = vmatmul.mubr.msk.bf16.gmra.mrb[72].mxu1 %vm1936_vm4, %v17580_v57  ;;  %v1194_v14 = vshrl.u32 %v248_v26, 16  ;;  %20947 = vmatmul.mubr.msk.bf16.gmra.mrb[8].mxu0 %vm1936_vm4, %v18576_v2  ;;  %v1178_v28 = vrot.slane %v1177_v24, 4  ;;  %v1200_v32 = vshll.u32 %v249_v11, 16  ;;  %v1204_v20 = vshrl.u32 %v249_v11, 16  ;;  %v22729_v24 = vld [vmem:[%s23338_s9 + $0x68] sm:$0xf] }
 0x145   : > { %v9501_v29 = vsel %vm23862_vm8, %v18541_v30, %v9500_v18  ;;  %v9502_v31 = vrot.slane %v9500_v18, 4  ;;  %v1188_v33 = vrot.slane %v1187_v23, 4  ;;  %v1210_v36 = vshll.u32 %v318_v22, 16  ;;  %v22730_v22 = vld [vmem:[%s23338_s9 + $0x6c] sm:$0xf] }
 0x146   : > { %v1196_v34 = vrot.slane %v1194_v14, 4  ;;  %v1183_v39 = vsel %vm23356_vm5, %v1178_v28, %v1182_v19  ;;  %v1202_v42 = vrot.slane %v1200_v32, 5  ;;  %v9505_v43 = vrot.slane %v9503_v13, 4  ;;  %v255_v32 = vld [vmem:[%s23338_s9 + $0x1a8] sm:$0xf] }
 0x147   : > { %v9504_v41 = vsel %vm23862_vm8, %v9502_v31, %v9503_v13  ;;  %v1193_v46 = vsel %vm23356_vm5, %v1188_v33, %v1192_v17  ;;  %v1206_v47 = vrot.slane %v1204_v20, 4  ;;  %v1212_v49 = vrot.slane %v1210_v36, 5  ;;  %v254_v13 = vld [vmem:[%s23338_s9 + $0x1a4] sm:$0xf] }
 0x148   : > { %v18577_v44 = vcombine.low %v9501_v29, %v9504_v41  ;;  %v1197_v40 = vor.u32 %v1196_v34, %v1192_v17  ;;  %v17581_v48 = vcombine.low %v1183_v39, %v1193_v46  ;;  %v9506_v51 = vrot.slane %v22727_v50, 5 }
 0x149   : > { %v9509_v27 = vrot.slane %v22728_v52, 5  ;;  %v1207_v45 = vor.u32 %v1206_v47, %v1202_v42  ;;  %v1215_v59 = vshrl.u32 %v250_v10, 16  ;;  %v1218_v60 = vshll.u32 %v250_v10, 16  ;;  %v18511_v47 = vld [vmem:[%s23338_s9 + $0x78] sm:$0xe] }
 0x14a   : > { %20950 = vmatprep.mubr.msk.bf16.mxu0 %vm1936_vm4, %v18577_v44  ;;  %v1198_v54 = vrot.slane %v1197_v40, 4  ;;  %20364 = vmatprep.mubr.msk.bf16.mxu1 %vm1936_vm4, %v17581_v48  ;;  %v9507_v58 = vsel %vm23862_vm8, %v9505_v43, %v9506_v51  ;;  %v9508_v21 = vrot.slane %v9506_v51, 4  ;;  %v1224_v0 = vshll.u32 %v251_v38, 16  ;;  %v256_v40 = vld [vmem:[%s23338_s9 + $0x1ac] sm:$0xf] }
 0x14b   : > { %v1228_v26 = vshrl.u32 %v251_v38, 16  ;;  %v1208_v53 = vrot.slane %v1207_v45, 4  ;;  %v1217_v63 = vrot.slane %v1215_v59, 4  ;;  %v1220_v3 = vrot.slane %v1218_v60, 5  ;;  %v22732_v51 = vld [vmem:[%s23338_s9 + $0x74] sm:$0x1] }
 0x14c   : > { %v1203_v62 = vsel %vm23356_vm5, %v1198_v54, %v1202_v42  ;;  %v9510_v5 = vsel %vm23862_vm8, %v9508_v21, %v9509_v27  ;;  %v1226_v61 = vrot.slane %v1224_v0, 5  ;;  %v1234_v9 = vshll.u32 %v252_v55, 16 }
 0x14d   : > { %v1230_v6 = vrot.slane %v1228_v26, 4  ;;  %v1213_v19 = vsel %vm23356_vm5, %v1208_v53, %v1212_v49  ;;  %v18578_v11 = vcombine.low %v9507_v58, %v9510_v5  ;;  %v1221_v57 = vor.u32 %v1220_v3, %v1217_v63  ;;  %v22731_v49 = vld [vmem:[%s23338_s9 + $0x70] sm:$0xf] }
 0x14e   : > { %v18542_v12 = vrot.slane %v18510_v56, 9  ;;  %v17582_v8 = vcombine.low %v1203_v62, %v1213_v19  ;;  %v1236_v2 = vrot.slane %v1234_v9, 5  ;;  %v9513_v30 = vrot.slane %v22729_v24, 5 }
 0x14f   : > { %v1231_v15 = vor.u32 %v1230_v6, %v1226_v61  ;;  %20951 = vmatmul.mubr.msk.bf16.gmra.mrb[12].mxu0 %vm1936_vm4, %v18578_v11  ;;  %v1222_v18 = vrot.slane %v1221_v57, 4  ;;  %v9516_v23 = vrot.slane %v22730_v22, 5  ;;  %v1238_v17 = vshrl.u32 %v252_v55, 16  ;;  %v257_v6 = vld [vmem:[%s23338_s9 + $0x1b0] sm:$0xf] }
 0x150   : > { %v1244_v25 = vshll.u32 %v253_v1, 16  ;;  %20365 = vmatmul.mubr.msk.bf16.gmra.mrb[76].mxu1 %vm1936_vm4, %v17582_v8  ;;  %v9514_v28 = vsel %vm23862_vm8, %v18542_v12, %v9513_v30  ;;  %v9515_v29 = vrot.slane %v9513_v30, 4  ;;  %v1248_v31 = vshrl.u32 %v253_v1, 16  ;;  %v320_v57 = vld [vmem:[%s23338_s9 + $0x1b4] sm:$0x1] }
 0x151   : > { %v1232_v14 = vrot.slane %v1231_v15, 4  ;;  %v1227_v10 = vsel %vm23356_vm5, %v1222_v18, %v1226_v61  ;;  %v1240_v33 = vrot.slane %v1238_v17, 4  ;;  %v1254_v20 = vshll.u32 %v319_v16, 16  ;;  %v22733_v8 = vld [vmem:[%s23338_s9 + $0x7c] sm:$0xf] }
 0x152   : > { %v1246_v34 = vrot.slane %v1244_v25, 5  ;;  %v9517_v38 = vsel %vm23862_vm8, %v9515_v29, %v9516_v23  ;;  %v1250_v39 = vrot.slane %v1248_v31, 4  ;;  %v9518_v41 = vrot.slane %v9516_v23, 4  ;;  %v258_v17 = vld [vmem:[%s23338_s9 + $0x1b8] sm:$0xf] }
 0x153   : > { %v1237_v36 = vsel %vm23356_vm5, %v1232_v14, %v1236_v2  ;;  %v18579_v43 = vcombine.low %v9514_v28, %v9517_v38  ;;  %v1241_v46 = vor.u32 %v1240_v33, %v1236_v2  ;;  %v1256_v44 = vrot.slane %v1254_v20, 5  ;;  %v22734_v2 = vld [vmem:[%s23338_s9 + $0x80] sm:$0xf]  ;;  %v259_v29 = vld [vmem:[%s23338_s9 + $0x1bc] sm:$0xf] }
 0x154   : > { %v17583_v42 = vcombine.low %v1227_v10, %v1237_v36  ;;  %v1251_v48 = vor.u32 %v1250_v39, %v1246_v34  ;;  %v9519_v50 = vrot.slane %v22731_v49, 5  ;;  %v9522_v52 = vrot.slane %v22732_v51, 5 }
 0x155   : > { %v1259_v27 = vshrl.u32 %v254_v13, 16  ;;  %20954 = vmatprep.mubr.msk.bf16.mxu0 %vm1936_vm4, %v18579_v43  ;;  %v1242_v54 = vrot.slane %v1241_v46, 4  ;;  %v1262_v45 = vshll.u32 %v254_v13, 16  ;;  %v1268_v55 = vshll.u32 %v255_v32, 16  ;;  %v22735_v43 = vld [vmem:[%s23338_s9 + $0x84] sm:$0xf] }
 0x156   : > { %20368 = vmatprep.mubr.msk.bf16.mxu1 %vm1936_vm4, %v17583_v42  ;;  %v1272_v59 = vshrl.u32 %v255_v32, 16  ;;  %v1252_v60 = vrot.slane %v1251_v48, 4  ;;  %v9520_v58 = vsel %vm23862_vm8, %v9518_v41, %v9519_v50  ;;  %v9521_v21 = vrot.slane %v9519_v50, 4  ;;  %v260_v48 = vld [vmem:[%s23338_s9 + $0x1c0] sm:$0xf] }
 0x157   : > { %v1261_v0 = vrot.slane %v1259_v27, 4  ;;  %v1247_v26 = vsel %vm23356_vm5, %v1242_v54, %v1246_v34  ;;  %v1264_v56 = vrot.slane %v1262_v45, 5  ;;  %v1270_v62 = vrot.slane %v1268_v55, 5 }
 0x158   : > { %v1274_v53 = vrot.slane %v1272_v59, 4  ;;  %v1257_v63 = vsel %vm23356_vm5, %v1252_v60, %v1256_v44  ;;  %v9523_v3 = vsel %vm23862_vm8, %v9521_v21, %v9522_v52  ;;  %v1278_v5 = vshll.u32 %v256_v40, 16 }
 0x159   : > { %v18543_v61 = vrot.slane %v18511_v47, 9  ;;  %v17584_v9 = vcombine.low %v1247_v26, %v1257_v63  ;;  %v18580_v1 = vcombine.low %v9520_v58, %v9523_v3  ;;  %v1265_v19 = vor.u32 %v1264_v56, %v1261_v0  ;;  %v18512_v58 = vld [vmem:[%s23338_s9 + $0x8c] sm:$0xe] }
 0x15a   : > { %v1275_v11 = vor.u32 %v1274_v53, %v1270_v62  ;;  %v1280_v12 = vrot.slane %v1278_v5, 5  ;;  %v9526_v15 = vrot.slane %v22733_v8, 5  ;;  %v9529_v24 = vrot.slane %v22734_v2, 5  ;;  %v321_v53 = vld [vmem:[%s23338_s9 + $0x1c8] sm:$0x1] }
 0x15b   : > { %v1282_v30 = vshrl.u32 %v256_v40, 16  ;;  %20369 = vmatmul.mubr.msk.bf16.gmra.mrb[80].mxu1 %vm1936_vm4, %v17584_v9  ;;  %20955 = vmatmul.mubr.msk.bf16.gmra.mrb[16].mxu0 %vm1936_vm4, %v18580_v1  ;;  %v1266_v16 = vrot.slane %v1265_v19, 4  ;;  %v1288_v22 = vshll.u32 %v257_v6, 16  ;;  %v1292_v23 = vshrl.u32 %v257_v6, 16  ;;  %v22736_v40 = vld [vmem:[%s23338_s9 + $0x88] sm:$0x1] }
 0x15c   : > { %v1276_v18 = vrot.slane %v1275_v11, 4  ;;  %v9527_v25 = vsel %vm23862_vm8, %v18543_v61, %v9526_v15  ;;  %v9528_v13 = vrot.slane %v9526_v15, 4  ;;  %v1298_v28 = vshll.u32 %v320_v57, 16  ;;  %v22737_v1 = vld [vmem:[%s23338_s9 + $0x90] sm:$0xf] }
 0x15d   : > { %v1284_v14 = vrot.slane %v1282_v30, 4  ;;  %v1271_v31 = vsel %vm23356_vm5, %v1266_v16, %v1270_v62  ;;  %v1290_v10 = vrot.slane %v1288_v22, 5  ;;  %v1294_v33 = vrot.slane %v1292_v23, 4  ;;  %v261_v62 = vld [vmem:[%s23338_s9 + $0x1c4] sm:$0xf] }
 0x15e   : > { %v1281_v32 = vsel %vm23356_vm5, %v1276_v18, %v1280_v12  ;;  %v9530_v20 = vsel %vm23862_vm8, %v9528_v13, %v9529_v24  ;;  %v1300_v38 = vrot.slane %v1298_v28, 5  ;;  %v9531_v42 = vrot.slane %v9529_v24, 4  ;;  %v22738_v11 = vld [vmem:[%s23338_s9 + $0x94] sm:$0xf]  ;;  %v262_v13 = vld [vmem:[%s23338_s9 + $0x1cc] sm:$0xf] }
 0x15f   : > { %v17585_v34 = vcombine.low %v1271_v31, %v1281_v32  ;;  %v1285_v36 = vor.u32 %v1284_v14, %v1280_v12  ;;  %v18581_v39 = vcombine.low %v9527_v25, %v9530_v20  ;;  %v1295_v41 = vor.u32 %v1294_v33, %v1290_v10 }
 0x160   : > { %v9532_v46 = vrot.slane %v22735_v43, 5  ;;  %v9535_v47 = vrot.slane %v22736_v40, 5  ;;  %v1303_v49 = vshrl.u32 %v258_v17, 16  ;;  %v1306_v50 = vshll.u32 %v258_v17, 16 }
 0x161   : > { %20372 = vmatprep.mubr.msk.bf16.mxu1 %vm1936_vm4, %v17585_v34  ;;  %v1286_v44 = vrot.slane %v1285_v36, 4  ;;  %20958 = vmatprep.mubr.msk.bf16.mxu0 %vm1936_vm4, %v18581_v39  ;;  %v1296_v51 = vrot.slane %v1295_v41, 4  ;;  %v1312_v54 = vshll.u32 %v259_v29, 16  ;;  %v1316_v60 = vshrl.u32 %v259_v29, 16  ;;  %v22739_v34 = vld [vmem:[%s23338_s9 + $0x98] sm:$0xf] }
 0x162   : > { %v9533_v52 = vsel %vm23862_vm8, %v9531_v42, %v9532_v46  ;;  %v9534_v27 = vrot.slane %v9532_v46, 4  ;;  %v1305_v55 = vrot.slane %v1303_v49, 4  ;;  %v1308_v59 = vrot.slane %v1306_v50, 5  ;;  %v263_v36 = vld [vmem:[%s23338_s9 + $0x1d0] sm:$0xf] }
 0x163   : > { %v1291_v45 = vsel %vm23356_vm5, %v1286_v44, %v1290_v10  ;;  %v1301_v21 = vsel %vm23356_vm5, %v1296_v51, %v1300_v38  ;;  %v1314_v26 = vrot.slane %v1312_v54, 5  ;;  %v1322_v56 = vshll.u32 %v260_v48, 16  ;;  %v264_v38 = vld [vmem:[%s23338_s9 + $0x1d4] sm:$0xf]  ;;  %v22740_v42 = vld [vmem:[%s23338_s9 + $0x9c] sm:$0x1] }
 0x164   : > { %v9536_v0 = vsel %vm23862_vm8, %v9534_v27, %v9535_v47  ;;  %v17586_v63 = vcombine.low %v1291_v45, %v1301_v21  ;;  %v1309_v5 = vor.u32 %v1308_v59, %v1305_v55  ;;  %v1318_v61 = vrot.slane %v1316_v60, 4  ;;  %v18513_v44 = vld [vmem:[%s23338_s9 + $0xa0] sm:$0xe]  ;;  %v265_v54 = vld [vmem:[%s23338_s9 + $0x1d8] sm:$0xf] }
 0x165   : > { %v18582_v3 = vcombine.low %v9533_v52, %v9536_v0  ;;  %v1324_v6 = vrot.slane %v1322_v56, 5  ;;  %v18544_v9 = vrot.slane %v18512_v58, 9  ;;  %v9539_v19 = vrot.slane %v22737_v1, 5  ;;  %v322_v45 = vld [vmem:[%s23338_s9 + $0x1dc] sm:$0x1] }
 0x166   : > { %v9542_v57 = vrot.slane %v22738_v11, 5  ;;  %20373 = vmatmul.mubr.msk.bf16.gmra.mrb[84].mxu1 %vm1936_vm4, %v17586_v63  ;;  %v1310_v12 = vrot.slane %v1309_v5, 4  ;;  %v1319_v8 = vor.u32 %v1318_v61, %v1314_v26  ;;  %v1326_v15 = vshrl.u32 %v260_v48, 16  ;;  %v22741_v61 = vld [vmem:[%s23338_s9 + $0xa4] sm:$0xf] }
 0x167   : > { %20959 = vmatmul.mubr.msk.bf16.gmra.mrb[20].mxu0 %vm1936_vm4, %v18582_v3  ;;  %v1332_v2 = vshll.u32 %v261_v62, 16  ;;  %v9540_v24 = vsel %vm23862_vm8, %v18544_v9, %v9539_v19  ;;  %v9541_v30 = vrot.slane %v9539_v19, 4  ;;  %v1336_v16 = vshrl.u32 %v261_v62, 16  ;;  %v22742_v9 = vld [vmem:[%s23338_s9 + $0xa8] sm:$0xf] }
 0x168   : > { %v1342_v18 = vshll.u32 %v321_v53, 16  ;;  %v1315_v22 = vsel %vm23356_vm5, %v1310_v12, %v1314_v26  ;;  %v1320_v23 = vrot.slane %v1319_v8, 4  ;;  %v1328_v17 = vrot.slane %v1326_v15, 4 }
 0x169   : > { %v1334_v25 = vrot.slane %v1332_v2, 5  ;;  %v9543_v14 = vsel %vm23862_vm8, %v9541_v30, %v9542_v57  ;;  %v1338_v28 = vrot.slane %v1336_v16, 4  ;;  %v9544_v31 = vrot.slane %v9542_v57, 4  ;;  %v266_v16 = vld [vmem:[%s23338_s9 + $0x1e0] sm:$0xf] }
 0x16a   : > { %v1344_v29 = vrot.slane %v1342_v18, 5  ;;  %v1325_v32 = vsel %vm23356_vm5, %v1320_v23, %v1324_v6  ;;  %v18583_v10 = vcombine.low %v9540_v24, %v9543_v14  ;;  %v1329_v33 = vor.u32 %v1328_v17, %v1324_v6 }
 0x16b   : > { %v9545_v20 = vrot.slane %v22739_v34, 5  ;;  %v17587_v39 = vcombine.low %v1315_v22, %v1325_v32  ;;  %v1339_v41 = vor.u32 %v1338_v28, %v1334_v25  ;;  %v9548_v43 = vrot.slane %v22740_v42, 5  ;;  %v22743_v34 = vld [vmem:[%s23338_s9 + $0xac] sm:$0xf] }
 0x16c   : > { %v1347_v46 = vshrl.u32 %v262_v13, 16  ;;  %20962 = vmatprep.mubr.msk.bf16.mxu0 %vm1936_vm4, %v18583_v10  ;;  %v1330_v40 = vrot.slane %v1329_v33, 4  ;;  %v1350_v49 = vshll.u32 %v262_v13, 16  ;;  %v1356_v52 = vshll.u32 %v263_v36, 16 }
 0x16d   : > { %v9546_v47 = vsel %vm23862_vm8, %v9544_v31, %v9545_v20  ;;  %v9547_v48 = vrot.slane %v9545_v20, 4  ;;  %20376 = vmatprep.mubr.msk.bf16.mxu1 %vm1936_vm4, %v17587_v39  ;;  %v1340_v50 = vrot.slane %v1339_v41, 4  ;;  %v1360_v27 = vshrl.u32 %v263_v36, 16  ;;  %v268_v31 = vld [vmem:[%s23338_s9 + $0x1e8] sm:$0xf] }
 0x16e   : > { %v1349_v51 = vrot.slane %v1347_v46, 4  ;;  %v1335_v55 = vsel %vm23356_vm5, %v1330_v40, %v1334_v25  ;;  %v1352_v60 = vrot.slane %v1350_v49, 5  ;;  %v1366_v58 = vshll.u32 %v264_v38, 16  ;;  %v267_v25 = vld [vmem:[%s23338_s9 + $0x1e4] sm:$0xf] }
 0x16f   : > { %v9549_v59 = vsel %vm23862_vm8, %v9547_v48, %v9548_v43  ;;  %v1345_v21 = vsel %vm23356_vm5, %v1340_v50, %v1344_v29  ;;  %v1358_v26 = vrot.slane %v1356_v52, 5  ;;  %v1362_v56 = vrot.slane %v1360_v27, 4 }
 0x170   : > { %v18584_v0 = vcombine.low %v9546_v47, %v9549_v59  ;;  %v17588_v62 = vcombine.low %v1335_v55, %v1345_v21  ;;  %v1353_v53 = vor.u32 %v1352_v60, %v1349_v51  ;;  %v1368_v63 = vrot.slane %v1366_v58, 5  ;;  %v18514_v51 = vld [vmem:[%s23338_s9 + $0xb4] sm:$0xe]  ;;  %v269_v55 = vld [vmem:[%s23338_s9 + $0x1ec] sm:$0xf] }
 0x171   : > { %v18545_v3 = vrot.slane %v18513_v44, 9  ;;  %v1363_v5 = vor.u32 %v1362_v56, %v1358_v26  ;;  %v9552_v6 = vrot.slane %v22741_v61, 5  ;;  %v9555_v1 = vrot.slane %v22742_v9, 5 }
 0x172   : > { %20963 = vmatmul.mubr.msk.bf16.gmra.mrb[24].mxu0 %vm1936_vm4, %v18584_v0  ;;  %v1370_v19 = vshrl.u32 %v264_v38, 16  ;;  %20377 = vmatmul.mubr.msk.bf16.gmra.mrb[88].mxu1 %vm1936_vm4, %v17588_v62  ;;  %v1354_v11 = vrot.slane %v1353_v53, 4  ;;  %v1376_v57 = vshll.u32 %v265_v54, 16  ;;  %v1380_v12 = vshrl.u32 %v265_v54, 16  ;;  %v22744_v38 = vld [vmem:[%s23338_s9 + $0xb0] sm:$0x1] }
 0x173   : > { %v1386_v8 = vshll.u32 %v322_v45, 16  ;;  %v1364_v15 = vrot.slane %v1363_v5, 4  ;;  %v9553_v2 = vsel %vm23862_vm8, %v18545_v3, %v9552_v6  ;;  %v9554_v24 = vrot.slane %v9552_v6, 4  ;;  %v323_v0 = vld [vmem:[%s23338_s9 + $0x1f0] sm:$0x1] }
 0x174   : > { %v1372_v30 = vrot.slane %v1370_v19, 4  ;;  %v1359_v18 = vsel %vm23356_vm5, %v1354_v11, %v1358_v26  ;;  %v1378_v22 = vrot.slane %v1376_v57, 5  ;;  %v1382_v23 = vrot.slane %v1380_v12, 4  ;;  %v22745_v62 = vld [vmem:[%s23338_s9 + $0xb8] sm:$0xf] }
 0x175   : > { %v1388_v17 = vrot.slane %v1386_v8, 5  ;;  %v1369_v13 = vsel %vm23356_vm5, %v1364_v15, %v1368_v63  ;;  %v9556_v14 = vsel %vm23862_vm8, %v9554_v24, %v9555_v1  ;;  %v9557_v29 = vrot.slane %v9555_v1, 4  ;;  %v270_v1 = vld [vmem:[%s23338_s9 + $0x1f4] sm:$0xf] }
 0x176   : > { %v1373_v28 = vor.u32 %v1372_v30, %v1368_v63  ;;  %v17589_v32 = vcombine.low %v1359_v18, %v1369_v13  ;;  %v18585_v10 = vcombine.low %v9553_v2, %v9556_v14  ;;  %v1383_v33 = vor.u32 %v1382_v23, %v1378_v22  ;;  %v22746_v63 = vld [vmem:[%s23338_s9 + $0xbc] sm:$0xf]  ;;  %v22747_v13 = vld [vmem:[%s23338_s9 + $0xc0] sm:$0xf] }
 0x177   : > { %v9558_v20 = vrot.slane %v22743_v34, 5  ;;  %v9561_v39 = vrot.slane %v22744_v38, 5  ;;  %v1391_v41 = vshrl.u32 %v266_v16, 16  ;;  %v1394_v42 = vshll.u32 %v266_v16, 16 }
 0x178   : > { %v1374_v36 = vrot.slane %v1373_v28, 4  ;;  %20380 = vmatprep.mubr.msk.bf16.mxu1 %vm1936_vm4, %v17589_v32  ;;  %20966 = vmatprep.mubr.msk.bf16.mxu0 %vm1936_vm4, %v18585_v10  ;;  %v1384_v43 = vrot.slane %v1383_v33, 4  ;;  %v1400_v40 = vshll.u32 %v267_v25, 16  ;;  %v1404_v50 = vshrl.u32 %v267_v25, 16  ;;  %v271_v28 = vld [vmem:[%s23338_s9 + $0x1f8] sm:$0xf] }
 0x179   : > { %v9559_v46 = vsel %vm23862_vm8, %v9557_v29, %v9558_v20  ;;  %v9560_v44 = vrot.slane %v9558_v20, 4  ;;  %v1393_v48 = vrot.slane %v1391_v41, 4  ;;  %v1396_v49 = vrot.slane %v1394_v42, 5  ;;  %v22748_v32 = vld [vmem:[%s23338_s9 + $0xc4] sm:$0x1] }
 0x17a   : > { %v1379_v47 = vsel %vm23356_vm5, %v1374_v36, %v1378_v22  ;;  %v1389_v52 = vsel %vm23356_vm5, %v1384_v43, %v1388_v17  ;;  %v1402_v54 = vrot.slane %v1400_v40, 5  ;;  %v1410_v45 = vshll.u32 %v268_v31, 16  ;;  %v272_v33 = vld [vmem:[%s23338_s9 + $0x1fc] sm:$0xf]  ;;  %v18515_v41 = vld [vmem:[%s23338_s9 + $0xc8] sm:$0xe] }
 0x17b   : > { %v9562_v27 = vsel %vm23862_vm8, %v9560_v44, %v9561_v39  ;;  %v17590_v59 = vcombine.low %v1379_v47, %v1389_v52  ;;  %v1397_v58 = vor.u32 %v1396_v49, %v1393_v48  ;;  %v1406_v21 = vrot.slane %v1404_v50, 4  ;;  %v273_v40 = vld [vmem:[%s23338_s9 + $0x200] sm:$0xf]  ;;  %v324_v47 = vld [vmem:[%s23338_s9 + $0x204] sm:$0x1] }
 0x17c   : > { %v18586_v60 = vcombine.low %v9559_v46, %v9562_v27  ;;  %v1412_v26 = vrot.slane %v1410_v45, 5  ;;  %v18546_v56 = vrot.slane %v18514_v51, 9  ;;  %v9565_v53 = vrot.slane %v22745_v62, 5 }
 0x17d   : > { %v9568_v3 = vrot.slane %v22746_v63, 5  ;;  %20381 = vmatmul.mubr.msk.bf16.gmra.mrb[92].mxu1 %vm1936_vm4, %v17590_v59  ;;  %v1398_v5 = vrot.slane %v1397_v58, 4  ;;  %v1407_v61 = vor.u32 %v1406_v21, %v1402_v54  ;;  %v1414_v6 = vshrl.u32 %v268_v31, 16 }
 0x17e   : > { %20967 = vmatmul.mubr.msk.bf16.gmra.mrb[28].mxu0 %vm1936_vm4, %v18586_v60  ;;  %v1420_v9 = vshll.u32 %v269_v55, 16  ;;  %v9566_v19 = vsel %vm23862_vm8, %v18546_v56, %v9565_v53  ;;  %v9567_v11 = vrot.slane %v9565_v53, 4  ;;  %v1424_v57 = vshrl.u32 %v269_v55, 16  ;;  %v22750_v56 = vld [vmem:[%s23338_s9 + $0xd0] sm:$0xf] }
 0x17f   : > { %v1430_v12 = vshll.u32 %v323_v0, 16  ;;  %v1403_v8 = vsel %vm23356_vm5, %v1398_v5, %v1402_v54  ;;  %v1408_v15 = vrot.slane %v1407_v61, 4  ;;  %v1416_v2 = vrot.slane %v1414_v6, 4  ;;  %v22749_v0 = vld [vmem:[%s23338_s9 + $0xcc] sm:$0xf] }
 0x180   : > { %v1422_v24 = vrot.slane %v1420_v9, 5  ;;  %v9569_v30 = vsel %vm23862_vm8, %v9567_v11, %v9568_v3  ;;  %v1426_v16 = vrot.slane %v1424_v57, 4  ;;  %v9570_v22 = vrot.slane %v9568_v3, 4  ;;  %v274_v11 = vld [vmem:[%s23338_s9 + $0x208] sm:$0xf] }
 0x181   : > { %v1432_v18 = vrot.slane %v1430_v12, 5  ;;  %v1413_v23 = vsel %vm23356_vm5, %v1408_v15, %v1412_v26  ;;  %v18587_v17 = vcombine.low %v9566_v19, %v9569_v30  ;;  %v1417_v25 = vor.u32 %v1416_v2, %v1412_v26  ;;  %v275_v2 = vld [vmem:[%s23338_s9 + $0x20c] sm:$0xf] }
 0x182   : > { %v9571_v14 = vrot.slane %v22747_v13, 5  ;;  %v17591_v29 = vcombine.low %v1403_v8, %v1413_v23  ;;  %v1427_v31 = vor.u32 %v1426_v16, %v1422_v24  ;;  %v9574_v10 = vrot.slane %v22748_v32, 5  ;;  %v22751_v13 = vld [vmem:[%s23338_s9 + $0xd4] sm:$0xf] }
 0x183   : > { %v1435_v34 = vshrl.u32 %v270_v1, 16  ;;  %20970 = vmatprep.mubr.msk.bf16.mxu0 %vm1936_vm4, %v18587_v17  ;;  %v1418_v20 = vrot.slane %v1417_v25, 4  ;;  %v1438_v39 = vshll.u32 %v270_v1, 16  ;;  %v1444_v46 = vshll.u32 %v271_v28, 16 }
 0x184   : > { %v9572_v36 = vsel %vm23862_vm8, %v9570_v22, %v9571_v14  ;;  %v9573_v38 = vrot.slane %v9571_v14, 4  ;;  %20384 = vmatprep.mubr.msk.bf16.mxu1 %vm1936_vm4, %v17591_v29  ;;  %v1428_v42 = vrot.slane %v1427_v31, 4  ;;  %v1448_v44 = vshrl.u32 %v271_v28, 16  ;;  %v276_v22 = vld [vmem:[%s23338_s9 + $0x210] sm:$0xf] }
 0x185   : > { %v1437_v43 = vrot.slane %v1435_v34, 4  ;;  %v1423_v48 = vsel %vm23356_vm5, %v1418_v20, %v1422_v24  ;;  %v1440_v50 = vrot.slane %v1438_v39, 5  ;;  %v1454_v51 = vshll.u32 %v272_v33, 16  ;;  %v22752_v29 = vld [vmem:[%s23338_s9 + $0xd8] sm:$0x1] }
 0x186   : > { %v9575_v49 = vsel %vm23862_vm8, %v9573_v38, %v9574_v10  ;;  %v1433_v52 = vsel %vm23356_vm5, %v1428_v42, %v1432_v18  ;;  %v1446_v54 = vrot.slane %v1444_v46, 5  ;;  %v1450_v45 = vrot.slane %v1448_v44, 4 }
 0x187   : > { %v18588_v27 = vcombine.low %v9572_v36, %v9575_v49  ;;  %v17592_v55 = vcombine.low %v1423_v48, %v1433_v52  ;;  %v1441_v59 = vor.u32 %v1440_v50, %v1437_v43  ;;  %v1456_v60 = vrot.slane %v1454_v51, 5  ;;  %v18516_v43 = vld [vmem:[%s23338_s9 + $0xdc] sm:$0xe]  ;;  %v277_v48 = vld [vmem:[%s23338_s9 + $0x214] sm:$0xf] }
 0x188   : > { %v18547_v58 = vrot.slane %v18515_v41, 9  ;;  %v1451_v21 = vor.u32 %v1450_v45, %v1446_v54  ;;  %v9578_v26 = vrot.slane %v22749_v0, 5  ;;  %v9581_v62 = vrot.slane %v22750_v56, 5 }
 0x189   : > { %20971 = vmatmul.mubr.msk.bf16.gmra.mrb[32].mxu0 %vm1936_vm4, %v18588_v27  ;;  %v1458_v53 = vshrl.u32 %v272_v33, 16  ;;  %20385 = vmatmul.mubr.msk.bf16.gmra.mrb[96].mxu1 %vm1936_vm4, %v17592_v55  ;;  %v1442_v63 = vrot.slane %v1441_v59, 4  ;;  %v1464_v3 = vshll.u32 %v273_v40, 16  ;;  %v1468_v5 = vshrl.u32 %v273_v40, 16  ;;  %v325_v27 = vld [vmem:[%s23338_s9 + $0x218] sm:$0x1] }
 0x18a   : > { %v1474_v61 = vshll.u32 %v324_v47, 16  ;;  %v1452_v6 = vrot.slane %v1451_v21, 4  ;;  %v9579_v9 = vsel %vm23862_vm8, %v18547_v58, %v9578_v26  ;;  %v9580_v1 = vrot.slane %v9578_v26, 4  ;;  %v22753_v55 = vld [vmem:[%s23338_s9 + $0xe0] sm:$0xf] }
 0x18b   : > { %v1460_v19 = vrot.slane %v1458_v53, 4  ;;  %v1447_v57 = vsel %vm23356_vm5, %v1442_v63, %v1446_v54  ;;  %v1466_v12 = vrot.slane %v1464_v3, 5  ;;  %v1470_v8 = vrot.slane %v1468_v5, 4 }
 0x18c   : > { %v1476_v15 = vrot.slane %v1474_v61, 5  ;;  %v1457_v24 = vsel %vm23356_vm5, %v1452_v6, %v1456_v60  ;;  %v9582_v30 = vsel %vm23862_vm8, %v9580_v1, %v9581_v62  ;;  %v9583_v18 = vrot.slane %v9581_v62, 4  ;;  %v278_v62 = vld [vmem:[%s23338_s9 + $0x21c] sm:$0xf] }
 0x18d   : > { %v1461_v16 = vor.u32 %v1460_v19, %v1456_v60  ;;  %v17593_v23 = vcombine.low %v1447_v57, %v1457_v24  ;;  %v18589_v17 = vcombine.low %v9579_v9, %v9582_v30  ;;  %v1471_v25 = vor.u32 %v1470_v8, %v1466_v12  ;;  %v22754_v60 = vld [vmem:[%s23338_s9 + $0xe4] sm:$0xf]  ;;  %v22755_v24 = vld [vmem:[%s23338_s9 + $0xe8] sm:$0xf] }
 0x18e   : > { %v9584_v14 = vrot.slane %v22751_v13, 5  ;;  %v9587_v31 = vrot.slane %v22752_v29, 5  ;;  %v1479_v32 = vshrl.u32 %v274_v11, 16  ;;  %v1482_v10 = vshll.u32 %v274_v11, 16 }
 0x18f   : > { %v1462_v28 = vrot.slane %v1461_v16, 4  ;;  %20388 = vmatprep.mubr.msk.bf16.mxu1 %vm1936_vm4, %v17593_v23  ;;  %20974 = vmatprep.mubr.msk.bf16.mxu0 %vm1936_vm4, %v18589_v17  ;;  %v1472_v33 = vrot.slane %v1471_v25, 4  ;;  %v1488_v36 = vshll.u32 %v275_v2, 16  ;;  %v1492_v42 = vshrl.u32 %v275_v2, 16  ;;  %v279_v16 = vld [vmem:[%s23338_s9 + $0x220] sm:$0xf] }
 0x190   : > { %v9585_v34 = vsel %vm23862_vm8, %v9583_v18, %v9584_v14  ;;  %v9586_v20 = vrot.slane %v9584_v14, 4  ;;  %v1481_v39 = vrot.slane %v1479_v32, 4  ;;  %v1484_v41 = vrot.slane %v1482_v10, 5  ;;  %v22756_v23 = vld [vmem:[%s23338_s9 + $0xec] sm:$0x1] }
 0x191   : > { %v1467_v38 = vsel %vm23356_vm5, %v1462_v28, %v1466_v12  ;;  %v1477_v46 = vsel %vm23356_vm5, %v1472_v33, %v1476_v15  ;;  %v1490_v40 = vrot.slane %v1488_v36, 5  ;;  %v1498_v47 = vshll.u32 %v276_v22, 16  ;;  %v280_v25 = vld [vmem:[%s23338_s9 + $0x224] sm:$0xf]  ;;  %v281_v36 = vld [vmem:[%s23338_s9 + $0x228] sm:$0xf] }
 0x192   : > { %v9588_v44 = vsel %vm23862_vm8, %v9586_v20, %v9587_v31  ;;  %v17594_v49 = vcombine.low %v1467_v38, %v1477_v46  ;;  %v1485_v51 = vor.u32 %v1484_v41, %v1481_v39  ;;  %v1494_v52 = vrot.slane %v1492_v42, 4  ;;  %v18517_v20 = vld [vmem:[%s23338_s9 + $0xf0] sm:$0xe]  ;;  %v326_v38 = vld [vmem:[%s23338_s9 + $0x22c] sm:$0x1] }
 0x193   : > { %v18590_v50 = vcombine.low %v9585_v34, %v9588_v44  ;;  %v1500_v54 = vrot.slane %v1498_v47, 5  ;;  %v18548_v45 = vrot.slane %v18516_v43, 9  ;;  %v9591_v59 = vrot.slane %v22753_v55, 5 }
 0x194   : > { %v9594_v58 = vrot.slane %v22754_v60, 5  ;;  %20389 = vmatmul.mubr.msk.bf16.gmra.mrb[100].mxu1 %vm1936_vm4, %v17594_v49  ;;  %v1486_v21 = vrot.slane %v1485_v51, 4  ;;  %v1495_v0 = vor.u32 %v1494_v52, %v1490_v40  ;;  %v1502_v26 = vshrl.u32 %v276_v22, 16 }
 0x195   : > { %20975 = vmatmul.mubr.msk.bf16.gmra.mrb[36].mxu0 %vm1936_vm4, %v18590_v50  ;;  %v1508_v56 = vshll.u32 %v277_v48, 16  ;;  %v9592_v53 = vsel %vm23862_vm8, %v18548_v45, %v9591_v59  ;;  %v9593_v63 = vrot.slane %v9591_v59, 4  ;;  %v1512_v3 = vshrl.u32 %v277_v48, 16  ;;  %v22758_v45 = vld [vmem:[%s23338_s9 + $0xf8] sm:$0xf] }
 0x196   : > { %v1518_v5 = vshll.u32 %v325_v27, 16  ;;  %v1491_v61 = vsel %vm23356_vm5, %v1486_v21, %v1490_v40  ;;  %v1496_v6 = vrot.slane %v1495_v0, 4  ;;  %v1504_v9 = vrot.slane %v1502_v26, 4  ;;  %v22757_v27 = vld [vmem:[%s23338_s9 + $0xf4] sm:$0xf] }
 0x197   : > { %v1510_v1 = vrot.slane %v1508_v56, 5  ;;  %v9595_v19 = vsel %vm23862_vm8, %v9593_v63, %v9594_v58  ;;  %v1514_v11 = vrot.slane %v1512_v3, 4  ;;  %v9596_v12 = vrot.slane %v9594_v58, 4 }
 0x198   : > { %v1520_v57 = vrot.slane %v1518_v5, 5  ;;  %v1501_v8 = vsel %vm23356_vm5, %v1496_v6, %v1500_v54  ;;  %v18591_v15 = vcombine.low %v9592_v53, %v9595_v19  ;;  %v1505_v2 = vor.u32 %v1504_v9, %v1500_v54  ;;  %v282_v6 = vld [vmem:[%s23338_s9 + $0x230] sm:$0xf] }
 0x199   : > { %v9597_v30 = vrot.slane %v22755_v24, 5  ;;  %v17595_v18 = vcombine.low %v1491_v61, %v1501_v8  ;;  %v1515_v22 = vor.u32 %v1514_v11, %v1510_v1  ;;  %v9600_v17 = vrot.slane %v22756_v23, 5  ;;  %v22759_v24 = vld [vmem:[%s23338_s9 + $0xfc] sm:$0xf] }
 0x19a   : > { %v1523_v13 = vshrl.u32 %v278_v62, 16  ;;  %20978 = vmatprep.mubr.msk.bf16.mxu0 %vm1936_vm4, %v18591_v15  ;;  %v1506_v14 = vrot.slane %v1505_v2, 4  ;;  %v1526_v31 = vshll.u32 %v278_v62, 16  ;;  %v1532_v33 = vshll.u32 %v279_v16, 16 }
 0x19b   : > { %v9598_v28 = vsel %vm23862_vm8, %v9596_v12, %v9597_v30  ;;  %v9599_v29 = vrot.slane %v9597_v30, 4  ;;  %20392 = vmatprep.mubr.msk.bf16.mxu1 %vm1936_vm4, %v17595_v18  ;;  %v1516_v32 = vrot.slane %v1515_v22, 4  ;;  %v1536_v34 = vshrl.u32 %v279_v16, 16  ;;  %v284_v12 = vld [vmem:[%s23338_s9 + $0x238] sm:$0xf] }
 0x19c   : > { %v1525_v10 = vrot.slane %v1523_v13, 4  ;;  %v1511_v39 = vsel %vm23356_vm5, %v1506_v14, %v1510_v1  ;;  %v1528_v42 = vrot.slane %v1526_v31, 5  ;;  %v1542_v43 = vshll.u32 %v280_v25, 16  ;;  %v22760_v18 = vld [vmem:[%s23338_s9 + $0x100] sm:$0x1] }
 0x19d   : > { %v9601_v41 = vsel %vm23862_vm8, %v9599_v29, %v9600_v17  ;;  %v1521_v46 = vsel %vm23356_vm5, %v1516_v32, %v1520_v57  ;;  %v1534_v40 = vrot.slane %v1532_v33, 5  ;;  %v1538_v47 = vrot.slane %v1536_v34, 4  ;;  %v283_v57 = vld [vmem:[%s23338_s9 + $0x234] sm:$0xf] }
 0x19e   : > { %v18592_v44 = vcombine.low %v9598_v28, %v9601_v41  ;;  %v17596_v48 = vcombine.low %v1511_v39, %v1521_v46  ;;  %v1529_v49 = vor.u32 %v1528_v42, %v1525_v10  ;;  %v1544_v50 = vrot.slane %v1542_v43, 5  ;;  %v285_v39 = vld [vmem:[%s23338_s9 + $0x23c] sm:$0xf] }
 0x19f   : > { %v18549_v51 = vrot.slane %v18517_v20, 9  ;;  %v1539_v52 = vor.u32 %v1538_v47, %v1534_v40  ;;  %v9604_v54 = vrot.slane %v22757_v27, 5  ;;  %v9607_v55 = vrot.slane %v22758_v45, 5 }
 0x1a0   : > { %20979 = vmatmul.mubr.msk.bf16.gmra.mrb[40].mxu0 %vm1936_vm4, %v18592_v44  ;;  %v1546_v59 = vshrl.u32 %v280_v25, 16  ;;  %20393 = vmatmul.mubr.msk.bf16.gmra.mrb[104].mxu1 %vm1936_vm4, %v17596_v48  ;;  %v1530_v60 = vrot.slane %v1529_v49, 4  ;;  %v1552_v58 = vshll.u32 %v281_v36, 16  ;;  %v1556_v21 = vshrl.u32 %v281_v36, 16  ;;  %v18518_v25 = vld [vmem:[%s23338_s9 + $0x104] sm:$0xe] }
 0x1a1   : > { %v1562_v0 = vshll.u32 %v326_v38, 16  ;;  %v1540_v26 = vrot.slane %v1539_v52, 4  ;;  %v9605_v56 = vsel %vm23862_vm8, %v18549_v51, %v9604_v54  ;;  %v9606_v62 = vrot.slane %v9604_v54, 4  ;;  %v327_v44 = vld [vmem:[%s23338_s9 + $0x240] sm:$0x1] }
 0x1a2   : > { %v1548_v53 = vrot.slane %v1546_v59, 4  ;;  %v1535_v63 = vsel %vm23356_vm5, %v1530_v60, %v1534_v40  ;;  %v1554_v3 = vrot.slane %v1552_v58, 5  ;;  %v1558_v5 = vrot.slane %v1556_v21, 4  ;;  %v22761_v48 = vld [vmem:[%s23338_s9 + $0x108] sm:$0xf] }
 0x1a3   : > { %v1564_v61 = vrot.slane %v1562_v0, 5  ;;  %v1545_v9 = vsel %vm23356_vm5, %v1540_v26, %v1544_v50  ;;  %v9608_v1 = vsel %vm23862_vm8, %v9606_v62, %v9607_v55  ;;  %v9609_v11 = vrot.slane %v9607_v55, 4  ;;  %v286_v55 = vld [vmem:[%s23338_s9 + $0x244] sm:$0xf] }
 0x1a4   : > { %v1549_v19 = vor.u32 %v1548_v53, %v1544_v50  ;;  %v17597_v8 = vcombine.low %v1535_v63, %v1545_v9  ;;  %v18593_v15 = vcombine.low %v9605_v56, %v9608_v1  ;;  %v1559_v2 = vor.u32 %v1558_v5, %v1554_v3  ;;  %v22762_v50 = vld [vmem:[%s23338_s9 + $0x10c] sm:$0xf]  ;;  %v287_v53 = vld [vmem:[%s23338_s9 + $0x248] sm:$0xf] }
 0x1a5   : > { %v9610_v30 = vrot.slane %v22759_v24, 5  ;;  %v9613_v22 = vrot.slane %v22760_v18, 5  ;;  %v1567_v23 = vshrl.u32 %v282_v6, 16  ;;  %v1570_v17 = vshll.u32 %v282_v6, 16 }
 0x1a6   : > { %v1550_v16 = vrot.slane %v1549_v19, 4  ;;  %20396 = vmatprep.mubr.msk.bf16.mxu1 %vm1936_vm4, %v17597_v8  ;;  %20982 = vmatprep.mubr.msk.bf16.mxu0 %vm1936_vm4, %v18593_v15  ;;  %v1560_v13 = vrot.slane %v1559_v2, 4  ;;  %v1576_v29 = vshll.u32 %v283_v57, 16  ;;  %v1580_v33 = vshrl.u32 %v283_v57, 16  ;;  %v22763_v19 = vld [vmem:[%s23338_s9 + $0x110] sm:$0xf] }
 0x1a7   : > { %v9611_v14 = vsel %vm23862_vm8, %v9609_v11, %v9610_v30  ;;  %v9612_v28 = vrot.slane %v9610_v30, 4  ;;  %v1569_v32 = vrot.slane %v1567_v23, 4  ;;  %v1572_v10 = vrot.slane %v1570_v17, 5  ;;  %v22764_v8 = vld [vmem:[%s23338_s9 + $0x114] sm:$0x1] }
 0x1a8   : > { %v1555_v31 = vsel %vm23356_vm5, %v1550_v16, %v1554_v3  ;;  %v1565_v34 = vsel %vm23356_vm5, %v1560_v13, %v1564_v61  ;;  %v1578_v36 = vrot.slane %v1576_v29, 5  ;;  %v1586_v38 = vshll.u32 %v284_v12, 16  ;;  %v288_v2 = vld [vmem:[%s23338_s9 + $0x24c] sm:$0xf] }
 0x1a9   : > { %v9614_v20 = vsel %vm23862_vm8, %v9612_v28, %v9613_v22  ;;  %v17598_v41 = vcombine.low %v1555_v31, %v1565_v34  ;;  %v1573_v43 = vor.u32 %v1572_v10, %v1569_v32  ;;  %v1582_v46 = vrot.slane %v1580_v33, 4  ;;  %v289_v10 = vld [vmem:[%s23338_s9 + $0x250] sm:$0xf]  ;;  %v328_v33 = vld [vmem:[%s23338_s9 + $0x254] sm:$0x1] }
 0x1aa   : > { %v18594_v42 = vcombine.low %v9611_v14, %v9614_v20  ;;  %v1588_v40 = vrot.slane %v1586_v38, 5  ;;  %v18550_v47 = vrot.slane %v18518_v25, 9  ;;  %v9617_v49 = vrot.slane %v22761_v48, 5  ;;  %v18519_v14 = vld [vmem:[%s23338_s9 + $0x118] sm:$0xe] }
 0x1ab   : > { %v9620_v51 = vrot.slane %v22762_v50, 5  ;;  %20397 = vmatmul.mubr.msk.bf16.gmra.mrb[108].mxu1 %vm1936_vm4, %v17598_v41  ;;  %v1574_v52 = vrot.slane %v1573_v43, 4  ;;  %v1583_v27 = vor.u32 %v1582_v46, %v1578_v36  ;;  %v1590_v54 = vshrl.u32 %v284_v12, 16 }
 0x1ac   : > { %20983 = vmatmul.mubr.msk.bf16.gmra.mrb[44].mxu0 %vm1936_vm4, %v18594_v42  ;;  %v1596_v45 = vshll.u32 %v285_v39, 16  ;;  %v9618_v59 = vsel %vm23862_vm8, %v18550_v47, %v9617_v49  ;;  %v9619_v60 = vrot.slane %v9617_v49, 4  ;;  %v1600_v58 = vshrl.u32 %v285_v39, 16  ;;  %v22766_v47 = vld [vmem:[%s23338_s9 + $0x120] sm:$0xf] }
 0x1ad   : > { %v1606_v21 = vshll.u32 %v327_v44, 16  ;;  %v1579_v0 = vsel %vm23356_vm5, %v1574_v52, %v1578_v36  ;;  %v1584_v26 = vrot.slane %v1583_v27, 4  ;;  %v1592_v56 = vrot.slane %v1590_v54, 4  ;;  %v22765_v44 = vld [vmem:[%s23338_s9 + $0x11c] sm:$0xf] }
 0x1ae   : > { %v1598_v62 = vrot.slane %v1596_v45, 5  ;;  %v9621_v63 = vsel %vm23862_vm8, %v9619_v60, %v9620_v51  ;;  %v1602_v3 = vrot.slane %v1600_v58, 4  ;;  %v9622_v61 = vrot.slane %v9620_v51, 4 }
 0x1af   : > { %v1608_v5 = vrot.slane %v1606_v21, 5  ;;  %v1589_v6 = vsel %vm23356_vm5, %v1584_v26, %v1588_v40  ;;  %v18595_v9 = vcombine.low %v9618_v59, %v9621_v63  ;;  %v1593_v1 = vor.u32 %v1592_v56, %v1588_v40  ;;  %v290_v26 = vld [vmem:[%s23338_s9 + $0x258] sm:$0xf] }
 0x1b0   : > { %v9623_v11 = vrot.slane %v22763_v19, 5  ;;  %v17599_v57 = vcombine.low %v1579_v0, %v1589_v6  ;;  %v1603_v12 = vor.u32 %v1602_v3, %v1598_v62  ;;  %v9626_v15 = vrot.slane %v22764_v8, 5  ;;  %v291_v3 = vld [vmem:[%s23338_s9 + $0x25c] sm:$0xf]  ;;  %v292_v19 = vld [vmem:[%s23338_s9 + $0x260] sm:$0xf] }
 0x1b1   : > { %v1611_v24 = vshrl.u32 %v286_v55, 16  ;;  %20986 = vmatprep.mubr.msk.bf16.mxu0 %vm1936_vm4, %v18595_v9  ;;  %v1594_v30 = vrot.slane %v1593_v1, 4  ;;  %v1614_v22 = vshll.u32 %v286_v55, 16  ;;  %v1620_v25 = vshll.u32 %v287_v53, 16  ;;  %v22767_v9 = vld [vmem:[%s23338_s9 + $0x124] sm:$0xf] }
 0x1b2   : > { %v9624_v16 = vsel %vm23862_vm8, %v9622_v61, %v9623_v11  ;;  %v9625_v18 = vrot.slane %v9623_v11, 4  ;;  %20400 = vmatprep.mubr.msk.bf16.mxu1 %vm1936_vm4, %v17599_v57  ;;  %v1604_v23 = vrot.slane %v1603_v12, 4  ;;  %v1624_v13 = vshrl.u32 %v287_v53, 16  ;;  %v22768_v57 = vld [vmem:[%s23338_s9 + $0x128] sm:$0x1] }
 0x1b3   : > { %v1613_v17 = vrot.slane %v1611_v24, 4  ;;  %v1599_v28 = vsel %vm23356_vm5, %v1594_v30, %v1598_v62  ;;  %v1616_v31 = vrot.slane %v1614_v22, 5  ;;  %v1630_v32 = vshll.u32 %v288_v2, 16  ;;  %v293_v22 = vld [vmem:[%s23338_s9 + $0x264] sm:$0xf] }
 0x1b4   : > { %v9627_v29 = vsel %vm23862_vm8, %v9625_v18, %v9626_v15  ;;  %v1609_v34 = vsel %vm23356_vm5, %v1604_v23, %v1608_v5  ;;  %v1622_v36 = vrot.slane %v1620_v25, 5  ;;  %v1626_v38 = vrot.slane %v1624_v13, 4 }
 0x1b5   : > { %v18596_v20 = vcombine.low %v9624_v16, %v9627_v29  ;;  %v17600_v39 = vcombine.low %v1599_v28, %v1609_v34  ;;  %v1617_v41 = vor.u32 %v1616_v31, %v1613_v17  ;;  %v1632_v42 = vrot.slane %v1630_v32, 5 }
 0x1b6   : > { %v18551_v43 = vrot.slane %v18519_v14, 9  ;;  %v1627_v46 = vor.u32 %v1626_v38, %v1622_v36  ;;  %v9630_v40 = vrot.slane %v22765_v44, 5  ;;  %v9633_v48 = vrot.slane %v22766_v47, 5 }
 0x1b7   : > { %20987 = vmatmul.mubr.msk.bf16.gmra.mrb[48].mxu0 %vm1936_vm4, %v18596_v20  ;;  %v1634_v49 = vshrl.u32 %v288_v2, 16  ;;  %20401 = vmatmul.mubr.msk.bf16.gmra.mrb[112].mxu1 %vm1936_vm4, %v17600_v39  ;;  %v1618_v50 = vrot.slane %v1617_v41, 4  ;;  %v1640_v51 = vshll.u32 %v289_v10, 16  ;;  %v1644_v52 = vshrl.u32 %v289_v10, 16  ;;  %v18520_v2 = vld [vmem:[%s23338_s9 + $0x12c] sm:$0xe] }
 0x1b8   : > { %v1650_v27 = vshll.u32 %v328_v33, 16  ;;  %v1628_v54 = vrot.slane %v1627_v46, 4  ;;  %v9631_v45 = vsel %vm23862_vm8, %v18551_v43, %v9630_v40  ;;  %v9632_v55 = vrot.slane %v9630_v40, 4  ;;  %v329_v20 = vld [vmem:[%s23338_s9 + $0x268] sm:$0x1] }
 0x1b9   : > { %v1636_v59 = vrot.slane %v1634_v49, 4  ;;  %v1623_v60 = vsel %vm23356_vm5, %v1618_v50, %v1622_v36  ;;  %v1642_v58 = vrot.slane %v1640_v51, 5  ;;  %v1646_v21 = vrot.slane %v1644_v52, 4  ;;  %v22769_v39 = vld [vmem:[%s23338_s9 + $0x130] sm:$0xf] }
 0x1ba   : > { %v1652_v0 = vrot.slane %v1650_v27, 5  ;;  %v1633_v56 = vsel %vm23356_vm5, %v1628_v54, %v1632_v42  ;;  %v9634_v62 = vsel %vm23862_vm8, %v9632_v55, %v9633_v48  ;;  %v9635_v63 = vrot.slane %v9633_v48, 4  ;;  %v294_v55 = vld [vmem:[%s23338_s9 + $0x26c] sm:$0xf] }
 0x1bb   : > { %v1637_v53 = vor.u32 %v1636_v59, %v1632_v42  ;;  %v17601_v5 = vcombine.low %v1623_v60, %v1633_v56  ;;  %v18597_v61 = vcombine.low %v9631_v45, %v9634_v62  ;;  %v1647_v6 = vor.u32 %v1646_v21, %v1642_v58  ;;  %v22770_v42 = vld [vmem:[%s23338_s9 + $0x134] sm:$0xf]  ;;  %v22771_v62 = vld [vmem:[%s23338_s9 + $0x138] sm:$0xf] }
 0x1bc   : > { %v9636_v1 = vrot.slane %v22767_v9, 5  ;;  %v9639_v12 = vrot.slane %v22768_v57, 5  ;;  %v1655_v8 = vshrl.u32 %v290_v26, 16  ;;  %v1658_v15 = vshll.u32 %v290_v26, 16  ;;  %v296_v9 = vld [vmem:[%s23338_s9 + $0x274] sm:$0xf] }
 0x1bd   : > { %v1638_v11 = vrot.slane %v1637_v53, 4  ;;  %20404 = vmatprep.mubr.msk.bf16.mxu1 %vm1936_vm4, %v17601_v5  ;;  %20990 = vmatprep.mubr.msk.bf16.mxu0 %vm1936_vm4, %v18597_v61  ;;  %v1648_v24 = vrot.slane %v1647_v6, 4  ;;  %v1664_v18 = vshll.u32 %v291_v3, 16  ;;  %v1668_v13 = vshrl.u32 %v291_v3, 16  ;;  %v22772_v61 = vld [vmem:[%s23338_s9 + $0x13c] sm:$0x1] }
 0x1be   : > { %v9637_v30 = vsel %vm23862_vm8, %v9635_v63, %v9636_v1  ;;  %v9638_v16 = vrot.slane %v9636_v1, 4  ;;  %v1657_v17 = vrot.slane %v1655_v8, 4  ;;  %v1660_v25 = vrot.slane %v1658_v15, 5  ;;  %v295_v63 = vld [vmem:[%s23338_s9 + $0x270] sm:$0xf] }
 0x1bf   : > { %v1643_v23 = vsel %vm23356_vm5, %v1638_v11, %v1642_v58  ;;  %v1653_v14 = vsel %vm23356_vm5, %v1648_v24, %v1652_v0  ;;  %v1666_v29 = vrot.slane %v1664_v18, 5  ;;  %v1674_v31 = vshll.u32 %v292_v19, 16 }
 0x1c0   : > { %v9640_v28 = vsel %vm23862_vm8, %v9638_v16, %v9639_v12  ;;  %v17602_v32 = vcombine.low %v1643_v23, %v1653_v14  ;;  %v1661_v33 = vor.u32 %v1660_v25, %v1657_v17  ;;  %v1670_v34 = vrot.slane %v1668_v13, 4 }
 0x1c1   : > { %v18598_v10 = vcombine.low %v9637_v30, %v9640_v28  ;;  %v1676_v36 = vrot.slane %v1674_v31, 5  ;;  %v18552_v38 = vrot.slane %v18520_v2, 9  ;;  %v9643_v41 = vrot.slane %v22769_v39, 5  ;;  %v18521_v30 = vld [vmem:[%s23338_s9 + $0x140] sm:$0xe] }
 0x1c2   : > { %v9646_v43 = vrot.slane %v22770_v42, 5  ;;  %20405 = vmatmul.mubr.msk.bf16.gmra.mrb[116].mxu1 %vm1936_vm4, %v17602_v32  ;;  %v1662_v46 = vrot.slane %v1661_v33, 4  ;;  %v1671_v44 = vor.u32 %v1670_v34, %v1666_v29  ;;  %v1678_v40 = vshrl.u32 %v292_v19, 16  ;;  %v297_v28 = vld [vmem:[%s23338_s9 + $0x278] sm:$0xf] }
 0x1c3   : > { %20991 = vmatmul.mubr.msk.bf16.gmra.mrb[52].mxu0 %vm1936_vm4, %v18598_v10  ;;  %v1684_v47 = vshll.u32 %v293_v22, 16  ;;  %v9644_v48 = vsel %vm23862_vm8, %v18552_v38, %v9643_v41  ;;  %v9645_v49 = vrot.slane %v9643_v41, 4  ;;  %v1688_v50 = vshrl.u32 %v293_v22, 16  ;;  %v22774_v38 = vld [vmem:[%s23338_s9 + $0x148] sm:$0xf] }
 0x1c4   : > { %v1694_v51 = vshll.u32 %v329_v20, 16  ;;  %v1667_v52 = vsel %vm23356_vm5, %v1662_v46, %v1666_v29  ;;  %v1672_v27 = vrot.slane %v1671_v44, 4  ;;  %v1680_v54 = vrot.slane %v1678_v40, 4  ;;  %v330_v29 = vld [vmem:[%s23338_s9 + $0x27c] sm:$0x1] }
 0x1c5   : > { %v1686_v45 = vrot.slane %v1684_v47, 5  ;;  %v9647_v59 = vsel %vm23862_vm8, %v9645_v49, %v9646_v43  ;;  %v1690_v60 = vrot.slane %v1688_v50, 4  ;;  %v9648_v21 = vrot.slane %v9646_v43, 4  ;;  %v22773_v20 = vld [vmem:[%s23338_s9 + $0x144] sm:$0xf] }
 0x1c6   : > { %v1696_v58 = vrot.slane %v1694_v51, 5  ;;  %v1677_v0 = vsel %vm23356_vm5, %v1672_v27, %v1676_v36  ;;  %v18599_v26 = vcombine.low %v9644_v48, %v9647_v59  ;;  %v1681_v56 = vor.u32 %v1680_v54, %v1676_v36  ;;  %v17831_v54 = vld [vmem:[%s29403_s1 + $0x4] sm:$0x3] }
 0x1c7   : > { %v9649_v53 = vrot.slane %v22771_v62, 5  ;;  %v17603_v3 = vcombine.low %v1667_v52, %v1677_v0  ;;  %v1691_v5 = vor.u32 %v1690_v60, %v1686_v45  ;;  %v9652_v6 = vrot.slane %v22772_v61, 5 }
 0x1c8   : > { %v1699_v1 = vshrl.u32 %v294_v55, 16  ;;  %20994 = vmatprep.mubr.msk.bf16.mxu0 %vm1936_vm4, %v18599_v26  ;;  %v1682_v19 = vrot.slane %v1681_v56, 4  ;;  %v1702_v12 = vshll.u32 %v294_v55, 16  ;;  %v1708_v2 = vshll.u32 %v295_v63, 16  ;;  %v22775_v56 = vld [vmem:[%s23338_s9 + $0x14c] sm:$0xf] }
 0x1c9   : > { %v9650_v11 = vsel %vm23862_vm8, %v9648_v21, %v9649_v53  ;;  %v9651_v57 = vrot.slane %v9649_v53, 4  ;;  %20408 = vmatprep.mubr.msk.bf16.mxu1 %vm1936_vm4, %v17603_v3  ;;  %v1692_v8 = vrot.slane %v1691_v5, 4  ;;  %v1712_v24 = vshrl.u32 %v295_v63, 16  ;;  %v18298_v53 = vld [vmem:[%s23338_s9 + $0x158] sm:$0xf] }
 0x1ca   : > { %v1701_v15 = vrot.slane %v1699_v1, 4  ;;  %v1687_v16 = vsel %vm23356_vm5, %v1682_v19, %v1686_v45  ;;  %v1704_v22 = vrot.slane %v1702_v12, 5  ;;  %v1718_v23 = vshll.u32 %v296_v9, 16  ;;  %v18299_v63 = vld [vmem:[%s23338_s9 + $0x15c] sm:$0xf] }
 0x1cb   : > { %v9653_v18 = vsel %vm23862_vm8, %v9651_v57, %v9652_v6  ;;  %v1697_v17 = vsel %vm23356_vm5, %v1692_v8, %v1696_v58  ;;  %v1710_v13 = vrot.slane %v1708_v2, 5  ;;  %v1714_v14 = vrot.slane %v1712_v24, 4  ;;  %v18522_v58 = vld [vmem:[%s23338_s9 + $0x154] sm:$0xe]  ;;  %v22776_v5 = vld [vmem:[%s23338_s9 + $0x150] sm:$0x1] }
 0x1cc   : > { %v18600_v25 = vcombine.low %v9650_v11, %v9653_v18  ;;  %v17604_v31 = vcombine.low %v1687_v16, %v1697_v17  ;;  %v1705_v32 = vor.u32 %v1704_v22, %v1701_v15  ;;  %v1720_v10 = vrot.slane %v1718_v23, 5  ;;  %v22777_v24 = vld [vmem:[%s23338_s9] sm:$0xf]  ;;  %v18301_v22 = vld [vmem:[%s23338_s9 + $0x164] sm:$0x1] }
 0x1cd   : > { %v18553_v33 = vrot.slane %v18521_v30, 9  ;;  %v1715_v34 = vor.u32 %v1714_v14, %v1710_v13  ;;  %v9656_v36 = vrot.slane %v22773_v20, 5  ;;  %v9659_v39 = vrot.slane %v22774_v38, 5  ;;  %v22778_v30 = vld [vmem:[%s23338_s9 + $0x4] sm:$0xf] }
 0x1ce   : > { %20995 = vmatmul.mubr.msk.bf16.gmra.mrb[56].mxu0 %vm1936_vm4, %v18600_v25  ;;  %v1722_v41 = vshrl.u32 %v296_v9, 16  ;;  %20409 = vmatmul.mubr.msk.bf16.gmra.mrb[120].mxu1 %vm1936_vm4, %v17604_v31  ;;  %v1706_v42 = vrot.slane %v1705_v32, 4  ;;  %v1728_v43 = vshll.u32 %v297_v28, 16  ;;  %v1732_v46 = vshrl.u32 %v297_v28, 16  ;;  %v18300_v18 = vld [vmem:[%s23338_s9 + $0x160] sm:$0xf] }
 0x1cf   : > { %v1738_v44 = vshll.u32 %v330_v29, 16  ;;  %v1716_v40 = vrot.slane %v1715_v34, 4  ;;  %v9657_v47 = vsel %vm23862_vm8, %v18553_v33, %v9656_v36  ;;  %v9658_v48 = vrot.slane %v9656_v36, 4  ;;  %v18303_v14 = vld [vmem:[%s23338_s9 + $0x16c] sm:$0xf] }
 0x1d0   : > { %v1724_v49 = vrot.slane %v1722_v41, 4  ;;  %v1711_v50 = vsel %vm23356_vm5, %v1706_v42, %v1710_v13  ;;  %v1730_v51 = vrot.slane %v1728_v43, 5  ;;  %v1734_v52 = vrot.slane %v1732_v46, 4  ;;  %v18523_v28 = vld [vmem:[%s23338_s9 + $0x168] sm:$0xe] }
 0x1d1   : > { %v1740_v27 = vrot.slane %v1738_v44, 5  ;;  %v1721_v45 = vsel %vm23356_vm5, %v1716_v40, %v1720_v10  ;;  %v9660_v55 = vsel %vm23862_vm8, %v9658_v48, %v9659_v39  ;;  %v9661_v60 = vrot.slane %v9659_v39, 4  ;;  %v18304_v31 = vld [vmem:[%s23338_s9 + $0x170] sm:$0xf]  ;;  %v18305_v34 = vld [vmem:[%s23338_s9 + $0x174] sm:$0xf] }
 0x1d2   : > { %v1725_v59 = vor.u32 %v1724_v49, %v1720_v10  ;;  %v17605_v21 = vcombine.low %v1711_v50, %v1721_v45  ;;  %v18601_v0 = vcombine.low %v9657_v47, %v9660_v55  ;;  %v1735_v26 = vor.u32 %v1734_v52, %v1730_v51  ;;  %v18306_v43 = vld [vmem:[%s23338_s9 + $0x178] sm:$0x1]  ;;  %v18308_v46 = vld [vmem:[%s23338_s9 + $0x180] sm:$0xf]  ;;  %v18309_v48 = vld [vmem:[%s23338_s9 + $0x184] sm:$0xf] }
 0x1d3   : > { %v9662_v62 = vrot.slane %v22775_v56, 5  ;;  %v9665_v61 = vrot.slane %v22776_v5, 5  ;;  %v24352_v6 = vand.u32 %v17831_v54, %v23314_v4  ;;  %v18554_v11 = vrot.slane %v18522_v58, 9  ;;  %v18524_v49 = vld [vmem:[%s23338_s9 + $0x17c] sm:$0xe] }
 0x1d4   : > { %v1726_v3 = vrot.slane %v1725_v59, 4  ;;  %20412 = vmatprep.mubr.msk.bf16.mxu1 %vm1936_vm4, %v17605_v21  ;;  %20998 = vmatprep.mubr.msk.bf16.mxu0 %vm1936_vm4, %v18601_v0  ;;  %v1736_v9 = vrot.slane %v1735_v26, 4  ;;  %v9669_v12 = vrot.slane %v18298_v53, 5  ;;  %v9672_v8 = vrot.slane %v18299_v63, 5  ;;  %v24390_v50 = vld [vmem:[%s23338_s9 + $0x8] sm:$0xf] }
 0x1d5   : > { %v9663_v1 = vsel %vm23862_vm8, %v9661_v60, %v9662_v62  ;;  %v9664_v19 = vrot.slane %v9662_v62, 4  ;;  %20546 = vmatprep.subr.bf16.mxu1 %v24352_v6  ;;  %v17671_v16 = vcombine.low %v22777_v24, %v22778_v30  ;;  %v9675_v10 = vrot.slane %v18300_v18, 5  ;;  %v22781_v54 = vld [vmem:[%s23338_s9 + $0x14] sm:$0xf]  ;;  %v24401_v45 = vld [vmem:[%s23338_s9 + $0x18] sm:$0xf] }
 0x1d6   : > { %v1731_v57 = vsel %vm23356_vm5, %v1726_v3, %v1730_v51  ;;  %v1741_v15 = vsel %vm23356_vm5, %v1736_v9, %v1740_v27  ;;  %v9670_v25 = vsel %vm23862_vm8, %v18554_v11, %v9669_v12  ;;  %v9671_v13 = vrot.slane %v9669_v12, 4  ;;  %v24393_v51 = vld [vmem:[%s23338_s9 + $0xc] sm:$0xf]  ;;  %v18310_v63 = vld [vmem:[%s23338_s9 + $0x188] sm:$0xf] }
 0x1d7   : > { %v9666_v2 = vsel %vm23862_vm8, %v9664_v19, %v9665_v61  ;;  %v17606_v23 = vcombine.low %v1731_v57, %v1741_v15  ;;  %v9674_v29 = vrot.slane %v9672_v8, 4  ;;  %v9678_v33 = vrot.slane %v18301_v22, 5  ;;  %v18313_v3 = vld [vmem:[%s23338_s9 + $0x194] sm:$0xf]  ;;  %v18314_v12 = vld [vmem:[%s23338_s9 + $0x198] sm:$0xf] }
 0x1d8   : > { %v18602_v17 = vcombine.low %v9663_v1, %v9666_v2  ;;  %v9673_v32 = vsel %vm23862_vm8, %v9671_v13, %v9672_v8  ;;  %v18555_v36 = vrot.slane %v18523_v28, 9  ;;  %v9682_v38 = vrot.slane %v18303_v14, 5  ;;  %v18525_v8 = vld [vmem:[%s23338_s9 + $0x190] sm:$0xe]  ;;  %v24425_v15 = vld [vmem:[%s23338_s9 + $0x1c] sm:$0xf] }
 0x1d9   : > { %20413 = vmatmul.mubr.msk.bf16.gmra.mrb[124].mxu1 %vm1936_vm4, %v17606_v23  ;;  %v18603_v20 = vcombine.low %v9670_v25, %v9673_v32  ;;  %v9676_v39 = vsel %vm23862_vm8, %v9674_v29, %v9675_v10  ;;  %v9677_v41 = vrot.slane %v9675_v10, 4  ;;  %v9685_v42 = vrot.slane %v18304_v31, 5  ;;  %v24428_v2 = vld [vmem:[%s23338_s9 + $0x20] sm:$0xf]  ;;  %v24434_v18 = vld [vmem:[%s23338_s9 + $0x2c] sm:$0xf] }
 0x1da   : > { %20999 = vmatmul.mubr.msk.bf16.gmra.mrb[60].mxu0 %vm1936_vm4, %v18602_v17  ;;  %20418 = vmatprep.mubr.msk.bf16.mxu1 %vm1936_vm4, %v17671_v16  ;;  %v9683_v44 = vsel %vm23862_vm8, %v18555_v36, %v9682_v38  ;;  %v9684_v40 = vrot.slane %v9682_v38, 4  ;;  %v9688_v47 = vrot.slane %v18305_v34, 5  ;;  %v17672_v52 = vcombine.low %v24390_v50, %v24393_v51  ;;  %v22785_v16 = vld [vmem:[%s23338_s9 + $0x28] sm:$0xf]  ;;  %v18315_v31 = vld [vmem:[%s23338_s9 + $0x19c] sm:$0xf] }
 0x1db   : > { %21002 = vmatprep.mubr.msk.bf16.mxu0 %vm1936_vm4, %v18603_v20  ;;  %v9679_v27 = vsel %vm23862_vm8, %v9677_v41, %v9678_v33  ;;  %v17673_v55 = vcombine.low %v22781_v54, %v24401_v45  ;;  %v9687_v59 = vrot.slane %v9685_v42, 4  ;;  %v9691_v0 = vrot.slane %v18306_v43, 5  ;;  %v18318_v32 = vld [vmem:[%s23338_s9 + $0x1a8] sm:$0xf]  ;;  %v18316_v38 = vld [vmem:[%s23338_s9 + $0x1a0] sm:$0x1] }
 0x1dc   : > { %v18604_v60 = vcombine.low %v9676_v39, %v9679_v27  ;;  %v9686_v58 = vsel %vm23862_vm8, %v9684_v40, %v9685_v42  ;;  %v9690_v21 = vrot.slane %v9688_v47, 4  ;;  %v18556_v56 = vrot.slane %v18524_v49, 9  ;;  %v18319_v41 = vld [vmem:[%s23338_s9 + $0x1ac] sm:$0xf]  ;;  %v18526_v42 = vld [vmem:[%s23338_s9 + $0x1a4] sm:$0xe] }
 0x1dd   : > { %v18605_v26 = vcombine.low %v9683_v44, %v9686_v58  ;;  %v9695_v62 = vrot.slane %v18308_v46, 5  ;;  %v9698_v53 = vrot.slane %v18309_v48, 5  ;;  %v9689_v61 = vsel %vm23862_vm8, %v9687_v59, %v9688_v47  ;;  %v24455_v43 = vld [vmem:[%s23338_s9 + $0x30] sm:$0xf]  ;;  %v24458_v46 = vld [vmem:[%s23338_s9 + $0x34] sm:$0xf] }
 0x1de   : > { %v9692_v9 = vsel %vm23862_vm8, %v9690_v21, %v9691_v0  ;;  %v9701_v1 = vrot.slane %v18310_v63, 5  ;;  %v9708_v57 = vrot.slane %v18313_v3, 5  ;;  %v17674_v24 = vcombine.low %v24425_v15, %v24428_v2  ;;  %v22789_v47 = vld [vmem:[%s23338_s9 + $0x3c] sm:$0xf]  ;;  %v24464_v48 = vld [vmem:[%s23338_s9 + $0x40] sm:$0xf] }
 0x1df   : > { %v9697_v5 = vrot.slane %v9695_v62, 4  ;;  %v9696_v19 = vsel %vm23862_vm8, %v18556_v56, %v9695_v62  ;;  %v18606_v30 = vcombine.low %v9689_v61, %v9692_v9  ;;  %v17675_v22 = vcombine.low %v22785_v16, %v24434_v18  ;;  %v18320_v21 = vld [vmem:[%s23338_s9 + $0x1b0] sm:$0xf]  ;;  %v18323_v0 = vld [vmem:[%s23338_s9 + $0x1bc] sm:$0xf] }
 0x1e0   : > { %v9700_v17 = vrot.slane %v9698_v53, 4  ;;  %v9703_v25 = vrot.slane %v9701_v1, 4  ;;  %v18557_v14 = vrot.slane %v18525_v8, 9  ;;  %v9710_v28 = vrot.slane %v9708_v57, 4  ;;  %v18321_v3 = vld [vmem:[%s23338_s9 + $0x1b4] sm:$0x1] }
 0x1e1   : > { %20419 = vmatmul.mubr.msk.bf16.vlgmr.msra.gmra.mrb[0].mxu1 %vm1936_vm4, %v17672_v52  ;;  %v9699_v11 = vsel %vm23862_vm8, %v9697_v5, %v9698_v53  ;;  %v9711_v29 = vrot.slane %v18314_v12, 5  ;;  %v9714_v34 = vrot.slane %v18315_v31, 5  ;;  %v9721_v39 = vrot.slane %v18318_v32, 5  ;;  %v18324_v61 = vld [vmem:[%s23338_s9 + $0x1c0] sm:$0xf] }
 0x1e2   : > { %21003 = vmatmul.mubr.msk.bf16.gmra.mrb[64].mxu0 %vm1936_vm4, %v18604_v60  ;;  %20547 = vmatpush3.bf16.msra.mxu1 %v24352_v6  ;;  %v18311_v6 = vld [vmem:[%s23338_s9 + $0x18c] sm:$0x1]  ;;  %v18607_v23 = vcombine.low %v9696_v19, %v9699_v11  ;;  %v9702_v10 = vsel %vm23862_vm8, %v9700_v17, %v9701_v1  ;;  %v9709_v20 = vsel %vm23862_vm8, %v18557_v14, %v9708_v57  ;;  %v18558_v59 = vrot.slane %v18526_v42, 9  ;;  %v18527_v9 = vld [vmem:[%s23338_s9 + $0x1b8] sm:$0xe] }
 0x1e3   : > { %20422 = vmatprep.mubr.msk.bf16.mxu1 %vm1936_vm4, %v17673_v55  ;;  %21006 = vmatprep.mubr.msk.bf16.mxu0 %vm1936_vm4, %v18605_v26  ;;  %v9704_v13 = vrot.slane %v18311_v6, 5  ;;  %v9712_v36 = vsel %vm23862_vm8, %v9710_v28, %v9711_v29  ;;  %v17676_v44 = vcombine.low %v24455_v43, %v24458_v46  ;;  %v17677_v49 = vcombine.low %v22789_v47, %v24464_v48  ;;  %v24485_v1 = vld [vmem:[%s23338_s9 + $0x44] sm:$0xf]  ;;  %v24488_v19 = vld [vmem:[%s23338_s9 + $0x48] sm:$0xf] }
 0x1e4   : > { %v18609_v52 = vcombine.low %v9709_v20, %v9712_v36  ;;  %v9713_v27 = vrot.slane %v9711_v29, 4  ;;  %v9716_v54 = vrot.slane %v9714_v34, 4  ;;  %v9717_v55 = vrot.slane %v18316_v38, 5  ;;  %v22793_v57 = vld [vmem:[%s23338_s9 + $0x50] sm:$0xf] }
 0x1e5   : > { %v9705_v33 = vsel %vm23862_vm8, %v9703_v25, %v9704_v13  ;;  %v9723_v60 = vrot.slane %v9721_v39, 4  ;;  %v9724_v58 = vrot.slane %v18319_v41, 5  ;;  %v9727_v62 = vrot.slane %v18320_v21, 5  ;;  %v24494_v12 = vld [vmem:[%s23338_s9 + $0x54] sm:$0xf] }
 0x1e6   : > { %v18608_v40 = vcombine.low %v9702_v10, %v9705_v33  ;;  %v9715_v26 = vsel %vm23862_vm8, %v9713_v27, %v9714_v34  ;;  %v9718_v56 = vsel %vm23862_vm8, %v9716_v54, %v9717_v55  ;;  %v9722_v53 = vsel %vm23862_vm8, %v18558_v59, %v9721_v39  ;;  %v18325_v13 = vld [vmem:[%s23338_s9 + $0x1c4] sm:$0xf]  ;;  %v18328_v14 = vld [vmem:[%s23338_s9 + $0x1d0] sm:$0xf]  ;;  %v18326_v33 = vld [vmem:[%s23338_s9 + $0x1c8] sm:$0x1] }
 0x1e7   : > { %v9725_v63 = vsel %vm23862_vm8, %v9723_v60, %v9724_v58  ;;  %v9734_v5 = vrot.slane %v18323_v0, 5  ;;  %v17678_v11 = vcombine.low %v24485_v1, %v24488_v19  ;;  %v18610_v6 = vcombine.low %v9715_v26, %v9718_v56  ;;  %v18329_v20 = vld [vmem:[%s23338_s9 + $0x1d4] sm:$0xf]  ;;  %v18528_v36 = vld [vmem:[%s23338_s9 + $0x1cc] sm:$0xe] }
 0x1e8   : > { %v17679_v8 = vcombine.low %v22793_v57, %v24494_v12  ;;  %v9729_v16 = vrot.slane %v9727_v62, 4  ;;  %v9737_v25 = vrot.slane %v18324_v61, 5  ;;  %v9740_v31 = vrot.slane %v18325_v13, 5  ;;  %v24515_v38 = vld [vmem:[%s23338_s9 + $0x58] sm:$0xf] }
 0x1e9   : > { %20423 = vmatmul.mubr.msk.bf16.gmra.mrb[4].mxu1 %vm1936_vm4, %v17674_v24  ;;  %v18611_v24 = vcombine.low %v9722_v53, %v9725_v63  ;;  %v9736_v17 = vrot.slane %v9734_v5, 4  ;;  %v9747_v34 = vrot.slane %v18328_v14, 5  ;;  %v24518_v39 = vld [vmem:[%s23338_s9 + $0x5c] sm:$0xf]  ;;  %v9743_v54 = vrot.slane %v18326_v33, 5 }
 0x1ea   : > { %21007 = vmatmul.mubr.msk.bf16.gmra.mrb[68].mxu0 %vm1936_vm4, %v18606_v30  ;;  %20426 = vmatprep.mubr.msk.bf16.mxu1 %vm1936_vm4, %v17675_v22  ;;  %v9726_v30 = vrot.slane %v9724_v58, 4  ;;  %v9730_v22 = vrot.slane %v18321_v3, 5  ;;  %v17680_v41 = vcombine.low %v24515_v38, %v24518_v39  ;;  %v9742_v27 = vrot.slane %v9740_v31, 4  ;;  %v18330_v58 = vld [vmem:[%s23338_s9 + $0x1d8] sm:$0xf] }
 0x1eb   : > { %21010 = vmatprep.mubr.msk.bf16.mxu0 %vm1936_vm4, %v18607_v23  ;;  %v18559_v23 = vrot.slane %v18527_v9, 9  ;;  %v9738_v10 = vsel %vm23862_vm8, %v9736_v17, %v9737_v25  ;;  %v18560_v55 = vrot.slane %v18528_v36, 9  ;;  %v9749_v59 = vrot.slane %v9747_v34, 4  ;;  %v18333_v21 = vld [vmem:[%s23338_s9 + $0x1e4] sm:$0xf] }
 0x1ec   : > { %v9728_v28 = vsel %vm23862_vm8, %v9726_v30, %v9727_v62  ;;  %v9731_v29 = vsel %vm23862_vm8, %v9729_v16, %v9730_v22  ;;  %v9750_v60 = vrot.slane %v18329_v20, 5  ;;  %v9744_v26 = vsel %vm23862_vm8, %v9742_v27, %v9743_v54  ;;  %v18331_v63 = vld [vmem:[%s23338_s9 + $0x1dc] sm:$0x1]  ;;  %v18529_v61 = vld [vmem:[%s23338_s9 + $0x1e0] sm:$0xe] }
 0x1ed   : > { %v9735_v32 = vsel %vm23862_vm8, %v18559_v23, %v9734_v5  ;;  %v18612_v42 = vcombine.low %v9728_v28, %v9731_v29  ;;  %v9753_v56 = vrot.slane %v18330_v58, 5  ;;  %v9748_v62 = vsel %vm23862_vm8, %v18560_v55, %v9747_v34  ;;  %v18334_v5 = vld [vmem:[%s23338_s9 + $0x1e8] sm:$0xf]  ;;  %v24545_v9 = vld [vmem:[%s23338_s9 + $0x6c] sm:$0xf] }
 0x1ee   : > { %v9751_v53 = vsel %vm23862_vm8, %v9749_v59, %v9750_v60  ;;  %v9760_v3 = vrot.slane %v18333_v21, 5  ;;  %v9752_v22 = vrot.slane %v9750_v60, 4  ;;  %v9756_v17 = vrot.slane %v18331_v63, 5  ;;  %v18335_v28 = vld [vmem:[%s23338_s9 + $0x1ec] sm:$0xf] }
 0x1ef   : > { %v18615_v16 = vcombine.low %v9748_v62, %v9751_v53  ;;  %v9755_v23 = vrot.slane %v9753_v56, 4  ;;  %v9763_v14 = vrot.slane %v18334_v5, 5  ;;  %v18338_v29 = vld [vmem:[%s23338_s9 + $0x1f8] sm:$0xf]  ;;  %v18336_v20 = vld [vmem:[%s23338_s9 + $0x1f0] sm:$0x1] }
 0x1f0   : > { %v9762_v13 = vrot.slane %v9760_v3, 4  ;;  %v9773_v36 = vrot.slane %v18338_v29, 5  ;;  %v22805_v27 = vld [vmem:[%s23338_s9 + $0x8c] sm:$0xf]  ;;  %v24584_v54 = vld [vmem:[%s23338_s9 + $0x90] sm:$0xf] }
 0x1f1   : > { %20427 = vmatmul.mubr.msk.bf16.gmra.mrb[8].mxu1 %vm1936_vm4, %v17676_v44  ;;  %v22797_v44 = vld [vmem:[%s23338_s9 + $0x64] sm:$0xf]  ;;  %v17685_v55 = vcombine.low %v22805_v27, %v24584_v54  ;;  %v9765_v60 = vrot.slane %v9763_v14, 4  ;;  %v9769_v21 = vrot.slane %v18336_v20, 5  ;;  %v18340_v62 = vld [vmem:[%s23338_s9 + $0x200] sm:$0xf] }
 0x1f2   : > { %21011 = vmatmul.mubr.msk.bf16.gmra.mrb[72].mxu0 %vm1936_vm4, %v18608_v40  ;;  %20430 = vmatprep.mubr.msk.bf16.mxu1 %vm1936_vm4, %v17677_v49  ;;  %v24524_v40 = vld [vmem:[%s23338_s9 + $0x68] sm:$0xf]  ;;  %v18613_v49 = vcombine.low %v9735_v32, %v9738_v10  ;;  %v9757_v32 = vsel %vm23862_vm8, %v9755_v23, %v9756_v17  ;;  %v9766_v10 = vrot.slane %v18335_v28, 5  ;;  %v9764_v34 = vsel %vm23862_vm8, %v9762_v13, %v9763_v14  ;;  %v18343_v53 = vld [vmem:[%s23338_s9 + $0x20c] sm:$0xf] }
 0x1f3   : > { %21014 = vmatprep.mubr.msk.bf16.mxu0 %vm1936_vm4, %v18609_v52  ;;  %v17681_v47 = vcombine.low %v22797_v44, %v24524_v40  ;;  %v9739_v52 = vrot.slane %v9737_v25, 4  ;;  %v18561_v25 = vrot.slane %v18529_v61, 9  ;;  %v24575_v44 = vld [vmem:[%s23338_s9 + $0x80] sm:$0xf]  ;;  %v18341_v5 = vld [vmem:[%s23338_s9 + $0x204] sm:$0x1] }
 0x1f4   : > { %v9768_v58 = vrot.slane %v9766_v10, 4  ;;  %v9767_v63 = vsel %vm23862_vm8, %v9765_v60, %v9766_v10  ;;  %v9779_v61 = vrot.slane %v18340_v62, 5  ;;  %v24608_v23 = vld [vmem:[%s23338_s9 + $0x94] sm:$0xf]  ;;  %v24611_v17 = vld [vmem:[%s23338_s9 + $0x98] sm:$0xf] }
 0x1f5   : > { %v9741_v0 = vsel %vm23862_vm8, %v9739_v52, %v9740_v31  ;;  %v9754_v31 = vsel %vm23862_vm8, %v9752_v22, %v9753_v56  ;;  %v9761_v33 = vsel %vm23862_vm8, %v18561_v25, %v9760_v3  ;;  %v18531_v22 = vld [vmem:[%s23338_s9 + $0x208] sm:$0xe]  ;;  %v17686_v25 = vcombine.low %v24608_v23, %v24611_v17  ;;  %v22809_v14 = vld [vmem:[%s23338_s9 + $0xa0] sm:$0xf]  ;;  %v24617_v28 = vld [vmem:[%s23338_s9 + $0xa4] sm:$0xf] }
 0x1f6   : > { %v18614_v57 = vcombine.low %v9741_v0, %v9744_v26  ;;  %v18616_v52 = vcombine.low %v9754_v31, %v9757_v32  ;;  %v18617_v59 = vcombine.low %v9761_v33, %v9764_v34  ;;  %v9775_v26 = vrot.slane %v9773_v36, 4  ;;  %v24645_v62 = vld [vmem:[%s23338_s9 + $0xac] sm:$0xf] }
 0x1f7   : > { %v9770_v3 = vsel %vm23862_vm8, %v9768_v58, %v9769_v21  ;;  %v17687_v29 = vcombine.low %v22809_v14, %v24617_v28  ;;  %v9782_v31 = vrot.slane %v18341_v5, 5  ;;  %v9781_v33 = vrot.slane %v9779_v61, 4  ;;  %v18346_v58 = vld [vmem:[%s23338_s9 + $0x218] sm:$0x1]  ;;  %v18353_v14 = vld [vmem:[%s23338_s9 + $0x234] sm:$0xf] }
 0x1f8   : > { %v18618_v13 = vcombine.low %v9767_v63, %v9770_v3  ;;  %v18563_v20 = vrot.slane %v18531_v22, 9  ;;  %v22813_v3 = vld [vmem:[%s23338_s9 + $0xb4] sm:$0xf]  ;;  %v24651_v5 = vld [vmem:[%s23338_s9 + $0xb8] sm:$0xf] }
 0x1f9   : > { %20431 = vmatmul.mubr.msk.bf16.gmra.mrb[12].mxu1 %vm1936_vm4, %v17678_v11  ;;  %v24548_v11 = vld [vmem:[%s23338_s9 + $0x70] sm:$0xf]  ;;  %v9783_v27 = vsel %vm23862_vm8, %v9781_v33, %v9782_v31 }
 0x1fa   : > { %21015 = vmatmul.mubr.msk.bf16.gmra.mrb[76].mxu0 %vm1936_vm4, %v18610_v6  ;;  %20434 = vmatprep.mubr.msk.bf16.mxu1 %vm1936_vm4, %v17679_v8  ;;  %v17682_v6 = vcombine.low %v24545_v9, %v24548_v11  ;;  %v22801_v8 = vld [vmem:[%s23338_s9 + $0x78] sm:$0xf] }
 0x1fb   : > { %21018 = vmatprep.mubr.msk.bf16.mxu0 %vm1936_vm4, %v18611_v24  ;;  %v24554_v24 = vld [vmem:[%s23338_s9 + $0x7c] sm:$0xf] }
 0x1fc   : > { %v17683_v30 = vcombine.low %v22801_v8, %v24554_v24  ;;  %v9786_v8 = vrot.slane %v18343_v53, 5 }
 0x201   : > { %20435 = vmatmul.mubr.msk.bf16.gmra.mrb[16].mxu1 %vm1936_vm4, %v17680_v41  ;;  %v18339_v41 = vld [vmem:[%s23338_s9 + $0x1fc] sm:$0xf] }
 0x202   : > { %21019 = vmatmul.mubr.msk.bf16.gmra.mrb[80].mxu0 %vm1936_vm4, %v18612_v42  ;;  %20438 = vmatprep.mubr.msk.bf16.mxu1 %vm1936_vm4, %v17681_v47  ;;  %v18530_v42 = vld [vmem:[%s23338_s9 + $0x1f4] sm:$0xe]  ;;  %v24578_v47 = vld [vmem:[%s23338_s9 + $0x84] sm:$0xf]  ;;  %v9776_v56 = vrot.slane %v18339_v41, 5 }
 0x203   : > { %21022 = vmatprep.mubr.msk.bf16.mxu0 %vm1936_vm4, %v18613_v49  ;;  %v17684_v49 = vcombine.low %v24575_v44, %v24578_v47  ;;  %v18562_v0 = vrot.slane %v18530_v42, 9  ;;  %v18345_v42 = vld [vmem:[%s23338_s9 + $0x214] sm:$0xf] }
 0x204   : > { %v9778_v10 = vrot.slane %v9776_v56, 4 }
 0x209   : > { %20439 = vmatmul.mubr.msk.bf16.gmra.mrb[20].mxu1 %vm1936_vm4, %v17682_v6  ;;  %v9774_v6 = vsel %vm23862_vm8, %v18562_v0, %v9773_v36  ;;  %v9788_v36 = vrot.slane %v9786_v8, 4  ;;  %v18349_v0 = vld [vmem:[%s23338_s9 + $0x224] sm:$0xf] }
 0x20a   : > { %21023 = vmatmul.mubr.msk.bf16.gmra.mrb[84].mxu0 %vm1936_vm4, %v18614_v57  ;;  %20442 = vmatprep.mubr.msk.bf16.mxu1 %vm1936_vm4, %v17683_v30  ;;  %v9777_v57 = vsel %vm23862_vm8, %v9775_v26, %v9776_v56  ;;  %v19116_v30 = vld [vmem:[%s29403_s1 + $0xe] sm:$0x3]  ;;  %v18532_v26 = vld [vmem:[%s23338_s9 + $0x21c] sm:$0xe]  ;;  %v24642_v56 = vld [vmem:[%s23338_s9 + $0xa8] sm:$0xf] }
 0x20b   : > { %21026 = vmatprep.mubr.msk.bf16.mxu0 %vm1936_vm4, %v18615_v16  ;;  %v18344_v16 = vld [vmem:[%s23338_s9 + $0x210] sm:$0xf]  ;;  %v18619_v32 = vcombine.low %v9774_v6, %v9777_v57  ;;  %v24621_v34 = vand.u32 %v19116_v30, %v23314_v4  ;;  %v17688_v53 = vcombine.low %v24642_v56, %v24645_v62  ;;  %v9795_v30 = vrot.slane %v18346_v58, 5 }
 0x20c   : > { %v9789_v41 = vrot.slane %v18344_v16, 5  ;;  %v18564_v16 = vrot.slane %v18532_v26, 9 }
 0x20d   : > { %21196 = vmatprep.subr.bf16.mxu0 %v24621_v34 }
 0x20e   : > { %v9790_v60 = vsel %vm23862_vm8, %v9788_v36, %v9789_v41  ;;  %v9791_v57 = vrot.slane %v9789_v41, 4  ;;  %v9812_v36 = vrot.slane %v18353_v14, 5  ;;  %v18354_v41 = vld [vmem:[%s23338_s9 + $0x238] sm:$0xf] }
 0x211   : > { %20443 = vmatmul.mubr.msk.bf16.gmra.mrb[24].mxu1 %vm1936_vm4, %v17684_v49  ;;  %v18348_v49 = vld [vmem:[%s23338_s9 + $0x220] sm:$0xf] }
 0x212   : > { %21027 = vmatmul.mubr.msk.bf16.gmra.mrb[88].mxu0 %vm1936_vm4, %v18616_v52  ;;  %20446 = vmatprep.mubr.msk.bf16.mxu1 %vm1936_vm4, %v17685_v55  ;;  %v9780_v52 = vsel %vm23862_vm8, %v9778_v10, %v9779_v61  ;;  %v9792_v55 = vrot.slane %v18345_v42, 5  ;;  %v9799_v21 = vrot.slane %v18348_v49, 5  ;;  %v17689_v61 = vcombine.low %v22813_v3, %v24651_v5  ;;  %v18533_v42 = vld [vmem:[%s23338_s9 + $0x230] sm:$0xe]  ;;  %v24672_v49 = vld [vmem:[%s23338_s9 + $0xbc] sm:$0xf] }
 0x213   : > { %21030 = vmatprep.mubr.msk.bf16.mxu0 %vm1936_vm4, %v18617_v59  ;;  %v9787_v59 = vsel %vm23862_vm8, %v18563_v20, %v9786_v8  ;;  %v18620_v63 = vcombine.low %v9780_v52, %v9783_v27  ;;  %v18351_v20 = vld [vmem:[%s23338_s9 + $0x22c] sm:$0x1]  ;;  %v24675_v52 = vld [vmem:[%s23338_s9 + $0xc0] sm:$0xf]  ;;  %v9814_v3 = vrot.slane %v9812_v36, 4 }
 0x214   : > { %v18621_v6 = vcombine.low %v9787_v59, %v9790_v60  ;;  %v9794_v8 = vrot.slane %v9792_v55, 4  ;;  %v9801_v22 = vrot.slane %v9799_v21, 4  ;;  %v9800_v10 = vsel %vm23862_vm8, %v18564_v16, %v9799_v21  ;;  %v22817_v59 = vld [vmem:[%s23338_s9 + $0xc8] sm:$0xf]  ;;  %v24681_v60 = vld [vmem:[%s23338_s9 + $0xcc] sm:$0xf] }
 0x215   : > { %v17690_v27 = vcombine.low %v24672_v49, %v24675_v52  ;;  %v17691_v58 = vcombine.low %v22817_v59, %v24681_v60 }
 0x216   : > { %v9796_v31 = vsel %vm23862_vm8, %v9794_v8, %v9795_v30 }
 0x219   : > { %20447 = vmatmul.mubr.msk.bf16.gmra.mrb[28].mxu1 %vm1936_vm4, %v17686_v25  ;;  %v9802_v25 = vrot.slane %v18349_v0, 5 }
 0x21a   : > { %21031 = vmatmul.mubr.msk.bf16.gmra.mrb[92].mxu0 %vm1936_vm4, %v18618_v13  ;;  %20450 = vmatprep.mubr.msk.bf16.mxu1 %vm1936_vm4, %v17687_v29  ;;  %v18350_v13 = vld [vmem:[%s23338_s9 + $0x228] sm:$0xf]  ;;  %v9793_v29 = vsel %vm23862_vm8, %v9791_v57, %v9792_v55 }
 0x21b   : > { %21034 = vmatprep.mubr.msk.bf16.mxu0 %vm1936_vm4, %v18619_v32  ;;  %v9805_v32 = vrot.slane %v18350_v13, 5  ;;  %v9803_v33 = vsel %vm23862_vm8, %v9801_v22, %v9802_v25  ;;  %v18622_v55 = vcombine.low %v9793_v29, %v9796_v31  ;;  %v9804_v0 = vrot.slane %v9802_v25, 4  ;;  %v18358_v57 = vld [vmem:[%s23338_s9 + $0x248] sm:$0xf]  ;;  %v18356_v13 = vld [vmem:[%s23338_s9 + $0x240] sm:$0x1] }
 0x21c   : > { %v18623_v21 = vcombine.low %v9800_v10, %v9803_v33  ;;  %v9825_v14 = vrot.slane %v18358_v57, 5  ;;  %v18359_v29 = vld [vmem:[%s23338_s9 + $0x24c] sm:$0xf]  ;;  %v18534_v31 = vld [vmem:[%s23338_s9 + $0x244] sm:$0xe] }
 0x21d   : > { %v9807_v26 = vrot.slane %v9805_v32, 4  ;;  %v9806_v8 = vsel %vm23862_vm8, %v9804_v0, %v9805_v32  ;;  %v24702_v10 = vld [vmem:[%s23338_s9 + $0xd0] sm:$0xf]  ;;  %v24705_v33 = vld [vmem:[%s23338_s9 + $0xd4] sm:$0xf] }
 0x21e   : > { %v17692_v32 = vcombine.low %v24702_v10, %v24705_v33  ;;  %v9827_v0 = vrot.slane %v9825_v14, 4 }
 0x221   : > { %20451 = vmatmul.mubr.msk.bf16.gmra.mrb[32].mxu1 %vm1936_vm4, %v17688_v53  ;;  %v9808_v53 = vrot.slane %v18351_v20, 5 }
 0x222   : > { %21035 = vmatmul.mubr.msk.bf16.gmra.mrb[96].mxu0 %vm1936_vm4, %v18620_v63  ;;  %20454 = vmatprep.mubr.msk.bf16.mxu1 %vm1936_vm4, %v17689_v61  ;;  %v18565_v63 = vrot.slane %v18533_v42, 9  ;;  %v9815_v61 = vrot.slane %v18354_v41, 5  ;;  %v22821_v41 = vld [vmem:[%s23338_s9 + $0xdc] sm:$0xf]  ;;  %v24711_v42 = vld [vmem:[%s23338_s9 + $0xe0] sm:$0xf] }
 0x223   : > { %21038 = vmatprep.mubr.msk.bf16.mxu0 %vm1936_vm4, %v18621_v6  ;;  %v18355_v6 = vld [vmem:[%s23338_s9 + $0x23c] sm:$0xf]  ;;  %v9809_v30 = vsel %vm23862_vm8, %v9807_v26, %v9808_v53  ;;  %v9828_v26 = vrot.slane %v18359_v29, 5  ;;  %v18360_v53 = vld [vmem:[%s23338_s9 + $0x250] sm:$0xf] }
 0x224   : > { %v9818_v16 = vrot.slane %v18355_v6, 5  ;;  %v9813_v22 = vsel %vm23862_vm8, %v18565_v63, %v9812_v36  ;;  %v9816_v25 = vsel %vm23862_vm8, %v9814_v3, %v9815_v61  ;;  %v18624_v20 = vcombine.low %v9806_v8, %v9809_v30  ;;  %v18363_v63 = vld [vmem:[%s23338_s9 + $0x25c] sm:$0xf]  ;;  %v18361_v30 = vld [vmem:[%s23338_s9 + $0x254] sm:$0x1] }
 0x225   : > { %v17693_v36 = vcombine.low %v22821_v41, %v24711_v42  ;;  %v9831_v6 = vrot.slane %v18360_v53, 5  ;;  %v9829_v8 = vsel %vm23862_vm8, %v9827_v0, %v9828_v26  ;;  %v24732_v29 = vld [vmem:[%s23338_s9 + $0xe4] sm:$0xf]  ;;  %v24741_v41 = vld [vmem:[%s23338_s9 + $0xf4] sm:$0xf] }
 0x226   : > { %v9820_v59 = vrot.slane %v9818_v16, 4  ;;  %29464 = vst [vmem:[#allocation7_spill] sm:$0xff] %v24741_v41  ;;  %v18365_v53 = vld [vmem:[%s23338_s9 + $0x264] sm:$0xf] }
 0x229   : > { %20455 = vmatmul.mubr.msk.bf16.gmra.mrb[36].mxu1 %vm1936_vm4, %v17690_v27  ;;  %v18625_v27 = vcombine.low %v9813_v22, %v9816_v25  ;;  %v9838_v22 = vrot.slane %v18363_v63, 5  ;;  %v18364_v25 = vld [vmem:[%s23338_s9 + $0x260] sm:$0xf]  ;;  %v18368_v63 = vld [vmem:[%s23338_s9 + $0x270] sm:$0xf] }
 0x22a   : > { %21039 = vmatmul.mubr.msk.bf16.gmra.mrb[100].mxu0 %vm1936_vm4, %v18622_v55  ;;  %20458 = vmatprep.mubr.msk.bf16.mxu1 %vm1936_vm4, %v17691_v58  ;;  %v9817_v55 = vrot.slane %v9815_v61, 4  ;;  %v9821_v58 = vrot.slane %v18356_v13, 5  ;;  %v18535_v13 = vld [vmem:[%s23338_s9 + $0x258] sm:$0xe]  ;;  %v9841_v0 = vrot.slane %v18364_v25, 5  ;;  %v9851_v25 = vrot.slane %v18368_v63, 5 }
 0x22b   : > { %21042 = vmatprep.mubr.msk.bf16.mxu0 %vm1936_vm4, %v18623_v21  ;;  %v18566_v21 = vrot.slane %v18534_v31, 9  ;;  %v24735_v31 = vld [vmem:[%s23338_s9 + $0xe8] sm:$0xf] }
 0x22c   : > { %v9819_v3 = vsel %vm23862_vm8, %v9817_v55, %v9818_v16  ;;  %v9822_v61 = vsel %vm23862_vm8, %v9820_v59, %v9821_v58  ;;  %v17694_v16 = vcombine.low %v24732_v29, %v24735_v31  ;;  %v9833_v55 = vrot.slane %v9831_v6, 4 }
 0x22d   : > { %v9826_v57 = vsel %vm23862_vm8, %v18566_v21, %v9825_v14  ;;  %v9834_v59 = vrot.slane %v18361_v30, 5  ;;  %v18567_v58 = vrot.slane %v18535_v13, 9  ;;  %v9840_v21 = vrot.slane %v9838_v22, 4  ;;  %v18366_v30 = vld [vmem:[%s23338_s9 + $0x268] sm:$0x1] }
 0x22e   : > { %v18369_v13 = vld [vmem:[%s23338_s9 + $0x274] sm:$0xf]  ;;  %v9853_v63 = vrot.slane %v9851_v25, 4 }
 0x22f   : > { %v9854_v35 = vrot.slane %v18369_v13, 5 }
 0x231   : > { %20459 = vmatmul.mubr.msk.bf16.gmra.mrb[40].mxu1 %vm1936_vm4, %v17692_v32  ;;  %v18626_v32 = vcombine.low %v9819_v3, %v9822_v61  ;;  %v9835_v3 = vsel %vm23862_vm8, %v9833_v55, %v9834_v59  ;;  %v9844_v61 = vrot.slane %v18365_v53, 5  ;;  %v9843_v59 = vrot.slane %v9841_v0, 4 }
 0x232   : > { %21043 = vmatmul.mubr.msk.bf16.gmra.mrb[104].mxu0 %vm1936_vm4, %v18624_v20  ;;  %20462 = vmatprep.mubr.msk.bf16.mxu1 %vm1936_vm4, %v17693_v36  ;;  %v22825_v20 = vld [vmem:[%s23338_s9 + $0xf0] sm:$0xf]  ;;  %v18627_v36 = vcombine.low %v9826_v57, %v9829_v8  ;;  %v9839_v57 = vsel %vm23862_vm8, %v18567_v58, %v9838_v22  ;;  %v9842_v8 = vsel %vm23862_vm8, %v9840_v21, %v9841_v0  ;;  %v9847_v21 = vrot.slane %v18366_v30, 5  ;;  %v18371_v30 = vld [vmem:[%s23338_s9 + $0x27c] sm:$0x1] }
 0x233   : > { %21046 = vmatprep.mubr.msk.bf16.mxu0 %vm1936_vm4, %v18625_v27  ;;  %v17695_v14 = vcombine.low %v22825_v20, %v24741_v41  ;;  %v9830_v27 = vrot.slane %v9828_v26, 4  ;;  %v24765_v20 = vld [vmem:[%s23338_s9 + $0xfc] sm:$0xf]  ;;  %v18629_v55 = vcombine.low %v9839_v57, %v9842_v8  ;;  %v9846_v58 = vrot.slane %v9844_v61, 4  ;;  %v18370_v41 = vld [vmem:[%s23338_s9 + $0x278] sm:$0xf] }
 0x234   : > { %29466 = vst [vmem:[#allocation9_spill] sm:$0xff] %v24765_v20  ;;  %v9845_v0 = vsel %vm23862_vm8, %v9843_v59, %v9844_v61  ;;  %v9855_v8 = vsel %vm23862_vm8, %v9853_v63, %v9854_v35 }
 0x235   : > { %v9832_v26 = vsel %vm23862_vm8, %v9830_v27, %v9831_v6  ;;  %v24771_v27 = vld [vmem:[%s23338_s9 + $0x108] sm:$0xf] }
 0x236   : > { %29467 = vst [vmem:[#allocation10_spill] sm:$0xff] %v24771_v27 }
 0x239   : > { %20463 = vmatmul.mubr.msk.bf16.gmra.mrb[44].mxu1 %vm1936_vm4, %v17694_v16  ;;  %v18536_v16 = vld [vmem:[%s23338_s9 + $0x26c] sm:$0xe] }
 0x23a   : > { %21047 = vmatmul.mubr.msk.bf16.gmra.mrb[108].mxu0 %vm1936_vm4, %v18626_v32  ;;  %20466 = vmatprep.mubr.msk.bf16.mxu1 %vm1936_vm4, %v17695_v14  ;;  %v24762_v32 = vld [vmem:[%s23338_s9 + $0xf8] sm:$0xf]  ;;  %v18628_v14 = vcombine.low %v9832_v26, %v9835_v3  ;;  %v18568_v53 = vrot.slane %v18536_v16, 9  ;;  %v9848_v26 = vsel %vm23862_vm8, %v9846_v58, %v9847_v21  ;;  %v9857_v3 = vrot.slane %v18370_v41, 5  ;;  %v18374_v16 = vld [vmem:[%s23338_s9 + $0x288] sm:$0xf] }
 0x23b   : > { %21050 = vmatprep.mubr.msk.bf16.mxu0 %vm1936_vm4, %v18627_v36  ;;  %29465 = vst [vmem:[#allocation8_spill] sm:$0xff] %v24762_v32  ;;  %v17696_v6 = vcombine.low %v24762_v32, %v24765_v20  ;;  %v22829_v36 = vld [vmem:[%s23338_s9 + $0x104] sm:$0xf]  ;;  %v22833_v41 = vld [vmem:[%s23338_s9 + $0x118] sm:$0xf]  ;;  %v9856_v58 = vrot.slane %v9854_v35, 4 }
 0x23c   : > { %v17697_v22 = vcombine.low %v22829_v36, %v24771_v27  ;;  %v18373_v20 = vld [vmem:[%s23338_s9 + $0x284] sm:$0xf]  ;;  %v9852_v57 = vsel %vm23862_vm8, %v18568_v53, %v9851_v25  ;;  %v24795_v36 = vld [vmem:[%s23338_s9 + $0x110] sm:$0xf]  ;;  %v9860_v21 = vrot.slane %v18371_v30, 5  ;;  %v9867_v27 = vrot.slane %v18374_v16, 5 }
 0x23d   : > { %v9864_v13 = vrot.slane %v18373_v20, 5  ;;  %v18631_v59 = vcombine.low %v9852_v57, %v9855_v8  ;;  %v9859_v20 = vrot.slane %v9857_v3, 4  ;;  %v18375_v32 = vld [vmem:[%s23338_s9 + $0x28c] sm:$0xf]  ;;  %v9858_v35 = vsel %vm23862_vm8, %v9856_v58, %v9857_v3  ;;  %v18376_v30 = vld [vmem:[%s23338_s9 + $0x290] sm:$0x1] }
 0x23e   : > { %v24819_v16 = vld [vmem:[%s23338_s9 + $0x120] sm:$0xf]  ;;  %v9873_v58 = vrot.slane %v18376_v30, 5  ;;  %v18088_v30 = vld [vmem:[%s29403_s1 + $0x6] sm:$0x3] }
 0x23f   : > { %v9866_v63 = vrot.slane %v9864_v13, 4  ;;  %29468 = vst [vmem:[#allocation11_spill] sm:$0xff] %v24819_v16 }
 0x241   : > { %20467 = vmatmul.mubr.msk.bf16.gmra.mrb[48].mxu1 %vm1936_vm4, %v17696_v6  ;;  %v18537_v6 = vld [vmem:[%s23338_s9 + $0x280] sm:$0xe]  ;;  %v9868_v8 = vsel %vm23862_vm8, %v9866_v63, %v9867_v27 }
 0x242   : > { %21051 = vmatmul.mubr.msk.bf16.gmra.mrb[112].mxu0 %vm1936_vm4, %v18628_v14  ;;  %20470 = vmatprep.mubr.msk.bf16.mxu1 %vm1936_vm4, %v17697_v22  ;;  %v24792_v14 = vld [vmem:[%s23338_s9 + $0x10c] sm:$0xf]  ;;  %v18630_v22 = vcombine.low %v9845_v0, %v9848_v26  ;;  %v18569_v53 = vrot.slane %v18537_v6, 9  ;;  %v9861_v0 = vsel %vm23862_vm8, %v9859_v20, %v9860_v21  ;;  %v9870_v26 = vrot.slane %v18375_v32, 5  ;;  %v24822_v6 = vld [vmem:[%s23338_s9 + $0x124] sm:$0xf] }
 0x243   : > { %21054 = vmatprep.mubr.msk.bf16.mxu0 %vm1936_vm4, %v18629_v55  ;;  %v17698_v61 = vcombine.low %v24792_v14, %v24795_v36  ;;  %v24801_v55 = vld [vmem:[%s23338_s9 + $0x11c] sm:$0xf]  ;;  %29469 = vst [vmem:[#allocation12_spill] sm:$0xff] %v24822_v6  ;;  %v18632_v3 = vcombine.low %v9858_v35, %v9861_v0  ;;  %v22841_v0 = vld [vmem:[%s23338_s9 + $0x140] sm:$0xf] }
 0x244   : > { %v17699_v25 = vcombine.low %v22833_v41, %v24801_v55  ;;  %v9865_v57 = vsel %vm23862_vm8, %v18569_v53, %v9864_v13  ;;  %v24828_v41 = vld [vmem:[%s23338_s9 + $0x130] sm:$0xf]  ;;  %v24843_v53 = vld [vmem:[%s23338_s9 + $0x138] sm:$0xf] }
 0x245   : > { %29470 = vst [vmem:[#allocation13_spill] sm:$0xff] %v24828_v41  ;;  %v18633_v13 = vcombine.low %v9865_v57, %v9868_v8  ;;  %29472 = vst [vmem:[#allocation15_spill] sm:$0xff] %v24843_v53  ;;  %v24849_v57 = vld [vmem:[%s23338_s9 + $0x144] sm:$0xf]  ;;  %v22558_v8 = vld [vmem:[%s23338_s9 + $0x28] sm:$0xff]  }
 0x246   : > { %29473 = vst [vmem:[#allocation16_spill] sm:$0xff] %v24849_v57 }
 0x249   : > { %20471 = vmatmul.mubr.msk.bf16.gmra.mrb[52].mxu1 %vm1936_vm4, %v17698_v61  ;;  %v17700_v61 = vcombine.low %v24819_v16, %v24822_v6  ;;  %v22621_v6 = vld [vmem:[%s23338_s9 + $0x168] sm:$0xff]  }
 0x24a   : > { %21055 = vmatmul.mubr.msk.bf16.gmra.mrb[116].mxu0 %vm1936_vm4, %v18630_v22  ;;  %20474 = vmatprep.mubr.msk.bf16.mxu1 %vm1936_vm4, %v17699_v25  ;;  %v22837_v22 = vld [vmem:[%s23338_s9 + $0x12c] sm:$0xf]  ;;  %v9869_v25 = vrot.slane %v9867_v27, 4  ;;  %v24840_v27 = vld [vmem:[%s23338_s9 + $0x134] sm:$0xf] }
 0x24b   : > { %21058 = vmatprep.mubr.msk.bf16.mxu0 %vm1936_vm4, %v18631_v59  ;;  %v17701_v32 = vcombine.low %v22837_v22, %v24828_v41  ;;  %v9872_v59 = vrot.slane %v9870_v26, 4  ;;  %29471 = vst [vmem:[#allocation14_spill] sm:$0xff] %v24840_v27  ;;  %v17702_v63 = vcombine.low %v24840_v27, %v24843_v53  ;;  %v24867_v22 = vld [vmem:[%s23338_s9 + $0x14c] sm:$0xf]  ;;  %v22907_v27 = vld [vmem:[%s23338_s9 + $0x24] sm:$0x1] }
 0x24c   : > { %v9871_v20 = vsel %vm23862_vm8, %v9869_v25, %v9870_v26  ;;  %v17703_v26 = vcombine.low %v22841_v0, %v24849_v57  ;;  %29475 = vst [vmem:[#allocation18_spill] sm:$0xff] %v24867_v22  ;;  %v22845_v25 = vld [vmem:[%s23338_s9 + $0x154] sm:$0xf]  ;;  %v22564_v0 = vld [vmem:[%s23338_s9 + $0x44] sm:$0xff]  }
 0x24d   : > { %v9874_v21 = vsel %vm23862_vm8, %v9872_v59, %v9873_v58  ;;  %v24875_v59 = vld [vmem:[%s23338_s9 + $0x158] sm:$0xf]  ;;  %v3743_v16 = vld [vmem:[%s23338_s9 + $0x28] sm:$0xe] }
 0x24e   : > { %v18634_v35 = vcombine.low %v9871_v20, %v9874_v21  ;;  %29476 = vst [vmem:[#allocation19_spill] sm:$0xff] %v24875_v59  ;;  %v17705_v58 = vcombine.low %v22845_v25, %v24875_v59  ;;  %v22562_v20 = vld [vmem:[%s23338_s9 + $0x3c] sm:$0xff]   ;;  %v22902_v59 = vld [vmem:[%s23338_s9 + $0x26c] sm:$0xf] }
 0x24f   : > { %v24885_v21 = vld [vmem:[%s23338_s9 + $0x15c] sm:$0xf] }
 0x250   : > { %29477 = vst [vmem:[#allocation20_spill] sm:$0xff] %v24885_v21 }
 0x251   : > { %20475 = vmatmul.mubr.msk.bf16.gmra.mrb[56].mxu1 %vm1936_vm4, %v17700_v61  ;;  %v24861_v61 = vand.u32 %v18088_v30, %v23314_v4  ;;  %v22566_v30 = vld [vmem:[%s23338_s9 + $0x50] sm:$0xff]  }
 0x252   : > { %21059 = vmatmul.mubr.msk.bf16.gmra.mrb[120].mxu0 %vm1936_vm4, %v18632_v3  ;;  %20478 = vmatprep.mubr.msk.bf16.mxu1 %vm1936_vm4, %v17701_v32  ;;  %v24864_v3 = vld [vmem:[%s23338_s9 + $0x148] sm:$0xf] }
 0x253   : > { %21062 = vmatprep.mubr.msk.bf16.mxu0 %vm1936_vm4, %v18633_v13  ;;  %29474 = vst [vmem:[#allocation17_spill] sm:$0xff] %v24864_v3  ;;  %v17704_v32 = vcombine.low %v24864_v3, %v24867_v22  ;;  %v22560_v13 = vld [vmem:[%s23338_s9 + $0x30] sm:$0xff]   ;;  %20676 = vmatprep.subr.bf16.mxu1 %v24861_v61 }
 0x254   : > { %v22618_v22 = vld [vmem:[%s23338_s9 + $0x154] sm:$0xff]  }
 0x259   : > { %20479 = vmatmul.mubr.msk.bf16.gmra.mrb[60].mxu1 %vm1936_vm4, %v17702_v63  ;;  %v24888_v63 = vld [vmem:[%s23338_s9 + $0x160] sm:$0xf] }
 0x25a   : > { %21063 = vmatmul.mubr.msk.bf16.gmra.mrb[124].mxu0 %vm1936_vm4, %v18634_v35  ;;  %20482 = vmatprep.mubr.msk.bf16.mxu1 %vm1936_vm4, %v17703_v26  ;;  %29478 = vst [vmem:[#allocation21_spill] sm:$0xff] %v24888_v63  ;;  %v17706_v35 = vcombine.low %v24885_v21, %v24888_v63  ;;  %v22849_v26 = vld [vmem:[%s23338_s9 + $0x168] sm:$0xf] }
 0x25b   : > { %21068 = vmatprep.mubr.msk.bf16.mxu0 %vm1936_vm4, %v22558_v8  ;;  %v24895_v8 = vld [vmem:[%s23338_s9 + $0x16c] sm:$0xf] }
 0x25c   : > { %29479 = vst [vmem:[#allocation22_spill] sm:$0xff] %v24895_v8  ;;  %v22616_v21 = vld [vmem:[%s23338_s9 + $0x148] sm:$0xff]  }
 0x261   : > { %20483 = vmatmul.mubr.msk.bf16.gmra.mrb[64].mxu1 %vm1936_vm4, %v17704_v32  ;;  %v24904_v32 = vld [vmem:[%s23338_s9 + $0x170] sm:$0xf] }
 0x262   : > { %21069 = vmatmul.mubr.msk.bf16.vlgmr.msra.gmra.mrb[0].mxu0 %vm1936_vm4, %v22560_v13  ;;  %20486 = vmatprep.mubr.msk.bf16.mxu1 %vm1936_vm4, %v17705_v58  ;;  %29480 = vst [vmem:[#allocation23_spill] sm:$0xff] %v24904_v32  ;;  %v22852_v13 = vld [vmem:[%s23338_s9 + $0x174] sm:$0xf]  ;;  %v22568_v58 = vld [vmem:[%s23338_s9 + $0x58] sm:$0xff]  }
 0x263   : > { %21197 = vmatpush3.bf16.msra.mxu0 %v24621_v34  ;;  %21072 = vmatprep.mubr.msk.bf16.mxu0 %vm1936_vm4, %v22562_v20  ;;  %v17707_v34 = vcombine.low %v22849_v26, %v24895_v8  ;;  %v17708_v25 = vcombine.low %v24904_v32, %v22852_v13  ;;  %v22853_v20 = vld [vmem:[%s23338_s9 + $0x17c] sm:$0xf]  ;;  %v22570_v8 = vld [vmem:[%s23338_s9 + $0x64] sm:$0xff]   ;;  %v22572_v13 = vld [vmem:[%s23338_s9 + $0x6c] sm:$0xff]  }
 0x269   : > { %20487 = vmatmul.mubr.msk.bf16.gmra.mrb[68].mxu1 %vm1936_vm4, %v17706_v35  ;;  %v22854_v35 = vld [vmem:[%s23338_s9 + $0x180] sm:$0xf] }
 0x26a   : > { %21073 = vmatmul.mubr.msk.bf16.gmra.mrb[4].mxu0 %vm1936_vm4, %v22564_v0  ;;  %20490 = vmatprep.mubr.msk.bf16.mxu1 %vm1936_vm4, %v17707_v34  ;;  %v17709_v26 = vcombine.low %v22853_v20, %v22854_v35  ;;  %v22855_v0 = vld [vmem:[%s23338_s9 + $0x184] sm:$0xf]  ;;  %v22856_v34 = vld [vmem:[%s23338_s9 + $0x188] sm:$0xf]  ;;  %v22857_v20 = vld [vmem:[%s23338_s9 + $0x190] sm:$0xf] }
 0x26b   : > { %21076 = vmatprep.mubr.msk.bf16.mxu0 %vm1936_vm4, %v22566_v30  ;;  %v17710_v30 = vcombine.low %v22855_v0, %v22856_v34  ;;  %v22858_v35 = vld [vmem:[%s23338_s9 + $0x194] sm:$0xf]  ;;  %v22576_v0 = vld [vmem:[%s23338_s9 + $0x80] sm:$0xff]  }
 0x26c   : > { %v17711_v32 = vcombine.low %v22857_v20, %v22858_v35  ;;  %v22861_v34 = vld [vmem:[%s23338_s9 + $0x1a4] sm:$0xf]  ;;  %v22862_v20 = vld [vmem:[%s23338_s9 + $0x1a8] sm:$0xf] }
 0x26d   : > { %v17713_v35 = vcombine.low %v22861_v34, %v22862_v20  ;;  %v22866_v34 = vld [vmem:[%s23338_s9 + $0x1bc] sm:$0xf] }
 0x271   : > { %20491 = vmatmul.mubr.msk.bf16.gmra.mrb[72].mxu1 %vm1936_vm4, %v17708_v25  ;;  %v22574_v25 = vld [vmem:[%s23338_s9 + $0x78] sm:$0xff]  }
 0x272   : > { %21077 = vmatmul.mubr.msk.bf16.gmra.mrb[8].mxu0 %vm1936_vm4, %v22568_v58  ;;  %20494 = vmatprep.mubr.msk.bf16.mxu1 %vm1936_vm4, %v17709_v26  ;;  %v22860_v58 = vld [vmem:[%s23338_s9 + $0x19c] sm:$0xf] }
 0x273   : > { %21080 = vmatprep.mubr.msk.bf16.mxu0 %vm1936_vm4, %v22570_v8  ;;  %v22859_v8 = vld [vmem:[%s23338_s9 + $0x198] sm:$0xf] }
 0x274   : > { %v17712_v26 = vcombine.low %v22859_v8, %v22860_v58  ;;  %v22580_v8 = vld [vmem:[%s23338_s9 + $0x94] sm:$0xff]  }
 0x275   : > { %v22865_v58 = vld [vmem:[%s23338_s9 + $0x1b8] sm:$0xf] }
 0x276   : > { %v17715_v20 = vcombine.low %v22865_v58, %v22866_v34  ;;  %v22870_v58 = vld [vmem:[%s23338_s9 + $0x1d0] sm:$0xf] }
 0x279   : > { %20495 = vmatmul.mubr.msk.bf16.gmra.mrb[76].mxu1 %vm1936_vm4, %v17710_v30  ;;  %v22578_v30 = vld [vmem:[%s23338_s9 + $0x8c] sm:$0xff]  }
 0x27a   : > { %21081 = vmatmul.mubr.msk.bf16.gmra.mrb[12].mxu0 %vm1936_vm4, %v22572_v13  ;;  %20498 = vmatprep.mubr.msk.bf16.mxu1 %vm1936_vm4, %v17711_v32  ;;  %v22863_v32 = vld [vmem:[%s23338_s9 + $0x1ac] sm:$0xf]  ;;  %v22864_v13 = vld [vmem:[%s23338_s9 + $0x1b0] sm:$0xf] }
 0x27b   : > { %21084 = vmatprep.mubr.msk.bf16.mxu0 %vm1936_vm4, %v22574_v25  ;;  %v17714_v25 = vcombine.low %v22863_v32, %v22864_v13  ;;  %v22584_v32 = vld [vmem:[%s23338_s9 + $0xa8] sm:$0xff]  }
 0x27c   : > { %v22869_v13 = vld [vmem:[%s23338_s9 + $0x1cc] sm:$0xf] }
 0x27d   : > { %v17717_v34 = vcombine.low %v22869_v13, %v22870_v58  ;;  %v22874_v13 = vld [vmem:[%s23338_s9 + $0x1e4] sm:$0xf] }
 0x281   : > { %20499 = vmatmul.mubr.msk.bf16.gmra.mrb[80].mxu1 %vm1936_vm4, %v17712_v26  ;;  %v22582_v26 = vld [vmem:[%s23338_s9 + $0xa0] sm:$0xff]  }
 0x282   : > { %21085 = vmatmul.mubr.msk.bf16.gmra.mrb[16].mxu0 %vm1936_vm4, %v22576_v0  ;;  %20502 = vmatprep.mubr.msk.bf16.mxu1 %vm1936_vm4, %v17713_v35  ;;  %v22867_v0 = vld [vmem:[%s23338_s9 + $0x1c0] sm:$0xf]  ;;  %v22868_v35 = vld [vmem:[%s23338_s9 + $0x1c4] sm:$0xf] }
 0x283   : > { %21088 = vmatprep.mubr.msk.bf16.mxu0 %vm1936_vm4, %v22578_v30  ;;  %v17716_v30 = vcombine.low %v22867_v0, %v22868_v35  ;;  %v22588_v0 = vld [vmem:[%s23338_s9 + $0xbc] sm:$0xff]  }
 0x284   : > { %v22873_v35 = vld [vmem:[%s23338_s9 + $0x1e0] sm:$0xf] }
 0x285   : > { %v17719_v58 = vcombine.low %v22873_v35, %v22874_v13  ;;  %v22878_v35 = vld [vmem:[%s23338_s9 + $0x1f8] sm:$0xf] }
 0x289   : > { %20503 = vmatmul.mubr.msk.bf16.gmra.mrb[84].mxu1 %vm1936_vm4, %v17714_v25  ;;  %v22586_v25 = vld [vmem:[%s23338_s9 + $0xb4] sm:$0xff]  }
 0x28a   : > { %21089 = vmatmul.mubr.msk.bf16.gmra.mrb[20].mxu0 %vm1936_vm4, %v22580_v8  ;;  %20506 = vmatprep.mubr.msk.bf16.mxu1 %vm1936_vm4, %v17715_v20  ;;  %v22871_v8 = vld [vmem:[%s23338_s9 + $0x1d4] sm:$0xf]  ;;  %v22872_v20 = vld [vmem:[%s23338_s9 + $0x1d8] sm:$0xf] }
 0x28b   : > { %21092 = vmatprep.mubr.msk.bf16.mxu0 %vm1936_vm4, %v22582_v26  ;;  %v17718_v26 = vcombine.low %v22871_v8, %v22872_v20  ;;  %v22592_v8 = vld [vmem:[%s23338_s9 + $0xd0] sm:$0xff]  }
 0x28c   : > { %v22877_v20 = vld [vmem:[%s23338_s9 + $0x1f4] sm:$0xf] }
 0x28d   : > { %v17721_v13 = vcombine.low %v22877_v20, %v22878_v35  ;;  %v22882_v20 = vld [vmem:[%s23338_s9 + $0x20c] sm:$0xf] }
 0x291   : > { %20507 = vmatmul.mubr.msk.bf16.gmra.mrb[88].mxu1 %vm1936_vm4, %v17716_v30  ;;  %v22590_v30 = vld [vmem:[%s23338_s9 + $0xc8] sm:$0xff]  }
 0x292   : > { %21093 = vmatmul.mubr.msk.bf16.gmra.mrb[24].mxu0 %vm1936_vm4, %v22584_v32  ;;  %20510 = vmatprep.mubr.msk.bf16.mxu1 %vm1936_vm4, %v17717_v34  ;;  %v22875_v32 = vld [vmem:[%s23338_s9 + $0x1e8] sm:$0xf]  ;;  %v22876_v34 = vld [vmem:[%s23338_s9 + $0x1ec] sm:$0xf] }
 0x293   : > { %21096 = vmatprep.mubr.msk.bf16.mxu0 %vm1936_vm4, %v22586_v25  ;;  %v17720_v25 = vcombine.low %v22875_v32, %v22876_v34  ;;  %v22596_v32 = vld [vmem:[%s23338_s9 + $0xe4] sm:$0xff]  }
 0x294   : > { %v22881_v34 = vld [vmem:[%s23338_s9 + $0x208] sm:$0xf] }
 0x295   : > { %v17723_v35 = vcombine.low %v22881_v34, %v22882_v20  ;;  %v22886_v34 = vld [vmem:[%s23338_s9 + $0x220] sm:$0xf] }
 0x299   : > { %20511 = vmatmul.mubr.msk.bf16.gmra.mrb[92].mxu1 %vm1936_vm4, %v17718_v26  ;;  %v22594_v26 = vld [vmem:[%s23338_s9 + $0xdc] sm:$0xff]  }
 0x29a   : > { %21097 = vmatmul.mubr.msk.bf16.gmra.mrb[28].mxu0 %vm1936_vm4, %v22588_v0  ;;  %20514 = vmatprep.mubr.msk.bf16.mxu1 %vm1936_vm4, %v17719_v58  ;;  %v22879_v0 = vld [vmem:[%s23338_s9 + $0x1fc] sm:$0xf]  ;;  %v22880_v58 = vld [vmem:[%s23338_s9 + $0x200] sm:$0xf] }
 0x29b   : > { %21100 = vmatprep.mubr.msk.bf16.mxu0 %vm1936_vm4, %v22590_v30  ;;  %v17722_v30 = vcombine.low %v22879_v0, %v22880_v58  ;;  %v22600_v0 = vld [vmem:[%s23338_s9 + $0xf8] sm:$0xff]  }
 0x29c   : > { %v22885_v58 = vld [vmem:[%s23338_s9 + $0x21c] sm:$0xf] }
 0x29d   : > { %v17725_v20 = vcombine.low %v22885_v58, %v22886_v34  ;;  %v22890_v58 = vld [vmem:[%s23338_s9 + $0x234] sm:$0xf] }
 0x2a1   : > { %20515 = vmatmul.mubr.msk.bf16.gmra.mrb[96].mxu1 %vm1936_vm4, %v17720_v25  ;;  %v22598_v25 = vld [vmem:[%s23338_s9 + $0xf0] sm:$0xff]  }
 0x2a2   : > { %21101 = vmatmul.mubr.msk.bf16.gmra.mrb[32].mxu0 %vm1936_vm4, %v22592_v8  ;;  %20518 = vmatprep.mubr.msk.bf16.mxu1 %vm1936_vm4, %v17721_v13  ;;  %v22883_v8 = vld [vmem:[%s23338_s9 + $0x210] sm:$0xf]  ;;  %v22884_v13 = vld [vmem:[%s23338_s9 + $0x214] sm:$0xf] }
 0x2a3   : > { %21104 = vmatprep.mubr.msk.bf16.mxu0 %vm1936_vm4, %v22594_v26  ;;  %v17724_v26 = vcombine.low %v22883_v8, %v22884_v13  ;;  %v22604_v8 = vld [vmem:[%s23338_s9 + $0x10c] sm:$0xff]  }
 0x2a4   : > { %v22889_v13 = vld [vmem:[%s23338_s9 + $0x230] sm:$0xf] }
 0x2a5   : > { %v17727_v34 = vcombine.low %v22889_v13, %v22890_v58  ;;  %v22894_v13 = vld [vmem:[%s23338_s9 + $0x248] sm:$0xf] }
 0x2a9   : > { %20519 = vmatmul.mubr.msk.bf16.gmra.mrb[100].mxu1 %vm1936_vm4, %v17722_v30  ;;  %v22602_v30 = vld [vmem:[%s23338_s9 + $0x104] sm:$0xff]  }
 0x2aa   : > { %21105 = vmatmul.mubr.msk.bf16.gmra.mrb[36].mxu0 %vm1936_vm4, %v22596_v32  ;;  %20522 = vmatprep.mubr.msk.bf16.mxu1 %vm1936_vm4, %v17723_v35  ;;  %v22887_v32 = vld [vmem:[%s23338_s9 + $0x224] sm:$0xf]  ;;  %v22888_v35 = vld [vmem:[%s23338_s9 + $0x228] sm:$0xf] }
 0x2ab   : > { %21108 = vmatprep.mubr.msk.bf16.mxu0 %vm1936_vm4, %v22598_v25  ;;  %v17726_v25 = vcombine.low %v22887_v32, %v22888_v35  ;;  %v22608_v32 = vld [vmem:[%s23338_s9 + $0x120] sm:$0xff]  }
 0x2ac   : > { %v22893_v35 = vld [vmem:[%s23338_s9 + $0x244] sm:$0xf] }
 0x2ad   : > { %v17729_v58 = vcombine.low %v22893_v35, %v22894_v13  ;;  %v22898_v35 = vld [vmem:[%s23338_s9 + $0x25c] sm:$0xf]  ;;  %v22614_v13 = vld [vmem:[%s23338_s9 + $0x140] sm:$0xff]  }
 0x2b1   : > { %20523 = vmatmul.mubr.msk.bf16.gmra.mrb[104].mxu1 %vm1936_vm4, %v17724_v26  ;;  %v22606_v26 = vld [vmem:[%s23338_s9 + $0x118] sm:$0xff]  }
 0x2b2   : > { %21109 = vmatmul.mubr.msk.bf16.gmra.mrb[40].mxu0 %vm1936_vm4, %v22600_v0  ;;  %20526 = vmatprep.mubr.msk.bf16.mxu1 %vm1936_vm4, %v17725_v20  ;;  %v22891_v0 = vld [vmem:[%s23338_s9 + $0x238] sm:$0xf]  ;;  %v22892_v20 = vld [vmem:[%s23338_s9 + $0x23c] sm:$0xf] }
 0x2b3   : > { %21112 = vmatprep.mubr.msk.bf16.mxu0 %vm1936_vm4, %v22602_v30  ;;  %v17728_v30 = vcombine.low %v22891_v0, %v22892_v20  ;;  %v22612_v0 = vld [vmem:[%s23338_s9 + $0x134] sm:$0xff]  }
 0x2b4   : > { %v22897_v20 = vld [vmem:[%s23338_s9 + $0x258] sm:$0xf] }
 0x2b9   : > { %20527 = vmatmul.mubr.msk.bf16.gmra.mrb[108].mxu1 %vm1936_vm4, %v17726_v25  ;;  %v22610_v25 = vld [vmem:[%s23338_s9 + $0x12c] sm:$0xff]  }
 0x2ba   : > { %21113 = vmatmul.mubr.msk.bf16.gmra.mrb[44].mxu0 %vm1936_vm4, %v22604_v8  ;;  %20530 = vmatprep.mubr.msk.bf16.mxu1 %vm1936_vm4, %v17727_v34  ;;  %v22895_v8 = vld [vmem:[%s23338_s9 + $0x24c] sm:$0xf]  ;;  %v22896_v34 = vld [vmem:[%s23338_s9 + $0x250] sm:$0xf] }
 0x2bb   : > { %21116 = vmatprep.mubr.msk.bf16.mxu0 %vm1936_vm4, %v22606_v26  ;;  %v17730_v26 = vcombine.low %v22895_v8, %v22896_v34  ;;  %v22900_v8 = vld [vmem:[%s23338_s9 + $0x260] sm:$0xf]  ;;  %v22901_v34 = vld [vmem:[%s23338_s9 + $0x264] sm:$0xf] }
 0x2bc   : > { %v17732_v63 = vcombine.low %v22900_v8, %v22901_v34  ;;  %v3855_v8 = vrot.slane %v24401_v45, 5  ;;  %v3858_v34 = vrot.slane %v24425_v15, 5  ;;  %v22905_v45 = vld [vmem:[%s23338_s9 + $0x274] sm:$0xf] }
 0x2be   : > { %v3857_v57 = vrot.slane %v3855_v8, 4  ;;  %v3860_v53 = vrot.slane %v3858_v34, 4 }
 0x2c1   : > { %20531 = vmatmul.mubr.msk.bf16.gmra.mrb[112].mxu1 %vm1936_vm4, %v17728_v30  ;;  %v17731_v30 = vcombine.low %v22897_v20, %v22898_v35  ;;  %v22903_v20 = vld [vmem:[%s23338_s9 + $0x270] sm:$0xf] }
 0x2c2   : > { %21117 = vmatmul.mubr.msk.bf16.gmra.mrb[48].mxu0 %vm1936_vm4, %v22608_v32  ;;  %20534 = vmatprep.mubr.msk.bf16.mxu1 %vm1936_vm4, %v17729_v58  ;;  %v22899_v32 = vld [vmem:[%s23338_s9 + $0x4] sm:$0xf]  ;;  %v17733_v35 = vcombine.low %v22902_v59, %v22903_v20  ;;  %v3861_v59 = vrot.slane %v24428_v2, 5 }
 0x2c3   : > { %21120 = vmatprep.mubr.msk.bf16.mxu0 %vm1936_vm4, %v22610_v25  ;;  %v3842_v58 = vrot.slane %v22899_v32, 5  ;;  %v3741_v25 = vld [vmem:[%s23338_s9] sm:$0xe]  ;;  %v3742_v32 = vld [vmem:[%s23338_s9 + $0x14] sm:$0xe] }
 0x2c4   : > { %v17800_v3 = vrot.slane %v3742_v32, 9 }
 0x2c9   : > { %20535 = vmatmul.mubr.msk.bf16.gmra.mrb[116].mxu1 %vm1936_vm4, %v17730_v26  ;;  %v17799_v26 = vrot.slane %v3741_v25, 9 }
 0x2ca   : > { %21121 = vmatmul.mubr.msk.bf16.gmra.mrb[52].mxu0 %vm1936_vm4, %v22612_v0  ;;  %20538 = vmatprep.mubr.msk.bf16.mxu1 %vm1936_vm4, %v17731_v30  ;;  %v3844_v0 = vrot.slane %v3842_v58, 4  ;;  %v3845_v30 = vrot.slane %v24390_v50, 5  ;;  %v22904_v50 = vld [vmem:[%s23338_s9 + $0x10] sm:$0x1] }
 0x2cb   : > { %21124 = vmatprep.mubr.msk.bf16.mxu0 %vm1936_vm4, %v22614_v13  ;;  %v3848_v13 = vrot.slane %v24393_v51, 5  ;;  %v3851_v25 = vrot.slane %v22904_v50, 5  ;;  %v3843_v51 = vsel %vm23862_vm8, %v17799_v26, %v3842_v58  ;;  %v3864_v50 = vrot.slane %v22907_v27, 5 }
 0x2cc   : > { %v3847_v20 = vrot.slane %v3845_v30, 4  ;;  %v3868_v58 = vrot.slane %v24434_v18, 5  ;;  %v3871_v26 = vrot.slane %v24455_v43, 5  ;;  %v3859_v18 = vsel %vm23862_vm8, %v3857_v57, %v3858_v34  ;;  %v22908_v57 = vld [vmem:[%s23338_s9 + $0x38] sm:$0x1] }
 0x2cd   : > { %v3850_v2 = vrot.slane %v3848_v13, 4  ;;  %v25070_v43 = vsel %vm23862_vm8, %v3860_v53, %v3861_v59  ;;  %v17801_v27 = vrot.slane %v3743_v16, 9  ;;  %v3877_v34 = vrot.slane %v22908_v57, 5  ;;  %v19309_v53 = vld [vmem:[%s29403_s1 + $0x10] sm:$0x3] }
 0x2ce   : > { %v25085_v16 = vand.u32 %v19309_v53, %v23314_v4 }
 0x2cf   : > { %v3852_v32 = vsel %vm23862_vm8, %v3850_v2, %v3851_v25  ;;  %v3884_v25 = vrot.slane %v24485_v1, 5  ;;  %v25096_v4 = vsel %vm23862_vm8, %v17801_v27, %v3868_v58  ;;  %v3745_v1 = vld [vmem:[%s23338_s9 + $0x50] sm:$0xe]  ;;  %v3900_v2 = vrot.slane %v24518_v39, 5 }
 0x2d0   : > { %29481 = vst [vmem:[#allocation24_spill] sm:$0xff] %v25085_v16  ;;  %21326 = vmatprep.subr.bf16.mxu0 %v25085_v16 }
 0x2d1   : > { %20539 = vmatmul.mubr.msk.bf16.gmra.mrb[120].mxu1 %vm1936_vm4, %v17732_v63  ;;  %v22906_v63 = vld [vmem:[%s23338_s9 + $0x278] sm:$0xf] }
 0x2d2   : > { %21125 = vmatmul.mubr.msk.bf16.gmra.mrb[56].mxu0 %vm1936_vm4, %v22616_v21  ;;  %20542 = vmatprep.mubr.msk.bf16.mxu1 %vm1936_vm4, %v17733_v35  ;;  %v3846_v21 = vsel %vm23862_vm8, %v3844_v0, %v3845_v30  ;;  %v17734_v15 = vcombine.low %v22905_v45, %v22906_v63  ;;  %v22620_v35 = vld [vmem:[%s23338_s9 + $0x15c] sm:$0xff]   ;;  %v3874_v0 = vrot.slane %v24458_v46, 5  ;;  %v3849_v30 = vsel %vm23862_vm8, %v3847_v20, %v3848_v13 }
 0x2d3   : > { %21128 = vmatprep.mubr.msk.bf16.mxu0 %vm1936_vm4, %v22618_v22  ;;  %v3863_v22 = vrot.slane %v3861_v59, 4  ;;  %v17832_v41 = vcombine.low %v3843_v51, %v3846_v21  ;;  %v3856_v45 = vsel %vm23862_vm8, %v17800_v3, %v3855_v8  ;;  %v3870_v3 = vrot.slane %v3868_v58, 4 }
 0x2d4   : > { %v3873_v13 = vrot.slane %v3871_v26, 4  ;;  %v3876_v8 = vrot.slane %v3874_v0, 4  ;;  %v3881_v59 = vrot.slane %v24464_v48, 5  ;;  %v3887_v51 = vrot.slane %v24488_v19, 5 }
 0x2d5   : > { %v25074_v46 = vsel %vm23862_vm8, %v3863_v22, %v3864_v50  ;;  %v3894_v21 = vrot.slane %v24494_v12, 5  ;;  %v3897_v63 = vrot.slane %v24515_v38, 5  ;;  %v17834_v20 = vcombine.low %v3856_v45, %v3859_v18  ;;  %v22623_v50 = vld [vmem:[%s23338_s9 + $0x17c] sm:$0xff]  }
 0x2d6   : > { %v17835_v48 = vcombine.low %v25070_v43, %v25074_v46  ;;  %v25103_v19 = vsel %vm23862_vm8, %v3870_v3, %v3871_v26  ;;  %v25107_v12 = vsel %vm23862_vm8, %v3873_v13, %v3874_v0  ;;  %v25111_v38 = vsel %vm23862_vm8, %v3876_v8, %v3877_v34  ;;  %v22910_v13 = vld [vmem:[%s23338_s9 + $0x60] sm:$0x1] }
 0x2d7   : > { %v3907_v22 = vrot.slane %v24524_v40, 5  ;;  %v3883_v58 = vrot.slane %v3881_v59, 4  ;;  %v3889_v26 = vrot.slane %v3887_v51, 4  ;;  %v17803_v18 = vrot.slane %v3745_v1, 9  ;;  %v22624_v1 = vld [vmem:[%s23338_s9 + $0x184] sm:$0xff]  }
 0x2d8   : > { %v3896_v27 = vrot.slane %v3894_v21, 4  ;;  %v3899_v3 = vrot.slane %v3897_v63, 4  ;;  %v3902_v0 = vrot.slane %v3900_v2, 4  ;;  %v3903_v8 = vrot.slane %v22910_v13, 5 }
 0x2d9   : > { %20543 = vmatmul.mubr.msk.bf16.gmra.mrb[124].mxu1 %vm1936_vm4, %v17734_v15  ;;  %v22622_v15 = vld [vmem:[%s23338_s9 + $0x170] sm:$0xff]   ;;  %v3910_v40 = vrot.slane %v24545_v9, 5  ;;  %v17836_v34 = vcombine.low %v25096_v4, %v25103_v19  ;;  %v17837_v53 = vcombine.low %v25107_v12, %v25111_v38  ;;  %v3920_v4 = vrot.slane %v24554_v24, 5 }
 0x2da   : > { %21129 = vmatmul.mubr.msk.bf16.gmra.mrb[60].mxu0 %vm1936_vm4, %v22620_v35  ;;  %20548 = vmatprep.mubr.msk.bf16.mxu1 %vm1936_vm4, %v17832_v41  ;;  %v17833_v41 = vcombine.low %v3849_v30, %v3852_v32  ;;  %v3746_v35 = vld [vmem:[%s23338_s9 + $0x64] sm:$0xe]  ;;  %v3886_v30 = vrot.slane %v3884_v25, 4  ;;  %v22909_v32 = vld [vmem:[%s23338_s9 + $0x4c] sm:$0x1]  ;;  %v25163_v24 = vsel %vm23862_vm8, %v3902_v0, %v3903_v8  ;;  %v3936_v0 = vrot.slane %v24608_v23, 5 }
 0x2db   : > { %21132 = vmatprep.mubr.msk.bf16.mxu0 %vm1936_vm4, %v22621_v6  ;;  %v3744_v6 = vld [vmem:[%s23338_s9 + $0x3c] sm:$0xe]  ;;  %v3890_v45 = vrot.slane %v22909_v32, 5  ;;  %v17804_v57 = vrot.slane %v3746_v35, 9  ;;  %v22911_v35 = vld [vmem:[%s23338_s9 + $0x74] sm:$0x1] }
 0x2dc   : > { %v17802_v39 = vrot.slane %v3744_v6, 9  ;;  %v3913_v6 = vrot.slane %v24548_v11, 5  ;;  %v3946_v23 = vrot.slane %v24617_v28, 5 }
 0x2dd   : > { %v25146_v11 = vsel %vm23862_vm8, %v3889_v26, %v3890_v45  ;;  %v25167_v19 = vsel %vm23862_vm8, %v17804_v57, %v3907_v22  ;;  %v3922_v45 = vrot.slane %v3920_v4, 4  ;;  %v3926_v26 = vrot.slane %v24578_v47, 5  ;;  %v3749_v57 = vld [vmem:[%s23338_s9 + $0xa0] sm:$0xe] }
 0x2de   : > { %v25131_v9 = vsel %vm23862_vm8, %v17802_v39, %v3881_v59  ;;  %v25150_v59 = vsel %vm23862_vm8, %v17803_v18, %v3894_v21  ;;  %v3912_v21 = vrot.slane %v3910_v40, 4  ;;  %v22625_v39 = vld [vmem:[%s23338_s9 + $0x190] sm:$0xff]  }
 0x2e0   : > { %v25198_v13 = vsel %vm23862_vm8, %v3912_v21, %v3913_v6 }
 0x2e1   : > { %20549 = vmatmul.mubr.msk.bf16.vlgmr.msra.gmra.mrb[0].mxu1 %vm1936_vm4, %v17833_v41  ;;  %v3909_v41 = vrot.slane %v3907_v22, 4  ;;  %v3933_v22 = vrot.slane %v24584_v54, 5 }
 0x2e2   : > { %21133 = vmatmul.mubr.msk.bf16.gmra.mrb[64].mxu0 %vm1936_vm4, %v22622_v15  ;;  %20677 = vmatpush3.bf16.msra.mxu1 %v24861_v61  ;;  %v25135_v61 = vsel %vm23862_vm8, %v3883_v58, %v3884_v25  ;;  %v25139_v15 = vsel %vm23862_vm8, %v3886_v30, %v3887_v51  ;;  %v25154_v25 = vsel %vm23862_vm8, %v3896_v27, %v3897_v63  ;;  %v3923_v30 = vrot.slane %v24575_v44, 5 }
 0x2e3   : > { %20552 = vmatprep.mubr.msk.bf16.mxu1 %vm1936_vm4, %v17834_v20  ;;  %21136 = vmatprep.mubr.msk.bf16.mxu0 %vm1936_vm4, %v22623_v50  ;;  %v3747_v20 = vld [vmem:[%s23338_s9 + $0x78] sm:$0xe]  ;;  %v25158_v51 = vsel %vm23862_vm8, %v3899_v3, %v3900_v2  ;;  %v3916_v50 = vrot.slane %v22911_v35, 5  ;;  %v25173_v63 = vsel %vm23862_vm8, %v3909_v41, %v3910_v40  ;;  %v3915_v2 = vrot.slane %v3913_v6, 4  ;;  %v3748_v3 = vld [vmem:[%s23338_s9 + $0x8c] sm:$0xe] }
 0x2e4   : > { %21456 = vmatprep.subr.bf16.mxu1 %v23322_v7  ;;  %v17805_v58 = vrot.slane %v3747_v20, 9  ;;  %v17838_v32 = vcombine.low %v25131_v9, %v25135_v61  ;;  %v17839_v18 = vcombine.low %v25139_v15, %v25146_v11  ;;  %v17840_v27 = vcombine.low %v25150_v59, %v25154_v25  ;;  %v22913_v61 = vld [vmem:[%s23338_s9 + $0x9c] sm:$0x1]  ;;  %v22633_v11 = vld [vmem:[%s23338_s9 + $0x1e0] sm:$0xff]   ;;  %v3756_v15 = vld [vmem:[%s23338_s9 + $0x12c] sm:$0xe] }
 0x2e5   : > { %v3939_v44 = vrot.slane %v24611_v17, 5  ;;  %v17841_v47 = vcombine.low %v25158_v51, %v25163_v24  ;;  %v17842_v54 = vcombine.low %v25167_v19, %v25173_v63  ;;  %v25205_v17 = vsel %vm23862_vm8, %v3915_v2, %v3916_v50  ;;  %v22627_v2 = vld [vmem:[%s23338_s9 + $0x1a4] sm:$0xff]  }
 0x2e6   : > { %v25209_v43 = vsel %vm23862_vm8, %v17805_v58, %v3920_v4  ;;  %v3925_v46 = vrot.slane %v3923_v30, 4  ;;  %v25215_v28 = vsel %vm23862_vm8, %v3922_v45, %v3923_v30  ;;  %v3928_v40 = vrot.slane %v3926_v26, 4  ;;  %v3750_v30 = vld [vmem:[%s23338_s9 + $0xb4] sm:$0xe] }
 0x2e7   : > { %v3935_v41 = vrot.slane %v3933_v22, 4  ;;  %v3938_v6 = vrot.slane %v3936_v0, 4  ;;  %v3941_v9 = vrot.slane %v3939_v44, 4  ;;  %v3942_v20 = vrot.slane %v22913_v61, 5  ;;  %v29482_v61 = vld [vmem:[#allocation7_spill] sm:$0xff] }
 0x2e8   : > { %v3949_v4 = vrot.slane %v24642_v56, 5  ;;  %v17807_v35 = vrot.slane %v3749_v57, 9  ;;  %v3948_v50 = vrot.slane %v3946_v23, 4  ;;  %v25226_v58 = vsel %vm23862_vm8, %v3925_v46, %v3926_v26  ;;  %v22914_v46 = vld [vmem:[%s23338_s9 + $0xb0] sm:$0x1] }
 0x2e9   : > { %20553 = vmatmul.mubr.msk.bf16.gmra.mrb[4].mxu1 %vm1936_vm4, %v17835_v48  ;;  %v22912_v48 = vld [vmem:[%s23338_s9 + $0x88] sm:$0x1]  ;;  %v3959_v45 = vrot.slane %v24651_v5, 5  ;;  %v3965_v56 = vrot.slane %v24675_v52, 5  ;;  %v25244_v26 = vsel %vm23862_vm8, %v3935_v41, %v3936_v0  ;;  %v25248_v5 = vsel %vm23862_vm8, %v3938_v6, %v3939_v44 }
 0x2ea   : > { %21137 = vmatmul.mubr.msk.bf16.gmra.mrb[68].mxu0 %vm1936_vm4, %v22624_v1  ;;  %20556 = vmatprep.mubr.msk.bf16.mxu1 %vm1936_vm4, %v17836_v34  ;;  %v3929_v8 = vrot.slane %v22912_v48, 5  ;;  %v17806_v34 = vrot.slane %v3748_v3, 9  ;;  %v22626_v1 = vld [vmem:[%s23338_s9 + $0x198] sm:$0xff]   ;;  %v3962_v3 = vrot.slane %v24672_v49, 5  ;;  %v25252_v49 = vsel %vm23862_vm8, %v3941_v9, %v3942_v20 }
 0x2eb   : > { %21140 = vmatprep.mubr.msk.bf16.mxu0 %vm1936_vm4, %v22625_v39  ;;  %v3952_v39 = vrot.slane %v24645_v62, 5  ;;  %v3951_v52 = vrot.slane %v3949_v4, 4  ;;  %v25266_v0 = vsel %vm23862_vm8, %v3948_v50, %v3949_v4  ;;  %v3961_v12 = vrot.slane %v3959_v45, 4  ;;  %v3751_v4 = vld [vmem:[%s23338_s9 + $0xc8] sm:$0xe]  ;;  %v22628_v50 = vld [vmem:[%s23338_s9 + $0x1ac] sm:$0xff]  }
 0x2ec   : > { %v25236_v57 = vsel %vm23862_vm8, %v3928_v40, %v3929_v8  ;;  %v25240_v62 = vsel %vm23862_vm8, %v17806_v34, %v3933_v22  ;;  %v3955_v8 = vrot.slane %v22914_v46, 5  ;;  %v25262_v22 = vsel %vm23862_vm8, %v17807_v35, %v3946_v23  ;;  %v22915_v34 = vld [vmem:[%s23338_s9 + $0xc4] sm:$0x1]  ;;  %v22917_v23 = vld [vmem:[%s23338_s9 + $0xec] sm:$0x1]  ;;  %v29490_v48 = vld [vmem:[#allocation14_spill] sm:$0xff] }
 0x2ed   : > { %v3954_v44 = vrot.slane %v3952_v39, 4  ;;  %v17808_v40 = vrot.slane %v3750_v30, 9  ;;  %v3964_v38 = vrot.slane %v3962_v3, 4  ;;  %v3968_v41 = vrot.slane %v22915_v34, 5  ;;  %v3752_v30 = vld [vmem:[%s23338_s9 + $0xdc] sm:$0xe] }
 0x2ee   : > { %v25282_v20 = vsel %vm23862_vm8, %v3951_v52, %v3952_v39  ;;  %v3978_v35 = vrot.slane %v24705_v33, 5  ;;  %v3988_v46 = vrot.slane %v24732_v29, 5  ;;  %v3991_v39 = vrot.slane %v24735_v31, 5  ;;  %v22629_v52 = vld [vmem:[%s23338_s9 + $0x1b8] sm:$0xff]  }
 0x2ef   : > { %v25303_v33 = vsel %vm23862_vm8, %v3961_v12, %v3962_v3  ;;  %v17809_v29 = vrot.slane %v3751_v4, 9  ;;  %v3998_v9 = vrot.slane %v29482_v61, 5  ;;  %v17810_v6 = vrot.slane %v3752_v30, 9  ;;  %v3753_v12 = vld [vmem:[%s23338_s9 + $0xf0] sm:$0xe] }
 0x2f0   : > { %v3994_v3 = vrot.slane %v22917_v23, 5  ;;  %v29484_v23 = vld [vmem:[#allocation9_spill] sm:$0xff]  ;;  %v4040_v21 = vrot.slane %v29490_v48, 5  ;;  %v29492_v48 = vcombine.low %v25198_v13, %v25205_v17  ;;  %v29495_v13 = vcombine.low %v25209_v43, %v25215_v28 }
 0x2f1   : > { %20557 = vmatmul.mubr.msk.bf16.gmra.mrb[8].mxu1 %vm1936_vm4, %v17837_v53  ;;  %v3967_v53 = vrot.slane %v3965_v56, 4  ;;  %v4004_v61 = vrot.slane %v29484_v23, 5  ;;  %v22920_v23 = vld [vmem:[%s23338_s9 + $0x128] sm:$0x1] }
 0x2f2   : > { %21141 = vmatmul.mubr.msk.bf16.gmra.mrb[72].mxu0 %vm1936_vm4, %v22626_v1  ;;  %20560 = vmatprep.mubr.msk.bf16.mxu1 %vm1936_vm4, %v17838_v32  ;;  %v3972_v32 = vrot.slane %v24681_v60, 5  ;;  %v3975_v1 = vrot.slane %v24702_v10, 5  ;;  %v3985_v60 = vrot.slane %v24711_v42, 5  ;;  %v25299_v10 = vsel %vm23862_vm8, %v17808_v40, %v3959_v45 }
 0x2f3   : > { %21144 = vmatprep.mubr.msk.bf16.mxu0 %vm1936_vm4, %v22627_v2  ;;  %v25290_v2 = vsel %vm23862_vm8, %v3954_v44, %v3955_v8  ;;  %v25307_v8 = vsel %vm23862_vm8, %v3964_v38, %v3965_v56  ;;  %v25311_v42 = vsel %vm23862_vm8, %v3967_v53, %v3968_v41  ;;  %v22916_v44 = vld [vmem:[%s23338_s9 + $0xd8] sm:$0x1]  ;;  %v3980_v40 = vrot.slane %v3978_v35, 4  ;;  %v29483_v41 = vld [vmem:[#allocation8_spill] sm:$0xff] }
 0x2f4   : > { %v3974_v31 = vrot.slane %v3972_v32, 4  ;;  %v3981_v34 = vrot.slane %v22916_v44, 5  ;;  %v3977_v45 = vrot.slane %v3975_v1, 4  ;;  %v3987_v56 = vrot.slane %v3985_v60, 4 }
 0x2f5   : > { %v3990_v38 = vrot.slane %v3988_v46, 4  ;;  %v3993_v53 = vrot.slane %v3991_v39, 4  ;;  %v4001_v4 = vrot.slane %v29483_v41, 5  ;;  %v25337_v59 = vsel %vm23862_vm8, %v17809_v29, %v3972_v32  ;;  %v29485_v32 = vld [vmem:[#allocation10_spill] sm:$0xff]  ;;  %v22630_v41 = vld [vmem:[%s23338_s9 + $0x1c0] sm:$0xff]  }
 0x2f6   : > { %v25341_v25 = vsel %vm23862_vm8, %v3974_v31, %v3975_v1  ;;  %v25345_v30 = vsel %vm23862_vm8, %v3977_v45, %v3978_v35  ;;  %v25353_v44 = vsel %vm23862_vm8, %v17810_v6, %v3985_v60  ;;  %v4011_v29 = vrot.slane %v29485_v32, 5  ;;  %v3754_v45 = vld [vmem:[%s23338_s9 + $0x104] sm:$0xe]  ;;  %v22631_v6 = vld [vmem:[%s23338_s9 + $0x1cc] sm:$0xff]   ;;  %v18956_v60 = vld [vmem:[%s23338_s9 + $0x28] sm:$0xf] }
 0x2f7   : > { %v25359_v1 = vsel %vm23862_vm8, %v3987_v56, %v3988_v46  ;;  %v25363_v31 = vsel %vm23862_vm8, %v3990_v38, %v3991_v39  ;;  %v25367_v35 = vsel %vm23862_vm8, %v3993_v53, %v3994_v3  ;;  %v4014_v56 = vrot.slane %v24792_v14, 5  ;;  %v3755_v39 = vld [vmem:[%s23338_s9 + $0x118] sm:$0xe]  ;;  %v18957_v14 = vld [vmem:[%s23338_s9 + $0x2c] sm:$0xf] }
 0x2f8   : > { %v4017_v53 = vrot.slane %v24795_v36, 5  ;;  %v17812_v32 = vrot.slane %v3754_v45, 9  ;;  %v12417_v19 = vshrl.u32 %v18956_v60, 16  ;;  %v12420_v63 = vshll.u32 %v18956_v60, 16 }
 0x2f9   : > { %20561 = vmatmul.mubr.msk.bf16.gmra.mrb[12].mxu1 %vm1936_vm4, %v17839_v18  ;;  %v4033_v18 = vrot.slane %v22920_v23, 5 }
 0x2fa   : > { %21145 = vmatmul.mubr.msk.bf16.gmra.mrb[76].mxu0 %vm1936_vm4, %v22628_v50  ;;  %20564 = vmatprep.mubr.msk.bf16.mxu1 %vm1936_vm4, %v17840_v27  ;;  %v17811_v27 = vrot.slane %v3753_v12, 9  ;;  %v4000_v50 = vrot.slane %v3998_v9, 4  ;;  %v22918_v12 = vld [vmem:[%s23338_s9 + $0x100] sm:$0x1]  ;;  %v12419_v7 = vrot.slane %v12417_v19, 4  ;;  %v12422_v16 = vrot.slane %v12420_v63, 5 }
 0x2fb   : > { %21148 = vmatprep.mubr.msk.bf16.mxu0 %vm1936_vm4, %v22629_v52  ;;  %v25349_v52 = vsel %vm23862_vm8, %v3980_v40, %v3981_v34  ;;  %v4003_v34 = vrot.slane %v4001_v4, 4  ;;  %v4006_v40 = vrot.slane %v4004_v61, 4  ;;  %v4007_v46 = vrot.slane %v22918_v12, 5  ;;  %v22921_v63 = vld [vmem:[%s23338_s9 + $0x13c] sm:$0x1] }
 0x2fc   : > { %v25379_v3 = vsel %vm23862_vm8, %v17811_v27, %v3998_v9  ;;  %v25383_v38 = vsel %vm23862_vm8, %v4000_v50, %v4001_v4  ;;  %v4013_v12 = vrot.slane %v4011_v29, 4  ;;  %v4024_v9 = vrot.slane %v24801_v55, 5  ;;  %v29487_v4 = vld [vmem:[#allocation11_spill] sm:$0xff]  ;;  %v29488_v50 = vld [vmem:[#allocation12_spill] sm:$0xff] }
 0x2fd   : > { %29486 = vst [vmem:[#allocation7_spill] sm:$0xff] %v25383_v38  ;;  %v25399_v36 = vsel %vm23862_vm8, %v4003_v34, %v4004_v61  ;;  %v4027_v27 = vrot.slane %v29487_v4, 5  ;;  %v4030_v45 = vrot.slane %v29488_v50, 5  ;;  %v25414_v24 = vsel %vm23862_vm8, %v4006_v40, %v4007_v46 }
 0x2fe   : > { %v4016_v55 = vrot.slane %v4014_v56, 4  ;;  %v17813_v34 = vrot.slane %v3755_v39, 9  ;;  %v25424_v40 = vsel %vm23862_vm8, %v4013_v12, %v4014_v56  ;;  %v12426_v46 = vshll.u32 %v18957_v14, 16  ;;  %v18958_v39 = vld [vmem:[%s23338_s9 + $0x30] sm:$0xf]  ;;  %v29491_v56 = vld [vmem:[#allocation15_spill] sm:$0xff] }
 0x2ff   : > { %v12430_v4 = vshrl.u32 %v18957_v14, 16  ;;  %v4026_v50 = vrot.slane %v4024_v9, 4  ;;  %v4029_v51 = vrot.slane %v4027_v27, 4  ;;  %v4043_v12 = vrot.slane %v29491_v56, 5 }
 0x300   : > { %v25431_v60 = vsel %vm23862_vm8, %v4016_v55, %v4017_v53  ;;  %v25443_v23 = vsel %vm23862_vm8, %v17813_v34, %v4024_v9  ;;  %v12436_v38 = vshll.u32 %v18958_v39, 16  ;;  %v17814_v34 = vrot.slane %v3756_v15, 9 }
 0x301   : > { %20565 = vmatmul.mubr.msk.bf16.gmra.mrb[16].mxu1 %vm1936_vm4, %v17841_v47  ;;  %v22919_v47 = vld [vmem:[%s23338_s9 + $0x114] sm:$0x1]  ;;  %v12432_v55 = vrot.slane %v12430_v4, 4  ;;  %v25458_v9 = vsel %vm23862_vm8, %v4029_v51, %v4030_v45  ;;  %v4045_v19 = vrot.slane %v4043_v12, 4  ;;  %v29496_v51 = vld [vmem:[#allocation16_spill] sm:$0xff]  ;;  %v12423_v43 = vor.u32 %v12422_v16, %v12419_v7  ;;  %v29498_v16 = vld [vmem:[#allocation18_spill] sm:$0xff] }
 0x302   : > { %21149 = vmatmul.mubr.msk.bf16.gmra.mrb[80].mxu0 %vm1936_vm4, %v22630_v41  ;;  %20568 = vmatprep.mubr.msk.bf16.mxu1 %vm1936_vm4, %v17842_v54  ;;  %v4020_v61 = vrot.slane %v22919_v47, 5  ;;  %v4019_v41 = vrot.slane %v4017_v53, 4  ;;  %v22632_v54 = vld [vmem:[%s23338_s9 + $0x1d4] sm:$0xff]   ;;  %v4032_v47 = vrot.slane %v4030_v45, 4  ;;  %v25445_v53 = vrot.slane %v12426_v46, 5  ;;  %29493 = vst [vmem:[#allocation8_spill] sm:$0xff] %v25458_v9 }
 0x303   : > { %21152 = vmatprep.mubr.msk.bf16.mxu0 %vm1936_vm4, %v22631_v6  ;;  %v25420_v6 = vsel %vm23862_vm8, %v17812_v32, %v4011_v29  ;;  %v29489_v29 = vld [vmem:[#allocation13_spill] sm:$0xff]  ;;  %v4046_v45 = vrot.slane %v22921_v63, 5  ;;  %v4050_v15 = vrot.slane %v29496_v51, 5  ;;  %v12424_v56 = vrot.slane %v12423_v43, 4 }
 0x304   : > { %v4037_v32 = vrot.slane %v29489_v29, 5  ;;  %v25439_v14 = vsel %vm23862_vm8, %v4019_v41, %v4020_v61  ;;  %v12440_v29 = vshrl.u32 %v18958_v39, 16  ;;  %v25454_v61 = vsel %vm23862_vm8, %v4026_v50, %v4027_v27  ;;  %v22634_v39 = vld [vmem:[%s23338_s9 + $0x1e8] sm:$0xff]   ;;  %v18959_v63 = vld [vmem:[%s23338_s9 + $0x34] sm:$0xf] }
 0x305   : > { %v25462_v41 = vsel %vm23862_vm8, %v4032_v47, %v4033_v18  ;;  %v4042_v27 = vrot.slane %v4040_v21, 4  ;;  %v12433_v4 = vor.u32 %v12432_v55, %v25445_v53  ;;  %v12438_v50 = vrot.slane %v12436_v38, 5  ;;  %v22635_v51 = vld [vmem:[%s23338_s9 + $0x1f4] sm:$0xff]  }
 0x306   : > { %29494 = vst [vmem:[#allocation9_spill] sm:$0xff] %v25462_v41  ;;  %v4039_v17 = vrot.slane %v4037_v32, 4  ;;  %v12442_v47 = vrot.slane %v12440_v29, 4  ;;  %v25490_v55 = vsel %vm23862_vm8, %v17814_v34, %v4037_v32  ;;  %v18962_v32 = vld [vmem:[%s23338_s9 + $0x40] sm:$0xf]  ;;  %v29503_v41 = vcombine.low %v25226_v58, %v25236_v57 }
 0x307   : > { %29499 = vst [vmem:[#allocation10_spill] sm:$0xff] %v25490_v55  ;;  %v25498_v29 = vsel %vm23862_vm8, %v4042_v27, %v4043_v12  ;;  %v12434_v34 = vrot.slane %v12433_v4, 4  ;;  %v22922_v27 = vld [vmem:[%s23338_s9 + $0x150] sm:$0x1]  ;;  %v12470_v4 = vshll.u32 %v18962_v32, 16  ;;  %v29510_v58 = vld [vmem:[#allocation19_spill] sm:$0xff] }
 0x308   : > { %v25494_v38 = vsel %vm23862_vm8, %v4039_v17, %v4040_v21  ;;  %29501 = vst [vmem:[#allocation12_spill] sm:$0xff] %v25498_v29  ;;  %v12443_v18 = vor.u32 %v12442_v47, %v12438_v50  ;;  %v12446_v21 = vshll.u32 %v18959_v63, 16  ;;  %v12450_v17 = vshrl.u32 %v18959_v63, 16  ;;  %v3758_v57 = vld [vmem:[%s23338_s9 + $0x154] sm:$0xe] }
 0x309   : > { %20569 = vmatmul.mubr.msk.bf16.gmra.mrb[20].mxu1 %vm1936_vm4, %v29492_v48  ;;  %29500 = vst [vmem:[#allocation11_spill] sm:$0xff] %v25494_v38  ;;  %v4052_v48 = vrot.slane %v4050_v15, 4  ;;  %v12474_v47 = vshrl.u32 %v18962_v32, 16  ;;  %v12429_v63 = vsel %vm23356_vm5, %v12424_v56, %v25445_v53  ;;  %v12439_v32 = vsel %vm23356_vm5, %v12434_v34, %v12438_v50  ;;  %v29511_v50 = vld [vmem:[#allocation20_spill] sm:$0xff] }
 0x30a   : > { %21153 = vmatmul.mubr.msk.bf16.gmra.mrb[84].mxu0 %vm1936_vm4, %v22632_v54  ;;  %20572 = vmatprep.mubr.msk.bf16.mxu1 %vm1936_vm4, %v29495_v13  ;;  %v29497_v54 = vld [vmem:[#allocation17_spill] sm:$0xff]  ;;  %v4056_v13 = vrot.slane %v29498_v16, 5  ;;  %v18961_v16 = vld [vmem:[%s23338_s9 + $0x3c] sm:$0xf]  ;;  %v25554_v34 = vrot.slane %v12470_v4, 5  ;;  %v25558_v29 = vcombine.low %v12429_v63, %v12439_v32  ;;  %v29513_v4 = vcombine.low %v25248_v5, %v25252_v49 }
 0x30b   : > { %21156 = vmatprep.mubr.msk.bf16.mxu0 %vm1936_vm4, %v22633_v11  ;;  %v4053_v46 = vrot.slane %v29497_v54, 5  ;;  %v3757_v11 = vld [vmem:[%s23338_s9 + $0x140] sm:$0xe]  ;;  %v25502_v54 = vsel %vm23862_vm8, %v4045_v19, %v4046_v45  ;;  %v4059_v19 = vrot.slane %v22922_v27, 5  ;;  %v12461_v45 = vshrl.u32 %v18961_v16, 16 }
 0x30c   : > { %29502 = vst [vmem:[#allocation13_spill] sm:$0xff] %v25502_v54  ;;  %v17815_v7 = vrot.slane %v3757_v11, 9  ;;  %v4058_v12 = vrot.slane %v4056_v13, 4  ;;  %v12464_v43 = vshll.u32 %v18961_v16, 16  ;;  %v29504_v11 = vcombine.low %v25240_v62, %v25244_v26  ;;  %v22636_v16 = vld [vmem:[%s23338_s9 + $0x1fc] sm:$0xff]   ;;  %29512 = vst [vmem:[#allocation18_spill] sm:$0xff] %v25558_v29 }
 0x30d   : > { %v4055_v28 = vrot.slane %v4053_v46, 4  ;;  %v25528_v62 = vsel %vm23862_vm8, %v4052_v48, %v4053_v46  ;;  %v25540_v27 = vrot.slane %v12443_v18, 4  ;;  %v22637_v46 = vld [vmem:[%s23338_s9 + $0x208] sm:$0xff]   ;;  %v12463_v56 = vrot.slane %v12461_v45, 4  ;;  %v18967_v45 = vld [vmem:[%s23338_s9 + $0x54] sm:$0xf] }
 0x30e   : > { %29506 = vst [vmem:[#allocation15_spill] sm:$0xff] %v25528_v62  ;;  %v25548_v48 = vsel %vm23862_vm8, %v4058_v12, %v4059_v19  ;;  %v4063_v54 = vrot.slane %v29510_v58, 5  ;;  %v4066_v18 = vrot.slane %v29511_v50, 5  ;;  %v18966_v50 = vld [vmem:[%s23338_s9 + $0x50] sm:$0xf]  ;;  %v17816_v32 = vrot.slane %v3758_v57, 9 }
 0x30f   : > { %29509 = vst [vmem:[#allocation17_spill] sm:$0xff] %v25548_v48  ;;  %v18965_v57 = vld [vmem:[%s23338_s9 + $0x4c] sm:$0x1]  ;;  %v12514_v29 = vshll.u32 %v18967_v45, 16  ;;  %v22639_v62 = vld [vmem:[%s23338_s9 + $0x21c] sm:$0xff]  }
 0x310   : > { %v4065_v5 = vrot.slane %v4063_v54, 4 }
 0x311   : > { %20573 = vmatmul.mubr.msk.bf16.gmra.mrb[24].mxu1 %vm1936_vm4, %v29503_v41  ;;  %v18960_v41 = vld [vmem:[%s23338_s9 + $0x38] sm:$0x1] }
 0x312   : > { %21157 = vmatmul.mubr.msk.bf16.gmra.mrb[88].mxu0 %vm1936_vm4, %v22634_v39  ;;  %20576 = vmatprep.mubr.msk.bf16.mxu1 %vm1936_vm4, %v29504_v11  ;;  %v25524_v39 = vsel %vm23862_vm8, %v17815_v7, %v4050_v15  ;;  %v25542_v15 = vrot.slane %v12446_v21, 5  ;;  %v12452_v7 = vrot.slane %v12450_v17, 4  ;;  %v18963_v11 = vld [vmem:[%s23338_s9 + $0x44] sm:$0xf]  ;;  %v12456_v53 = vshll.u32 %v18960_v41, 16 }
 0x313   : > { %21160 = vmatprep.mubr.msk.bf16.mxu0 %vm1936_vm4, %v22635_v51  ;;  %29505 = vst [vmem:[#allocation14_spill] sm:$0xff] %v25524_v39  ;;  %v25535_v51 = vsel %vm23862_vm8, %v4055_v28, %v4056_v13  ;;  %v12466_v28 = vrot.slane %v12464_v43, 5  ;;  %v18964_v13 = vld [vmem:[%s23338_s9 + $0x48] sm:$0xf]  ;;  %v12476_v21 = vrot.slane %v12474_v47, 4  ;;  %v12480_v12 = vshll.u32 %v18963_v11, 16 }
 0x314   : > { %29508 = vst [vmem:[#allocation16_spill] sm:$0xff] %v25535_v51  ;;  %v12484_v19 = vshrl.u32 %v18963_v11, 16  ;;  %v12453_v43 = vor.u32 %v12452_v7, %v25542_v15  ;;  %v12490_v41 = vshll.u32 %v18964_v13, 16  ;;  %v12494_v58 = vshrl.u32 %v18964_v13, 16  ;;  %v29515_v13 = vld [vmem:[#allocation21_spill] sm:$0xff]  ;;  %v29516_v47 = vld [vmem:[#allocation22_spill] sm:$0xff] }
 0x315   : > { %v25573_v63 = vrot.slane %v12456_v53, 5  ;;  %v12467_v7 = vor.u32 %v12466_v28, %v12463_v56  ;;  %v29514_v11 = vcombine.low %v25262_v22, %v25266_v0  ;;  %v12477_v49 = vor.u32 %v12476_v21, %v25554_v34  ;;  %v22638_v51 = vld [vmem:[%s23338_s9 + $0x210] sm:$0xff]  }
 0x316   : > { %v12482_v53 = vrot.slane %v12480_v12, 5  ;;  %v12486_v56 = vrot.slane %v12484_v19, 4  ;;  %v12505_v28 = vshrl.u32 %v18966_v50, 16  ;;  %v12508_v22 = vshll.u32 %v18966_v50, 16  ;;  %v22923_v50 = vld [vmem:[%s23338_s9 + $0x164] sm:$0x1] }
 0x317   : > { %v12454_v0 = vrot.slane %v12453_v43, 4  ;;  %v25584_v17 = vrot.slane %v12490_v41, 5  ;;  %v4076_v48 = vrot.slane %v29516_v47, 5  ;;  %v25591_v21 = vsel %vm23862_vm8, %v17816_v32, %v4063_v54 }
 0x318   : > { %v12518_v12 = vshrl.u32 %v18967_v45, 16  ;;  %v12478_v19 = vrot.slane %v12477_v49, 4  ;;  %v4072_v43 = vrot.slane %v22923_v50, 5  ;;  %v12500_v41 = vshll.u32 %v18965_v57, 16  ;;  %v29517_v45 = vld [vmem:[#allocation23_spill] sm:$0xff] }
 0x319   : > { %20577 = vmatmul.mubr.msk.bf16.gmra.mrb[28].mxu1 %vm1936_vm4, %v29513_v4  ;;  %v4069_v4 = vrot.slane %v29515_v13, 5  ;;  %v12468_v13 = vrot.slane %v12467_v7, 4  ;;  %v12487_v38 = vor.u32 %v12486_v56, %v12482_v53  ;;  %v12507_v55 = vrot.slane %v12505_v28, 4 }
 0x31a   : > { %21161 = vmatmul.mubr.msk.bf16.gmra.mrb[92].mxu0 %vm1936_vm4, %v22636_v16  ;;  %20580 = vmatprep.mubr.msk.bf16.mxu1 %vm1936_vm4, %v29514_v11  ;;  %v4068_v16 = vrot.slane %v4066_v18, 4  ;;  %v12496_v11 = vrot.slane %v12494_v58, 4  ;;  %v12510_v9 = vrot.slane %v12508_v22, 5  ;;  %v25597_v47 = vsel %vm23862_vm8, %v4065_v5, %v4066_v18  ;;  %v18968_v5 = vld [vmem:[%s23338_s9 + $0x58] sm:$0xf] }
 0x31b   : > { %21164 = vmatprep.mubr.msk.bf16.mxu0 %vm1936_vm4, %v22637_v46  ;;  %v3759_v46 = vld [vmem:[%s23338_s9 + $0x168] sm:$0xe]  ;;  %v4071_v39 = vrot.slane %v4069_v4, 4  ;;  %v4078_v32 = vrot.slane %v4076_v48, 4  ;;  %v4079_v7 = vrot.slane %v29517_v45, 5  ;;  %v29518_v49 = vcombine.low %v25282_v20, %v25290_v2 }
 0x31c   : > { %v17817_v58 = vrot.slane %v3759_v46, 9  ;;  %v12497_v54 = vor.u32 %v12496_v11, %v25584_v17  ;;  %v12459_v57 = vsel %vm23356_vm5, %v12454_v0, %v25573_v63  ;;  %v25611_v18 = vsel %vm23862_vm8, %v4068_v16, %v4069_v4  ;;  %v22924_v4 = vld [vmem:[%s23338_s9 + $0x174] sm:$0xf]  ;;  %v22640_v11 = vld [vmem:[%s23338_s9 + $0x224] sm:$0xff]  }
 0x31d   : > { %v25614_v56 = vrot.slane %v12514_v29, 5  ;;  %v12520_v28 = vrot.slane %v12518_v12, 4  ;;  %v29519_v20 = vcombine.low %v25299_v10, %v25303_v33  ;;  %v12473_v2 = vsel %vm23356_vm5, %v12468_v13, %v25554_v34  ;;  %v18969_v10 = vld [vmem:[%s23338_s9 + $0x5c] sm:$0xf]  ;;  %v22641_v12 = vld [vmem:[%s23338_s9 + $0x230] sm:$0xff]  }
 0x31e   : > { %v25628_v29 = vsel %vm23862_vm8, %v4071_v39, %v4072_v43  ;;  %v25630_v63 = vrot.slane %v12500_v41, 5  ;;  %v25633_v33 = vrot.slane %v12487_v38, 4  ;;  %v12511_v16 = vor.u32 %v12510_v9, %v12507_v55  ;;  %v18970_v41 = vld [vmem:[%s23338_s9 + $0x60] sm:$0x1]  ;;  %v18971_v45 = vld [vmem:[%s23338_s9 + $0x64] sm:$0xf] }
 0x31f   : > { %v4082_v34 = vrot.slane %v22924_v4, 5  ;;  %v12498_v22 = vrot.slane %v12497_v54, 4  ;;  %v12524_v39 = vshll.u32 %v18968_v5, 16  ;;  %v12528_v0 = vshrl.u32 %v18968_v5, 16 }
 0x320   : > { %v12521_v38 = vor.u32 %v12520_v28, %v25614_v56  ;;  %v4081_v46 = vrot.slane %v4079_v7, 4  ;;  %v12534_v13 = vshll.u32 %v18969_v10, 16  ;;  %v29520_v9 = vsel %vm23356_vm5, %v25540_v27, %v25542_v15  ;;  %v22925_v15 = vld [vmem:[%s23338_s9 + $0x178] sm:$0x1]  ;;  %v18972_v28 = vld [vmem:[%s23338_s9 + $0x68] sm:$0xf] }
 0x321   : > { %20581 = vmatmul.mubr.msk.bf16.gmra.mrb[32].mxu1 %vm1936_vm4, %v29518_v49  ;;  %v25652_v55 = vcombine.low %v29520_v9, %v12459_v57  ;;  %v12512_v54 = vrot.slane %v12511_v16, 4  ;;  %v4084_v27 = vrot.slane %v4082_v34, 4  ;;  %v12526_v57 = vrot.slane %v12524_v39, 5  ;;  %v18979_v49 = vld [vmem:[%s23338_s9 + $0x84] sm:$0xf] }
 0x322   : > { %21165 = vmatmul.mubr.msk.bf16.gmra.mrb[96].mxu0 %vm1936_vm4, %v22638_v51  ;;  %20584 = vmatprep.mubr.msk.bf16.mxu1 %vm1936_vm4, %v29519_v20  ;;  %v12483_v51 = vsel %vm23356_vm5, %v12478_v19, %v12482_v53  ;;  %v25642_v53 = vsel %vm23862_vm8, %v4078_v32, %v4079_v7  ;;  %v4085_v32 = vrot.slane %v22925_v15, 5  ;;  %v12503_v7 = vsel %vm23356_vm5, %v12498_v22, %v25630_v63  ;;  %v18973_v20 = vld [vmem:[%s23338_s9 + $0x6c] sm:$0xf] }
 0x323   : > { %21168 = vmatprep.mubr.msk.bf16.mxu0 %vm1936_vm4, %v22639_v62  ;;  %v25637_v62 = vsel %vm23862_vm8, %v17817_v58, %v4076_v48  ;;  %v12538_v48 = vshrl.u32 %v18969_v10, 16  ;;  %v25656_v50 = vcombine.low %v12473_v2, %v12483_v51  ;;  %v12493_v58 = vsel %vm23356_vm5, %v25633_v33, %v25584_v17  ;;  %v3760_v33 = vld [vmem:[%s23338_s9 + $0x17c] sm:$0xe] }
 0x324   : > { %v12530_v5 = vrot.slane %v12528_v0, 4  ;;  %v29521_v17 = vcombine.low %v25307_v8, %v25311_v42  ;;  %v12522_v2 = vrot.slane %v12521_v38, 4  ;;  %v25681_v51 = vsel %vm23862_vm8, %v4081_v46, %v4082_v34  ;;  %v22926_v42 = vld [vmem:[%s23338_s9 + $0x180] sm:$0xf]  ;;  %v18974_v34 = vld [vmem:[%s23338_s9 + $0x70] sm:$0xf] }
 0x325   : > { %v25683_v63 = vrot.slane %v12534_v13, 5  ;;  %v12540_v10 = vrot.slane %v12538_v48, 4  ;;  %v29522_v16 = vcombine.low %v25337_v59, %v25341_v25  ;;  %v12544_v8 = vshll.u32 %v18970_v41, 16 }
 0x326   : > { %v4089_v4 = vrot.slane %v22926_v42, 5  ;;  %v12549_v22 = vshrl.u32 %v18971_v45, 16  ;;  %v12552_v39 = vshll.u32 %v18971_v45, 16  ;;  %v12517_v0 = vsel %vm23356_vm5, %v12512_v54, %v25614_v56  ;;  %v22643_v56 = vld [vmem:[%s23338_s9 + $0x244] sm:$0xff]  }
 0x327   : > { %v25698_v59 = vsel %vm23862_vm8, %v4084_v27, %v4085_v32  ;;  %v12558_v25 = vshll.u32 %v18972_v28, 16  ;;  %v12531_v38 = vor.u32 %v12530_v5, %v12526_v57  ;;  %v17818_v46 = vrot.slane %v3760_v33, 9 }
 0x328   : > { %v12568_v13 = vshll.u32 %v18973_v20, 16  ;;  %v12572_v48 = vshrl.u32 %v18973_v20, 16  ;;  %v12527_v9 = vsel %vm23356_vm5, %v12522_v2, %v12526_v57  ;;  %v12541_v41 = vor.u32 %v12540_v10, %v25683_v63 }
 0x329   : > { %20585 = vmatmul.mubr.msk.bf16.gmra.mrb[36].mxu1 %vm1936_vm4, %v29521_v17  ;;  %v12578_v15 = vshll.u32 %v18974_v34, 16  ;;  %v12582_v45 = vshrl.u32 %v18974_v34, 16  ;;  %v4091_v54 = vrot.slane %v4089_v4, 4  ;;  %v22927_v17 = vld [vmem:[%s23338_s9 + $0x184] sm:$0xf]  ;;  %v12551_v32 = vrot.slane %v12549_v22, 4 }
 0x32a   : > { %21169 = vmatmul.mubr.msk.bf16.gmra.mrb[100].mxu0 %vm1936_vm4, %v22640_v11  ;;  %20588 = vmatprep.mubr.msk.bf16.mxu1 %vm1936_vm4, %v29522_v16  ;;  %v12562_v11 = vshrl.u32 %v18972_v28, 16  ;;  %v4092_v27 = vrot.slane %v22927_v17, 5  ;;  %v12554_v16 = vrot.slane %v12552_v39, 5  ;;  %v25706_v5 = vcombine.low %v12493_v58, %v12503_v7  ;;  %v18976_v22 = vld [vmem:[%s23338_s9 + $0x78] sm:$0xf] }
 0x32b   : > { %21172 = vmatprep.mubr.msk.bf16.mxu0 %vm1936_vm4, %v22641_v12  ;;  %v22642_v12 = vld [vmem:[%s23338_s9 + $0x238] sm:$0xff]   ;;  %v25710_v20 = vrot.slane %v12558_v25, 5  ;;  %v25712_v2 = vcombine.low %v12517_v0, %v12527_v9  ;;  %v25714_v10 = vrot.slane %v12531_v38, 4  ;;  %v25716_v33 = vrot.slane %v12568_v13, 5  ;;  %v18975_v38 = vld [vmem:[%s23338_s9 + $0x74] sm:$0x1] }
 0x32c   : > { %v12564_v57 = vrot.slane %v12562_v11, 4  ;;  %v12574_v42 = vrot.slane %v12572_v48, 4  ;;  %v29523_v58 = vcombine.low %v25345_v30, %v25349_v52  ;;  %v25724_v7 = vrot.slane %v12541_v41, 4  ;;  %v18977_v25 = vld [vmem:[%s23338_s9 + $0x7c] sm:$0xf] }
 0x32d   : > { %v25726_v39 = vrot.slane %v12544_v8, 5  ;;  %v25728_v34 = vrot.slane %v12578_v15, 5  ;;  %v12584_v0 = vrot.slane %v12582_v45, 4  ;;  %v29524_v11 = vcombine.low %v25353_v44, %v25359_v1  ;;  %v22928_v44 = vld [vmem:[%s23338_s9 + $0x188] sm:$0xf]  ;;  %v22644_v15 = vld [vmem:[%s23338_s9 + $0x24c] sm:$0xff]  }
 0x32e   : > { %v25738_v30 = vsel %vm23862_vm8, %v17818_v46, %v4089_v4  ;;  %v25742_v52 = vsel %vm23862_vm8, %v4091_v54, %v4092_v27  ;;  %v12555_v8 = vor.u32 %v12554_v16, %v12551_v32  ;;  %v12565_v13 = vor.u32 %v12564_v57, %v25710_v20  ;;  %v3761_v17 = vld [vmem:[%s23338_s9 + $0x190] sm:$0xe]  ;;  %v22929_v32 = vld [vmem:[%s23338_s9 + $0x194] sm:$0xf]  ;;  %v22645_v57 = vld [vmem:[%s23338_s9 + $0x258] sm:$0xff]  }
 0x32f   : > { %v4095_v1 = vrot.slane %v22928_v44, 5  ;;  %v12593_v48 = vshrl.u32 %v18976_v22, 16  ;;  %v12537_v4 = vsel %vm23356_vm5, %v25714_v10, %v25683_v63  ;;  %v12575_v46 = vor.u32 %v12574_v42, %v25716_v33  ;;  %v18978_v44 = vld [vmem:[%s23338_s9 + $0x80] sm:$0xf] }
 0x330   : > { %v12602_v9 = vshll.u32 %v18977_v25, 16  ;;  %v12606_v41 = vshrl.u32 %v18977_v25, 16  ;;  %v12547_v45 = vsel %vm23356_vm5, %v25724_v7, %v25726_v39  ;;  %v12588_v54 = vshll.u32 %v18975_v38, 16 }
 0x331   : > { %20589 = vmatmul.mubr.msk.bf16.gmra.mrb[40].mxu1 %vm1936_vm4, %v29523_v58  ;;  %v4102_v16 = vrot.slane %v22929_v32, 5  ;;  %v12556_v10 = vrot.slane %v12555_v8, 4  ;;  %v4094_v42 = vrot.slane %v4092_v27, 4  ;;  %v12566_v25 = vrot.slane %v12565_v13, 4 }
 0x332   : > { %21173 = vmatmul.mubr.msk.bf16.gmra.mrb[104].mxu0 %vm1936_vm4, %v22642_v12  ;;  %20592 = vmatprep.mubr.msk.bf16.mxu1 %vm1936_vm4, %v29524_v11  ;;  %v12596_v12 = vshll.u32 %v18976_v22, 16  ;;  %v22930_v22 = vld [vmem:[%s23338_s9 + $0x18c] sm:$0x1]  ;;  %v4097_v11 = vrot.slane %v4095_v1, 4  ;;  %v12595_v7 = vrot.slane %v12593_v48, 4  ;;  %v17819_v38 = vrot.slane %v3761_v17, 9 }
 0x333   : > { %21176 = vmatprep.mubr.msk.bf16.mxu0 %vm1936_vm4, %v22643_v56  ;;  %v12585_v56 = vor.u32 %v12584_v0, %v25728_v34  ;;  %v4098_v58 = vrot.slane %v22930_v22, 5  ;;  %v12576_v0 = vrot.slane %v12575_v46, 4  ;;  %v25765_v28 = vrot.slane %v12602_v9, 5  ;;  %v22931_v22 = vld [vmem:[%s23338_s9 + $0x198] sm:$0xf] }
 0x334   : > { %v12598_v39 = vrot.slane %v12596_v12, 5  ;;  %v12608_v32 = vrot.slane %v12606_v41, 4  ;;  %v29525_v43 = vcombine.low %v25363_v31, %v25367_v35  ;;  %v12590_v8 = vrot.slane %v12588_v54, 5  ;;  %v29526_v12 = vld [vmem:[#allocation7_spill] sm:$0xff] }
 0x335   : > { %v12586_v27 = vrot.slane %v12585_v56, 4  ;;  %v4104_v13 = vrot.slane %v4102_v16, 4  ;;  %v4105_v48 = vrot.slane %v22931_v22, 5  ;;  %v29527_v46 = vcombine.low %v25379_v3, %v29526_v12  ;;  %v22933_v22 = vld [vmem:[%s23338_s9 + $0x1a0] sm:$0x1] }
 0x336   : > { %v12561_v31 = vsel %vm23356_vm5, %v12556_v10, %v25710_v20  ;;  %v25784_v35 = vsel %vm23862_vm8, %v4094_v42, %v4095_v1  ;;  %v12616_v9 = vshrl.u32 %v18978_v44, 16  ;;  %v25788_v41 = vsel %vm23862_vm8, %v4097_v11, %v4098_v58  ;;  %v22647_v10 = vld [vmem:[%s23338_s9 + $0x26c] sm:$0xff]   ;;  %v22932_v58 = vld [vmem:[%s23338_s9 + $0x19c] sm:$0xf]  ;;  %v18983_v12 = vld [vmem:[%s23338_s9 + $0x94] sm:$0xf] }
 0x337   : > { %v12599_v3 = vor.u32 %v12598_v39, %v12595_v7  ;;  %v12626_v56 = vshrl.u32 %v18979_v49, 16  ;;  %v12571_v54 = vsel %vm23356_vm5, %v12566_v25, %v25716_v33  ;;  %v12581_v20 = vsel %vm23356_vm5, %v12576_v0, %v25728_v34  ;;  %v18981_v39 = vld [vmem:[%s23338_s9 + $0x8c] sm:$0xf] }
 0x338   : > { %v25798_v1 = vsel %vm23862_vm8, %v17819_v38, %v4102_v16  ;;  %v12609_v17 = vor.u32 %v12608_v32, %v25765_v28  ;;  %v25807_v33 = vsel %vm23862_vm8, %v4104_v13, %v4105_v48  ;;  %v4107_v42 = vrot.slane %v4105_v48, 4 }
 0x339   : > { %20593 = vmatmul.mubr.msk.bf16.gmra.mrb[44].mxu1 %vm1936_vm4, %v29525_v43  ;;  %v12612_v43 = vshll.u32 %v18978_v44, 16  ;;  %29528 = vst [vmem:[#allocation6_spill] sm:$0xff] %v25798_v1  ;;  %29529 = vst [vmem:[#allocation19_spill] sm:$0xff] %v25807_v33  ;;  %v4108_v34 = vrot.slane %v22932_v58, 5  ;;  %v25810_v25 = vcombine.low %v12537_v4, %v12547_v45  ;;  %v18980_v44 = vld [vmem:[%s23338_s9 + $0x88] sm:$0x1]  ;;  %v25816_v0 = vcombine.low %v12561_v31, %v12571_v54 }
 0x33a   : > { %21177 = vmatmul.mubr.msk.bf16.gmra.mrb[108].mxu0 %vm1936_vm4, %v22644_v15  ;;  %20596 = vmatprep.mubr.msk.bf16.mxu1 %vm1936_vm4, %v29527_v46  ;;  %v12622_v15 = vshll.u32 %v18979_v49, 16  ;;  %v12591_v49 = vsel %vm23356_vm5, %v12586_v27, %v12590_v8  ;;  %v12618_v7 = vrot.slane %v12616_v9, 4  ;;  %v12600_v38 = vrot.slane %v12599_v3, 4  ;;  %v18982_v8 = vld [vmem:[%s23338_s9 + $0x90] sm:$0xf] }
 0x33b   : > { %21180 = vmatprep.mubr.msk.bf16.mxu0 %vm1936_vm4, %v22645_v57  ;;  %v22646_v57 = vld [vmem:[%s23338_s9 + $0x260] sm:$0xff]   ;;  %v12614_v11 = vrot.slane %v12612_v43, 5  ;;  %v12628_v27 = vrot.slane %v12626_v56, 4  ;;  %v25821_v13 = vcombine.low %v12581_v20, %v12591_v49  ;;  %v12610_v45 = vrot.slane %v12609_v17, 4  ;;  %v29536_v1 = vld [vmem:[#allocation9_spill] sm:$0xff] }
 0x33c   : > { %v25818_v32 = vrot.slane %v12622_v15, 5  ;;  %v4111_v48 = vrot.slane %v22933_v22, 5  ;;  %v29530_v46 = vcombine.low %v25399_v36, %v25414_v24  ;;  %v25834_v31 = vsel %vm23862_vm8, %v4107_v42, %v4108_v34  ;;  %v18984_v15 = vld [vmem:[%s23338_s9 + $0x98] sm:$0xf]  ;;  %v3762_v54 = vld [vmem:[%s23338_s9 + $0x1a4] sm:$0xe] }
 0x33d   : > { %v4110_v43 = vrot.slane %v4108_v34, 4  ;;  %v12637_v9 = vshrl.u32 %v18981_v39, 16  ;;  %v12640_v3 = vshll.u32 %v18981_v39, 16  ;;  %v29531_v56 = vcombine.low %v25420_v6, %v25424_v40  ;;  %v22649_v39 = vld [vmem:[%s23338_s9 + $0x280] sm:$0xff]  }
 0x33e   : > { %v12619_v36 = vor.u32 %v12618_v7, %v12614_v11  ;;  %v12632_v24 = vshll.u32 %v18980_v44, 16  ;;  %v12646_v20 = vshll.u32 %v18982_v8, 16  ;;  %v12650_v17 = vshrl.u32 %v18982_v8, 16  ;;  %v22648_v7 = vld [vmem:[%s23338_s9 + $0x274] sm:$0xff]  }
 0x33f   : > { %v12629_v49 = vor.u32 %v12628_v27, %v25818_v32  ;;  %v12656_v42 = vshll.u32 %v18983_v12, 16  ;;  %v12660_v6 = vshrl.u32 %v18983_v12, 16  ;;  %v12615_v40 = vsel %vm23356_vm5, %v12610_v45, %v12614_v11  ;;  %v22935_v12 = vld [vmem:[%s23338_s9 + $0x1ac] sm:$0xf] }
 0x340   : > { %v12666_v34 = vshll.u32 %v18984_v15, 16  ;;  %v12670_v44 = vshrl.u32 %v18984_v15, 16  ;;  %v25854_v8 = vsel %vm23862_vm8, %v4110_v43, %v4111_v48  ;;  %v12642_v27 = vrot.slane %v12640_v3, 5  ;;  %v18985_v3 = vld [vmem:[%s23338_s9 + $0x9c] sm:$0x1] }
 0x341   : > { %20597 = vmatmul.mubr.msk.bf16.gmra.mrb[48].mxu1 %vm1936_vm4, %v29530_v46  ;;  %v25856_v22 = vrot.slane %v12619_v36, 4  ;;  %v4118_v46 = vrot.slane %v22935_v12, 5  ;;  %v25859_v11 = vrot.slane %v12646_v20, 5  ;;  %v12652_v45 = vrot.slane %v12650_v17, 4 }
 0x342   : > { %21181 = vmatmul.mubr.msk.bf16.gmra.mrb[112].mxu0 %vm1936_vm4, %v22646_v57  ;;  %20600 = vmatprep.mubr.msk.bf16.mxu1 %vm1936_vm4, %v29531_v56  ;;  %v12605_v57 = vsel %vm23356_vm5, %v12600_v38, %v25765_v28  ;;  %v17820_v28 = vrot.slane %v3762_v54, 9  ;;  %v12639_v38 = vrot.slane %v12637_v9, 4  ;;  %v18986_v56 = vld [vmem:[%s23338_s9 + $0xa0] sm:$0xf]  ;;  %v25862_v15 = vrot.slane %v12629_v49, 4 }
 0x343   : > { %21184 = vmatprep.mubr.msk.bf16.mxu0 %vm1936_vm4, %v22647_v10  ;;  %v22934_v10 = vld [vmem:[%s23338_s9 + $0x1a8] sm:$0xf]  ;;  %v25866_v4 = vrot.slane %v12656_v42, 5  ;;  %v12662_v48 = vrot.slane %v12660_v6, 4  ;;  %v25868_v43 = vcombine.low %v12605_v57, %v12615_v40  ;;  %v25871_v36 = vrot.slane %v12666_v34, 5 }
 0x344   : > { %v4115_v58 = vrot.slane %v22934_v10, 5  ;;  %v25864_v10 = vrot.slane %v12632_v24, 5  ;;  %v12672_v54 = vrot.slane %v12670_v44, 4  ;;  %v29533_v20 = vcombine.low %v25431_v60, %v25439_v14  ;;  %v18987_v57 = vld [vmem:[%s23338_s9 + $0xa4] sm:$0xf] }
 0x345   : > { %29532 = vst [vmem:[#allocation20_spill] sm:$0xff] %v25868_v43  ;;  %v12643_v17 = vor.u32 %v12642_v27, %v12639_v38  ;;  %v12681_v49 = vshrl.u32 %v18986_v56, 16  ;;  %v12684_v42 = vshll.u32 %v18986_v56, 16  ;;  %v29534_v6 = vcombine.low %v25443_v23, %v25454_v61  ;;  %v22650_v38 = vld [vmem:[%s23338_s9 + $0x288] sm:$0xff]  }
 0x346   : > { %v4117_v9 = vrot.slane %v4115_v58, 4  ;;  %v25880_v24 = vsel %vm23862_vm8, %v17820_v28, %v4115_v58  ;;  %v12653_v14 = vor.u32 %v12652_v45, %v25859_v11  ;;  %v4120_v40 = vrot.slane %v4118_v46, 4  ;;  %v22936_v58 = vld [vmem:[%s23338_s9 + $0x1b0] sm:$0xf] }
 0x347   : > { %v4121_v34 = vrot.slane %v22936_v58, 5  ;;  %v12635_v23 = vsel %vm23356_vm5, %v25862_v15, %v25864_v10  ;;  %v12663_v61 = vor.u32 %v12662_v48, %v25866_v4  ;;  %v12676_v44 = vshll.u32 %v18985_v3, 16  ;;  %v22938_v15 = vld [vmem:[%s23338_s9 + $0x1b4] sm:$0x1]  ;;  %v18988_v48 = vld [vmem:[%s23338_s9 + $0xa8] sm:$0xf] }
 0x348   : > { %v25904_v27 = vsel %vm23862_vm8, %v4117_v9, %v4118_v46  ;;  %v12673_v12 = vor.u32 %v12672_v54, %v25871_v36  ;;  %v12690_v45 = vshll.u32 %v18987_v57, 16  ;;  %v12694_v56 = vshrl.u32 %v18987_v57, 16  ;;  %v22651_v58 = vld [vmem:[%s23338_s9 + $0x294] sm:$0xff]   ;;  %v18989_v9 = vld [vmem:[%s23338_s9 + $0xac] sm:$0xf] }
 0x349   : > { %20601 = vmatmul.mubr.msk.bf16.gmra.mrb[52].mxu1 %vm1936_vm4, %v29533_v20  ;;  %v12644_v20 = vrot.slane %v12643_v17, 4  ;;  %v4124_v10 = vrot.slane %v22938_v15, 5  ;;  %v12686_v3 = vrot.slane %v12684_v42, 5  ;;  %v12654_v16 = vrot.slane %v12653_v14, 4  ;;  %v22939_v57 = vld [vmem:[%s23338_s9 + $0x1c0] sm:$0xf] }
 0x34a   : > { %21185 = vmatmul.mubr.msk.bf16.gmra.mrb[116].mxu0 %vm1936_vm4, %v22648_v7  ;;  %20604 = vmatprep.mubr.msk.bf16.mxu1 %vm1936_vm4, %v29534_v6  ;;  %v3763_v7 = vld [vmem:[%s23338_s9 + $0x1b8] sm:$0xe]  ;;  %v12683_v6 = vrot.slane %v12681_v49, 4  ;;  %v4123_v63 = vrot.slane %v4121_v34, 4  ;;  %v12664_v19 = vrot.slane %v12663_v61, 4  ;;  %v12678_v54 = vrot.slane %v12676_v44, 5 }
 0x34b   : > { %21188 = vmatprep.mubr.msk.bf16.mxu0 %vm1936_vm4, %v22649_v39  ;;  %v22937_v39 = vld [vmem:[%s23338_s9 + $0x1bc] sm:$0xf]  ;;  %v17821_v46 = vrot.slane %v3763_v7, 9  ;;  %v4131_v43 = vrot.slane %v22939_v57, 5  ;;  %v12674_v17 = vrot.slane %v12673_v12, 4  ;;  %v25916_v33 = vrot.slane %v12690_v45, 5 }
 0x34c   : > { %v4128_v28 = vrot.slane %v22937_v39, 5  ;;  %v25912_v39 = vsel %vm23862_vm8, %v4120_v40, %v4121_v34  ;;  %v12696_v15 = vrot.slane %v12694_v56, 4  ;;  %v12700_v49 = vshll.u32 %v18988_v48, 16  ;;  %v29535_v42 = vld [vmem:[#allocation8_spill] sm:$0xff]  ;;  %v29538_v7 = vld [vmem:[#allocation10_spill] sm:$0xff]  ;;  %v29539_v57 = vld [vmem:[#allocation11_spill] sm:$0xff] }
 0x34d   : > { %v29537_v14 = vcombine.low %v29535_v42, %v29536_v1  ;;  %v12687_v40 = vor.u32 %v12686_v3, %v12683_v6  ;;  %v12704_v34 = vshrl.u32 %v18988_v48, 16  ;;  %v12710_v61 = vshll.u32 %v18989_v9, 16 }
 0x34e   : > { %v4130_v60 = vrot.slane %v4128_v28, 4  ;;  %v12714_v44 = vshrl.u32 %v18989_v9, 16  ;;  %v29540_v12 = vcombine.low %v29538_v7, %v29539_v57  ;;  %v12649_v1 = vsel %vm23356_vm5, %v12644_v20, %v25859_v11  ;;  %v22652_v20 = vld [vmem:[%s23338_s9 + $0x29c] sm:$0xff]  }
 0x34f   : > { %v25936_v45 = vsel %vm23862_vm8, %v4123_v63, %v4124_v10  ;;  %v12669_v56 = vsel %vm23356_vm5, %v12664_v19, %v25871_v36  ;;  %v25943_v48 = vsel %vm23862_vm8, %v17821_v46, %v4128_v28  ;;  %v4133_v11 = vrot.slane %v4131_v43, 4  ;;  %v22940_v19 = vld [vmem:[%s23338_s9 + $0x1c4] sm:$0xf]  ;;  %v18990_v10 = vld [vmem:[%s23338_s9 + $0xb0] sm:$0x1] }
 0x350   : > { %29541 = vst [vmem:[#allocation21_spill] sm:$0xff] %v25943_v48  ;;  %v25947_v6 = vsel %vm23862_vm8, %v4130_v60, %v4131_v43  ;;  %v12697_v63 = vor.u32 %v12696_v15, %v25916_v33  ;;  %v4134_v36 = vrot.slane %v22940_v19, 5  ;;  %v25956_v28 = vrot.slane %v12687_v40, 4  ;;  %v18991_v15 = vld [vmem:[%s23338_s9 + $0xb4] sm:$0xf] }
 0x351   : > { %20605 = vmatmul.mubr.msk.bf16.gmra.mrb[56].mxu1 %vm1936_vm4, %v29537_v14  ;;  %29542 = vst [vmem:[#allocation22_spill] sm:$0xff] %v25947_v6  ;;  %v12706_v60 = vrot.slane %v12704_v34, 4  ;;  %v25959_v3 = vrot.slane %v12710_v61, 5  ;;  %v12716_v43 = vrot.slane %v12714_v44, 4  ;;  %v29543_v46 = vsel %vm23356_vm5, %v25856_v22, %v25818_v32  ;;  %v22941_v32 = vld [vmem:[%s23338_s9 + $0x1c8] sm:$0x1] }
 0x352   : > { %21189 = vmatmul.mubr.msk.bf16.gmra.mrb[120].mxu0 %vm1936_vm4, %v22650_v38  ;;  %20608 = vmatprep.mubr.msk.bf16.mxu1 %vm1936_vm4, %v29540_v12  ;;  %v12659_v38 = vsel %vm23356_vm5, %v12654_v16, %v25866_v4  ;;  %v12679_v16 = vsel %vm23356_vm5, %v12674_v17, %v12678_v54  ;;  %v25953_v4 = vrot.slane %v12700_v49, 5  ;;  %v25968_v9 = vcombine.low %v29543_v46, %v12635_v23  ;;  %v18992_v23 = vld [vmem:[%s23338_s9 + $0xb8] sm:$0xf]  ;;  %v18993_v40 = vld [vmem:[%s23338_s9 + $0xbc] sm:$0xf]  ;;  %v29545_v12 = vld [vmem:[#allocation12_spill] sm:$0xff] }
 0x353   : > { %21192 = vmatprep.mubr.msk.bf16.mxu0 %vm1936_vm4, %v22651_v58  ;;  %v25972_v17 = vcombine.low %v12649_v1, %v12659_v38  ;;  %v25977_v42 = vcombine.low %v12669_v56, %v12679_v16  ;;  %v4137_v22 = vrot.slane %v22941_v32, 5  ;;  %v12698_v34 = vrot.slane %v12697_v63, 4  ;;  %v18994_v57 = vld [vmem:[%s23338_s9 + $0xc0] sm:$0xf]  ;;  %v29546_v1 = vld [vmem:[#allocation13_spill] sm:$0xff] }
 0x354   : > { %v25986_v61 = vsel %vm23862_vm8, %v4133_v11, %v4134_v36  ;;  %v4136_v44 = vrot.slane %v4134_v36, 4  ;;  %v12720_v7 = vshll.u32 %v18990_v10, 16  ;;  %v29547_v38 = vcombine.low %v29545_v12, %v29546_v1  ;;  %v3764_v63 = vld [vmem:[%s23338_s9 + $0x1cc] sm:$0xe]  ;;  %v22942_v19 = vld [vmem:[%s23338_s9 + $0x1d0] sm:$0xf] }
 0x355   : > { %29544 = vst [vmem:[#allocation23_spill] sm:$0xff] %v25977_v42  ;;  %v12693_v56 = vsel %vm23356_vm5, %v25956_v28, %v25916_v33  ;;  %v12707_v16 = vor.u32 %v12706_v60, %v25953_v4  ;;  %v12717_v11 = vor.u32 %v12716_v43, %v25959_v3  ;;  %v4141_v36 = vrot.slane %v22942_v19, 5  ;;  %v29548_v10 = vld [vmem:[#allocation14_spill] sm:$0xff]  ;;  %v29549_v46 = vld [vmem:[#allocation15_spill] sm:$0xff]  ;;  %v18997_v42 = vld [vmem:[%s23338_s9 + $0xcc] sm:$0xf] }
 0x356   : > { %v29550_v32 = vcombine.low %v29548_v10, %v29549_v46  ;;  %v29551_v12 = vld [vmem:[#allocation18_spill] sm:$0xff]  ;;  %v12728_v1 = vshll.u32 %v18991_v15, 16  ;;  %v12734_v33 = vshll.u32 %v18992_v23, 16  ;;  %v12738_v28 = vshrl.u32 %v18992_v23, 16  ;;  %v22943_v23 = vld [vmem:[%s23338_s9 + $0x1d4] sm:$0xf] }
 0x357   : > { %v12744_v60 = vshll.u32 %v18993_v40, 16  ;;  %v12754_v43 = vshll.u32 %v18994_v57, 16  ;;  %v12758_v14 = vshrl.u32 %v18994_v57, 16  ;;  %v12703_v19 = vsel %vm23356_vm5, %v12698_v34, %v25953_v4 }
 0x358   : > { %v26013_v10 = vsel %vm23862_vm8, %v4136_v44, %v4137_v22  ;;  %v12722_v46 = vrot.slane %v12720_v7, 5  ;;  %v4143_v49 = vrot.slane %v4141_v36, 4  ;;  %v4144_v54 = vrot.slane %v22943_v23, 5 }
 0x359   : > { %20609 = vmatmul.mubr.msk.bf16.gmra.mrb[60].mxu1 %vm1936_vm4, %v29547_v38  ;;  %v12748_v38 = vshrl.u32 %v18993_v40, 16  ;;  %v18996_v40 = vld [vmem:[%s23338_s9 + $0xc8] sm:$0xf]  ;;  %v12730_v6 = vrot.slane %v12728_v1, 5  ;;  %v26017_v57 = vrot.slane %v12734_v33, 5  ;;  %v12740_v48 = vrot.slane %v12738_v28, 4 }
 0x35a   : > { %21193 = vmatmul.mubr.msk.bf16.gmra.mrb[124].mxu0 %vm1936_vm4, %v22652_v20  ;;  %20612 = vmatprep.mubr.msk.bf16.mxu1 %vm1936_vm4, %v29550_v32  ;;  %v12725_v20 = vshrl.u32 %v18991_v15, 16  ;;  %v17822_v32 = vrot.slane %v3764_v63, 9  ;;  %v12718_v15 = vrot.slane %v12717_v11, 4  ;;  %v26020_v4 = vrot.slane %v12744_v60, 5  ;;  %v18995_v11 = vld [vmem:[%s23338_s9 + $0xc4] sm:$0x1] }
 0x35b   : > { %21198 = vmatprep.mubr.msk.bf16.mxu0 %vm1936_vm4, %v29551_v12  ;;  %v12708_v12 = vrot.slane %v12707_v16, 4  ;;  %v12750_v34 = vrot.slane %v12748_v38, 4  ;;  %v26022_v22 = vrot.slane %v12754_v43, 5  ;;  %v12760_v44 = vrot.slane %v12758_v14, 4  ;;  %v29553_v1 = vld [vmem:[#allocation16_spill] sm:$0xff]  ;;  %v29554_v33 = vld [vmem:[#allocation17_spill] sm:$0xff] }
 0x35c   : > { %v12727_v58 = vrot.slane %v12725_v20, 4  ;;  %v26028_v16 = vsel %vm23862_vm8, %v17822_v32, %v4141_v36  ;;  %v12769_v63 = vshrl.u32 %v18996_v40, 16  ;;  %v12772_v20 = vshll.u32 %v18996_v40, 16  ;;  %v29557_v43 = vld [vmem:[#allocation24_spill] sm:$0xff] }
 0x35d   : > { %29552 = vst [vmem:[#allocation7_spill] sm:$0xff] %v26028_v16  ;;  %v29555_v28 = vcombine.low %v29553_v1, %v29554_v33  ;;  %v12713_v14 = vsel %vm23356_vm5, %v12708_v12, %v25959_v3  ;;  %v26042_v60 = vsel %vm23862_vm8, %v4143_v49, %v4144_v54  ;;  %v12778_v36 = vshll.u32 %v18997_v42, 16  ;;  %v22944_v49 = vld [vmem:[%s23338_s9 + $0x1d8] sm:$0xf] }
 0x35e   : > { %29556 = vst [vmem:[#allocation8_spill] sm:$0xff] %v26042_v60  ;;  %v12782_v38 = vshrl.u32 %v18997_v42, 16  ;;  %v29558_v32 = vcombine.low %v25591_v21, %v25597_v47  ;;  %v12731_v23 = vor.u32 %v12730_v6, %v12727_v58  ;;  %v12741_v3 = vor.u32 %v12740_v48, %v26017_v57  ;;  %v3765_v6 = vld [vmem:[%s23338_s9 + $0x1e0] sm:$0xe]  ;;  %v22945_v48 = vld [vmem:[%s23338_s9 + $0x1e4] sm:$0xf] }
 0x35f   : > { %v4147_v12 = vrot.slane %v22944_v49, 5  ;;  %v26055_v42 = vcombine.low %v12693_v56, %v12703_v19  ;;  %v12751_v40 = vor.u32 %v12750_v34, %v26020_v4  ;;  %v12761_v21 = vor.u32 %v12760_v44, %v26022_v22  ;;  %v18998_v56 = vld [vmem:[%s23338_s9 + $0xd0] sm:$0xf]  ;;  %v18999_v49 = vld [vmem:[%s23338_s9 + $0xd4] sm:$0xf] }
 0x360   : > { %v12764_v47 = vshll.u32 %v18995_v11, 16  ;;  %v4154_v58 = vrot.slane %v22945_v48, 5  ;;  %v12774_v1 = vrot.slane %v12772_v20, 5  ;;  %v26066_v19 = vrot.slane %v12778_v36, 5  ;;  %v22947_v20 = vld [vmem:[%s23338_s9 + $0x1e8] sm:$0xf] }
 0x361   : > { %20613 = vmatmul.mubr.msk.bf16.gmra.mrb[64].mxu1 %vm1936_vm4, %v29555_v28  ;;  %v12784_v34 = vrot.slane %v12782_v38, 4  ;;  %v12732_v44 = vrot.slane %v12731_v23, 4  ;;  %v12742_v28 = vrot.slane %v12741_v3, 4  ;;  %v4149_v11 = vrot.slane %v4147_v12, 4 }
 0x362   : > { %21199 = vmatmul.mubr.msk.bf16.vlgmr.msra.gmra.mrb[0].mxu0 %vm1936_vm4, %v25652_v55  ;;  %20616 = vmatprep.mubr.msk.bf16.mxu1 %vm1936_vm4, %v29558_v32  ;;  %v12723_v55 = vsel %vm23356_vm5, %v12718_v15, %v12722_v46  ;;  %v12771_v15 = vrot.slane %v12769_v63, 4  ;;  %v12752_v46 = vrot.slane %v12751_v40, 4  ;;  %v12762_v7 = vrot.slane %v12761_v21, 4  ;;  %v19002_v21 = vld [vmem:[%s23338_s9 + $0xe0] sm:$0xf] }
 0x363   : > { %21327 = vmatpush3.bf16.msra.mxu0 %v29557_v43  ;;  %21202 = vmatprep.mubr.msk.bf16.mxu0 %vm1936_vm4, %v25656_v50  ;;  %v26063_v33 = vcombine.low %v12713_v14, %v12723_v55  ;;  %v4146_v50 = vrot.slane %v4144_v54, 4  ;;  %v22946_v43 = vld [vmem:[%s23338_s9 + $0x1dc] sm:$0x1]  ;;  %v12766_v60 = vrot.slane %v12764_v47, 5  ;;  %v17823_v48 = vrot.slane %v3765_v6, 9 }
 0x364   : > { %v4150_v32 = vrot.slane %v22946_v43, 5  ;;  %v4156_v63 = vrot.slane %v4154_v58, 4  ;;  %v4157_v14 = vrot.slane %v22947_v20, 5  ;;  %v12775_v55 = vor.u32 %v12774_v1, %v12771_v15  ;;  %v22949_v20 = vld [vmem:[%s23338_s9 + $0x1f0] sm:$0x1] }
 0x365   : > { %v12788_v16 = vshll.u32 %v18998_v56, 16  ;;  %v29559_v54 = vcombine.low %v25611_v18, %v25628_v29  ;;  %v12785_v36 = vor.u32 %v12784_v34, %v26066_v19  ;;  %v12792_v38 = vshrl.u32 %v18998_v56, 16 }
 0x366   : > { %v12798_v23 = vshll.u32 %v18999_v49, 16  ;;  %v12802_v3 = vshrl.u32 %v18999_v49, 16  ;;  %v29560_v40 = vcombine.low %v25637_v62, %v25642_v53  ;;  %v12737_v18 = vsel %vm23356_vm5, %v12732_v44, %v26017_v57 }
 0x367   : > { %v26089_v29 = vsel %vm23862_vm8, %v4146_v50, %v4147_v12  ;;  %v12747_v62 = vsel %vm23356_vm5, %v12742_v28, %v26020_v4  ;;  %v12757_v53 = vsel %vm23356_vm5, %v12752_v46, %v26022_v22  ;;  %v26105_v57 = vsel %vm23862_vm8, %v17823_v48, %v4154_v58  ;;  %v19001_v12 = vld [vmem:[%s23338_s9 + $0xdc] sm:$0xf]  ;;  %v22948_v4 = vld [vmem:[%s23338_s9 + $0x1ec] sm:$0xf] }
 0x368   : > { %v26111_v47 = vsel %vm23862_vm8, %v4156_v63, %v4157_v14  ;;  %v12776_v6 = vrot.slane %v12775_v55, 4  ;;  %v12790_v15 = vrot.slane %v12788_v16, 5  ;;  %v4160_v1 = vrot.slane %v22948_v4, 5 }
 0x369   : > { %20617 = vmatmul.mubr.msk.bf16.gmra.mrb[68].mxu1 %vm1936_vm4, %v29559_v54  ;;  %v12786_v50 = vrot.slane %v12785_v36, 4  ;;  %v12794_v22 = vrot.slane %v12792_v38, 4  ;;  %v26114_v46 = vrot.slane %v12798_v23, 5  ;;  %v12813_v58 = vshrl.u32 %v19001_v12, 16  ;;  %v19004_v54 = vld [vmem:[%s23338_s9 + $0xe8] sm:$0xf] }
 0x36a   : > { %21203 = vmatmul.mubr.msk.bf16.gmra.mrb[4].mxu0 %vm1936_vm4, %v25706_v5  ;;  %20620 = vmatprep.mubr.msk.bf16.mxu1 %vm1936_vm4, %v29560_v40  ;;  %v26093_v5 = vsel %vm23862_vm8, %v4149_v11, %v4150_v32  ;;  %v12816_v56 = vshll.u32 %v19001_v12, 16  ;;  %v12822_v34 = vshll.u32 %v19002_v21, 16  ;;  %v12826_v44 = vshrl.u32 %v19002_v21, 16  ;;  %v19003_v32 = vld [vmem:[%s23338_s9 + $0xe4] sm:$0xf] }
 0x36b   : > { %21206 = vmatprep.mubr.msk.bf16.mxu0 %vm1936_vm4, %v25712_v2  ;;  %v12767_v2 = vsel %vm23356_vm5, %v12762_v7, %v12766_v60  ;;  %v12804_v7 = vrot.slane %v12802_v3, 4  ;;  %v19000_v60 = vld [vmem:[%s23338_s9 + $0xd8] sm:$0x1]  ;;  %v26117_v28 = vcombine.low %v12737_v18, %v12747_v62  ;;  %v17879_v16 = vcombine.low %v26089_v29, %v26093_v5 }
 0x36c   : > { %v26121_v11 = vcombine.low %v12757_v53, %v12767_v2  ;;  %v17880_v43 = vcombine.low %v26105_v57, %v26111_v47  ;;  %v12781_v49 = vsel %vm23356_vm5, %v12776_v6, %v26066_v19  ;;  %v4159_v48 = vrot.slane %v4157_v14, 4  ;;  %v3766_v14 = vld [vmem:[%s23338_s9 + $0x1f4] sm:$0xe]  ;;  %v22950_v21 = vld [vmem:[%s23338_s9 + $0x1f8] sm:$0xf] }
 0x36d   : > { %v4162_v63 = vrot.slane %v4160_v1, 4  ;;  %v4163_v55 = vrot.slane %v22949_v20, 5  ;;  %v29561_v36 = vcombine.low %v25681_v51, %v25698_v59  ;;  %v12791_v38 = vsel %vm23356_vm5, %v12786_v50, %v12790_v15 }
 0x36e   : > { %v12795_v23 = vor.u32 %v12794_v22, %v12790_v15  ;;  %v12805_v3 = vor.u32 %v12804_v7, %v26114_v46  ;;  %v12808_v19 = vshll.u32 %v19000_v60, 16  ;;  %v29562_v40 = vcombine.low %v25738_v30, %v25742_v52  ;;  %v22951_v22 = vld [vmem:[%s23338_s9 + $0x1fc] sm:$0xf]  ;;  %v19006_v60 = vld [vmem:[%s23338_s9 + $0xf0] sm:$0xf] }
 0x36f   : > { %v12815_v51 = vrot.slane %v12813_v58, 4  ;;  %v12818_v59 = vrot.slane %v12816_v56, 5  ;;  %v12828_v18 = vrot.slane %v12826_v44, 4  ;;  %v12832_v62 = vshll.u32 %v19003_v32, 16 }
 0x370   : > { %v12836_v53 = vshrl.u32 %v19003_v32, 16  ;;  %v12842_v2 = vshll.u32 %v19004_v54, 16  ;;  %v12846_v12 = vshrl.u32 %v19004_v54, 16  ;;  %v26151_v30 = vsel %vm23862_vm8, %v4159_v48, %v4160_v1  ;;  %v19007_v32 = vld [vmem:[%s23338_s9 + $0xf4] sm:$0xf] }
 0x371   : > { %20621 = vmatmul.mubr.msk.bf16.gmra.mrb[72].mxu1 %vm1936_vm4, %v29561_v36  ;;  %v26155_v52 = vsel %vm23862_vm8, %v4162_v63, %v4163_v55  ;;  %v4167_v6 = vrot.slane %v22950_v21, 5  ;;  %v26158_v15 = vcombine.low %v12781_v49, %v12791_v38  ;;  %v12796_v4 = vrot.slane %v12795_v23, 4  ;;  %v19005_v36 = vld [vmem:[%s23338_s9 + $0xec] sm:$0x1] }
 0x372   : > { %21207 = vmatmul.mubr.msk.bf16.gmra.mrb[8].mxu0 %vm1936_vm4, %v25810_v25  ;;  %20624 = vmatprep.mubr.msk.bf16.mxu1 %vm1936_vm4, %v29562_v40  ;;  %v26147_v25 = vrot.slane %v12822_v34, 5  ;;  %v12810_v50 = vrot.slane %v12808_v19, 5  ;;  %v4170_v7 = vrot.slane %v22951_v22, 5  ;;  %v12806_v58 = vrot.slane %v12805_v3, 4  ;;  %v22952_v34 = vld [vmem:[%s23338_s9 + $0x200] sm:$0xf] }
 0x373   : > { %21210 = vmatprep.mubr.msk.bf16.mxu0 %vm1936_vm4, %v25816_v0  ;;  %v17824_v0 = vrot.slane %v3766_v14, 9  ;;  %v12819_v56 = vor.u32 %v12818_v59, %v12815_v51  ;;  %v4173_v44 = vrot.slane %v22952_v34, 5  ;;  %v12834_v48 = vrot.slane %v12832_v62, 5  ;;  %v3767_v14 = vld [vmem:[%s23338_s9 + $0x208] sm:$0xe]  ;;  %v29564_v62 = vld [vmem:[#allocation6_spill] sm:$0xff] }
 0x374   : > { %v12829_v1 = vor.u32 %v12828_v18, %v26147_v25  ;;  %v12838_v63 = vrot.slane %v12836_v53, 4  ;;  %v26165_v20 = vrot.slane %v12842_v2, 5  ;;  %v12848_v49 = vrot.slane %v12846_v12, 4  ;;  %v22953_v40 = vld [vmem:[%s23338_s9 + $0x20c] sm:$0xf]  ;;  %v29565_v53 = vld [vmem:[#allocation19_spill] sm:$0xff] }
 0x375   : > { %v26169_v55 = vsel %vm23862_vm8, %v17824_v0, %v4167_v6  ;;  %v4169_v54 = vrot.slane %v4167_v6, 4  ;;  %v12857_v38 = vshrl.u32 %v19006_v60, 16  ;;  %v12860_v23 = vshll.u32 %v19006_v60, 16  ;;  %v22954_v0 = vld [vmem:[%s23338_s9 + $0x204] sm:$0x1] }
 0x376   : > { %v29563_v3 = vcombine.low %v25784_v35, %v25788_v41  ;;  %v12801_v19 = vsel %vm23356_vm5, %v12796_v4, %v26114_v46  ;;  %v4180_v51 = vrot.slane %v22953_v40, 5  ;;  %v12866_v59 = vshll.u32 %v19007_v32, 16  ;;  %v29567_v35 = vld [vmem:[#allocation20_spill] sm:$0xff] }
 0x377   : > { %v12870_v18 = vshrl.u32 %v19007_v32, 16  ;;  %v29566_v2 = vcombine.low %v29564_v62, %v29565_v53  ;;  %v12820_v41 = vrot.slane %v12819_v56, 4  ;;  %v4172_v12 = vrot.slane %v4170_v7, 4  ;;  %v22955_v62 = vld [vmem:[%s23338_s9 + $0x210] sm:$0xf] }
 0x378   : > { %v4176_v46 = vrot.slane %v22954_v0, 5  ;;  %v4175_v21 = vrot.slane %v4173_v44, 4  ;;  %v12839_v6 = vor.u32 %v12838_v63, %v12834_v48  ;;  %v12849_v4 = vor.u32 %v12848_v49, %v26165_v20  ;;  %v19008_v56 = vld [vmem:[%s23338_s9 + $0xf8] sm:$0xf] }
 0x379   : > { %20625 = vmatmul.mubr.msk.bf16.gmra.mrb[76].mxu1 %vm1936_vm4, %v29563_v3  ;;  %v12852_v22 = vshll.u32 %v19005_v36, 16  ;;  %v12811_v60 = vsel %vm23356_vm5, %v12806_v58, %v12810_v50  ;;  %v17825_v34 = vrot.slane %v3767_v14, 9  ;;  %v12859_v32 = vrot.slane %v12857_v38, 4 }
 0x37a   : > { %21211 = vmatmul.mubr.msk.bf16.gmra.mrb[12].mxu0 %vm1936_vm4, %v25821_v13  ;;  %20628 = vmatprep.mubr.msk.bf16.mxu1 %vm1936_vm4, %v29566_v2  ;;  %v12830_v13 = vrot.slane %v12829_v1, 4  ;;  %v12862_v3 = vrot.slane %v12860_v23, 5  ;;  %v4182_v40 = vrot.slane %v4180_v51, 4  ;;  %v4183_v53 = vrot.slane %v22955_v62, 5 }
 0x37b   : > { %21214 = vmatprep.mubr.msk.bf16.mxu0 %vm1936_vm4, %v29567_v35  ;;  %v26195_v2 = vrot.slane %v12866_v59, 5  ;;  %v12872_v1 = vrot.slane %v12870_v18, 4  ;;  %v26199_v35 = vsel %vm23862_vm8, %v4169_v54, %v4170_v7  ;;  %v12825_v63 = vsel %vm23356_vm5, %v12820_v41, %v26147_v25  ;;  %v22956_v18 = vld [vmem:[%s23338_s9 + $0x214] sm:$0xf]  ;;  %v22963_v41 = vld [vmem:[%s23338_s9 + $0x238] sm:$0xf] }
 0x37c   : > { %v12835_v50 = vsel %vm23356_vm5, %v12830_v13, %v12834_v48  ;;  %v26208_v58 = vsel %vm23862_vm8, %v4172_v12, %v4173_v44  ;;  %v26212_v49 = vsel %vm23862_vm8, %v4175_v21, %v4176_v46  ;;  %v26214_v36 = vrot.slane %v12839_v6, 4  ;;  %v19009_v13 = vld [vmem:[%s23338_s9 + $0xfc] sm:$0xf]  ;;  %v19010_v12 = vld [vmem:[%s23338_s9 + $0x100] sm:$0x1] }
 0x37d   : > { %v26216_v7 = vrot.slane %v12849_v4, 4  ;;  %v26218_v54 = vrot.slane %v12852_v22, 5  ;;  %v26222_v38 = vcombine.low %v12801_v19, %v12811_v60  ;;  %v12863_v48 = vor.u32 %v12862_v3, %v12859_v32  ;;  %v19011_v46 = vld [vmem:[%s23338_s9 + $0x104] sm:$0xf]  ;;  %v19012_v21 = vld [vmem:[%s23338_s9 + $0x108] sm:$0xf] }
 0x37e   : > { %v12876_v23 = vshll.u32 %v19008_v56, 16  ;;  %v29568_v44 = vcombine.low %v25834_v31, %v25854_v8  ;;  %v26232_v14 = vsel %vm23862_vm8, %v17825_v34, %v4180_v51  ;;  %v26236_v19 = vsel %vm23862_vm8, %v4182_v40, %v4183_v53  ;;  %v22957_v60 = vld [vmem:[%s23338_s9 + $0x218] sm:$0x1]  ;;  %v19013_v32 = vld [vmem:[%s23338_s9 + $0x10c] sm:$0xf] }
 0x37f   : > { %v12873_v59 = vor.u32 %v12872_v1, %v26195_v2  ;;  %v4186_v31 = vrot.slane %v22956_v18, 5  ;;  %v29569_v8 = vcombine.low %v25880_v24, %v25904_v27  ;;  %v26248_v51 = vcombine.low %v12825_v63, %v12835_v50  ;;  %v19014_v1 = vld [vmem:[%s23338_s9 + $0x110] sm:$0xf] }
 0x380   : > { %v12845_v24 = vsel %vm23356_vm5, %v26214_v36, %v26165_v20  ;;  %v12855_v27 = vsel %vm23356_vm5, %v26216_v7, %v26218_v54  ;;  %v12880_v0 = vshrl.u32 %v19008_v56, 16  ;;  %v12864_v4 = vrot.slane %v12863_v48, 4 }
 0x381   : > { %20629 = vmatmul.mubr.msk.bf16.gmra.mrb[80].mxu1 %vm1936_vm4, %v29568_v44  ;;  %v12878_v22 = vrot.slane %v12876_v23, 5  ;;  %v4189_v34 = vrot.slane %v22957_v60, 5  ;;  %v12874_v20 = vrot.slane %v12873_v59, 4  ;;  %v4188_v3 = vrot.slane %v4186_v31, 4 }
 0x382   : > { %21215 = vmatmul.mubr.msk.bf16.gmra.mrb[16].mxu0 %vm1936_vm4, %v25968_v9  ;;  %20632 = vmatprep.mubr.msk.bf16.mxu1 %vm1936_vm4, %v29569_v8  ;;  %v12886_v40 = vshll.u32 %v19009_v13, 16  ;;  %v12890_v62 = vshrl.u32 %v19009_v13, 16  ;;  %v12901_v63 = vshrl.u32 %v19011_v46, 16  ;;  %v12904_v50 = vshll.u32 %v19011_v46, 16  ;;  %v29571_v13 = vld [vmem:[#allocation23_spill] sm:$0xff]  ;;  %v29572_v46 = vld [vmem:[#allocation21_spill] sm:$0xff] }
 0x383   : > { %21218 = vmatprep.mubr.msk.bf16.mxu0 %vm1936_vm4, %v25972_v17  ;;  %v4185_v17 = vrot.slane %v4183_v53, 4  ;;  %v12910_v53 = vshll.u32 %v19012_v21, 16  ;;  %v12914_v56 = vshrl.u32 %v19012_v21, 16  ;;  %v12882_v7 = vrot.slane %v12880_v0, 4  ;;  %v26291_v0 = vld [vmem:[%s23338_s9 + $0x21c] sm:$0xe] }
 0x384   : > { %v12920_v54 = vshll.u32 %v19013_v32, 16  ;;  %v12924_v48 = vshrl.u32 %v19013_v32, 16  ;;  %v12869_v23 = vsel %vm23356_vm5, %v12864_v4, %v26195_v2  ;;  %v12896_v44 = vshll.u32 %v19010_v12, 16 }
 0x385   : > { %v26271_v36 = vsel %vm23862_vm8, %v4185_v17, %v4186_v31  ;;  %v12930_v59 = vshll.u32 %v19014_v1, 16  ;;  %v12934_v18 = vshrl.u32 %v19014_v1, 16  ;;  %v29570_v8 = vcombine.low %v25912_v39, %v25936_v45  ;;  %v29573_v39 = vld [vmem:[#allocation22_spill] sm:$0xff] }
 0x386   : > { %v12879_v31 = vsel %vm23356_vm5, %v12874_v20, %v12878_v22  ;;  %v26286_v17 = vsel %vm23862_vm8, %v4188_v3, %v4189_v34  ;;  %v26288_v2 = vrot.slane %v12886_v40, 5  ;;  %v12892_v12 = vrot.slane %v12890_v62, 4  ;;  %v22958_v20 = vld [vmem:[%s23338_s9 + $0x220] sm:$0xf] }
 0x387   : > { %v29574_v45 = vcombine.low %v29572_v46, %v29573_v39  ;;  %v12903_v21 = vrot.slane %v12901_v63, 4  ;;  %v12906_v4 = vrot.slane %v12904_v50, 5  ;;  %v26299_v60 = vrot.slane %v12910_v53, 5 }
 0x388   : > { %v12916_v34 = vrot.slane %v12914_v56, 4  ;;  %v12883_v32 = vor.u32 %v12882_v7, %v12878_v22  ;;  %v4193_v3 = vrot.slane %v22958_v20, 5  ;;  %v26302_v40 = vrot.slane %v12920_v54, 5  ;;  %v22959_v7 = vld [vmem:[%s23338_s9 + $0x224] sm:$0xf] }
 0x389   : > { %20633 = vmatmul.mubr.msk.bf16.gmra.mrb[84].mxu1 %vm1936_vm4, %v29570_v8  ;;  %v12926_v62 = vrot.slane %v12924_v48, 4  ;;  %v26304_v1 = vcombine.low %v12845_v24, %v12855_v27  ;;  %v17826_v8 = vrot.slane %v26291_v0, 9  ;;  %v26308_v63 = vrot.slane %v12930_v59, 5  ;;  %v19016_v24 = vld [vmem:[%s23338_s9 + $0x118] sm:$0xf] }
 0x38a   : > { %21219 = vmatmul.mubr.msk.bf16.gmra.mrb[20].mxu0 %vm1936_vm4, %v29571_v13  ;;  %20636 = vmatprep.mubr.msk.bf16.mxu1 %vm1936_vm4, %v29574_v45  ;;  %v12936_v50 = vrot.slane %v12934_v18, 4  ;;  %v26310_v53 = vcombine.low %v12869_v23, %v12879_v31  ;;  %v12893_v56 = vor.u32 %v12892_v12, %v26288_v2  ;;  %v4196_v54 = vrot.slane %v22959_v7, 5  ;;  %v22960_v59 = vld [vmem:[%s23338_s9 + $0x228] sm:$0xf]  ;;  %v19017_v18 = vld [vmem:[%s23338_s9 + $0x11c] sm:$0xf] }
 0x38b   : > { %21222 = vmatprep.mubr.msk.bf16.mxu0 %vm1936_vm4, %v26055_v42  ;;  %v19015_v42 = vld [vmem:[%s23338_s9 + $0x114] sm:$0x1]  ;;  %v26317_v27 = vrot.slane %v12896_v44, 5  ;;  %v12907_v48 = vor.u32 %v12906_v4, %v12903_v21  ;;  %v12917_v13 = vor.u32 %v12916_v34, %v26299_v60  ;;  %v4199_v0 = vrot.slane %v22960_v59, 5  ;;  %v3769_v12 = vld [vmem:[%s23338_s9 + $0x230] sm:$0xe] }
 0x38c   : > { %v12884_v23 = vrot.slane %v12883_v32, 4  ;;  %v4195_v31 = vrot.slane %v4193_v3, 4  ;;  %v12927_v46 = vor.u32 %v12926_v62, %v26302_v40  ;;  %v12940_v39 = vshll.u32 %v19015_v42, 16  ;;  %v22961_v20 = vld [vmem:[%s23338_s9 + $0x234] sm:$0xf]  ;;  %v29576_v42 = vld [vmem:[#allocation7_spill] sm:$0xff] }
 0x38d   : > { %v12937_v45 = vor.u32 %v12936_v50, %v26308_v63  ;;  %v4206_v7 = vrot.slane %v22961_v20, 5  ;;  %v12945_v22 = vshrl.u32 %v19016_v24, 16  ;;  %v12948_v44 = vshll.u32 %v19016_v24, 16  ;;  %v29577_v50 = vld [vmem:[#allocation8_spill] sm:$0xff] }
 0x38e   : > { %v29575_v21 = vcombine.low %v25986_v61, %v26013_v10  ;;  %v12894_v4 = vrot.slane %v12893_v56, 4  ;;  %v4198_v34 = vrot.slane %v4196_v54, 4  ;;  %v12954_v32 = vshll.u32 %v19017_v18, 16  ;;  %v22962_v20 = vld [vmem:[%s23338_s9 + $0x22c] sm:$0x1] }
 0x38f   : > { %v12958_v62 = vshrl.u32 %v19017_v18, 16  ;;  %v29578_v59 = vcombine.low %v29576_v42, %v29577_v50  ;;  %v12908_v24 = vrot.slane %v12907_v48, 4  ;;  %v12918_v61 = vrot.slane %v12917_v13, 4  ;;  %v19018_v13 = vld [vmem:[%s23338_s9 + $0x120] sm:$0xf] }
 0x390   : > { %v4201_v10 = vrot.slane %v4199_v0, 4  ;;  %v12928_v6 = vrot.slane %v12927_v46, 4  ;;  %v17827_v56 = vrot.slane %v3769_v12, 9  ;;  %v4209_v18 = vrot.slane %v22963_v41, 5  ;;  %v19022_v12 = vld [vmem:[%s23338_s9 + $0x130] sm:$0xf] }
 0x391   : > { %20637 = vmatmul.mubr.msk.bf16.gmra.mrb[88].mxu1 %vm1936_vm4, %v29575_v21  ;;  %v4202_v21 = vrot.slane %v22962_v20, 5  ;;  %v12938_v9 = vrot.slane %v12937_v45, 4  ;;  %v4208_v25 = vrot.slane %v4206_v7, 4  ;;  %v12947_v42 = vrot.slane %v12945_v22, 4 }
 0x392   : > { %21223 = vmatmul.mubr.msk.bf16.gmra.mrb[24].mxu0 %vm1936_vm4, %v26063_v33  ;;  %20640 = vmatprep.mubr.msk.bf16.mxu1 %vm1936_vm4, %v29578_v59  ;;  %v12942_v33 = vrot.slane %v12940_v39, 5  ;;  %v12950_v50 = vrot.slane %v12948_v44, 5  ;;  %v26345_v48 = vsel %vm23862_vm8, %v17826_v8, %v4193_v3  ;;  %v26348_v59 = vrot.slane %v12954_v32, 5  ;;  %v19019_v8 = vld [vmem:[%s23338_s9 + $0x124] sm:$0xf] }
 0x393   : > { %21226 = vmatprep.mubr.msk.bf16.mxu0 %vm1936_vm4, %v26117_v28  ;;  %v12889_v28 = vsel %vm23356_vm5, %v12884_v23, %v26288_v2  ;;  %v12960_v46 = vrot.slane %v12958_v62, 4  ;;  %v12899_v41 = vsel %vm23356_vm5, %v12894_v4, %v26317_v27  ;;  %v26355_v22 = vsel %vm23862_vm8, %v4195_v31, %v4196_v54  ;;  %v22964_v4 = vld [vmem:[%s23338_s9 + $0x23c] sm:$0xf]  ;;  %v22965_v32 = vld [vmem:[%s23338_s9 + $0x240] sm:$0x1] }
 0x394   : > { %v12913_v2 = vsel %vm23356_vm5, %v12908_v24, %v26299_v60  ;;  %v26362_v3 = vsel %vm23862_vm8, %v4198_v34, %v4199_v0  ;;  %v12923_v23 = vsel %vm23356_vm5, %v12918_v61, %v26302_v40  ;;  %v26370_v27 = vsel %vm23862_vm8, %v4201_v10, %v4202_v21  ;;  %v19023_v24 = vld [vmem:[%s23338_s9 + $0x134] sm:$0xf] }
 0x395   : > { %v12933_v54 = vsel %vm23356_vm5, %v12928_v6, %v26308_v63  ;;  %v26377_v60 = vsel %vm23862_vm8, %v17827_v56, %v4206_v7  ;;  %v12943_v0 = vsel %vm23356_vm5, %v12938_v9, %v12942_v33  ;;  %v26383_v31 = vsel %vm23862_vm8, %v4208_v25, %v4209_v18  ;;  %v19024_v33 = vld [vmem:[%s23338_s9 + $0x138] sm:$0xf]  ;;  %v3770_v56 = vld [vmem:[%s23338_s9 + $0x244] sm:$0xe] }
 0x396   : > { %v12951_v40 = vor.u32 %v12950_v50, %v12947_v42  ;;  %v12964_v39 = vshll.u32 %v19018_v13, 16  ;;  %v12961_v6 = vor.u32 %v12960_v46, %v26348_v59  ;;  %v12968_v9 = vshrl.u32 %v19018_v13, 16  ;;  %v22966_v46 = vld [vmem:[%s23338_s9 + $0x248] sm:$0xf] }
 0x397   : > { %v12974_v63 = vshll.u32 %v19019_v8, 16  ;;  %v12978_v25 = vshrl.u32 %v19019_v8, 16  ;;  %v26398_v29 = vcombine.low %v12889_v28, %v12899_v41  ;;  %v17886_v5 = vcombine.low %v26345_v48, %v26355_v22 }
 0x398   : > { %v26406_v45 = vcombine.low %v12933_v54, %v12943_v0  ;;  %v17888_v57 = vcombine.low %v26377_v60, %v26383_v31  ;;  %v4211_v47 = vrot.slane %v4209_v18, 4  ;;  %v26413_v7 = vrot.slane %v12951_v40, 4 }
 0x399   : > { %20641 = vmatmul.mubr.msk.bf16.gmra.mrb[92].mxu1 %vm1936_vm4, %v17879_v16  ;;  %v17887_v16 = vcombine.low %v26362_v3, %v26370_v27  ;;  %v26415_v44 = vrot.slane %v12964_v39, 5  ;;  %v4212_v34 = vrot.slane %v22964_v4, 5  ;;  %v4215_v62 = vrot.slane %v22965_v32, 5  ;;  %v22975_v27 = vld [vmem:[%s23338_s9 + $0x274] sm:$0xf] }
 0x39a   : > { %21227 = vmatmul.mubr.msk.bf16.gmra.mrb[28].mxu0 %vm1936_vm4, %v26121_v11  ;;  %20644 = vmatprep.mubr.msk.bf16.mxu1 %vm1936_vm4, %v17880_v43  ;;  %v26404_v11 = vcombine.low %v12913_v2, %v12923_v23  ;;  %v19020_v43 = vld [vmem:[%s23338_s9 + $0x128] sm:$0x1]  ;;  %v12962_v61 = vrot.slane %v12961_v6, 4  ;;  %v12970_v10 = vrot.slane %v12968_v9, 4  ;;  %v26420_v20 = vrot.slane %v12974_v63, 5 }
 0x39b   : > { %21230 = vmatprep.mubr.msk.bf16.mxu0 %vm1936_vm4, %v26158_v15  ;;  %v19021_v15 = vld [vmem:[%s23338_s9 + $0x12c] sm:$0xf]  ;;  %v12980_v21 = vrot.slane %v12978_v25, 4  ;;  %v12998_v50 = vshll.u32 %v19022_v12, 16  ;;  %v13002_v28 = vshrl.u32 %v19022_v12, 16  ;;  %v26426_v13 = vsel %vm23862_vm8, %v4211_v47, %v4212_v34 }
 0x39c   : > { %v12989_v18 = vshrl.u32 %v19021_v15, 16  ;;  %v12992_v42 = vshll.u32 %v19021_v15, 16  ;;  %v4219_v41 = vrot.slane %v22966_v46, 5  ;;  %v13008_v2 = vshll.u32 %v19023_v24, 16  ;;  %v22967_v25 = vld [vmem:[%s23338_s9 + $0x24c] sm:$0xf] }
 0x39d   : > { %v13012_v8 = vshrl.u32 %v19023_v24, 16  ;;  %v4214_v23 = vrot.slane %v4212_v34, 4  ;;  %v12984_v54 = vshll.u32 %v19020_v43, 16  ;;  %v13018_v0 = vshll.u32 %v19024_v33, 16  ;;  %v22968_v34 = vld [vmem:[%s23338_s9 + $0x250] sm:$0xf] }
 0x39e   : > { %v13022_v40 = vshrl.u32 %v19024_v33, 16  ;;  %v29579_v39 = vcombine.low %v26151_v30, %v26155_v52  ;;  %v12971_v6 = vor.u32 %v12970_v10, %v26415_v44  ;;  %v12981_v9 = vor.u32 %v12980_v21, %v26420_v20  ;;  %v22969_v46 = vld [vmem:[%s23338_s9 + $0x254] sm:$0x1] }
 0x39f   : > { %v17828_v63 = vrot.slane %v3770_v56, 9  ;;  %v4222_v47 = vrot.slane %v22967_v25, 5  ;;  %v29580_v43 = vcombine.low %v26169_v55, %v26199_v35  ;;  %v12991_v30 = vrot.slane %v12989_v18, 4 }
 0x3a0   : > { %v12994_v52 = vrot.slane %v12992_v42, 5  ;;  %v26444_v15 = vrot.slane %v12998_v50, 5  ;;  %v4221_v12 = vrot.slane %v4219_v41, 4  ;;  %v26446_v4 = vrot.slane %v13008_v2, 5  ;;  %v19025_v42 = vld [vmem:[%s23338_s9 + $0x13c] sm:$0x1] }
 0x3a1   : > { %20645 = vmatmul.mubr.msk.bf16.gmra.mrb[96].mxu1 %vm1936_vm4, %v29579_v39  ;;  %v4225_v32 = vrot.slane %v22968_v34, 5  ;;  %v13014_v24 = vrot.slane %v13012_v8, 4  ;;  %v12957_v55 = vsel %vm23356_vm5, %v26413_v7, %v26348_v59  ;;  %v12967_v35 = vsel %vm23356_vm5, %v12962_v61, %v26415_v44  ;;  %v19026_v61 = vld [vmem:[%s23338_s9 + $0x140] sm:$0xf] }
 0x3a2   : > { %21231 = vmatmul.mubr.msk.bf16.gmra.mrb[32].mxu0 %vm1936_vm4, %v26222_v38  ;;  %20648 = vmatprep.mubr.msk.bf16.mxu1 %vm1936_vm4, %v29580_v43  ;;  %v13004_v38 = vrot.slane %v13002_v28, 4  ;;  %v13024_v10 = vrot.slane %v13022_v40, 4  ;;  %v26460_v21 = vsel %vm23862_vm8, %v4214_v23, %v4215_v62  ;;  %v12972_v33 = vrot.slane %v12971_v6, 4  ;;  %v19027_v40 = vld [vmem:[%s23338_s9 + $0x144] sm:$0xf] }
 0x3a3   : > { %21234 = vmatprep.mubr.msk.bf16.mxu0 %vm1936_vm4, %v26248_v51  ;;  %v26456_v51 = vrot.slane %v13018_v0, 5  ;;  %v12982_v56 = vrot.slane %v12981_v9, 4  ;;  %v12986_v18 = vrot.slane %v12984_v54, 5  ;;  %v26465_v59 = vsel %vm23862_vm8, %v17828_v63, %v4219_v41  ;;  %v19028_v43 = vld [vmem:[%s23338_s9 + $0x148] sm:$0xf] }
 0x3a4   : > { %v12995_v7 = vor.u32 %v12994_v52, %v12991_v30  ;;  %v13005_v50 = vor.u32 %v13004_v38, %v26444_v15  ;;  %v4224_v44 = vrot.slane %v4222_v47, 4  ;;  %v26471_v28 = vsel %vm23862_vm8, %v4221_v12, %v4222_v47  ;;  %v22970_v52 = vld [vmem:[%s23338_s9 + $0x25c] sm:$0xf] }
 0x3a5   : > { %v4227_v62 = vrot.slane %v4225_v32, 4  ;;  %v4228_v2 = vrot.slane %v22969_v46, 5  ;;  %v13015_v8 = vor.u32 %v13014_v24, %v26446_v4  ;;  %v26475_v23 = vcombine.low %v12957_v55, %v12967_v35  ;;  %v22971_v46 = vld [vmem:[%s23338_s9 + $0x260] sm:$0xf] }
 0x3a6   : > { %v17889_v41 = vcombine.low %v26426_v13, %v26460_v21  ;;  %v13025_v54 = vor.u32 %v13024_v10, %v26456_v51  ;;  %v13028_v0 = vshll.u32 %v19025_v42, 16  ;;  %v29581_v39 = vcombine.low %v26208_v58, %v26212_v49 }
 0x3a7   : > { %v12977_v6 = vsel %vm23356_vm5, %v12972_v33, %v26420_v20  ;;  %v12987_v9 = vsel %vm23356_vm5, %v12982_v56, %v12986_v18  ;;  %v13033_v63 = vshrl.u32 %v19026_v61, 16  ;;  %v13036_v25 = vshll.u32 %v19026_v61, 16  ;;  %v19029_v33 = vld [vmem:[%s23338_s9 + $0x14c] sm:$0xf] }
 0x3a8   : > { %v29582_v47 = vcombine.low %v26232_v14, %v26236_v19  ;;  %v17890_v58 = vcombine.low %v26465_v59, %v26471_v28  ;;  %v12996_v49 = vrot.slane %v12995_v7, 4  ;;  %v26502_v20 = vsel %vm23862_vm8, %v4224_v44, %v4225_v32  ;;  %v3771_v19 = vld [vmem:[%s23338_s9 + $0x258] sm:$0xe]  ;;  %v19031_v44 = vld [vmem:[%s23338_s9 + $0x154] sm:$0xf] }
 0x3a9   : > { %20649 = vmatmul.mubr.msk.bf16.gmra.mrb[100].mxu1 %vm1936_vm4, %v29581_v39  ;;  %v26507_v30 = vsel %vm23862_vm8, %v4227_v62, %v4228_v2  ;;  %v13016_v14 = vrot.slane %v13015_v8, 4  ;;  %v13042_v38 = vshll.u32 %v19027_v40, 16  ;;  %v26511_v12 = vcombine.low %v12977_v6, %v12987_v9 }
 0x3aa   : > { %21235 = vmatmul.mubr.msk.bf16.gmra.mrb[36].mxu0 %vm1936_vm4, %v26304_v1  ;;  %20652 = vmatprep.mubr.msk.bf16.mxu1 %vm1936_vm4, %v29582_v47  ;;  %v13006_v1 = vrot.slane %v13005_v50, 4  ;;  %v13026_v34 = vrot.slane %v13025_v54, 4  ;;  %v13030_v24 = vrot.slane %v13028_v0, 5  ;;  %v13046_v55 = vshrl.u32 %v19027_v40, 16 }
 0x3ab   : > { %21238 = vmatprep.mubr.msk.bf16.mxu0 %vm1936_vm4, %v26310_v53  ;;  %v4232_v53 = vrot.slane %v22970_v52, 5  ;;  %v13035_v32 = vrot.slane %v13033_v63, 4  ;;  %v13038_v35 = vrot.slane %v13036_v25, 5  ;;  %v13052_v10 = vshll.u32 %v19028_v43, 16 }
 0x3ac   : > { %v13056_v56 = vshrl.u32 %v19028_v43, 16  ;;  %v13001_v18 = vsel %vm23356_vm5, %v12996_v49, %v26444_v15  ;;  %v13011_v42 = vsel %vm23356_vm5, %v13006_v1, %v26446_v4  ;;  %v17891_v7 = vcombine.low %v26502_v20, %v26507_v30  ;;  %v19032_v15 = vld [vmem:[%s23338_s9 + $0x158] sm:$0xf]  ;;  %v22972_v43 = vld [vmem:[%s23338_s9 + $0x264] sm:$0xf] }
 0x3ad   : > { %v17829_v50 = vrot.slane %v3771_v19, 9  ;;  %v13021_v61 = vsel %vm23356_vm5, %v13016_v14, %v26456_v51  ;;  %v4234_v62 = vrot.slane %v4232_v53, 4  ;;  %v4235_v2 = vrot.slane %v22971_v46, 5 }
 0x3ae   : > { %v26527_v8 = vrot.slane %v13042_v38, 5  ;;  %v13031_v54 = vsel %vm23356_vm5, %v13026_v34, %v13030_v24  ;;  %v13048_v4 = vrot.slane %v13046_v55, 4  ;;  %v13062_v0 = vshll.u32 %v19029_v33, 16  ;;  %v19034_v38 = vld [vmem:[%s23338_s9 + $0x160] sm:$0xf] }
 0x3af   : > { %v13066_v40 = vshrl.u32 %v19029_v33, 16  ;;  %v29583_v39 = vcombine.low %v26271_v36, %v26286_v17  ;;  %v26538_v51 = vcombine.low %v13001_v18, %v13011_v42  ;;  %v13039_v6 = vor.u32 %v13038_v35, %v13035_v32  ;;  %v19030_v36 = vld [vmem:[%s23338_s9 + $0x150] sm:$0x1]  ;;  %v22973_v24 = vld [vmem:[%s23338_s9 + $0x268] sm:$0x1] }
 0x3b0   : > { %v26540_v9 = vrot.slane %v13052_v10, 5  ;;  %v13058_v63 = vrot.slane %v13056_v56, 4  ;;  %v13077_v17 = vshrl.u32 %v19031_v44, 16  ;;  %v13086_v25 = vshll.u32 %v19032_v15, 16  ;;  %v3772_v35 = vld [vmem:[%s23338_s9 + $0x26c] sm:$0xe] }
 0x3b1   : > { %20653 = vmatmul.mubr.msk.bf16.gmra.mrb[104].mxu1 %vm1936_vm4, %v29583_v39  ;;  %v13090_v47 = vshrl.u32 %v19032_v15, 16  ;;  %v26549_v49 = vcombine.low %v13021_v61, %v13031_v54  ;;  %v26553_v1 = vsel %vm23862_vm8, %v17829_v50, %v4232_v53  ;;  %v26557_v48 = vsel %vm23862_vm8, %v4234_v62, %v4235_v2  ;;  %v22974_v15 = vld [vmem:[%s23338_s9 + $0x270] sm:$0xf] }
 0x3b2   : > { %21239 = vmatmul.mubr.msk.bf16.gmra.mrb[40].mxu0 %vm1936_vm4, %v26398_v29  ;;  %20656 = vmatprep.mubr.msk.bf16.mxu1 %vm1936_vm4, %v17886_v5  ;;  %v13080_v29 = vshll.u32 %v19031_v44, 16  ;;  %v4237_v22 = vrot.slane %v4235_v2, 4  ;;  %v19033_v5 = vld [vmem:[%s23338_s9 + $0x15c] sm:$0xf]  ;;  %v4238_v14 = vrot.slane %v22972_v43, 5  ;;  %v26562_v19 = vrot.slane %v13062_v0, 5 }
 0x3b3   : > { %21242 = vmatprep.mubr.msk.bf16.mxu0 %vm1936_vm4, %v26404_v11  ;;  %v13049_v11 = vor.u32 %v13048_v4, %v26527_v8  ;;  %v13068_v52 = vrot.slane %v13066_v40, 4  ;;  %v26565_v34 = vrot.slane %v13039_v6, 4  ;;  %v4241_v53 = vrot.slane %v22973_v24, 5  ;;  %v19036_v6 = vld [vmem:[%s23338_s9 + $0x168] sm:$0xf] }
 0x3b4   : > { %v13059_v55 = vor.u32 %v13058_v63, %v26540_v9  ;;  %v13072_v32 = vshll.u32 %v19030_v36, 16  ;;  %v13079_v10 = vrot.slane %v13077_v17, 4  ;;  %v13082_v33 = vrot.slane %v13080_v29, 5  ;;  %v19035_v17 = vld [vmem:[%s23338_s9 + $0x164] sm:$0x1] }
 0x3b5   : > { %v26570_v56 = vrot.slane %v13086_v25, 5  ;;  %v13092_v18 = vrot.slane %v13090_v47, 4  ;;  %v13096_v42 = vshll.u32 %v19033_v5, 16  ;;  %v13100_v50 = vshrl.u32 %v19033_v5, 16 }
 0x3b6   : > { %v13106_v44 = vshll.u32 %v19034_v38, 16  ;;  %v13110_v61 = vshrl.u32 %v19034_v38, 16  ;;  %v26572_v62 = vrot.slane %v13049_v11, 4  ;;  %v26576_v46 = vsel %vm23862_vm8, %v4237_v22, %v4238_v14  ;;  %v22976_v38 = vld [vmem:[%s23338_s9 + $0x278] sm:$0xf] }
 0x3b7   : > { %v13069_v2 = vor.u32 %v13068_v52, %v26562_v19  ;;  %v4245_v54 = vrot.slane %v22974_v15, 5  ;;  %v13045_v4 = vsel %vm23356_vm5, %v26565_v34, %v26527_v8  ;;  %v4240_v0 = vrot.slane %v4238_v14, 4  ;;  %v19037_v8 = vld [vmem:[%s23338_s9 + $0x16c] sm:$0xf] }
 0x3b8   : > { %v26590_v40 = vrot.slane %v13072_v32, 5  ;;  %v17830_v39 = vrot.slane %v3772_v35, 9  ;;  %v13060_v3 = vrot.slane %v13059_v55, 4  ;;  %v13093_v63 = vor.u32 %v13092_v18, %v26570_v56 }
 0x3b9   : > { %20657 = vmatmul.mubr.msk.bf16.gmra.mrb[108].mxu1 %vm1936_vm4, %v17887_v16  ;;  %v4248_v16 = vrot.slane %v22975_v27, 5  ;;  %v13098_v36 = vrot.slane %v13096_v42, 5  ;;  %v13102_v29 = vrot.slane %v13100_v50, 4  ;;  %v26603_v25 = vrot.slane %v13106_v44, 5  ;;  %v22977_v50 = vld [vmem:[%s23338_s9 + $0x27c] sm:$0x1] }
 0x3ba   : > { %21243 = vmatmul.mubr.msk.bf16.gmra.mrb[44].mxu0 %vm1936_vm4, %v26406_v45  ;;  %20660 = vmatprep.mubr.msk.bf16.mxu1 %vm1936_vm4, %v17888_v57  ;;  %v13083_v45 = vor.u32 %v13082_v33, %v13079_v10  ;;  %v13112_v47 = vrot.slane %v13110_v61, 4  ;;  %v13070_v60 = vrot.slane %v13069_v2, 4  ;;  %v4247_v31 = vrot.slane %v4245_v54, 4  ;;  %v19038_v33 = vld [vmem:[%s23338_s9 + $0x170] sm:$0xf] }
 0x3bb   : > { %21246 = vmatprep.mubr.msk.bf16.mxu0 %vm1936_vm4, %v26475_v23  ;;  %v13121_v57 = vshrl.u32 %v19036_v6, 16  ;;  %v13124_v22 = vshll.u32 %v19036_v6, 16  ;;  %v13055_v23 = vsel %vm23356_vm5, %v26572_v62, %v26540_v9  ;;  %v26611_v5 = vsel %vm23862_vm8, %v4240_v0, %v4241_v53  ;;  %v19039_v2 = vld [vmem:[%s23338_s9 + $0x174] sm:$0xf] }
 0x3bc   : > { %v13130_v11 = vshll.u32 %v19037_v8, 16  ;;  %v13134_v43 = vshrl.u32 %v19037_v8, 16  ;;  %v13084_v14 = vrot.slane %v13083_v45, 4  ;;  %v13094_v52 = vrot.slane %v13093_v63, 4 }
 0x3bd   : > { %v4251_v34 = vrot.slane %v22976_v38, 5  ;;  %v13116_v24 = vshll.u32 %v19035_v17, 16  ;;  %v13065_v55 = vsel %vm23356_vm5, %v13060_v3, %v26562_v19  ;;  %v26619_v9 = vsel %vm23862_vm8, %v17830_v39, %v4245_v54  ;;  %v19040_v3 = vld [vmem:[%s23338_s9 + $0x178] sm:$0x1] }
 0x3be   : > { %v13103_v32 = vor.u32 %v13102_v29, %v13098_v36  ;;  %v13113_v53 = vor.u32 %v13112_v47, %v26603_v25  ;;  %v13075_v35 = vsel %vm23356_vm5, %v13070_v60, %v26590_v40  ;;  %v26627_v10 = vsel %vm23862_vm8, %v4247_v31, %v4248_v16  ;;  %v19043_v29 = vld [vmem:[%s23338_s9 + $0x184] sm:$0xf]  ;;  %v19044_v47 = vld [vmem:[%s23338_s9 + $0x188] sm:$0xf] }
 0x3bf   : > { %v13123_v18 = vrot.slane %v13121_v57, 4  ;;  %v13126_v42 = vrot.slane %v13124_v22, 5  ;;  %v4250_v19 = vrot.slane %v4248_v16, 4  ;;  %v4254_v44 = vrot.slane %v22977_v50, 5  ;;  %v19041_v16 = vld [vmem:[%s23338_s9 + $0x17c] sm:$0xf] }
 0x3c0   : > { %v26637_v61 = vrot.slane %v13130_v11, 5  ;;  %v13136_v62 = vrot.slane %v13134_v43, 4  ;;  %v13089_v13 = vsel %vm23356_vm5, %v13084_v14, %v26570_v56  ;;  %v13099_v21 = vsel %vm23356_vm5, %v13094_v52, %v13098_v36  ;;  %v19047_v14 = vld [vmem:[%s23338_s9 + $0x194] sm:$0xf] }
 0x3c1   : > { %20661 = vmatmul.mubr.msk.bf16.gmra.mrb[112].mxu1 %vm1936_vm4, %v17889_v41  ;;  %v4253_v41 = vrot.slane %v4251_v34, 4  ;;  %v26653_v15 = vrot.slane %v13103_v32, 4  ;;  %v26655_v59 = vrot.slane %v13113_v53, 4  ;;  %v13140_v28 = vshll.u32 %v19038_v33, 16  ;;  %v19048_v53 = vld [vmem:[%s23338_s9 + $0x198] sm:$0xf] }
 0x3c2   : > { %21247 = vmatmul.mubr.msk.bf16.gmra.mrb[48].mxu0 %vm1936_vm4, %v26511_v12  ;;  %20664 = vmatprep.mubr.msk.bf16.mxu1 %vm1936_vm4, %v17890_v58  ;;  %v26651_v12 = vrot.slane %v13116_v24, 5  ;;  %v13144_v58 = vshrl.u32 %v19038_v33, 16  ;;  %v19145_v54 = vcombine.low %v13045_v4, %v13055_v23  ;;  %v13127_v0 = vor.u32 %v13126_v42, %v13123_v18  ;;  %v19046_v23 = vld [vmem:[%s23338_s9 + $0x190] sm:$0xf] }
 0x3c3   : > { %21250 = vmatprep.mubr.msk.bf16.mxu0 %vm1936_vm4, %v26538_v51  ;;  %v17892_v51 = vcombine.low %v26553_v1, %v26557_v48  ;;  %v13150_v56 = vshll.u32 %v19039_v2, 16  ;;  %v17893_v40 = vcombine.low %v26576_v46, %v26611_v5  ;;  %v17894_v39 = vcombine.low %v26619_v9, %v26627_v10  ;;  %v19042_v46 = vld [vmem:[%s23338_s9 + $0x180] sm:$0xf] }
 0x3c4   : > { %v13137_v6 = vor.u32 %v13136_v62, %v26637_v61  ;;  %v13154_v27 = vshrl.u32 %v19039_v2, 16  ;;  %v19146_v45 = vcombine.low %v13065_v55, %v13075_v35  ;;  %v19147_v63 = vcombine.low %v13089_v13, %v13099_v21 }
 0x3c5   : > { %v26668_v1 = vsel %vm23862_vm8, %v4250_v19, %v4251_v34  ;;  %v26672_v48 = vsel %vm23862_vm8, %v4253_v41, %v4254_v44  ;;  %v13109_v4 = vsel %vm23356_vm5, %v26653_v15, %v26603_v25  ;;  %v13119_v8 = vsel %vm23356_vm5, %v26655_v59, %v26651_v12 }
 0x3c6   : > { %v13142_v36 = vrot.slane %v13140_v28, 5  ;;  %v13146_v17 = vrot.slane %v13144_v58, 4  ;;  %v13128_v60 = vrot.slane %v13127_v0, 4  ;;  %v26685_v31 = vrot.slane %v13150_v56, 5 }
 0x3c7   : > { %v13160_v57 = vshll.u32 %v19040_v3, 16  ;;  %v13165_v22 = vshrl.u32 %v19041_v16, 16  ;;  %v13138_v25 = vrot.slane %v13137_v6, 4  ;;  %v13156_v5 = vrot.slane %v13154_v27, 4  ;;  %v19049_v3 = vld [vmem:[%s23338_s9 + $0x19c] sm:$0xf] }
 0x3c8   : > { %v13168_v11 = vshll.u32 %v19041_v16, 16  ;;  %v13174_v43 = vshll.u32 %v19042_v46, 16  ;;  %v13178_v52 = vshrl.u32 %v19042_v46, 16  ;;  %v13184_v38 = vshll.u32 %v19043_v29, 16 }
 0x3c9   : > { %20665 = vmatmul.mubr.msk.bf16.gmra.mrb[116].mxu1 %vm1936_vm4, %v17891_v7  ;;  %v13188_v34 = vshrl.u32 %v19043_v29, 16  ;;  %v13194_v24 = vshll.u32 %v19044_v47, 16  ;;  %v13147_v20 = vor.u32 %v13146_v17, %v13142_v36  ;;  %v13198_v30 = vshrl.u32 %v19044_v47, 16 }
 0x3ca   : > { %21251 = vmatmul.mubr.msk.bf16.gmra.mrb[52].mxu0 %vm1936_vm4, %v26549_v49  ;;  %20668 = vmatprep.mubr.msk.bf16.mxu1 %vm1936_vm4, %v17892_v51  ;;  %v13209_v7 = vshrl.u32 %v19046_v23, 16  ;;  %v13212_v55 = vshll.u32 %v19046_v23, 16  ;;  %v13133_v49 = vsel %vm23356_vm5, %v13128_v60, %v26637_v61  ;;  %v13167_v32 = vrot.slane %v13165_v22, 4  ;;  %v19045_v61 = vld [vmem:[%s23338_s9 + $0x18c] sm:$0x1] }
 0x3cb   : > { %21254 = vmatprep.mubr.msk.bf16.mxu0 %vm1936_vm4, %v19145_v54  ;;  %v13218_v35 = vshll.u32 %v19047_v14, 16  ;;  %v13222_v33 = vshrl.u32 %v19047_v14, 16  ;;  %v13143_v18 = vsel %vm23356_vm5, %v13138_v25, %v13142_v36  ;;  %v13157_v42 = vor.u32 %v13156_v5, %v26685_v31  ;;  %v19052_v36 = vld [vmem:[%s23338_s9 + $0x1a8] sm:$0xf] }
 0x3cc   : > { %v13170_v19 = vrot.slane %v13168_v11, 5  ;;  %v26704_v50 = vrot.slane %v13174_v43, 5  ;;  %v13180_v44 = vrot.slane %v13178_v52, 4  ;;  %v26706_v62 = vrot.slane %v13184_v38, 5 }
 0x3cd   : > { %v13190_v2 = vrot.slane %v13188_v34, 4  ;;  %v26708_v13 = vrot.slane %v13194_v24, 5  ;;  %v13200_v21 = vrot.slane %v13198_v30, 4  ;;  %v13211_v41 = vrot.slane %v13209_v7, 4  ;;  %v19050_v34 = vld [vmem:[%s23338_s9 + $0x1a0] sm:$0x1] }
 0x3ce   : > { %v13214_v12 = vrot.slane %v13212_v55, 5  ;;  %v13228_v15 = vshll.u32 %v19048_v53, 16  ;;  %v17895_v59 = vcombine.low %v26668_v1, %v26672_v48  ;;  %v26713_v28 = vrot.slane %v13218_v35, 5  ;;  %v19053_v7 = vld [vmem:[%s23338_s9 + $0x1ac] sm:$0xf] }
 0x3cf   : > { %v13224_v58 = vrot.slane %v13222_v33, 4  ;;  %v13232_v51 = vshrl.u32 %v19048_v53, 16  ;;  %v19148_v54 = vcombine.low %v13109_v4, %v13119_v8  ;;  %v13148_v0 = vrot.slane %v13147_v20, 4 }
 0x3d0   : > { %v13162_v56 = vrot.slane %v13160_v57, 5  ;;  %v13171_v6 = vor.u32 %v13170_v19, %v13167_v32  ;;  %v19149_v27 = vcombine.low %v13133_v49, %v13143_v18  ;;  %v13158_v16 = vrot.slane %v13157_v42, 4  ;;  %v22653_v57 = vld [vmem:[%s23338_s9 + $0x14] sm:$0xff]   ;;  %v19054_v18 = vld [vmem:[%s23338_s9 + $0x1b0] sm:$0xf] }
 0x3d1   : > { %20669 = vmatmul.mubr.msk.bf16.gmra.mrb[120].mxu1 %vm1936_vm4, %v17893_v40  ;;  %v13181_v1 = vor.u32 %v13180_v44, %v26704_v50  ;;  %v13204_v40 = vshll.u32 %v19045_v61, 16  ;;  %v13191_v48 = vor.u32 %v13190_v2, %v26706_v62  ;;  %v13201_v46 = vor.u32 %v13200_v21, %v26708_v13  ;;  %v19056_v2 = vld [vmem:[%s23338_s9 + $0x1b8] sm:$0xf]  ;;  %v19057_v61 = vld [vmem:[%s23338_s9 + $0x1bc] sm:$0xf] }
 0x3d2   : > { %21255 = vmatmul.mubr.msk.bf16.gmra.mrb[56].mxu0 %vm1936_vm4, %v19146_v45  ;;  %20672 = vmatprep.mubr.msk.bf16.mxu1 %vm1936_vm4, %v17894_v39  ;;  %v19051_v45 = vld [vmem:[%s23338_s9 + $0x1a4] sm:$0xf]  ;;  %v13215_v4 = vor.u32 %v13214_v12, %v13211_v41  ;;  %v13230_v8 = vrot.slane %v13228_v15, 5  ;;  %v13225_v9 = vor.u32 %v13224_v58, %v26713_v28  ;;  %v13234_v10 = vrot.slane %v13232_v51, 4  ;;  %v22654_v15 = vld [vmem:[%s23338_s9 + $0x1c] sm:$0xff]  }
 0x3d3   : > { %21258 = vmatprep.mubr.msk.bf16.mxu0 %vm1936_vm4, %v19147_v63  ;;  %v13238_v39 = vshll.u32 %v19049_v3, 16  ;;  %v13242_v63 = vshrl.u32 %v19049_v3, 16  ;;  %v13153_v17 = vsel %vm23356_vm5, %v13148_v0, %v26685_v31  ;;  %v13172_v29 = vrot.slane %v13171_v6, 4 }
 0x3d4   : > { %v13253_v47 = vshrl.u32 %v19051_v45, 16  ;;  %v13256_v60 = vshll.u32 %v19051_v45, 16  ;;  %v13163_v22 = vsel %vm23356_vm5, %v13158_v16, %v13162_v56  ;;  %v13182_v23 = vrot.slane %v13181_v1, 4 }
 0x3d5   : > { %v13262_v25 = vshll.u32 %v19052_v36, 16  ;;  %v13266_v5 = vshrl.u32 %v19052_v36, 16  ;;  %v13192_v11 = vrot.slane %v13191_v48, 4  ;;  %v13202_v43 = vrot.slane %v13201_v46, 4  ;;  %v19059_v36 = vld [vmem:[%s23338_s9 + $0x1c4] sm:$0xf] }
 0x3d6   : > { %v13206_v14 = vrot.slane %v13204_v40, 5  ;;  %v13216_v52 = vrot.slane %v13215_v4, 4  ;;  %v13226_v38 = vrot.slane %v13225_v9, 4  ;;  %v13235_v24 = vor.u32 %v13234_v10, %v13230_v8  ;;  %v19055_v4 = vld [vmem:[%s23338_s9 + $0x1b4] sm:$0x1] }
 0x3d7   : > { %v26736_v31 = vrot.slane %v13238_v39, 5  ;;  %v13244_v20 = vrot.slane %v13242_v63, 4  ;;  %v19150_v30 = vcombine.low %v13153_v17, %v13163_v22  ;;  %v13255_v55 = vrot.slane %v13253_v47, 4  ;;  %v19061_v17 = vld [vmem:[%s23338_s9 + $0x1cc] sm:$0xf] }
 0x3d8   : > { %v13258_v49 = vrot.slane %v13256_v60, 5  ;;  %v13177_v32 = vsel %vm23356_vm5, %v13172_v29, %v26704_v50  ;;  %v13187_v53 = vsel %vm23356_vm5, %v13182_v23, %v26706_v62  ;;  %v26749_v35 = vrot.slane %v13262_v25, 5  ;;  %v29584_v29 = vld [vmem:[#allocation5_spill] sm:$0xff] }
 0x3d9   : > { %20673 = vmatmul.mubr.msk.bf16.gmra.mrb[124].mxu1 %vm1936_vm4, %v17895_v59  ;;  %v13268_v33 = vrot.slane %v13266_v5, 4  ;;  %v13197_v42 = vsel %vm23356_vm5, %v13192_v11, %v26708_v13  ;;  %v13207_v19 = vsel %vm23356_vm5, %v13202_v43, %v13206_v14  ;;  %v13221_v50 = vsel %vm23356_vm5, %v13216_v52, %v26713_v28  ;;  %v22655_v28 = vld [vmem:[%s23338_s9 + $0x28] sm:$0xff]   ;;  %v19062_v23 = vld [vmem:[%s23338_s9 + $0x1d0] sm:$0xf] }
 0x3da   : > { %21259 = vmatmul.mubr.msk.bf16.gmra.mrb[60].mxu0 %vm1936_vm4, %v19148_v54  ;;  %20678 = vmatprep.mubr.msk.bf16.mxu1 %vm1936_vm4, %v22653_v57  ;;  %v13248_v44 = vshll.u32 %v19050_v34, 16  ;;  %v13231_v62 = vsel %vm23356_vm5, %v13226_v38, %v13230_v8  ;;  %v26764_v21 = vrot.slane %v13235_v24, 4  ;;  %v13245_v41 = vor.u32 %v13244_v20, %v26736_v31  ;;  %v19058_v8 = vld [vmem:[%s23338_s9 + $0x1c0] sm:$0xf]  ;;  %v22656_v24 = vld [vmem:[%s23338_s9 + $0x30] sm:$0xff]  }
 0x3db   : > { %21262 = vmatprep.mubr.msk.bf16.mxu0 %vm1936_vm4, %v19149_v27  ;;  %v13272_v12 = vshll.u32 %v19053_v7, 16  ;;  %v13259_v13 = vor.u32 %v13258_v49, %v13255_v55  ;;  %v13276_v59 = vshrl.u32 %v19053_v7, 16  ;;  %v13282_v58 = vshll.u32 %v19054_v18, 16  ;;  %v22657_v49 = vld [vmem:[%s23338_s9 + $0x3c] sm:$0xff]  }
 0x3dc   : > { %v13286_v51 = vshrl.u32 %v19054_v18, 16  ;;  %v13269_v54 = vor.u32 %v13268_v33, %v26749_v35  ;;  %v13297_v0 = vshrl.u32 %v19056_v2, 16  ;;  %v13300_v56 = vshll.u32 %v19056_v2, 16  ;;  %v19060_v2 = vld [vmem:[%s23338_s9 + $0x1c8] sm:$0x1] }
 0x3dd   : > { %v13306_v6 = vshll.u32 %v19057_v61, 16  ;;  %v19151_v3 = vcombine.low %v13177_v32, %v13187_v53  ;;  %v19152_v27 = vcombine.low %v13197_v42, %v13207_v19  ;;  %v13250_v16 = vrot.slane %v13248_v44, 5 }
 0x3de   : > { %v13310_v1 = vshrl.u32 %v19057_v61, 16  ;;  %v19153_v40 = vcombine.low %v13221_v50, %v13231_v62  ;;  %v13241_v45 = vsel %vm23356_vm5, %v26764_v21, %v26736_v31  ;;  %v13246_v48 = vrot.slane %v13245_v41, 4 }
 0x3df   : > { %v13274_v46 = vrot.slane %v13272_v12, 5  ;;  %v13260_v9 = vrot.slane %v13259_v13, 4  ;;  %v13278_v10 = vrot.slane %v13276_v59, 4  ;;  %v26779_v39 = vrot.slane %v13282_v58, 5 }
 0x3e0   : > { %v13288_v63 = vrot.slane %v13286_v51, 4  ;;  %v13270_v47 = vrot.slane %v13269_v54, 4  ;;  %v13299_v60 = vrot.slane %v13297_v0, 4  ;;  %v13302_v57 = vrot.slane %v13300_v56, 5 }
 0x3e1   : > { %20679 = vmatmul.mubr.msk.bf16.vlgmr.msra.gmra.mrb[0].mxu1 %vm1936_vm4, %v22654_v15  ;;  %v26784_v22 = vrot.slane %v13306_v6, 5  ;;  %v13312_v25 = vrot.slane %v13310_v1, 4  ;;  %v13316_v5 = vshll.u32 %v19058_v8, 16  ;;  %v13320_v11 = vshrl.u32 %v19058_v8, 16 }
 0x3e2   : > { %21263 = vmatmul.mubr.msk.bf16.gmra.mrb[64].mxu0 %vm1936_vm4, %v19150_v30  ;;  %21457 = vmatpush3.bf16.msra.mxu1 %v29584_v29  ;;  %v13326_v43 = vshll.u32 %v19059_v36, 16  ;;  %v13251_v14 = vsel %vm23356_vm5, %v13246_v48, %v13250_v16  ;;  %v13330_v52 = vshrl.u32 %v19059_v36, 16  ;;  %v13341_v38 = vshrl.u32 %v19061_v17, 16  ;;  %v19063_v30 = vld [vmem:[%s23338_s9 + $0x1d4] sm:$0xf] }
 0x3e3   : > { %20682 = vmatprep.mubr.msk.bf16.mxu1 %vm1936_vm4, %v22655_v28  ;;  %21266 = vmatprep.mubr.msk.bf16.mxu0 %vm1936_vm4, %v19151_v3  ;;  %v13344_v34 = vshll.u32 %v19061_v17, 16  ;;  %v13279_v31 = vor.u32 %v13278_v10, %v13274_v46  ;;  %v13292_v20 = vshll.u32 %v19055_v4, 16  ;;  %v13350_v7 = vshll.u32 %v19062_v23, 16  ;;  %v19064_v28 = vld [vmem:[%s23338_s9 + $0x1d8] sm:$0xf] }
 0x3e4   : > { %v13354_v55 = vshrl.u32 %v19062_v23, 16  ;;  %v13265_v32 = vsel %vm23356_vm5, %v13260_v9, %v26749_v35  ;;  %v13275_v53 = vsel %vm23356_vm5, %v13270_v47, %v13274_v46  ;;  %v13289_v33 = vor.u32 %v13288_v63, %v26779_v39  ;;  %v19066_v3 = vld [vmem:[%s23338_s9 + $0x1e0] sm:$0xf]  ;;  %v19067_v46 = vld [vmem:[%s23338_s9 + $0x1e4] sm:$0xf]  ;;  %v22659_v9 = vld [vmem:[%s23338_s9 + $0x50] sm:$0xff]  }
 0x3e5   : > { %v13303_v18 = vor.u32 %v13302_v57, %v13299_v60  ;;  %v13313_v42 = vor.u32 %v13312_v25, %v26784_v22  ;;  %v26800_v19 = vrot.slane %v13316_v5, 5  ;;  %v13322_v50 = vrot.slane %v13320_v11, 4 }
 0x3e6   : > { %v26802_v44 = vrot.slane %v13326_v43, 5  ;;  %v13332_v61 = vrot.slane %v13330_v52, 4  ;;  %v13343_v62 = vrot.slane %v13341_v38, 4  ;;  %v13346_v21 = vrot.slane %v13344_v34, 5 }
 0x3e7   : > { %v13360_v41 = vshll.u32 %v19063_v30, 16  ;;  %v26807_v35 = vrot.slane %v13350_v7, 5  ;;  %v13356_v12 = vrot.slane %v13354_v55, 4  ;;  %v13364_v15 = vshrl.u32 %v19063_v30, 16  ;;  %v19069_v55 = vld [vmem:[%s23338_s9 + $0x1ec] sm:$0xf] }
 0x3e8   : > { %v19154_v13 = vcombine.low %v13241_v45, %v13251_v14  ;;  %v13280_v59 = vrot.slane %v13279_v31, 4  ;;  %v13290_v58 = vrot.slane %v13289_v33, 4  ;;  %v13294_v51 = vrot.slane %v13292_v20, 5  ;;  %v19065_v14 = vld [vmem:[%s23338_s9 + $0x1dc] sm:$0x1] }
 0x3e9   : > { %20683 = vmatmul.mubr.msk.bf16.gmra.mrb[4].mxu1 %vm1936_vm4, %v22656_v24  ;;  %v19155_v54 = vcombine.low %v13265_v32, %v13275_v53  ;;  %v13304_v0 = vrot.slane %v13303_v18, 4  ;;  %v13314_v56 = vrot.slane %v13313_v42, 4  ;;  %v13336_v6 = vshll.u32 %v19060_v2, 16  ;;  %v19068_v20 = vld [vmem:[%s23338_s9 + $0x1e8] sm:$0xf]  ;;  %v22660_v42 = vld [vmem:[%s23338_s9 + $0x58] sm:$0xff]  }
 0x3ea   : > { %21267 = vmatmul.mubr.msk.bf16.gmra.mrb[68].mxu0 %vm1936_vm4, %v19152_v27  ;;  %20686 = vmatprep.mubr.msk.bf16.mxu1 %vm1936_vm4, %v22657_v49  ;;  %v13323_v27 = vor.u32 %v13322_v50, %v26800_v19  ;;  %v13333_v16 = vor.u32 %v13332_v61, %v26802_v44  ;;  %v13347_v1 = vor.u32 %v13346_v21, %v13343_v62  ;;  %v13362_v48 = vrot.slane %v13360_v41, 5  ;;  %v19071_v18 = vld [vmem:[%s23338_s9 + $0x1f4] sm:$0xf]  ;;  %v19072_v62 = vld [vmem:[%s23338_s9 + $0x1f8] sm:$0xf]  ;;  %v22661_v21 = vld [vmem:[%s23338_s9 + $0x64] sm:$0xff]  }
 0x3eb   : > { %21270 = vmatprep.mubr.msk.bf16.mxu0 %vm1936_vm4, %v19153_v40  ;;  %v22658_v40 = vld [vmem:[%s23338_s9 + $0x44] sm:$0xff]   ;;  %v13357_v45 = vor.u32 %v13356_v12, %v26807_v35  ;;  %v13366_v4 = vrot.slane %v13364_v15, 4  ;;  %v13370_v8 = vshll.u32 %v19064_v28, 16  ;;  %v13374_v36 = vshrl.u32 %v19064_v28, 16 }
 0x3ec   : > { %v13285_v10 = vsel %vm23356_vm5, %v13280_v59, %v26779_v39  ;;  %v13295_v63 = vsel %vm23356_vm5, %v13290_v58, %v13294_v51  ;;  %v13385_v17 = vshrl.u32 %v19066_v3, 16  ;;  %v13388_v29 = vshll.u32 %v19066_v3, 16 }
 0x3ed   : > { %v13309_v47 = vsel %vm23356_vm5, %v13304_v0, %v26784_v22  ;;  %v13338_v60 = vrot.slane %v13336_v6, 5  ;;  %v13394_v57 = vshll.u32 %v19067_v46, 16  ;;  %v13398_v23 = vshrl.u32 %v19067_v46, 16 }
 0x3ee   : > { %v13319_v25 = vsel %vm23356_vm5, %v13314_v56, %v26800_v19  ;;  %v13324_v5 = vrot.slane %v13323_v27, 4  ;;  %v13334_v11 = vrot.slane %v13333_v16, 4  ;;  %v13348_v39 = vrot.slane %v13347_v1, 4  ;;  %v19073_v27 = vld [vmem:[%s23338_s9 + $0x1fc] sm:$0xf] }
 0x3ef   : > { %v13358_v43 = vrot.slane %v13357_v45, 4  ;;  %v13367_v52 = vor.u32 %v13366_v4, %v13362_v48  ;;  %v26833_v22 = vrot.slane %v13370_v8, 5  ;;  %v13376_v38 = vrot.slane %v13374_v36, 4  ;;  %v19074_v16 = vld [vmem:[%s23338_s9 + $0x200] sm:$0xf] }
 0x3f0   : > { %v13387_v34 = vrot.slane %v13385_v17, 4  ;;  %v13390_v24 = vrot.slane %v13388_v29, 5  ;;  %v19156_v31 = vcombine.low %v13285_v10, %v13295_v63  ;;  %v26838_v30 = vrot.slane %v13394_v57, 5  ;;  %v19076_v45 = vld [vmem:[%s23338_s9 + $0x208] sm:$0xf]  ;;  %v22662_v57 = vld [vmem:[%s23338_s9 + $0x6c] sm:$0xff]  }
 0x3f1   : > { %20687 = vmatmul.mubr.msk.bf16.gmra.mrb[8].mxu1 %vm1936_vm4, %v22658_v40  ;;  %v13400_v7 = vrot.slane %v13398_v23, 4  ;;  %v19157_v49 = vcombine.low %v13309_v47, %v13319_v25  ;;  %v13329_v32 = vsel %vm23356_vm5, %v13324_v5, %v26802_v44  ;;  %v13339_v53 = vsel %vm23356_vm5, %v13334_v11, %v13338_v60  ;;  %v19077_v10 = vld [vmem:[%s23338_s9 + $0x20c] sm:$0xf]  ;;  %v19070_v63 = vld [vmem:[%s23338_s9 + $0x1f0] sm:$0x1] }
 0x3f2   : > { %21271 = vmatmul.mubr.msk.bf16.gmra.mrb[72].mxu0 %vm1936_vm4, %v19154_v13  ;;  %20690 = vmatprep.mubr.msk.bf16.mxu1 %vm1936_vm4, %v22659_v9  ;;  %v13380_v33 = vshll.u32 %v19065_v14, 16  ;;  %v13353_v19 = vsel %vm23356_vm5, %v13348_v39, %v26807_v35  ;;  %v13363_v50 = vsel %vm23356_vm5, %v13358_v43, %v13362_v48  ;;  %v26853_v2 = vrot.slane %v13367_v52, 4  ;;  %v22663_v39 = vld [vmem:[%s23338_s9 + $0x78] sm:$0xff]  }
 0x3f3   : > { %21274 = vmatprep.mubr.msk.bf16.mxu0 %vm1936_vm4, %v19155_v54  ;;  %v13377_v61 = vor.u32 %v13376_v38, %v26833_v22  ;;  %v13391_v44 = vor.u32 %v13390_v24, %v13387_v34  ;;  %v13404_v41 = vshll.u32 %v19068_v20, 16  ;;  %v13408_v12 = vshrl.u32 %v19068_v20, 16  ;;  %v19078_v20 = vld [vmem:[%s23338_s9 + $0x210] sm:$0xf] }
 0x3f4   : > { %v13414_v15 = vshll.u32 %v19069_v55, 16  ;;  %v13401_v13 = vor.u32 %v13400_v7, %v26838_v30  ;;  %v13418_v59 = vshrl.u32 %v19069_v55, 16  ;;  %v13429_v58 = vshrl.u32 %v19071_v18, 16 }
 0x3f5   : > { %v13432_v35 = vshll.u32 %v19071_v18, 16  ;;  %v19158_v51 = vcombine.low %v13329_v32, %v13339_v53  ;;  %v13438_v28 = vshll.u32 %v19072_v62, 16  ;;  %v13442_v54 = vshrl.u32 %v19072_v62, 16  ;;  %v19079_v53 = vld [vmem:[%s23338_s9 + $0x214] sm:$0xf] }
 0x3f6   : > { %v19159_v0 = vcombine.low %v13353_v19, %v13363_v50  ;;  %v13373_v56 = vsel %vm23356_vm5, %v26853_v2, %v26833_v22  ;;  %v13378_v6 = vrot.slane %v13377_v61, 4  ;;  %v13382_v3 = vrot.slane %v13380_v33, 5  ;;  %v19075_v33 = vld [vmem:[%s23338_s9 + $0x204] sm:$0x1] }
 0x3f7   : > { %v13392_v1 = vrot.slane %v13391_v44, 4  ;;  %v13406_v48 = vrot.slane %v13404_v41, 5  ;;  %v13410_v46 = vrot.slane %v13408_v12, 4  ;;  %v26869_v40 = vrot.slane %v13414_v15, 5 }
 0x3f8   : > { %v13402_v4 = vrot.slane %v13401_v13, 4  ;;  %v13420_v8 = vrot.slane %v13418_v59, 4  ;;  %v13431_v36 = vrot.slane %v13429_v58, 4  ;;  %v13434_v9 = vrot.slane %v13432_v35, 5  ;;  %v19081_v35 = vld [vmem:[%s23338_s9 + $0x21c] sm:$0xf] }
 0x3f9   : > { %20691 = vmatmul.mubr.msk.bf16.gmra.mrb[12].mxu1 %vm1936_vm4, %v22660_v42  ;;  %v26874_v17 = vrot.slane %v13438_v28, 5  ;;  %v13444_v29 = vrot.slane %v13442_v54, 4  ;;  %v13448_v47 = vshll.u32 %v19073_v27, 16  ;;  %v13452_v60 = vshrl.u32 %v19073_v27, 16  ;;  %v22665_v27 = vld [vmem:[%s23338_s9 + $0x8c] sm:$0xff]  }
 0x3fa   : > { %21275 = vmatmul.mubr.msk.bf16.gmra.mrb[76].mxu0 %vm1936_vm4, %v19156_v31  ;;  %20694 = vmatprep.mubr.msk.bf16.mxu1 %vm1936_vm4, %v22661_v21  ;;  %v13458_v23 = vshll.u32 %v19074_v16, 16  ;;  %v13462_v25 = vshrl.u32 %v19074_v16, 16  ;;  %v13473_v5 = vshrl.u32 %v19076_v45, 16  ;;  %v13476_v11 = vshll.u32 %v19076_v45, 16 }
 0x3fb   : > { %21278 = vmatprep.mubr.msk.bf16.mxu0 %vm1936_vm4, %v19157_v49  ;;  %v13383_v43 = vsel %vm23356_vm5, %v13378_v6, %v13382_v3  ;;  %v13411_v14 = vor.u32 %v13410_v46, %v13406_v48  ;;  %v13482_v52 = vshll.u32 %v19077_v10, 16  ;;  %v13486_v22 = vshrl.u32 %v19077_v10, 16  ;;  %v19082_v3 = vld [vmem:[%s23338_s9 + $0x220] sm:$0xf]  ;;  %v19080_v46 = vld [vmem:[%s23338_s9 + $0x218] sm:$0x1] }
 0x3fc   : > { %v13397_v38 = vsel %vm23356_vm5, %v13392_v1, %v26838_v30  ;;  %v13407_v34 = vsel %vm23356_vm5, %v13402_v4, %v13406_v48  ;;  %v13421_v24 = vor.u32 %v13420_v8, %v26869_v40  ;;  %v13424_v31 = vshll.u32 %v19070_v63, 16 }
 0x3fd   : > { %v13435_v7 = vor.u32 %v13434_v9, %v13431_v36  ;;  %v13445_v55 = vor.u32 %v13444_v29, %v26874_v17  ;;  %v26888_v49 = vrot.slane %v13448_v47, 5  ;;  %v13454_v32 = vrot.slane %v13452_v60, 4 }
 0x3fe   : > { %v26894_v30 = vrot.slane %v13458_v23, 5  ;;  %v13464_v18 = vrot.slane %v13462_v25, 4  ;;  %v13475_v42 = vrot.slane %v13473_v5, 4  ;;  %v13478_v19 = vrot.slane %v13476_v11, 5  ;;  %v19083_v23 = vld [vmem:[%s23338_s9 + $0x224] sm:$0xf] }
 0x3ff   : > { %v26898_v50 = vrot.slane %v13482_v52, 5  ;;  %v13488_v2 = vrot.slane %v13486_v22, 4  ;;  %v13492_v61 = vshll.u32 %v19078_v20, 16  ;;  %v13496_v62 = vshrl.u32 %v19078_v20, 16  ;;  %v22666_v20 = vld [vmem:[%s23338_s9 + $0x94] sm:$0xff]  }
 0x400   : > { %v19160_v21 = vcombine.low %v13373_v56, %v13383_v43  ;;  %v13412_v44 = vrot.slane %v13411_v14, 4  ;;  %v13502_v41 = vshll.u32 %v19079_v53, 16  ;;  %v13506_v12 = vshrl.u32 %v19079_v53, 16  ;;  %v19084_v43 = vld [vmem:[%s23338_s9 + $0x228] sm:$0xf] }
 0x401   : > { %20695 = vmatmul.mubr.msk.bf16.gmra.mrb[16].mxu1 %vm1936_vm4, %v22662_v57  ;;  %v19161_v15 = vcombine.low %v13397_v38, %v13407_v34  ;;  %v13422_v13 = vrot.slane %v13421_v24, 4  ;;  %v13426_v59 = vrot.slane %v13424_v31, 5  ;;  %v13468_v58 = vshll.u32 %v19075_v33, 16 }
 0x402   : > { %21279 = vmatmul.mubr.msk.bf16.gmra.mrb[80].mxu0 %vm1936_vm4, %v19158_v51  ;;  %20698 = vmatprep.mubr.msk.bf16.mxu1 %vm1936_vm4, %v22663_v39  ;;  %v22664_v51 = vld [vmem:[%s23338_s9 + $0x80] sm:$0xff]   ;;  %v13436_v28 = vrot.slane %v13435_v7, 4  ;;  %v13446_v54 = vrot.slane %v13445_v55, 4  ;;  %v13465_v6 = vor.u32 %v13464_v18, %v26894_v30  ;;  %v13479_v16 = vor.u32 %v13478_v19, %v13475_v42  ;;  %v19086_v19 = vld [vmem:[%s23338_s9 + $0x230] sm:$0xf] }
 0x403   : > { %21282 = vmatprep.mubr.msk.bf16.mxu0 %vm1936_vm4, %v19159_v0  ;;  %v13455_v0 = vor.u32 %v13454_v32, %v26888_v49  ;;  %v13489_v56 = vor.u32 %v13488_v2, %v26898_v50  ;;  %v26907_v1 = vrot.slane %v13492_v61, 5  ;;  %v13498_v48 = vrot.slane %v13496_v62, 4  ;;  %v22667_v32 = vld [vmem:[%s23338_s9 + $0xa0] sm:$0xff]  }
 0x404   : > { %v26910_v45 = vrot.slane %v13502_v41, 5  ;;  %v13508_v4 = vrot.slane %v13506_v12, 4  ;;  %v13517_v8 = vshrl.u32 %v19081_v35, 16  ;;  %v13520_v36 = vshll.u32 %v19081_v35, 16 }
 0x405   : > { %v13417_v9 = vsel %vm23356_vm5, %v13412_v44, %v26869_v40  ;;  %v13427_v10 = vsel %vm23356_vm5, %v13422_v13, %v13426_v59  ;;  %v13526_v63 = vshll.u32 %v19082_v3, 16  ;;  %v13530_v29 = vshrl.u32 %v19082_v3, 16 }
 0x406   : > { %v13441_v47 = vsel %vm23356_vm5, %v13436_v28, %v26874_v17  ;;  %v13451_v60 = vsel %vm23356_vm5, %v13446_v54, %v26888_v49  ;;  %v13456_v57 = vrot.slane %v13455_v0, 4  ;;  %v13470_v40 = vrot.slane %v13468_v58, 5  ;;  %v19088_v0 = vld [vmem:[%s23338_s9 + $0x238] sm:$0xf] }
 0x407   : > { %v13466_v25 = vrot.slane %v13465_v6, 4  ;;  %v13480_v5 = vrot.slane %v13479_v16, 4  ;;  %v13490_v11 = vrot.slane %v13489_v56, 4  ;;  %v13512_v39 = vshll.u32 %v19080_v46, 16  ;;  %v19091_v46 = vld [vmem:[%s23338_s9 + $0x244] sm:$0xf] }
 0x408   : > { %v13499_v17 = vor.u32 %v13498_v48, %v26907_v1  ;;  %v13509_v14 = vor.u32 %v13508_v4, %v26910_v45  ;;  %v13519_v52 = vrot.slane %v13517_v8, 4  ;;  %v13522_v22 = vrot.slane %v13520_v36, 5  ;;  %v22668_v4 = vld [vmem:[%s23338_s9 + $0xa8] sm:$0xff]  }
 0x409   : > { %20699 = vmatmul.mubr.msk.bf16.gmra.mrb[20].mxu1 %vm1936_vm4, %v22664_v51  ;;  %v26931_v38 = vrot.slane %v13526_v63, 5  ;;  %v13532_v34 = vrot.slane %v13530_v29, 4  ;;  %v13536_v24 = vshll.u32 %v19083_v23, 16  ;;  %v13540_v31 = vshrl.u32 %v19083_v23, 16  ;;  %v22669_v63 = vld [vmem:[%s23338_s9 + $0xb4] sm:$0xff]  }
 0x40a   : > { %21283 = vmatmul.mubr.msk.bf16.gmra.mrb[84].mxu0 %vm1936_vm4, %v19160_v21  ;;  %20702 = vmatprep.mubr.msk.bf16.mxu1 %vm1936_vm4, %v22665_v27  ;;  %v19162_v7 = vcombine.low %v13417_v9, %v13427_v10  ;;  %v13546_v55 = vshll.u32 %v19084_v43, 16  ;;  %v13550_v49 = vshrl.u32 %v19084_v43, 16  ;;  %v19163_v53 = vcombine.low %v13441_v47, %v13451_v60  ;;  %v19089_v27 = vld [vmem:[%s23338_s9 + $0x23c] sm:$0xf]  ;;  %v19092_v10 = vld [vmem:[%s23338_s9 + $0x248] sm:$0xf] }
 0x40b   : > { %21286 = vmatprep.mubr.msk.bf16.mxu0 %vm1936_vm4, %v19161_v15  ;;  %v13461_v33 = vsel %vm23356_vm5, %v13456_v57, %v26894_v30  ;;  %v13471_v18 = vsel %vm23356_vm5, %v13466_v25, %v13470_v40  ;;  %v13485_v42 = vsel %vm23356_vm5, %v13480_v5, %v26898_v50  ;;  %v13495_v2 = vsel %vm23356_vm5, %v13490_v11, %v26907_v1  ;;  %v19087_v15 = vld [vmem:[%s23338_s9 + $0x234] sm:$0xf]  ;;  %v19085_v50 = vld [vmem:[%s23338_s9 + $0x22c] sm:$0x1] }
 0x40c   : > { %v26947_v61 = vrot.slane %v13499_v17, 4  ;;  %v26949_v62 = vrot.slane %v13509_v14, 4  ;;  %v26951_v21 = vrot.slane %v13512_v39, 5  ;;  %v13523_v44 = vor.u32 %v13522_v22, %v13519_v52  ;;  %v19093_v43 = vld [vmem:[%s23338_s9 + $0x24c] sm:$0xf] }
 0x40d   : > { %v13533_v30 = vor.u32 %v13532_v34, %v26931_v38  ;;  %v26954_v41 = vrot.slane %v13536_v24, 5  ;;  %v13542_v12 = vrot.slane %v13540_v31, 4  ;;  %v26960_v13 = vrot.slane %v13546_v55, 5 }
 0x40e   : > { %v13552_v59 = vrot.slane %v13550_v49, 4  ;;  %v13561_v58 = vshrl.u32 %v19086_v19, 16  ;;  %v13564_v35 = vshll.u32 %v19086_v19, 16  ;;  %v19164_v51 = vcombine.low %v13461_v33, %v13471_v18  ;;  %v19090_v49 = vld [vmem:[%s23338_s9 + $0x240] sm:$0x1] }
 0x40f   : > { %v19165_v28 = vcombine.low %v13485_v42, %v13495_v2  ;;  %v13505_v54 = vsel %vm23356_vm5, %v26947_v61, %v26910_v45  ;;  %v13570_v6 = vshll.u32 %v19087_v15, 16  ;;  %v13574_v3 = vshrl.u32 %v19087_v15, 16  ;;  %v22670_v2 = vld [vmem:[%s23338_s9 + $0xbc] sm:$0xff]  }
 0x410   : > { %v13515_v16 = vsel %vm23356_vm5, %v26949_v62, %v26951_v21  ;;  %v13524_v56 = vrot.slane %v13523_v44, 4  ;;  %v13543_v1 = vor.u32 %v13542_v12, %v26954_v41  ;;  %v13556_v48 = vshll.u32 %v19085_v50, 16 }
 0x411   : > { %20703 = vmatmul.mubr.msk.bf16.gmra.mrb[24].mxu1 %vm1936_vm4, %v22666_v20  ;;  %v13534_v8 = vrot.slane %v13533_v30, 4  ;;  %v13553_v45 = vor.u32 %v13552_v59, %v26960_v13  ;;  %v13563_v36 = vrot.slane %v13561_v58, 4  ;;  %v13566_v9 = vrot.slane %v13564_v35, 5  ;;  %v19094_v30 = vld [vmem:[%s23338_s9 + $0x250] sm:$0xf] }
 0x412   : > { %21287 = vmatmul.mubr.msk.bf16.gmra.mrb[88].mxu0 %vm1936_vm4, %v19162_v7  ;;  %20706 = vmatprep.mubr.msk.bf16.mxu1 %vm1936_vm4, %v22667_v32  ;;  %v13580_v29 = vshll.u32 %v19088_v0, 16  ;;  %v13584_v47 = vshrl.u32 %v19088_v0, 16  ;;  %v13590_v60 = vshll.u32 %v19089_v27, 16  ;;  %v13594_v57 = vshrl.u32 %v19089_v27, 16  ;;  %v19096_v58 = vld [vmem:[%s23338_s9 + $0x258] sm:$0xf] }
 0x413   : > { %21290 = vmatprep.mubr.msk.bf16.mxu0 %vm1936_vm4, %v19163_v53  ;;  %v26980_v40 = vrot.slane %v13570_v6, 5  ;;  %v13576_v23 = vrot.slane %v13574_v3, 4  ;;  %v13605_v25 = vshrl.u32 %v19091_v46, 16  ;;  %v13608_v5 = vshll.u32 %v19091_v46, 16  ;;  %v19097_v3 = vld [vmem:[%s23338_s9 + $0x25c] sm:$0xf] }
 0x414   : > { %v13529_v11 = vsel %vm23356_vm5, %v13524_v56, %v26931_v38  ;;  %v13544_v39 = vrot.slane %v13543_v1, 4  ;;  %v13614_v17 = vshll.u32 %v19092_v10, 16  ;;  %v13618_v14 = vshrl.u32 %v19092_v10, 16 }
 0x415   : > { %v13539_v52 = vsel %vm23356_vm5, %v13534_v8, %v26954_v41  ;;  %v13554_v22 = vrot.slane %v13553_v45, 4  ;;  %v13558_v34 = vrot.slane %v13556_v48, 5  ;;  %v13567_v24 = vor.u32 %v13566_v9, %v13563_v36  ;;  %v22671_v41 = vld [vmem:[%s23338_s9 + $0xc8] sm:$0xff]   ;;  %v19098_v8 = vld [vmem:[%s23338_s9 + $0x260] sm:$0xf] }
 0x416   : > { %v13582_v38 = vrot.slane %v13580_v29, 5  ;;  %v13586_v31 = vrot.slane %v13584_v47, 4  ;;  %v26993_v20 = vrot.slane %v13590_v60, 5  ;;  %v13596_v7 = vrot.slane %v13594_v57, 4 }
 0x417   : > { %v13577_v55 = vor.u32 %v13576_v23, %v26980_v40  ;;  %v13607_v32 = vrot.slane %v13605_v25, 4  ;;  %v13610_v53 = vrot.slane %v13608_v5, 5  ;;  %v13624_v33 = vshll.u32 %v19093_v43, 16  ;;  %v19095_v23 = vld [vmem:[%s23338_s9 + $0x254] sm:$0x1] }
 0x418   : > { %v26997_v18 = vrot.slane %v13614_v17, 5  ;;  %v13620_v42 = vrot.slane %v13618_v14, 4  ;;  %v13628_v19 = vshrl.u32 %v19093_v43, 16  ;;  %v19166_v61 = vcombine.low %v13505_v54, %v13515_v16  ;;  %v22673_v43 = vld [vmem:[%s23338_s9 + $0xdc] sm:$0xff]  }
 0x419   : > { %20707 = vmatmul.mubr.msk.bf16.gmra.mrb[28].mxu1 %vm1936_vm4, %v22668_v4  ;;  %v19167_v62 = vcombine.low %v13529_v11, %v13539_v52  ;;  %v13549_v21 = vsel %vm23356_vm5, %v13544_v39, %v26960_v13  ;;  %v13559_v44 = vsel %vm23356_vm5, %v13554_v22, %v13558_v34  ;;  %v13568_v12 = vrot.slane %v13567_v24, 4  ;;  %v19101_v22 = vld [vmem:[%s23338_s9 + $0x26c] sm:$0xf] }
 0x41a   : > { %21291 = vmatmul.mubr.msk.bf16.gmra.mrb[92].mxu0 %vm1936_vm4, %v19164_v51  ;;  %20710 = vmatprep.mubr.msk.bf16.mxu1 %vm1936_vm4, %v22669_v63  ;;  %v13587_v15 = vor.u32 %v13586_v31, %v13582_v38  ;;  %v13597_v50 = vor.u32 %v13596_v7, %v26993_v20  ;;  %v13600_v59 = vshll.u32 %v19090_v49, 16  ;;  %v13578_v35 = vrot.slane %v13577_v55, 4  ;;  %v22672_v63 = vld [vmem:[%s23338_s9 + $0xd0] sm:$0xff]  }
 0x41b   : > { %21294 = vmatprep.mubr.msk.bf16.mxu0 %vm1936_vm4, %v19165_v28  ;;  %v13611_v51 = vor.u32 %v13610_v53, %v13607_v32  ;;  %v27009_v28 = vrot.slane %v13624_v33, 5  ;;  %v13621_v54 = vor.u32 %v13620_v42, %v26997_v18  ;;  %v13630_v13 = vrot.slane %v13628_v19, 4  ;;  %v19102_v7 = vld [vmem:[%s23338_s9 + $0x270] sm:$0xf] }
 0x41c   : > { %v13634_v0 = vshll.u32 %v19094_v30, 16  ;;  %v13638_v6 = vshrl.u32 %v19094_v30, 16  ;;  %v19168_v27 = vcombine.low %v13549_v21, %v13559_v44  ;;  %v13649_v16 = vshrl.u32 %v19096_v58, 16 }
 0x41d   : > { %v13652_v56 = vshll.u32 %v19096_v58, 16  ;;  %v13573_v1 = vsel %vm23356_vm5, %v13568_v12, %v26980_v40  ;;  %v13588_v48 = vrot.slane %v13587_v15, 4  ;;  %v13598_v46 = vrot.slane %v13597_v50, 4  ;;  %v19099_v40 = vld [vmem:[%s23338_s9 + $0x264] sm:$0xf]  ;;  %v22675_v50 = vld [vmem:[%s23338_s9 + $0xf0] sm:$0xff]  }
 0x41e   : > { %v13602_v4 = vrot.slane %v13600_v59, 5  ;;  %v13583_v45 = vsel %vm23356_vm5, %v13578_v35, %v13582_v38  ;;  %v13612_v36 = vrot.slane %v13611_v51, 4  ;;  %v13658_v9 = vshll.u32 %v19097_v3, 16  ;;  %v22674_v12 = vld [vmem:[%s23338_s9 + $0xe4] sm:$0xff]   ;;  %v19103_v51 = vld [vmem:[%s23338_s9 + $0x274] sm:$0xf] }
 0x41f   : > { %v13662_v10 = vshrl.u32 %v19097_v3, 16  ;;  %v13622_v29 = vrot.slane %v13621_v54, 4  ;;  %v13631_v47 = vor.u32 %v13630_v13, %v27009_v28  ;;  %v27025_v60 = vrot.slane %v13634_v0, 5  ;;  %v19106_v3 = vld [vmem:[%s23338_s9 + $0x280] sm:$0xf] }
 0x420   : > { %v13640_v57 = vrot.slane %v13638_v6, 4  ;;  %v13651_v25 = vrot.slane %v13649_v16, 4  ;;  %v13654_v5 = vrot.slane %v13652_v56, 5  ;;  %v13668_v11 = vshll.u32 %v19098_v8, 16  ;;  %v19104_v6 = vld [vmem:[%s23338_s9 + $0x278] sm:$0xf] }
 0x421   : > { %20711 = vmatmul.mubr.msk.bf16.gmra.mrb[32].mxu1 %vm1936_vm4, %v22670_v2  ;;  %v13672_v39 = vshrl.u32 %v19098_v8, 16  ;;  %v19169_v17 = vcombine.low %v13573_v1, %v13583_v45  ;;  %v13593_v14 = vsel %vm23356_vm5, %v13588_v48, %v26993_v20  ;;  %v13603_v52 = vsel %vm23356_vm5, %v13598_v46, %v13602_v4  ;;  %v19107_v48 = vld [vmem:[%s23338_s9 + $0x284] sm:$0xf] }
 0x422   : > { %21295 = vmatmul.mubr.msk.bf16.gmra.mrb[96].mxu0 %vm1936_vm4, %v19166_v61  ;;  %20714 = vmatprep.mubr.msk.bf16.mxu1 %vm1936_vm4, %v22671_v41  ;;  %v27036_v34 = vrot.slane %v13658_v9, 5  ;;  %v13664_v24 = vrot.slane %v13662_v10, 4  ;;  %v13678_v38 = vshll.u32 %v19099_v40, 16  ;;  %v13682_v31 = vshrl.u32 %v19099_v40, 16 }
 0x423   : > { %21298 = vmatprep.mubr.msk.bf16.mxu0 %vm1936_vm4, %v19167_v62  ;;  %v13617_v55 = vsel %vm23356_vm5, %v13612_v36, %v26997_v18  ;;  %v13627_v49 = vsel %vm23356_vm5, %v13622_v29, %v27009_v28  ;;  %v13641_v20 = vor.u32 %v13640_v57, %v27025_v60  ;;  %v13644_v32 = vshll.u32 %v19095_v23, 16  ;;  %v19100_v18 = vld [vmem:[%s23338_s9 + $0x268] sm:$0x1] }
 0x424   : > { %v27048_v53 = vrot.slane %v13631_v47, 4  ;;  %v13655_v33 = vor.u32 %v13654_v5, %v13651_v25  ;;  %v27050_v42 = vrot.slane %v13668_v11, 5  ;;  %v13674_v19 = vrot.slane %v13672_v39, 4 }
 0x425   : > { %v13693_v2 = vshrl.u32 %v19101_v22, 16  ;;  %v13696_v61 = vshll.u32 %v19101_v22, 16  ;;  %v13702_v62 = vshll.u32 %v19102_v7, 16  ;;  %v13706_v21 = vshrl.u32 %v19102_v7, 16  ;;  %v19108_v7 = vld [vmem:[%s23338_s9 + $0x288] sm:$0xf] }
 0x426   : > { %v13665_v44 = vor.u32 %v13664_v24, %v27036_v34  ;;  %v27056_v30 = vrot.slane %v13678_v38, 5  ;;  %v13684_v41 = vrot.slane %v13682_v31, 4  ;;  %v19170_v15 = vcombine.low %v13593_v14, %v13603_v52  ;;  %v22676_v38 = vld [vmem:[%s23338_s9 + $0xf8] sm:$0xff]  }
 0x427   : > { %v19171_v59 = vcombine.low %v13617_v55, %v13627_v49  ;;  %v13642_v58 = vrot.slane %v13641_v20, 4  ;;  %v13646_v35 = vrot.slane %v13644_v32, 5  ;;  %v13637_v28 = vsel %vm23356_vm5, %v27048_v53, %v27025_v60  ;;  %v22677_v20 = vld [vmem:[%s23338_s9 + $0x104] sm:$0xff]  }
 0x428   : > { %v13656_v54 = vrot.slane %v13655_v33, 4  ;;  %v13675_v13 = vor.u32 %v13674_v19, %v27050_v42  ;;  %v13688_v0 = vshll.u32 %v19100_v18, 16  ;;  %v13698_v16 = vrot.slane %v13696_v61, 5  ;;  %v19109_v19 = vld [vmem:[%s23338_s9 + $0x28c] sm:$0xf] }
 0x429   : > { %20715 = vmatmul.mubr.msk.bf16.gmra.mrb[36].mxu1 %vm1936_vm4, %v22672_v63  ;;  %v27068_v56 = vrot.slane %v13702_v62, 5  ;;  %v13708_v1 = vrot.slane %v13706_v21, 4  ;;  %v13666_v46 = vrot.slane %v13665_v44, 4  ;;  %v13685_v4 = vor.u32 %v13684_v41, %v27056_v30  ;;  %v19111_v41 = vld [vmem:[%s23338_s9 + $0x294] sm:$0xf] }
 0x42a   : > { %21299 = vmatmul.mubr.msk.bf16.gmra.mrb[100].mxu0 %vm1936_vm4, %v19168_v27  ;;  %20718 = vmatprep.mubr.msk.bf16.mxu1 %vm1936_vm4, %v22673_v43  ;;  %v13695_v27 = vrot.slane %v13693_v2, 4  ;;  %v13712_v8 = vshll.u32 %v19103_v51, 16  ;;  %v13716_v45 = vshrl.u32 %v19103_v51, 16  ;;  %v13722_v36 = vshll.u32 %v19104_v6, 16 }
 0x42b   : > { %21302 = vmatprep.mubr.msk.bf16.mxu0 %vm1936_vm4, %v19169_v17  ;;  %v13726_v9 = vshrl.u32 %v19104_v6, 16  ;;  %v13737_v10 = vshrl.u32 %v19106_v3, 16  ;;  %v13740_v63 = vshll.u32 %v19106_v3, 16  ;;  %v13647_v29 = vsel %vm23356_vm5, %v13642_v58, %v13646_v35  ;;  %v19105_v17 = vld [vmem:[%s23338_s9 + $0x27c] sm:$0x1] }
 0x42c   : > { %v13661_v47 = vsel %vm23356_vm5, %v13656_v54, %v27036_v34  ;;  %v13746_v60 = vshll.u32 %v19107_v48, 16  ;;  %v13750_v57 = vshrl.u32 %v19107_v48, 16  ;;  %v13676_v40 = vrot.slane %v13675_v13, 4  ;;  %v22678_v48 = vld [vmem:[%s23338_s9 + $0x10c] sm:$0xff]  }
 0x42d   : > { %v13690_v23 = vrot.slane %v13688_v0, 5  ;;  %v13699_v25 = vor.u32 %v13698_v16, %v13695_v27  ;;  %v13709_v5 = vor.u32 %v13708_v1, %v27068_v56  ;;  %v13671_v11 = vsel %vm23356_vm5, %v13666_v46, %v27050_v42 }
 0x42e   : > { %v13686_v39 = vrot.slane %v13685_v4, 4  ;;  %v13714_v43 = vrot.slane %v13712_v8, 5  ;;  %v13718_v14 = vrot.slane %v13716_v45, 4  ;;  %v27086_v52 = vrot.slane %v13722_v36, 5  ;;  %v22679_v45 = vld [vmem:[%s23338_s9 + $0x118] sm:$0xff]  }
 0x42f   : > { %v13728_v22 = vrot.slane %v13726_v9, 4  ;;  %v13739_v34 = vrot.slane %v13737_v10, 4  ;;  %v13742_v24 = vrot.slane %v13740_v63, 5  ;;  %v19172_v31 = vcombine.low %v13637_v28, %v13647_v29  ;;  %v19110_v9 = vld [vmem:[%s23338_s9 + $0x290] sm:$0x1] }
 0x430   : > { %v27090_v55 = vrot.slane %v13746_v60, 5  ;;  %v13752_v49 = vrot.slane %v13750_v57, 4  ;;  %v19173_v32 = vcombine.low %v13661_v47, %v13671_v11  ;;  %v13700_v53 = vrot.slane %v13699_v25, 4  ;;  %v19113_v10 = vld [vmem:[%s23338_s9 + $0x29c] sm:$0xf] }
 0x431   : > { %20719 = vmatmul.mubr.msk.bf16.gmra.mrb[40].mxu1 %vm1936_vm4, %v22674_v12  ;;  %v13710_v33 = vrot.slane %v13709_v5, 4  ;;  %v13732_v42 = vshll.u32 %v19105_v17, 16  ;;  %v13681_v18 = vsel %vm23356_vm5, %v13676_v40, %v27056_v30  ;;  %v13691_v2 = vsel %vm23356_vm5, %v13686_v39, %v13690_v23  ;;  %v19112_v12 = vld [vmem:[%s23338_s9 + $0x298] sm:$0xf]  ;;  %v19114_v57 = vld [vmem:[%s23338_s9 + $0x2a0] sm:$0xf] }
 0x432   : > { %21303 = vmatmul.mubr.msk.bf16.gmra.mrb[104].mxu0 %vm1936_vm4, %v19170_v15  ;;  %20722 = vmatprep.mubr.msk.bf16.mxu1 %vm1936_vm4, %v22675_v50  ;;  %v13719_v61 = vor.u32 %v13718_v14, %v13714_v43  ;;  %v13729_v62 = vor.u32 %v13728_v22, %v27086_v52  ;;  %v13743_v21 = vor.u32 %v13742_v24, %v13739_v34  ;;  %v13756_v44 = vshll.u32 %v19108_v7, 16 }
 0x433   : > { %21306 = vmatprep.mubr.msk.bf16.mxu0 %vm1936_vm4, %v19171_v59  ;;  %v13753_v15 = vor.u32 %v13752_v49, %v27090_v55  ;;  %v13760_v50 = vshrl.u32 %v19108_v7, 16  ;;  %v13766_v59 = vshll.u32 %v19109_v19, 16  ;;  %v13770_v30 = vshrl.u32 %v19109_v19, 16 }
 0x434   : > { %v19174_v58 = vcombine.low %v13681_v18, %v13691_v2  ;;  %v13705_v35 = vsel %vm23356_vm5, %v13700_v53, %v27068_v56  ;;  %v13715_v51 = vsel %vm23356_vm5, %v13710_v33, %v13714_v43  ;;  %v13734_v28 = vrot.slane %v13732_v42, 5 }
 0x435   : > { %v13781_v54 = vshrl.u32 %v19111_v41, 16  ;;  %v13784_v13 = vshll.u32 %v19111_v41, 16  ;;  %v13790_v0 = vshll.u32 %v19112_v12, 16  ;;  %v13794_v6 = vshrl.u32 %v19112_v12, 16 }
 0x436   : > { %v13720_v3 = vrot.slane %v13719_v61, 4  ;;  %v13730_v27 = vrot.slane %v13729_v62, 4  ;;  %v13744_v16 = vrot.slane %v13743_v21, 4  ;;  %v13758_v1 = vrot.slane %v13756_v44, 5  ;;  %v19115_v61 = vld [vmem:[%s23338_s9 + $0x2a4] sm:$0x1] }
 0x437   : > { %v13754_v46 = vrot.slane %v13753_v15, 4  ;;  %v13762_v4 = vrot.slane %v13760_v50, 4  ;;  %v13768_v56 = vrot.slane %v13766_v59, 5  ;;  %v13772_v8 = vrot.slane %v13770_v30, 4  ;;  %v22978_v59 = vld [vmem:[%s23338_s9 + $0x2c] sm:$0xf] }
 0x438   : > { %v19175_v36 = vcombine.low %v13705_v35, %v13715_v51  ;;  %v13783_v63 = vrot.slane %v13781_v54, 4  ;;  %v13786_v29 = vrot.slane %v13784_v13, 5  ;;  %v13792_v47 = vrot.slane %v13790_v0, 5  ;;  %v22979_v35 = vld [vmem:[%s23338_s9 + $0x160] sm:$0xf]  ;;  %v22682_v54 = vld [vmem:[%s23338_s9 + $0x134] sm:$0xff]  }
 0x439   : > { %20723 = vmatmul.mubr.msk.bf16.gmra.mrb[44].mxu1 %vm1936_vm4, %v22676_v38  ;;  %v13796_v60 = vrot.slane %v13794_v6, 4  ;;  %v13725_v40 = vsel %vm23356_vm5, %v13720_v3, %v27086_v52  ;;  %v13735_v23 = vsel %vm23356_vm5, %v13730_v27, %v13734_v28  ;;  %v13749_v25 = vsel %vm23356_vm5, %v13744_v16, %v27090_v55  ;;  %v22683_v0 = vld [vmem:[%s23338_s9 + $0x140] sm:$0xff]  }
 0x43a   : > { %21307 = vmatmul.mubr.msk.bf16.gmra.mrb[108].mxu0 %vm1936_vm4, %v19172_v31  ;;  %20726 = vmatprep.mubr.msk.bf16.mxu1 %vm1936_vm4, %v22677_v20  ;;  %v13759_v5 = vsel %vm23356_vm5, %v13754_v46, %v13758_v1  ;;  %v13763_v11 = vor.u32 %v13762_v4, %v13758_v1  ;;  %v13773_v39 = vor.u32 %v13772_v8, %v13768_v56  ;;  %v13776_v43 = vshll.u32 %v19110_v9, 16  ;;  %v22680_v31 = vld [vmem:[%s23338_s9 + $0x120] sm:$0xff]   ;;  %v22980_v46 = vld [vmem:[%s23338_s9 + $0x30] sm:$0xf] }
 0x43b   : > { %21310 = vmatprep.mubr.msk.bf16.mxu0 %vm1936_vm4, %v19173_v32  ;;  %v13800_v17 = vshll.u32 %v19113_v10, 16  ;;  %v13804_v14 = vshrl.u32 %v19113_v10, 16  ;;  %v13810_v52 = vshll.u32 %v19114_v57, 16  ;;  %v13814_v22 = vshrl.u32 %v19114_v57, 16  ;;  %v22681_v32 = vld [vmem:[%s23338_s9 + $0x12c] sm:$0xff]  }
 0x43c   : > { %v13787_v34 = vor.u32 %v13786_v29, %v13783_v63  ;;  %v13797_v24 = vor.u32 %v13796_v60, %v13792_v47  ;;  %v19176_v38 = vcombine.low %v13725_v40, %v13735_v23  ;;  %v19177_v7 = vcombine.low %v13749_v25, %v13759_v5  ;;  %v19246_v63 = vld [vmem:[%s23338_s9 + $0x3c] sm:$0xe]  ;;  %v22982_v29 = vld [vmem:[%s23338_s9 + $0x40] sm:$0xf]  ;;  %v22983_v60 = vld [vmem:[%s23338_s9 + $0x164] sm:$0x1] }
 0x43d   : > { %v13764_v55 = vrot.slane %v13763_v11, 4  ;;  %v13774_v49 = vrot.slane %v13773_v39, 4  ;;  %v13778_v20 = vrot.slane %v13776_v43, 5  ;;  %v13802_v53 = vrot.slane %v13800_v17, 5  ;;  %v22984_v11 = vld [vmem:[%s23338_s9 + $0x38] sm:$0x1] }
 0x43e   : > { %v13806_v33 = vrot.slane %v13804_v14, 4  ;;  %v13812_v42 = vrot.slane %v13810_v52, 5  ;;  %v13816_v19 = vrot.slane %v13814_v22, 4  ;;  %v13788_v18 = vrot.slane %v13787_v34, 4  ;;  %v22985_v43 = vld [vmem:[%s23338_s9 + $0x44] sm:$0xf] }
 0x43f   : > { %v13798_v2 = vrot.slane %v13797_v24, 4  ;;  %v13769_v62 = vsel %vm23356_vm5, %v13764_v55, %v13768_v56  ;;  %v13779_v21 = vsel %vm23356_vm5, %v13774_v49, %v13778_v20  ;;  %v13820_v12 = vshll.u32 %v19115_v61, 16  ;;  %v22981_v56 = vld [vmem:[%s23338_s9 + $0x34] sm:$0xf]  ;;  %v22684_v52 = vld [vmem:[%s23338_s9 + $0x148] sm:$0xff]  }
 0x440   : > { %v13807_v44 = vor.u32 %v13806_v33, %v13802_v53  ;;  %v13817_v41 = vor.u32 %v13816_v19, %v13812_v42  ;;  %v13793_v15 = vsel %vm23356_vm5, %v13788_v18, %v13792_v47  ;;  %v15080_v30 = vrot.slane %v22978_v59, 5  ;;  %v22986_v24 = vld [vmem:[%s23338_s9 + $0x48] sm:$0xf]  ;;  %v22988_v18 = vld [vmem:[%s23338_s9 + $0x15c] sm:$0xf] }
 0x441   : > { %20727 = vmatmul.mubr.msk.bf16.gmra.mrb[48].mxu1 %vm1936_vm4, %v22678_v48  ;;  %v13803_v50 = vsel %vm23356_vm5, %v13798_v2, %v13802_v53  ;;  %v7531_v51 = vshll.u32 %v22979_v35, 16  ;;  %v7535_v28 = vshrl.u32 %v22979_v35, 16  ;;  %v19178_v13 = vcombine.low %v13769_v62, %v13779_v21  ;;  %v22987_v53 = vld [vmem:[%s23338_s9 + $0x54] sm:$0xf] }
 0x442   : > { %21311 = vmatmul.mubr.msk.bf16.gmra.mrb[112].mxu0 %vm1936_vm4, %v19174_v58  ;;  %20730 = vmatprep.mubr.msk.bf16.mxu1 %vm1936_vm4, %v22679_v45  ;;  %v19245_v58 = vld [vmem:[%s23338_s9 + $0x28] sm:$0xe]  ;;  %v19179_v6 = vcombine.low %v13793_v15, %v13803_v50  ;;  %v13808_v3 = vrot.slane %v13807_v44, 4  ;;  %v13818_v27 = vrot.slane %v13817_v41, 4  ;;  %v13822_v16 = vrot.slane %v13820_v12, 5 }
 0x443   : > { %21314 = vmatprep.mubr.msk.bf16.mxu0 %vm1936_vm4, %v19175_v36  ;;  %v19277_v1 = vrot.slane %v19245_v58, 9  ;;  %v15082_v48 = vrot.slane %v15080_v30, 4  ;;  %v15083_v4 = vrot.slane %v22980_v46, 5  ;;  %v15086_v8 = vrot.slane %v22981_v56, 5  ;;  %v22989_v41 = vld [vmem:[%s23338_s9 + $0x4c] sm:$0x1] }
 0x444   : > { %v27153_v45 = vrot.slane %v7531_v51, 5  ;;  %v7537_v36 = vrot.slane %v7535_v28, 4  ;;  %v13813_v9 = vsel %vm23356_vm5, %v13808_v3, %v13812_v42  ;;  %v13823_v10 = vsel %vm23356_vm5, %v13818_v27, %v13822_v16  ;;  %v22990_v51 = vld [vmem:[%s23338_s9 + $0x58] sm:$0xf]  ;;  %v22992_v3 = vld [vmem:[%s23338_s9 + $0x68] sm:$0xf] }
 0x445   : > { %v15093_v47 = vrot.slane %v22982_v29, 5  ;;  %v7541_v57 = vshll.u32 %v22983_v60, 16  ;;  %v15081_v40 = vsel %vm23862_vm8, %v19277_v1, %v15080_v30  ;;  %v15084_v23 = vsel %vm23862_vm8, %v15082_v48, %v15083_v4  ;;  %v22993_v16 = vld [vmem:[%s23338_s9 + $0x6c] sm:$0xf]  ;;  %v22686_v46 = vld [vmem:[%s23338_s9 + $0x15c] sm:$0xff]  }
 0x446   : > { %v15085_v25 = vrot.slane %v15083_v4, 4  ;;  %v15088_v5 = vrot.slane %v15086_v8, 4  ;;  %v15089_v39 = vrot.slane %v22984_v11, 5  ;;  %v15096_v17 = vrot.slane %v22985_v43, 5  ;;  %v22996_v60 = vld [vmem:[%s23338_s9 + $0x7c] sm:$0xf] }
 0x447   : > { %v7538_v14 = vor.u32 %v7537_v36, %v27153_v45  ;;  %v19180_v22 = vcombine.low %v13813_v9, %v13823_v10  ;;  %v19278_v34 = vrot.slane %v19246_v63, 9  ;;  %v15095_v55 = vrot.slane %v15093_v47, 4  ;;  %v22995_v9 = vld [vmem:[%s23338_s9 + $0x70] sm:$0xf]  ;;  %v22687_v63 = vld [vmem:[%s23338_s9 + $0x168] sm:$0xff]  }
 0x448   : > { %v27176_v49 = vrot.slane %v7541_v57, 5  ;;  %v15087_v20 = vsel %vm23862_vm8, %v15085_v25, %v15086_v8  ;;  %v15106_v33 = vrot.slane %v22987_v53, 5  ;;  %v15090_v42 = vsel %vm23862_vm8, %v15088_v5, %v15089_v39  ;;  %v22994_v8 = vld [vmem:[%s23338_s9 + $0x60] sm:$0x1] }
 0x449   : > { %20731 = vmatmul.mubr.msk.bf16.gmra.mrb[52].mxu1 %vm1936_vm4, %v22680_v31  ;;  %v22685_v31 = vld [vmem:[%s23338_s9 + $0x154] sm:$0xff]   ;;  %v15098_v19 = vrot.slane %v15096_v17, 4  ;;  %v7521_v2 = vshll.u32 %v22988_v18, 16  ;;  %v7525_v61 = vshrl.u32 %v22988_v18, 16  ;;  %v7539_v62 = vrot.slane %v7538_v14, 4 }
 0x44a   : > { %21315 = vmatmul.mubr.msk.bf16.gmra.mrb[116].mxu0 %vm1936_vm4, %v19176_v38  ;;  %20734 = vmatprep.mubr.msk.bf16.mxu1 %vm1936_vm4, %v22681_v32  ;;  %v15099_v38 = vrot.slane %v22986_v24, 5  ;;  %v19247_v32 = vld [vmem:[%s23338_s9 + $0x50] sm:$0xe]  ;;  %v15094_v21 = vsel %vm23862_vm8, %v19278_v34, %v15093_v47  ;;  %v15102_v12 = vrot.slane %v22989_v41, 5  ;;  %v15097_v15 = vsel %vm23862_vm8, %v15095_v55, %v15096_v17  ;;  %v19249_v47 = vld [vmem:[%s23338_s9 + $0x78] sm:$0xe] }
 0x44b   : > { %21318 = vmatprep.mubr.msk.bf16.mxu0 %vm1936_vm4, %v19177_v7  ;;  %v19310_v7 = vcombine.low %v15081_v40, %v15084_v23  ;;  %v19279_v50 = vrot.slane %v19247_v32, 9  ;;  %v27194_v59 = vrot.slane %v7521_v2, 5  ;;  %v7527_v30 = vrot.slane %v7525_v61, 4  ;;  %v22997_v14 = vld [vmem:[%s23338_s9 + $0x74] sm:$0x1] }
 0x44c   : > { %v15101_v44 = vrot.slane %v15099_v38, 4  ;;  %v19311_v58 = vcombine.low %v15087_v20, %v15090_v42  ;;  %v15108_v35 = vrot.slane %v15106_v33, 4  ;;  %v15109_v28 = vrot.slane %v22990_v51, 5  ;;  %v22688_v2 = vld [vmem:[%s23338_s9 + $0x170] sm:$0xff]  }
 0x44d   : > { %v15119_v27 = vrot.slane %v22992_v3, 5  ;;  %v15122_v1 = vrot.slane %v22993_v16, 5  ;;  %v7528_v48 = vor.u32 %v7527_v30, %v27194_v59  ;;  %v19312_v4 = vcombine.low %v15094_v21, %v15097_v15  ;;  %v19250_v30 = vld [vmem:[%s23338_s9 + $0x8c] sm:$0xe]  ;;  %v23002_v51 = vld [vmem:[%s23338_s9 + $0x94] sm:$0xf] }
 0x44e   : > { %v27209_v56 = vsel %vm23862_vm8, %v15101_v44, %v15102_v12  ;;  %v15115_v36 = vrot.slane %v22994_v8, 5  ;;  %v15125_v10 = vrot.slane %v22995_v9, 5  ;;  %v27216_v29 = vsel %vm23862_vm8, %v19279_v50, %v15106_v33  ;;  %v23000_v44 = vld [vmem:[%s23338_s9 + $0x88] sm:$0x1]  ;;  %v22689_v12 = vld [vmem:[%s23338_s9 + $0x17c] sm:$0xff]  }
 0x44f   : > { %v15132_v57 = vrot.slane %v22996_v60, 5  ;;  %v7529_v40 = vrot.slane %v7528_v48, 4  ;;  %v7544_v23 = vsel %vm23356_vm5, %v7539_v62, %v27176_v49  ;;  %v15110_v25 = vsel %vm23862_vm8, %v15108_v35, %v15109_v28  ;;  %v22999_v49 = vld [vmem:[%s23338_s9 + $0x84] sm:$0xf]  ;;  %v19251_v16 = vld [vmem:[%s23338_s9 + $0xa0] sm:$0xe] }
 0x450   : > { %v15111_v5 = vrot.slane %v15109_v28, 4  ;;  %v15121_v43 = vrot.slane %v15119_v27, 4  ;;  %v15124_v17 = vrot.slane %v15122_v1, 4  ;;  %v15127_v34 = vrot.slane %v15125_v10, 4 }
 0x451   : > { %20735 = vmatmul.mubr.msk.bf16.gmra.mrb[56].mxu1 %vm1936_vm4, %v22682_v54  ;;  %v22991_v54 = vld [vmem:[%s23338_s9 + $0x5c] sm:$0xf]  ;;  %v19281_v24 = vrot.slane %v19249_v47, 9  ;;  %v15134_v55 = vrot.slane %v15132_v57, 4  ;;  %v19314_v32 = vcombine.low %v27216_v29, %v15110_v25  ;;  %v15141_v41 = vrot.slane %v23000_v44, 5 }
 0x452   : > { %21319 = vmatmul.mubr.msk.bf16.gmra.mrb[120].mxu0 %vm1936_vm4, %v19178_v13  ;;  %20738 = vmatprep.mubr.msk.bf16.mxu1 %vm1936_vm4, %v22683_v0  ;;  %v15112_v13 = vrot.slane %v22991_v54, 5  ;;  %v27200_v0 = vsel %vm23862_vm8, %v15098_v19, %v15099_v38  ;;  %v22998_v38 = vld [vmem:[%s23338_s9 + $0x80] sm:$0xf]  ;;  %v27254_v19 = vsel %vm23862_vm8, %v15121_v43, %v15122_v1  ;;  %v27258_v18 = vsel %vm23862_vm8, %v15124_v17, %v15125_v10  ;;  %v23003_v54 = vld [vmem:[%s23338_s9 + $0x98] sm:$0xf] }
 0x453   : > { %21322 = vmatprep.mubr.msk.bf16.mxu0 %vm1936_vm4, %v19179_v6  ;;  %v19248_v6 = vld [vmem:[%s23338_s9 + $0x64] sm:$0xe]  ;;  %v19313_v20 = vcombine.low %v27200_v0, %v27209_v56  ;;  %v27267_v62 = vsel %vm23862_vm8, %v19281_v24, %v15132_v57  ;;  %v15148_v28 = vrot.slane %v23002_v51, 5  ;;  %v23005_v1 = vld [vmem:[%s23338_s9 + $0xa8] sm:$0xf]  ;;  %v19282_v9 = vrot.slane %v19250_v30, 9 }
 0x454   : > { %v15114_v11 = vrot.slane %v15112_v13, 4  ;;  %v19280_v39 = vrot.slane %v19248_v6, 9  ;;  %v27242_v53 = vsel %vm23862_vm8, %v15111_v5, %v15112_v13  ;;  %v15151_v13 = vrot.slane %v23003_v54, 5  ;;  %v23004_v0 = vld [vmem:[%s23338_s9 + $0xa4] sm:$0xf] }
 0x455   : > { %v15158_v6 = vrot.slane %v23004_v0, 5  ;;  %v15161_v48 = vrot.slane %v23005_v1, 5  ;;  %v15150_v29 = vrot.slane %v15148_v28, 4  ;;  %v23007_v47 = vld [vmem:[%s23338_s9 + $0x9c] sm:$0x1] }
 0x456   : > { %v27246_v33 = vsel %vm23862_vm8, %v15114_v11, %v15115_v36  ;;  %v27250_v42 = vsel %vm23862_vm8, %v19280_v39, %v15119_v27  ;;  %v15154_v60 = vrot.slane %v23007_v47, 5  ;;  %v15153_v57 = vrot.slane %v15151_v13, 4  ;;  %v23008_v25 = vld [vmem:[%s23338_s9 + $0xb0] sm:$0x1]  ;;  %v19252_v43 = vld [vmem:[%s23338_s9 + $0xb4] sm:$0xe] }
 0x457   : > { %v19315_v3 = vcombine.low %v27242_v53, %v27246_v33  ;;  %v19316_v27 = vcombine.low %v27250_v42, %v27254_v19  ;;  %v15167_v5 = vrot.slane %v23008_v25, 5  ;;  %v15163_v11 = vrot.slane %v15161_v48, 4  ;;  %v23009_v17 = vld [vmem:[%s23338_s9 + $0xb8] sm:$0xf]  ;;  %v19253_v33 = vld [vmem:[%s23338_s9 + $0xc8] sm:$0xe] }
 0x458   : > { %v27324_v53 = vsel %vm23862_vm8, %v15150_v29, %v15151_v13  ;;  %v23013_v42 = vld [vmem:[%s23338_s9 + $0xd0] sm:$0xf]  ;;  %v27331_v44 = vsel %vm23862_vm8, %v15153_v57, %v15154_v60  ;;  %v23015_v54 = vld [vmem:[%s23338_s9 + $0xc4] sm:$0x1]  ;;  %v19285_v0 = vrot.slane %v19253_v33, 9 }
 0x459   : > { %20739 = vmatmul.mubr.msk.bf16.gmra.mrb[60].mxu1 %vm1936_vm4, %v22684_v52  ;;  %v15128_v52 = vrot.slane %v22997_v14, 5  ;;  %v15171_v14 = vrot.slane %v23009_v17, 5  ;;  %v15187_v19 = vrot.slane %v23013_v42, 5  ;;  %v15180_v13 = vrot.slane %v23015_v54, 5  ;;  %v23021_v42 = vld [vmem:[%s23338_s9 + $0xf8] sm:$0xf] }
 0x45a   : > { %21323 = vmatmul.mubr.msk.bf16.gmra.mrb[124].mxu0 %vm1936_vm4, %v19180_v22  ;;  %20742 = vmatprep.mubr.msk.bf16.mxu1 %vm1936_vm4, %v22685_v31  ;;  %v7534_v22 = vsel %vm23356_vm5, %v7529_v40, %v27153_v45  ;;  %v15135_v31 = vrot.slane %v22998_v38, 5  ;;  %v15138_v45 = vrot.slane %v22999_v49, 5  ;;  %v19283_v40 = vrot.slane %v19251_v16, 9  ;;  %v23012_v49 = vld [vmem:[%s23338_s9 + $0xcc] sm:$0xf] }
 0x45b   : > { %21328 = vmatprep.mubr.msk.bf16.mxu0 %vm1936_vm4, %v19310_v7  ;;  %v27232_v7 = vcombine.low %v7534_v22, %v7544_v23  ;;  %v27263_v61 = vsel %vm23862_vm8, %v15127_v34, %v15128_v52  ;;  %v15160_v23 = vrot.slane %v15158_v6, 4  ;;  %v23010_v52 = vld [vmem:[%s23338_s9 + $0xbc] sm:$0xf]  ;;  %v22690_v34 = vld [vmem:[%s23338_s9 + $0x184] sm:$0xff]   ;;  %v15189_v16 = vrot.slane %v15187_v19, 4 }
 0x45c   : > { %v15137_v21 = vrot.slane %v15135_v31, 4  ;;  %v27273_v15 = vsel %vm23862_vm8, %v15134_v55, %v15135_v31  ;;  %v15140_v50 = vrot.slane %v15138_v45, 4  ;;  %v19317_v56 = vcombine.low %v27258_v18, %v27263_v61  ;;  %v23011_v31 = vld [vmem:[%s23338_s9 + $0xc0] sm:$0xf] }
 0x45d   : > { %29585 = vst [vmem:[#allocation9_spill] sm:$0xff] %v27232_v7  ;;  %v19318_v8 = vcombine.low %v27267_v62, %v27273_v15  ;;  %v15174_v22 = vrot.slane %v23010_v52, 5  ;;  %v15177_v55 = vrot.slane %v23011_v31, 5  ;;  %v19321_v29 = vcombine.low %v27324_v53, %v27331_v44  ;;  %v23019_v31 = vld [vmem:[%s23338_s9 + $0xe8] sm:$0xf] }
 0x45e   : > { %v27295_v36 = vsel %vm23862_vm8, %v15137_v21, %v15138_v45  ;;  %v27301_v10 = vsel %vm23862_vm8, %v15140_v50, %v15141_v41  ;;  %v15184_v45 = vrot.slane %v23012_v49, 5  ;;  %v27335_v41 = vsel %vm23862_vm8, %v19283_v40, %v15158_v6  ;;  %v19260_v53 = vld [vmem:[%s23338_s9 + $0x154] sm:$0xe]  ;;  %v23046_v49 = vld [vmem:[%s23338_s9 + $0x164] sm:$0x1] }
 0x45f   : > { %v19319_v24 = vcombine.low %v27295_v36, %v27301_v10  ;;  %v19284_v50 = vrot.slane %v19252_v43, 9  ;;  %v15176_v51 = vrot.slane %v15174_v22, 4  ;;  %v15284_v57 = vrot.slane %v23046_v49, 5 }
 0x460   : > { %v15186_v6 = vrot.slane %v15184_v45, 4 }
 0x461   : > { %20743 = vmatmul.mubr.msk.bf16.gmra.mrb[64].mxu1 %vm1936_vm4, %v22686_v46  ;;  %v23006_v46 = vld [vmem:[%s23338_s9 + $0xac] sm:$0xf]  ;;  %v27368_v40 = vsel %vm23862_vm8, %v19284_v50, %v15171_v14  ;;  %v27376_v25 = vsel %vm23862_vm8, %v15176_v51, %v15177_v55  ;;  %v19255_v51 = vld [vmem:[%s23338_s9 + $0xf0] sm:$0xe] }
 0x462   : > { %21329 = vmatmul.mubr.msk.bf16.vlgmr.msra.gmra.mrb[0].mxu0 %vm1936_vm4, %v19311_v58  ;;  %20746 = vmatprep.mubr.msk.bf16.mxu1 %vm1936_vm4, %v22687_v63  ;;  %v23001_v58 = vld [vmem:[%s23338_s9 + $0x90] sm:$0xf]  ;;  %v27389_v43 = vsel %vm23862_vm8, %v15186_v6, %v15187_v19  ;;  %v15213_v19 = vrot.slane %v23021_v42, 5  ;;  %v23022_v50 = vld [vmem:[%s23338_s9 + $0xec] sm:$0x1]  ;;  %v19287_v62 = vrot.slane %v19255_v51, 9 }
 0x463   : > { %21332 = vmatprep.mubr.msk.bf16.mxu0 %vm1936_vm4, %v19312_v4  ;;  %v15145_v35 = vrot.slane %v23001_v58, 5  ;;  %v15164_v4 = vrot.slane %v23006_v46, 5  ;;  %v23024_v6 = vld [vmem:[%s23338_s9 + $0x108] sm:$0xf]  ;;  %v22695_v51 = vld [vmem:[%s23338_s9 + $0x1b8] sm:$0xff]  }
 0x465   : > { %v15147_v63 = vrot.slane %v15145_v35, 4  ;;  %v15166_v39 = vrot.slane %v15164_v4, 4  ;;  %v27313_v38 = vsel %vm23862_vm8, %v19282_v9, %v15145_v35  ;;  %v27343_v30 = vsel %vm23862_vm8, %v15163_v11, %v15164_v4  ;;  %v19254_v4 = vld [vmem:[%s23338_s9 + $0xdc] sm:$0xe]  ;;  %v23017_v9 = vld [vmem:[%s23338_s9 + $0xe0] sm:$0xf] }
 0x466   : > { %v15173_v35 = vrot.slane %v15171_v14, 4  ;;  %v19286_v17 = vrot.slane %v19254_v4, 9  ;;  %v22693_v14 = vld [vmem:[%s23338_s9 + $0x1a4] sm:$0xff]  }
 0x467   : > { %v27347_v58 = vsel %vm23862_vm8, %v15166_v39, %v15167_v5  ;;  %v22692_v5 = vld [vmem:[%s23338_s9 + $0x198] sm:$0xff]   ;;  %v27385_v39 = vsel %vm23862_vm8, %v19285_v0, %v15184_v45 }
 0x469   : > { %20747 = vmatmul.mubr.msk.bf16.gmra.mrb[68].mxu1 %vm1936_vm4, %v22688_v2  ;;  %v23014_v2 = vld [vmem:[%s23338_s9 + $0xd4] sm:$0xf] }
 0x46a   : > { %21333 = vmatmul.mubr.msk.bf16.gmra.mrb[4].mxu0 %vm1936_vm4, %v19313_v20  ;;  %20750 = vmatprep.mubr.msk.bf16.mxu1 %vm1936_vm4, %v22689_v12  ;;  %v22691_v20 = vld [vmem:[%s23338_s9 + $0x190] sm:$0xff]   ;;  %v15190_v21 = vrot.slane %v23014_v2, 5  ;;  %v27339_v12 = vsel %vm23862_vm8, %v15160_v23, %v15161_v48  ;;  %v23016_v48 = vld [vmem:[%s23338_s9 + $0xd8] sm:$0x1]  ;;  %v27372_v23 = vsel %vm23862_vm8, %v15173_v35, %v15174_v22  ;;  %v15206_v35 = vrot.slane %v23022_v50, 5 }
 0x46b   : > { %21336 = vmatprep.mubr.msk.bf16.mxu0 %vm1936_vm4, %v19314_v32  ;;  %v27320_v32 = vsel %vm23862_vm8, %v15147_v63, %v15148_v28  ;;  %v15179_v28 = vrot.slane %v15177_v55, 4  ;;  %v15193_v46 = vrot.slane %v23016_v48, 5  ;;  %v15197_v63 = vrot.slane %v23017_v9, 5  ;;  %v23027_v9 = vld [vmem:[%s23338_s9 + $0x11c] sm:$0xf]  ;;  %v22694_v50 = vld [vmem:[%s23338_s9 + $0x1ac] sm:$0xff]  }
 0x46c   : > { %v15192_v1 = vrot.slane %v15190_v21, 4  ;;  %v19322_v47 = vcombine.low %v27335_v41, %v27339_v12  ;;  %v27394_v52 = vsel %vm23862_vm8, %v15189_v16, %v15190_v21  ;;  %v15203_v55 = vrot.slane %v23019_v31, 5  ;;  %v23043_v2 = vld [vmem:[%s23338_s9 + $0x160] sm:$0xf]  ;;  %v23044_v12 = vld [vmem:[%s23338_s9 + $0x16c] sm:$0xf] }
 0x46d   : > { %v27381_v11 = vsel %vm23862_vm8, %v15179_v28, %v15180_v13  ;;  %v23023_v28 = vld [vmem:[%s23338_s9 + $0xfc] sm:$0xf]  ;;  %v27421_v0 = vsel %vm23862_vm8, %v19286_v17, %v15197_v63  ;;  %v15223_v16 = vrot.slane %v23024_v6, 5  ;;  %v23028_v17 = vld [vmem:[%s23338_s9 + $0x100] sm:$0x1] }
 0x46e   : > { %v27398_v22 = vsel %vm23862_vm8, %v15192_v1, %v15193_v46  ;;  %v15216_v54 = vrot.slane %v23023_v28, 5  ;;  %v23025_v1 = vld [vmem:[%s23338_s9 + $0x10c] sm:$0xf]  ;;  %v15205_v61 = vrot.slane %v15203_v55, 4  ;;  %v23026_v46 = vld [vmem:[%s23338_s9 + $0x110] sm:$0xf] }
 0x46f   : > { %v15226_v48 = vrot.slane %v23025_v1, 5  ;;  %v15229_v4 = vrot.slane %v23026_v46, 5  ;;  %v23031_v46 = vld [vmem:[%s23338_s9 + $0x114] sm:$0x1] }
 0x471   : > { %20751 = vmatmul.mubr.msk.bf16.gmra.mrb[72].mxu1 %vm1936_vm4, %v22690_v34  ;;  %v15199_v34 = vrot.slane %v15197_v63, 4  ;;  %v15236_v63 = vrot.slane %v23027_v9, 5  ;;  %v15231_v1 = vrot.slane %v15229_v4, 4  ;;  %v15232_v9 = vrot.slane %v23031_v46, 5 }
 0x472   : > { %21337 = vmatmul.mubr.msk.bf16.gmra.mrb[8].mxu0 %vm1936_vm4, %v19315_v3  ;;  %20754 = vmatprep.mubr.msk.bf16.mxu1 %vm1936_vm4, %v22691_v20  ;;  %v19320_v3 = vcombine.low %v27313_v38, %v27320_v32  ;;  %v23020_v20 = vld [vmem:[%s23338_s9 + $0xf4] sm:$0xf]  ;;  %v23033_v38 = vld [vmem:[%s23338_s9 + $0x130] sm:$0xf] }
 0x473   : > { %21340 = vmatprep.mubr.msk.bf16.mxu0 %vm1936_vm4, %v19316_v27  ;;  %v23018_v27 = vld [vmem:[%s23338_s9 + $0xe4] sm:$0xf]  ;;  %v15210_v33 = vrot.slane %v23020_v20, 5  ;;  %v15238_v21 = vrot.slane %v15236_v63, 4  ;;  %v27495_v36 = vsel %vm23862_vm8, %v15231_v1, %v15232_v9  ;;  %v15249_v32 = vrot.slane %v23033_v38, 5 }
 0x474   : > { %v15200_v60 = vrot.slane %v23018_v27, 5  ;;  %v23030_v20 = vld [vmem:[%s23338_s9 + $0x124] sm:$0xf]  ;;  %v23036_v9 = vld [vmem:[%s23338_s9 + $0x158] sm:$0xf] }
 0x475   : > { %v15212_v15 = vrot.slane %v15210_v33, 4  ;;  %v15242_v42 = vrot.slane %v23030_v20, 5 }
 0x476   : > { %v15202_v45 = vrot.slane %v15200_v60, 4  ;;  %v27432_v18 = vsel %vm23862_vm8, %v15199_v34, %v15200_v60  ;;  %v15218_v60 = vrot.slane %v15216_v54, 4  ;;  %v23029_v34 = vld [vmem:[%s23338_s9 + $0x120] sm:$0xf] }
 0x477   : > { %v15239_v31 = vrot.slane %v23029_v34, 5  ;;  %v27456_v34 = vsel %vm23862_vm8, %v19287_v62, %v15210_v33 }
 0x478   : > { %v27439_v27 = vsel %vm23862_vm8, %v15202_v45, %v15203_v55  ;;  %v15225_v55 = vrot.slane %v15223_v16, 4  ;;  %v15228_v45 = vrot.slane %v15226_v48, 4 }
 0x479   : > { %20755 = vmatmul.mubr.msk.bf16.gmra.mrb[76].mxu1 %vm1936_vm4, %v22692_v5  ;;  %v19257_v5 = vld [vmem:[%s23338_s9 + $0x118] sm:$0xe]  ;;  %v15241_v46 = vrot.slane %v15239_v31, 4 }
 0x47a   : > { %21341 = vmatmul.mubr.msk.bf16.gmra.mrb[12].mxu0 %vm1936_vm4, %v19317_v56  ;;  %20758 = vmatprep.mubr.msk.bf16.mxu1 %vm1936_vm4, %v22693_v14  ;;  %v19256_v56 = vld [vmem:[%s23338_s9 + $0x104] sm:$0xe]  ;;  %v15219_v14 = vrot.slane %v23028_v17, 5  ;;  %v19289_v13 = vrot.slane %v19257_v5, 9  ;;  %v27452_v17 = vsel %vm23862_vm8, %v15205_v61, %v15206_v35  ;;  %v15244_v35 = vrot.slane %v15242_v42, 4 }
 0x47b   : > { %21344 = vmatprep.mubr.msk.bf16.mxu0 %vm1936_vm4, %v19318_v8  ;;  %v15215_v8 = vrot.slane %v15213_v19, 4  ;;  %v19288_v6 = vrot.slane %v19256_v56, 9  ;;  %v27460_v56 = vsel %vm23862_vm8, %v15212_v15, %v15213_v19  ;;  %v23032_v61 = vld [vmem:[%s23338_s9 + $0x128] sm:$0x1]  ;;  %v27486_v62 = vsel %vm23862_vm8, %v15228_v45, %v15229_v4  ;;  %v23035_v15 = vld [vmem:[%s23338_s9 + $0x138] sm:$0xf] }
 0x47c   : > { %v27468_v5 = vsel %vm23862_vm8, %v15218_v60, %v15219_v14  ;;  %v15245_v33 = vrot.slane %v23032_v61, 5  ;;  %v27499_v10 = vsel %vm23862_vm8, %v19289_v13, %v15236_v63  ;;  %v18297_v60 = vld [vmem:[%s23338_s9 + $0x154] sm:$0xf]  ;;  %v27518_v63 = vsel %vm23862_vm8, %v15241_v46, %v15242_v42  ;;  %v22697_v42 = vld [vmem:[%s23338_s9 + $0x1cc] sm:$0xff]  }
 0x47d   : > { %v27464_v20 = vsel %vm23862_vm8, %v15215_v8, %v15216_v54  ;;  %v27478_v19 = vsel %vm23862_vm8, %v19288_v6, %v15223_v16  ;;  %v27482_v54 = vsel %vm23862_vm8, %v15225_v55, %v15226_v48  ;;  %v19258_v16 = vld [vmem:[%s23338_s9 + $0x12c] sm:$0xe]  ;;  %v15255_v8 = vrot.slane %v23035_v15, 5  ;;  %29587 = vst [vmem:[#allocation11_spill] sm:$0xff] %v27518_v63  ;;  %v23037_v15 = vld [vmem:[%s23338_s9 + $0x13c] sm:$0x1] }
 0x47e   : > { %v27522_v14 = vsel %vm23862_vm8, %v15244_v35, %v15245_v33  ;;  %v19290_v45 = vrot.slane %v19258_v16, 9  ;;  %v7505_v1 = vshll.u32 %v18297_v60, 16  ;;  %v7511_v46 = vshll.u32 %v23036_v9, 16  ;;  %v19259_v16 = vld [vmem:[%s23338_s9 + $0x140] sm:$0xe] }
 0x47f   : > { %29588 = vst [vmem:[#allocation12_spill] sm:$0xff] %v27522_v14  ;;  %v7515_v35 = vshrl.u32 %v23036_v9, 16  ;;  %v15251_v33 = vrot.slane %v15249_v32, 4  ;;  %v15258_v55 = vrot.slane %v23037_v15, 5  ;;  %v23038_v6 = vld [vmem:[%s23338_s9 + $0x144] sm:$0xf] }
 0x480   : > { %v23040_v13 = vld [vmem:[%s23338_s9 + $0x14c] sm:$0xf]  ;;  %v27547_v9 = vsel %vm23862_vm8, %v19290_v45, %v15249_v32  ;;  %v23041_v15 = vld [vmem:[%s23338_s9 + $0x158] sm:$0xf]  ;;  %v27558_v32 = vrot.slane %v7511_v46, 5  ;;  %v19291_v41 = vrot.slane %v19259_v16, 9 }
 0x481   : > { %20759 = vmatmul.mubr.msk.bf16.gmra.mrb[80].mxu1 %vm1936_vm4, %v22694_v50  ;;  %v15262_v50 = vrot.slane %v23038_v6, 5  ;;  %v15268_v48 = vrot.slane %v23040_v13, 5  ;;  %v15275_v61 = vrot.slane %v23041_v15, 5  ;;  %v23042_v6 = vld [vmem:[%s23338_s9 + $0x15c] sm:$0xf]  ;;  %v7517_v13 = vrot.slane %v7515_v35, 4 }
 0x482   : > { %21345 = vmatmul.mubr.msk.bf16.gmra.mrb[16].mxu0 %vm1936_vm4, %v19319_v24  ;;  %20762 = vmatprep.mubr.msk.bf16.mxu1 %vm1936_vm4, %v22695_v51  ;;  %v27503_v24 = vsel %vm23862_vm8, %v15238_v21, %v15239_v31  ;;  %v22696_v31 = vld [vmem:[%s23338_s9 + $0x1c0] sm:$0xff]   ;;  %v7502_v51 = vshrl.u32 %v18297_v60, 16  ;;  %v23039_v21 = vld [vmem:[%s23338_s9 + $0x148] sm:$0xf]  ;;  %v15278_v28 = vrot.slane %v23042_v6, 5  ;;  %v22698_v15 = vld [vmem:[%s23338_s9 + $0x1d4] sm:$0xff]  }
 0x483   : > { %21348 = vmatprep.mubr.msk.bf16.mxu0 %vm1936_vm4, %v19320_v3  ;;  %29586 = vst [vmem:[#allocation10_spill] sm:$0xff] %v27503_v24  ;;  %v23034_v3 = vld [vmem:[%s23338_s9 + $0x134] sm:$0xf]  ;;  %v15265_v60 = vrot.slane %v23039_v21, 5  ;;  %v15281_v21 = vrot.slane %v23043_v2, 5  ;;  %v15264_v45 = vrot.slane %v15262_v50, 4  ;;  %v7518_v7 = vor.u32 %v7517_v13, %v27558_v32 }
 0x484   : > { %v15252_v4 = vrot.slane %v23034_v3, 5  ;;  %v15257_v3 = vrot.slane %v15255_v8, 4  ;;  %v7504_v44 = vrot.slane %v7502_v51, 4  ;;  %v15270_v51 = vrot.slane %v15268_v48, 4  ;;  %v19261_v35 = vld [vmem:[%s23338_s9 + $0x168] sm:$0xe] }
 0x485   : > { %v15277_v6 = vrot.slane %v15275_v61, 4  ;;  %v15283_v16 = vrot.slane %v15281_v21, 4  ;;  %v19293_v14 = vrot.slane %v19261_v35, 9  ;;  %v23047_v24 = vld [vmem:[%s23338_s9 + $0x170] sm:$0xf] }
 0x486   : > { %v15254_v38 = vrot.slane %v15252_v4, 4 }
 0x488   : > { %v27566_v2 = vsel %vm23862_vm8, %v15254_v38, %v15255_v8  ;;  %v15280_v8 = vrot.slane %v15278_v28, 4  ;;  %v22699_v38 = vld [vmem:[%s23338_s9 + $0x1e0] sm:$0xff]  }
 0x489   : > { %20763 = vmatmul.mubr.msk.bf16.gmra.mrb[84].mxu1 %vm1936_vm4, %v22696_v31  ;;  %v27562_v31 = vsel %vm23862_vm8, %v15251_v33, %v15252_v4  ;;  %v27574_v4 = vsel %vm23862_vm8, %v15257_v3, %v15258_v55  ;;  %v19292_v33 = vrot.slane %v19260_v53, 9  ;;  %v15291_v55 = vrot.slane %v23047_v24, 5 }
 0x48a   : > { %21349 = vmatmul.mubr.msk.bf16.gmra.mrb[20].mxu0 %vm1936_vm4, %v19321_v29  ;;  %20766 = vmatprep.mubr.msk.bf16.mxu1 %vm1936_vm4, %v22697_v42  ;;  %v7507_v29 = vrot.slane %v7505_v1, 5  ;;  %v15267_v42 = vrot.slane %v15265_v60, 4  ;;  %v23045_v1 = vld [vmem:[%s23338_s9 + $0x150] sm:$0x1]  ;;  %v27584_v3 = vsel %vm23862_vm8, %v19291_v41, %v15262_v50  ;;  %v27588_v53 = vsel %vm23862_vm8, %v15264_v45, %v15265_v60  ;;  %v18302_v41 = vld [vmem:[%s23338_s9 + $0x168] sm:$0xf] }
 0x48b   : > { %21352 = vmatprep.mubr.msk.bf16.mxu0 %vm1936_vm4, %v19322_v47  ;;  %v15288_v47 = vrot.slane %v23044_v12, 5  ;;  %v15271_v46 = vrot.slane %v23045_v1, 5  ;;  %v29589_v24 = vcombine.low %v27343_v30, %v27347_v58  ;;  %v27607_v60 = vsel %vm23862_vm8, %v19292_v33, %v15275_v61 }
 0x48c   : > { %v7508_v12 = vor.u32 %v7507_v29, %v7504_v44  ;;  %v27592_v49 = vsel %vm23862_vm8, %v15267_v42, %v15268_v48  ;;  %v27611_v48 = vsel %vm23862_vm8, %v15277_v6, %v15278_v28  ;;  %v23048_v29 = vld [vmem:[%s23338_s9 + $0x174] sm:$0xf]  ;;  %v29591_v30 = vcombine.low %v27368_v40, %v27372_v23 }
 0x48d   : > { %v15290_v63 = vrot.slane %v15288_v47, 4  ;;  %v27596_v44 = vsel %vm23862_vm8, %v15270_v51, %v15271_v46  ;;  %29590 = vst [vmem:[#allocation13_spill] sm:$0xff] %v27611_v48  ;;  %v15294_v13 = vrot.slane %v23048_v29, 5  ;;  %v27622_v58 = vsel %vm23862_vm8, %v15280_v8, %v15281_v21  ;;  %v22701_v8 = vld [vmem:[%s23338_s9 + $0x1f4] sm:$0xff]   ;;  %v18307_v29 = vld [vmem:[%s23338_s9 + $0x17c] sm:$0xf] }
 0x48e   : > { %29592 = vst [vmem:[#allocation14_spill] sm:$0xff] %v27622_v58  ;;  %v27626_v28 = vsel %vm23862_vm8, %v15283_v16, %v15284_v57  ;;  %v7509_v61 = vrot.slane %v7508_v12, 4  ;;  %v7519_v45 = vrot.slane %v7518_v7, 4  ;;  %v27634_v40 = vsel %vm23862_vm8, %v19293_v14, %v15288_v47  ;;  %v23049_v7 = vld [vmem:[%s23338_s9 + $0x16c] sm:$0xf] }
 0x48f   : > { %29593 = vst [vmem:[#allocation15_spill] sm:$0xff] %v27626_v28  ;;  %29594 = vst [vmem:[#allocation18_spill] sm:$0xff] %v27634_v40  ;;  %v27638_v23 = vsel %vm23862_vm8, %v15290_v63, %v15291_v55  ;;  %v7546_v57 = vshrl.u32 %v18302_v41, 16  ;;  %v7549_v21 = vshll.u32 %v18302_v41, 16  ;;  %v7555_v46 = vshll.u32 %v23049_v7, 16 }
 0x490   : > { %29595 = vst [vmem:[#allocation16_spill] sm:$0xff] %v27638_v23  ;;  %v7559_v35 = vshrl.u32 %v23049_v7, 16  ;;  %v15293_v47 = vrot.slane %v15291_v55, 4  ;;  %v15296_v6 = vrot.slane %v15294_v13, 4  ;;  %v7514_v63 = vsel %vm23356_vm5, %v7509_v61, %v27558_v32  ;;  %v23050_v12 = vld [vmem:[%s23338_s9 + $0x178] sm:$0x1] }
 0x491   : > { %20767 = vmatmul.mubr.msk.bf16.gmra.mrb[88].mxu1 %vm1936_vm4, %v22698_v15  ;;  %v22700_v15 = vld [vmem:[%s23338_s9 + $0x1e8] sm:$0xff]   ;;  %v23051_v41 = vld [vmem:[%s23338_s9 + $0x170] sm:$0xf]  ;;  %v23052_v7 = vld [vmem:[%s23338_s9 + $0x174] sm:$0xf]  ;;  %v7548_v51 = vrot.slane %v7546_v57, 4  ;;  %v29597_v57 = vcombine.low %v27385_v39, %v27389_v43 }
 0x492   : > { %21353 = vmatmul.mubr.msk.bf16.gmra.mrb[24].mxu0 %vm1936_vm4, %v29589_v24  ;;  %20770 = vmatprep.mubr.msk.bf16.mxu1 %vm1936_vm4, %v22699_v38  ;;  %v7524_v38 = vsel %vm23356_vm5, %v7519_v45, %v27194_v59  ;;  %v15297_v24 = vrot.slane %v23050_v12, 5  ;;  %v7565_v55 = vshll.u32 %v23051_v41, 16  ;;  %v7575_v14 = vshll.u32 %v23052_v7, 16  ;;  %v19262_v12 = vld [vmem:[%s23338_s9 + $0x17c] sm:$0xe] }
 0x493   : > { %21356 = vmatprep.mubr.msk.bf16.mxu0 %vm1936_vm4, %v29591_v30  ;;  %v7569_v30 = vshrl.u32 %v23051_v41, 16  ;;  %v7579_v33 = vshrl.u32 %v23052_v7, 16  ;;  %v7551_v32 = vrot.slane %v7549_v21, 5  ;;  %v27659_v61 = vrot.slane %v7555_v46, 5  ;;  %v23053_v41 = vld [vmem:[%s23338_s9 + $0x180] sm:$0xf] }
 0x494   : > { %v7561_v59 = vrot.slane %v7559_v35, 4  ;;  %v29596_v45 = vcombine.low %v27376_v25, %v27381_v11  ;;  %v7590_v16 = vshrl.u32 %v18307_v29, 16  ;;  %v7593_v42 = vshll.u32 %v18307_v29, 16  ;;  %v23054_v46 = vld [vmem:[%s23338_s9 + $0x180] sm:$0xf] }
 0x495   : > { %v7599_v50 = vshll.u32 %v23053_v41, 16  ;;  %v7603_v7 = vshrl.u32 %v23053_v41, 16  ;;  %v27673_v21 = vcombine.low %v7514_v63, %v7524_v38  ;;  %v27677_v25 = vsel %vm23862_vm8, %v15293_v47, %v15294_v13  ;;  %v23055_v47 = vld [vmem:[%s23338_s9 + $0x178] sm:$0x1] }
 0x496   : > { %v27681_v11 = vsel %vm23862_vm8, %v15296_v6, %v15297_v24  ;;  %v15301_v35 = vrot.slane %v23054_v46, 5  ;;  %v7571_v39 = vrot.slane %v7569_v30, 4  ;;  %v27686_v43 = vrot.slane %v7575_v14, 5  ;;  %v22702_v6 = vld [vmem:[%s23338_s9 + $0x1fc] sm:$0xff]   ;;  %v23056_v14 = vld [vmem:[%s23338_s9 + $0x184] sm:$0xf] }
 0x497   : > { %29598 = vst [vmem:[#allocation17_spill] sm:$0xff] %v27673_v21  ;;  %v7552_v63 = vor.u32 %v7551_v32, %v7548_v51  ;;  %v7562_v38 = vor.u32 %v7561_v59, %v27659_v61  ;;  %v19294_v13 = vrot.slane %v19262_v12, 9  ;;  %v7585_v29 = vshll.u32 %v23055_v47, 16  ;;  %v23058_v12 = vld [vmem:[%s23338_s9 + $0x184] sm:$0xf] }
 0x498   : > { %v7592_v24 = vrot.slane %v7590_v16, 4  ;;  %v27691_v41 = vrot.slane %v7599_v50, 5  ;;  %v7609_v30 = vshll.u32 %v23056_v14, 16  ;;  %v7613_v46 = vshrl.u32 %v23056_v14, 16  ;;  %v23060_v14 = vld [vmem:[%s23338_s9 + $0x194] sm:$0xf] }
 0x499   : > { %20771 = vmatmul.mubr.msk.bf16.gmra.mrb[92].mxu1 %vm1936_vm4, %v22700_v15  ;;  %v27684_v15 = vrot.slane %v7565_v55, 5  ;;  %v7605_v55 = vrot.slane %v7603_v7, 4  ;;  %v15303_v59 = vrot.slane %v15301_v35, 4  ;;  %v15304_v1 = vrot.slane %v23058_v12, 5  ;;  %v23059_v7 = vld [vmem:[%s23338_s9 + $0x188] sm:$0xf] }
 0x49a   : > { %21357 = vmatmul.mubr.msk.bf16.gmra.mrb[28].mxu0 %vm1936_vm4, %v29596_v45  ;;  %20774 = vmatprep.mubr.msk.bf16.mxu1 %vm1936_vm4, %v22701_v8  ;;  %v7581_v8 = vrot.slane %v7579_v33, 4  ;;  %v7595_v45 = vrot.slane %v7593_v42, 5  ;;  %v23057_v33 = vld [vmem:[%s23338_s9 + $0x188] sm:$0xf]  ;;  %v27699_v50 = vrot.slane %v7552_v63, 4  ;;  %v27703_v16 = vsel %vm23862_vm8, %v19294_v13, %v15301_v35 }
 0x49b   : > { %21360 = vmatprep.mubr.msk.bf16.mxu0 %vm1936_vm4, %v29597_v57  ;;  %v22703_v57 = vld [vmem:[%s23338_s9 + $0x208] sm:$0xff]   ;;  %v7619_v51 = vshll.u32 %v23057_v33, 16  ;;  %v7623_v32 = vshrl.u32 %v23057_v33, 16  ;;  %v7572_v47 = vor.u32 %v7571_v39, %v27684_v15  ;;  %v15307_v23 = vrot.slane %v23059_v7, 5  ;;  %v19263_v35 = vld [vmem:[%s23338_s9 + $0x190] sm:$0xe] }
 0x49c   : > { %v7582_v42 = vor.u32 %v7581_v8, %v27686_v43  ;;  %v15314_v40 = vrot.slane %v23060_v14, 5  ;;  %v29599_v33 = vcombine.low %v27394_v52, %v27398_v22  ;;  %v7563_v39 = vrot.slane %v7562_v38, 4  ;;  %v18312_v14 = vld [vmem:[%s23338_s9 + $0x190] sm:$0xf] }
 0x49d   : > { %v7587_v8 = vrot.slane %v7585_v29, 5  ;;  %v7596_v63 = vor.u32 %v7595_v45, %v7592_v24  ;;  %v7606_v12 = vor.u32 %v7605_v55, %v27691_v41  ;;  %v29600_v13 = vcombine.low %v27421_v0, %v27432_v18  ;;  %v23061_v55 = vld [vmem:[%s23338_s9 + $0x18c] sm:$0x1]  ;;  %v23062_v0 = vld [vmem:[%s23338_s9 + $0x198] sm:$0xf] }
 0x49e   : > { %v7611_v52 = vrot.slane %v7609_v30, 5  ;;  %v7615_v22 = vrot.slane %v7613_v46, 4  ;;  %v7625_v38 = vrot.slane %v7623_v32, 4  ;;  %v7573_v29 = vrot.slane %v7572_v47, 4  ;;  %v23063_v32 = vld [vmem:[%s23338_s9 + $0x18c] sm:$0x1] }
 0x49f   : > { %v7583_v24 = vrot.slane %v7582_v42, 4  ;;  %v15306_v45 = vrot.slane %v15304_v1, 4  ;;  %v15310_v7 = vrot.slane %v23061_v55, 5  ;;  %v15316_v21 = vrot.slane %v15314_v40, 4  ;;  %v22705_v42 = vld [vmem:[%s23338_s9 + $0x21c] sm:$0xff]  }
 0x4a0   : > { %v15317_v18 = vrot.slane %v23062_v0, 5  ;;  %v27727_v30 = vsel %vm23862_vm8, %v15303_v59, %v15304_v1  ;;  %v7597_v46 = vrot.slane %v7596_v63, 4  ;;  %v7629_v47 = vshll.u32 %v23063_v32, 16  ;;  %v23066_v0 = vld [vmem:[%s23338_s9 + $0x194] sm:$0xf] }
 0x4a1   : > { %20775 = vmatmul.mubr.msk.bf16.gmra.mrb[96].mxu1 %vm1936_vm4, %v22702_v6  ;;  %v27719_v6 = vrot.slane %v7619_v51, 5  ;;  %v7607_v51 = vrot.slane %v7606_v12, 4  ;;  %v7616_v28 = vor.u32 %v7615_v22, %v7611_v52  ;;  %v7634_v55 = vshrl.u32 %v18312_v14, 16 }
 0x4a2   : > { %21361 = vmatmul.mubr.msk.bf16.gmra.mrb[32].mxu0 %vm1936_vm4, %v29599_v33  ;;  %20778 = vmatprep.mubr.msk.bf16.mxu1 %vm1936_vm4, %v22703_v57  ;;  %v15309_v57 = vrot.slane %v15307_v23, 4  ;;  %v19295_v33 = vrot.slane %v19263_v35, 9  ;;  %v7637_v48 = vshll.u32 %v18312_v14, 16  ;;  %v7558_v35 = vsel %vm23356_vm5, %v27699_v50, %v27659_v61  ;;  %v22706_v14 = vld [vmem:[%s23338_s9 + $0x224] sm:$0xff]  }
 0x4a3   : > { %21364 = vmatprep.mubr.msk.bf16.mxu0 %vm1936_vm4, %v29600_v13  ;;  %v22704_v13 = vld [vmem:[%s23338_s9 + $0x210] sm:$0xff]   ;;  %v7626_v58 = vor.u32 %v7625_v38, %v27719_v6  ;;  %v7568_v1 = vsel %vm23356_vm5, %v7563_v39, %v27684_v15  ;;  %v7578_v59 = vsel %vm23356_vm5, %v7573_v29, %v27686_v43  ;;  %v27744_v63 = vsel %vm23862_vm8, %v15306_v45, %v15307_v23  ;;  %v23064_v39 = vld [vmem:[%s23338_s9 + $0x19c] sm:$0xf] }
 0x4a4   : > { %v7588_v12 = vsel %vm23356_vm5, %v7583_v24, %v7587_v8  ;;  %v27750_v22 = vsel %vm23862_vm8, %v15309_v57, %v15310_v7  ;;  %v27754_v61 = vsel %vm23862_vm8, %v19295_v33, %v15314_v40  ;;  %v27758_v15 = vsel %vm23862_vm8, %v15316_v21, %v15317_v18  ;;  %v18317_v7 = vld [vmem:[%s23338_s9 + $0x1a4] sm:$0xf] }
 0x4a5   : > { %v29601_v23 = vcombine.low %v27439_v27, %v27452_v17  ;;  %v7602_v43 = vsel %vm23356_vm5, %v7597_v46, %v27691_v41  ;;  %v7612_v50 = vsel %vm23356_vm5, %v7607_v51, %v7611_v52  ;;  %v7631_v40 = vrot.slane %v7629_v47, 5  ;;  %v22707_v51 = vld [vmem:[%s23338_s9 + $0x230] sm:$0xff]  }
 0x4a6   : > { %v15320_v8 = vrot.slane %v23064_v39, 5  ;;  %v29602_v21 = vcombine.low %v27456_v34, %v27460_v56  ;;  %v7617_v27 = vrot.slane %v7616_v28, 4  ;;  %v7627_v17 = vrot.slane %v7626_v58, 4  ;;  %v23075_v56 = vld [vmem:[%s23338_s9 + $0x1b0] sm:$0xf] }
 0x4a7   : > { %v7636_v41 = vrot.slane %v7634_v55, 4  ;;  %v7639_v38 = vrot.slane %v7637_v48, 5  ;;  %v27778_v29 = vcombine.low %v7558_v35, %v7568_v1  ;;  %v27782_v45 = vcombine.low %v7578_v59, %v7588_v12  ;;  %v23065_v48 = vld [vmem:[%s23338_s9 + $0x1a0] sm:$0x1]  ;;  %v19264_v35 = vld [vmem:[%s23338_s9 + $0x1a4] sm:$0xe] }
 0x4a8   : > { %v15319_v58 = vrot.slane %v15317_v18, 4  ;;  %v15323_v28 = vrot.slane %v23065_v48, 5  ;;  %v27791_v57 = vcombine.low %v7602_v43, %v7612_v50  ;;  %v15322_v33 = vrot.slane %v15320_v8, 4  ;;  %v23068_v59 = vld [vmem:[%s23338_s9 + $0x19c] sm:$0xf] }
 0x4a9   : > { %20779 = vmatmul.mubr.msk.bf16.gmra.mrb[100].mxu1 %vm1936_vm4, %v22704_v13  ;;  %v7643_v13 = vshll.u32 %v23066_v0, 16  ;;  %v7647_v46 = vshrl.u32 %v23066_v0, 16  ;;  %v7622_v32 = vsel %vm23356_vm5, %v7617_v27, %v27719_v6  ;;  %v7632_v18 = vsel %vm23356_vm5, %v7627_v17, %v7631_v40 }
 0x4aa   : > { %21365 = vmatmul.mubr.msk.bf16.gmra.mrb[36].mxu0 %vm1936_vm4, %v29601_v23  ;;  %20782 = vmatprep.mubr.msk.bf16.mxu1 %vm1936_vm4, %v22705_v42  ;;  %v7640_v47 = vor.u32 %v7639_v38, %v7636_v41  ;;  %v23067_v42 = vld [vmem:[%s23338_s9 + $0x198] sm:$0xf]  ;;  %v7663_v12 = vshll.u32 %v23068_v59, 16  ;;  %v7667_v23 = vshrl.u32 %v23068_v59, 16  ;;  %v7678_v43 = vshrl.u32 %v18317_v7, 16 }
 0x4ab   : > { %21368 = vmatprep.mubr.msk.bf16.mxu0 %vm1936_vm4, %v29602_v21  ;;  %v7653_v55 = vshll.u32 %v23067_v42, 16  ;;  %v7657_v1 = vshrl.u32 %v23067_v42, 16  ;;  %v27805_v50 = vsel %vm23862_vm8, %v15319_v58, %v15320_v8  ;;  %v7681_v39 = vshll.u32 %v18317_v7, 16  ;;  %v23069_v21 = vld [vmem:[%s23338_s9 + $0x1a8] sm:$0xf]  ;;  %v22708_v42 = vld [vmem:[%s23338_s9 + $0x238] sm:$0xff]  }
 0x4ac   : > { %v7687_v6 = vshll.u32 %v23069_v21, 16  ;;  %v7691_v27 = vshrl.u32 %v23069_v21, 16  ;;  %v29603_v40 = vcombine.low %v27464_v20, %v27468_v5  ;;  %v27813_v17 = vcombine.low %v7622_v32, %v7632_v18  ;;  %v23070_v7 = vld [vmem:[%s23338_s9 + $0x1a8] sm:$0xf]  ;;  %v23071_v32 = vld [vmem:[%s23338_s9 + $0x1ac] sm:$0xf] }
 0x4ad   : > { %v27817_v41 = vsel %vm23862_vm8, %v15322_v33, %v15323_v28  ;;  %v27819_v8 = vrot.slane %v7643_v13, 5  ;;  %v7649_v38 = vrot.slane %v7647_v46, 4  ;;  %v29604_v58 = vcombine.low %v27478_v19, %v27482_v54 }
 0x4ae   : > { %v27826_v20 = vrot.slane %v7640_v47, 4  ;;  %v27828_v5 = vrot.slane %v7653_v55, 5  ;;  %v19296_v48 = vrot.slane %v19264_v35, 9  ;;  %v15327_v28 = vrot.slane %v23070_v7, 5 }
 0x4af   : > { %v27831_v33 = vrot.slane %v7663_v12, 5  ;;  %v7669_v0 = vrot.slane %v7667_v23, 4  ;;  %v7680_v13 = vrot.slane %v7678_v43, 4  ;;  %v7683_v19 = vrot.slane %v7681_v39, 5  ;;  %v22709_v43 = vld [vmem:[%s23338_s9 + $0x244] sm:$0xff]  }
 0x4b0   : > { %v27835_v54 = vrot.slane %v7687_v6, 5  ;;  %v7697_v18 = vshll.u32 %v23071_v32, 16  ;;  %v7701_v35 = vshrl.u32 %v23071_v32, 16  ;;  %v7650_v39 = vor.u32 %v7649_v38, %v27819_v8  ;;  %v23073_v6 = vld [vmem:[%s23338_s9 + $0x1ac] sm:$0xf] }
 0x4b1   : > { %20783 = vmatmul.mubr.msk.bf16.gmra.mrb[104].mxu1 %vm1936_vm4, %v22706_v14  ;;  %v7659_v14 = vrot.slane %v7657_v1, 4  ;;  %v23072_v1 = vld [vmem:[%s23338_s9 + $0x1b0] sm:$0xf]  ;;  %v27850_v21 = vsel %vm23862_vm8, %v19296_v48, %v15327_v28  ;;  %v15329_v32 = vrot.slane %v15327_v28, 4  ;;  %v7670_v55 = vor.u32 %v7669_v0, %v27831_v33 }
 0x4b2   : > { %21369 = vmatmul.mubr.msk.bf16.gmra.mrb[40].mxu0 %vm1936_vm4, %v29603_v40  ;;  %20786 = vmatprep.mubr.msk.bf16.mxu1 %vm1936_vm4, %v22707_v51  ;;  %v7693_v51 = vrot.slane %v7691_v27, 4  ;;  %v7707_v59 = vshll.u32 %v23072_v1, 16  ;;  %v7711_v12 = vshrl.u32 %v23072_v1, 16  ;;  %v15330_v27 = vrot.slane %v23073_v6, 5  ;;  %v23074_v40 = vld [vmem:[%s23338_s9 + $0x1a0] sm:$0x1] }
 0x4b3   : > { %21372 = vmatprep.mubr.msk.bf16.mxu0 %vm1936_vm4, %v29604_v58  ;;  %v7673_v58 = vshll.u32 %v23074_v40, 16  ;;  %v7660_v1 = vor.u32 %v7659_v14, %v27828_v5  ;;  %v15333_v34 = vrot.slane %v23075_v56, 5  ;;  %v7684_v48 = vor.u32 %v7683_v19, %v7680_v13  ;;  %v19265_v40 = vld [vmem:[%s23338_s9 + $0x1b8] sm:$0xe]  ;;  %v23076_v56 = vld [vmem:[%s23338_s9 + $0x1bc] sm:$0xf] }
 0x4b4   : > { %v27833_v46 = vpop.f32.mrb[0].mxu1  ;;  %v7694_v6 = vor.u32 %v7693_v51, %v27835_v54  ;;  %v27864_v24 = vrot.slane %v7697_v18, 5  ;;  %v29609_v28 = vcombine.low %v27486_v62, %v27495_v36  ;;  %v15340_v14 = vrot.slane %v23076_v56, 5  ;;  %v29610_v19 = vld [vmem:[#allocation10_spill] sm:$0xff]  ;;  %v23077_v36 = vld [vmem:[%s23338_s9 + $0x1b4] sm:$0x1] }
 0x4b5   : > { %29605 = vst [vmem:[#allocation24_spill] sm:$0xff] %v27833_v46  ;;  %v27838_v47 = vpop.f32.mrb[1].mxu1  ;;  %v7703_v0 = vrot.slane %v7701_v35, 4  ;;  %v27873_v52 = vrot.slane %v7707_v59, 5  ;;  %v7713_v13 = vrot.slane %v7711_v12, 4  ;;  %v29611_v51 = vcombine.low %v27499_v10, %v29610_v19  ;;  %v22711_v46 = vld [vmem:[%s23338_s9 + $0x258] sm:$0xff]  }
 0x4b6   : > { %29606 = vst [vmem:[#allocation6_spill] sm:$0xff] %v27838_v47  ;;  %v27844_v23 = vpop.f32.mrb[2].mxu1  ;;  %v7651_v18 = vrot.slane %v7650_v39, 4  ;;  %v15332_v62 = vrot.slane %v15330_v27, 4  ;;  %v7661_v56 = vrot.slane %v7660_v1, 4  ;;  %v7671_v35 = vrot.slane %v7670_v55, 4 }
 0x4b7   : > { %29607 = vst [vmem:[#allocation19_spill] sm:$0xff] %v27844_v23  ;;  %v27854_v7 = vpop.f32.mrb[3].mxu1  ;;  %v15335_v59 = vrot.slane %v15333_v34, 4  ;;  %v19297_v38 = vrot.slane %v19265_v40, 9  ;;  %v18322_v12 = vld [vmem:[%s23338_s9 + $0x1b8] sm:$0xf]  ;;  %v27886_v10 = vsel %vm23862_vm8, %v15329_v32, %v15330_v27  ;;  %v7704_v40 = vor.u32 %v7703_v0, %v27864_v24 }
 0x4b8   : > { %29608 = vst [vmem:[#allocation20_spill] sm:$0xff] %v27854_v7  ;;  %v7685_v19 = vrot.slane %v7684_v48, 4  ;;  %v7695_v39 = vrot.slane %v7694_v6, 4  ;;  %v22710_v23 = vld [vmem:[%s23338_s9 + $0x24c] sm:$0xff]   ;;  %v23079_v1 = vld [vmem:[%s23338_s9 + $0x1c0] sm:$0xf]  ;;  %v7714_v47 = vor.u32 %v7713_v13, %v27873_v52  ;;  %v7656_v27 = vsel %vm23356_vm5, %v7651_v18, %v27828_v5 }
 0x4b9   : > { %20787 = vmatmul.mubr.msk.bf16.gmra.mrb[108].mxu1 %vm1936_vm4, %v22708_v42  ;;  %v7675_v42 = vrot.slane %v7673_v58, 5  ;;  %v23078_v58 = vld [vmem:[%s23338_s9 + $0x1b4] sm:$0x1]  ;;  %v15343_v55 = vrot.slane %v23079_v1, 5  ;;  %v27903_v32 = vsel %vm23862_vm8, %v15332_v62, %v15333_v34  ;;  %v7722_v48 = vshrl.u32 %v18322_v12, 16 }
 0x4ba   : > { %21373 = vmatmul.mubr.msk.bf16.gmra.mrb[44].mxu0 %vm1936_vm4, %v29609_v28  ;;  %20790 = vmatprep.mubr.msk.bf16.mxu1 %vm1936_vm4, %v22709_v43  ;;  %v15336_v28 = vrot.slane %v23077_v36, 5  ;;  %v15342_v36 = vrot.slane %v15340_v14, 4  ;;  %v7725_v6 = vshll.u32 %v18322_v12, 16  ;;  %v7666_v0 = vsel %vm23356_vm5, %v7661_v56, %v27831_v33  ;;  %v23080_v62 = vld [vmem:[%s23338_s9 + $0x1c4] sm:$0xf] }
 0x4bb   : > { %21376 = vmatprep.mubr.msk.bf16.mxu0 %vm1936_vm4, %v29611_v51  ;;  %v7717_v51 = vshll.u32 %v23078_v58, 16  ;;  %v7676_v13 = vsel %vm23356_vm5, %v7671_v35, %v7675_v42  ;;  %v27918_v34 = vsel %vm23862_vm8, %v19297_v38, %v15340_v14  ;;  %v7690_v5 = vsel %vm23356_vm5, %v7685_v19, %v27835_v54  ;;  %v29616_v42 = vld [vmem:[#allocation11_spill] sm:$0xff] }
 0x4bc   : > { %v27882_v43 = vpop.f32.mrb[4].mxu1  ;;  %v27914_v1 = vsel %vm23862_vm8, %v15335_v59, %v15336_v28  ;;  %v7700_v18 = vsel %vm23356_vm5, %v7695_v39, %v27864_v24  ;;  %v15346_v56 = vrot.slane %v23080_v62, 5  ;;  %v29617_v28 = vld [vmem:[#allocation12_spill] sm:$0xff]  ;;  %v27934_v38 = vsel %vm23862_vm8, %v15342_v36, %v15343_v55  ;;  %v23081_v59 = vld [vmem:[%s23338_s9 + $0x1bc] sm:$0xf] }
 0x4bd   : > { %29612 = vst [vmem:[#allocation23_spill] sm:$0xff] %v27882_v43  ;;  %v27889_v7 = vpop.f32.mrb[5].mxu1  ;;  %v7719_v33 = vrot.slane %v7717_v51, 5  ;;  %v29618_v35 = vcombine.low %v29616_v42, %v29617_v28  ;;  %v7705_v14 = vrot.slane %v7704_v40, 4  ;;  %v7715_v54 = vrot.slane %v7714_v47, 4 }
 0x4be   : > { %29613 = vst [vmem:[#allocation21_spill] sm:$0xff] %v27889_v7  ;;  %v27895_v43 = vpop.f32.mrb[6].mxu1  ;;  %v7731_v12 = vshll.u32 %v23081_v59, 16  ;;  %v29619_v24 = vcombine.low %v27547_v9, %v27562_v31  ;;  %v7724_v19 = vrot.slane %v7722_v48, 4  ;;  %v7727_v39 = vrot.slane %v7725_v6, 5 }
 0x4bf   : > { %29614 = vst [vmem:[#allocation22_spill] sm:$0xff] %v27895_v43  ;;  %v27905_v58 = vpop.f32.mrb[7].mxu1  ;;  %v7735_v51 = vshrl.u32 %v23081_v59, 16  ;;  %v29620_v47 = vsel %vm23356_vm5, %v27826_v20, %v27819_v8  ;;  %v15345_v31 = vrot.slane %v15343_v55, 4  ;;  %v27957_v48 = vcombine.low %v7690_v5, %v7700_v18  ;;  %v23082_v8 = vld [vmem:[%s23338_s9 + $0x1c8] sm:$0x1] }
 0x4c0   : > { %29615 = vst [vmem:[#allocation7_spill] sm:$0xff] %v27905_v58  ;;  %v27949_v36 = vcombine.low %v29620_v47, %v7656_v27  ;;  %v15348_v62 = vrot.slane %v15346_v56, 4  ;;  %v15349_v20 = vrot.slane %v23082_v8, 5  ;;  %v18327_v27 = vld [vmem:[%s23338_s9 + $0x1cc] sm:$0xf]  ;;  %v7710_v55 = vsel %vm23356_vm5, %v7705_v14, %v27873_v52 }
 0x4c1   : > { %20791 = vmatmul.mubr.msk.bf16.gmra.mrb[112].mxu1 %vm1936_vm4, %v22710_v23  ;;  %v7720_v42 = vsel %vm23356_vm5, %v7715_v54, %v7719_v33  ;;  %v27971_v5 = vrot.slane %v7731_v12, 5  ;;  %v23083_v18 = vld [vmem:[%s23338_s9 + $0x1c0] sm:$0xf]  ;;  %v7728_v47 = vor.u32 %v7727_v39, %v7724_v19  ;;  %v7737_v8 = vrot.slane %v7735_v51, 4  ;;  %v23084_v9 = vld [vmem:[%s23338_s9 + $0x1c4] sm:$0xf] }
 0x4c2   : > { %21377 = vmatmul.mubr.msk.bf16.gmra.mrb[48].mxu0 %vm1936_vm4, %v29618_v35  ;;  %20794 = vmatprep.mubr.msk.bf16.mxu1 %vm1936_vm4, %v22711_v46  ;;  %v27951_v46 = vcombine.low %v7666_v0, %v7676_v13  ;;  %v22712_v13 = vld [vmem:[%s23338_s9 + $0x260] sm:$0xff]   ;;  %v7741_v28 = vshll.u32 %v23083_v18, 16  ;;  %v19266_v35 = vld [vmem:[%s23338_s9 + $0x1cc] sm:$0xe]  ;;  %v7745_v6 = vshrl.u32 %v23083_v18, 16  ;;  %v7751_v23 = vshll.u32 %v23084_v9, 16 }
 0x4c3   : > { %21380 = vmatprep.mubr.msk.bf16.mxu0 %vm1936_vm4, %v29619_v24  ;;  %v22713_v24 = vld [vmem:[%s23338_s9 + $0x26c] sm:$0xff]   ;;  %v27983_v52 = vsel %vm23862_vm8, %v15345_v31, %v15346_v56  ;;  %v7755_v33 = vshrl.u32 %v23084_v9, 16  ;;  %v7766_v14 = vshrl.u32 %v18327_v27, 16  ;;  %v7769_v54 = vshll.u32 %v18327_v27, 16  ;;  %v23087_v31 = vld [vmem:[%s23338_s9 + $0x1d4] sm:$0xf] }
 0x4c4   : > { %v27955_v40 = vpop.f32.mrb[8].mxu1  ;;  %v19298_v12 = vrot.slane %v19266_v35, 9  ;;  %v29625_v39 = vcombine.low %v27566_v2, %v27574_v4  ;;  %v27992_v51 = vcombine.low %v7710_v55, %v7720_v42  ;;  %v27996_v56 = vsel %vm23862_vm8, %v15348_v62, %v15349_v20  ;;  %v23088_v55 = vld [vmem:[%s23338_s9 + $0x1d8] sm:$0xf] }
 0x4c5   : > { %29621 = vst [vmem:[#allocation8_spill] sm:$0xff] %v27955_v40  ;;  %v27963_v0 = vpop.f32.mrb[9].mxu1  ;;  %v23085_v40 = vld [vmem:[%s23338_s9 + $0x1d0] sm:$0xf]  ;;  %v27998_v9 = vrot.slane %v7741_v28, 5  ;;  %v29627_v27 = vcombine.low %v27584_v3, %v27588_v53  ;;  %v28006_v2 = vrot.slane %v7728_v47, 4  ;;  %v7738_v4 = vor.u32 %v7737_v8, %v27971_v5 }
 0x4c6   : > { %29622 = vst [vmem:[#allocation5_spill] sm:$0xff] %v27963_v0  ;;  %v27975_v59 = vpop.f32.mrb[10].mxu1  ;;  %v15353_v58 = vrot.slane %v23085_v40, 5  ;;  %29626 = vst [vmem:[#allocation12_spill] sm:$0xff] %v27992_v51  ;;  %v15356_v40 = vrot.slane %v23087_v31, 5  ;;  %v28009_v62 = vrot.slane %v7751_v23, 5 }
 0x4c7   : > { %29623 = vst [vmem:[#allocation10_spill] sm:$0xff] %v27975_v59  ;;  %v27979_v0 = vpop.f32.mrb[11].mxu1  ;;  %v23086_v59 = vld [vmem:[%s23338_s9 + $0x1d0] sm:$0xf]  ;;  %v7757_v20 = vrot.slane %v7755_v33, 4  ;;  %v15359_v42 = vrot.slane %v23088_v55, 5 }
 0x4c8   : > { %29624 = vst [vmem:[#allocation11_spill] sm:$0xff] %v27979_v0  ;;  %v7775_v43 = vshll.u32 %v23086_v59, 16  ;;  %v7779_v19 = vshrl.u32 %v23086_v59, 16  ;;  %v7768_v18 = vrot.slane %v7766_v14, 4  ;;  %v7771_v28 = vrot.slane %v7769_v54, 5 }
 0x4c9   : > { %20795 = vmatmul.mubr.msk.bf16.gmra.mrb[116].mxu1 %vm1936_vm4, %v22712_v13  ;;  %v7747_v13 = vrot.slane %v7745_v6, 4  ;;  %v28016_v3 = vsel %vm23862_vm8, %v19298_v12, %v15353_v58  ;;  %v15355_v53 = vrot.slane %v15353_v58, 4  ;;  %v23089_v47 = vld [vmem:[%s23338_s9 + $0x1d4] sm:$0xf]  ;;  %v23090_v14 = vld [vmem:[%s23338_s9 + $0x1d8] sm:$0xf] }
 0x4ca   : > { %21381 = vmatmul.mubr.msk.bf16.gmra.mrb[52].mxu0 %vm1936_vm4, %v29625_v39  ;;  %20798 = vmatprep.mubr.msk.bf16.mxu1 %vm1936_vm4, %v22713_v24  ;;  %v28018_v59 = vrot.slane %v7775_v43, 5  ;;  %v7781_v6 = vrot.slane %v7779_v19, 4  ;;  %v22714_v24 = vld [vmem:[%s23338_s9 + $0x274] sm:$0xff]   ;;  %v7785_v8 = vshll.u32 %v23089_v47, 16  ;;  %v7789_v33 = vshrl.u32 %v23089_v47, 16  ;;  %v22715_v12 = vld [vmem:[%s23338_s9 + $0x280] sm:$0xff]  }
 0x4cb   : > { %21384 = vmatprep.mubr.msk.bf16.mxu0 %vm1936_vm4, %v29627_v27  ;;  %v7795_v54 = vshll.u32 %v23090_v14, 16  ;;  %v7799_v39 = vshrl.u32 %v23090_v14, 16  ;;  %v7739_v27 = vrot.slane %v7738_v4, 4  ;;  %v7748_v43 = vor.u32 %v7747_v13, %v27998_v9  ;;  %v23091_v58 = vld [vmem:[%s23338_s9 + $0x1c8] sm:$0x1] }
 0x4cc   : > { %v28012_v35 = vpop.f32.mrb[12].mxu1  ;;  %v7761_v19 = vshll.u32 %v23091_v58, 16  ;;  %v15358_v55 = vrot.slane %v15356_v40, 4  ;;  %v15361_v0 = vrot.slane %v15359_v42, 4  ;;  %v23092_v47 = vld [vmem:[%s23338_s9 + $0x1dc] sm:$0x1]  ;;  %v7772_v51 = vor.u32 %v7771_v28, %v7768_v18 }
 0x4cd   : > { %29628 = vst [vmem:[#allocation25_spill] sm:$0xff] %v28012_v35  ;;  %v28020_v23 = vpop.f32.mrb[13].mxu1  ;;  %v7758_v35 = vor.u32 %v7757_v20, %v28009_v62  ;;  %v15362_v7 = vrot.slane %v23092_v47, 5  ;;  %v7734_v14 = vsel %vm23356_vm5, %v28006_v2, %v27971_v5  ;;  %v28040_v4 = vsel %vm23862_vm8, %v15355_v53, %v15356_v40  ;;  %v19267_v58 = vld [vmem:[%s23338_s9 + $0x1e0] sm:$0xe]  ;;  %v29633_v2 = vld [vmem:[#allocation13_spill] sm:$0xff] }
 0x4ce   : > { %29629 = vst [vmem:[#allocation26_spill] sm:$0xff] %v28020_v23  ;;  %v28025_v31 = vpop.f32.mrb[14].mxu1  ;;  %v7782_v13 = vor.u32 %v7781_v6, %v28018_v59  ;;  %v29632_v20 = vcombine.low %v27592_v49, %v27596_v44  ;;  %v7787_v18 = vrot.slane %v7785_v8, 5  ;;  %v7791_v28 = vrot.slane %v7789_v33, 4 }
 0x4cf   : > { %29630 = vst [vmem:[#allocation27_spill] sm:$0xff] %v28025_v31  ;;  %v28030_v23 = vpop.f32.mrb[15].mxu1  ;;  %v23093_v31 = vld [vmem:[%s23338_s9 + $0x1e4] sm:$0xf]  ;;  %v28050_v5 = vrot.slane %v7795_v54, 5  ;;  %v7801_v40 = vrot.slane %v7799_v39, 4  ;;  %v29634_v53 = vcombine.low %v27607_v60, %v29633_v2  ;;  %v7744_v49 = vsel %vm23356_vm5, %v7739_v27, %v27998_v9 }
 0x4d0   : > { %29631 = vst [vmem:[#allocation28_spill] sm:$0xff] %v28030_v23  ;;  %v15366_v23 = vrot.slane %v23093_v31, 5  ;;  %v7749_v44 = vrot.slane %v7748_v43, 4  ;;  %v7763_v6 = vrot.slane %v7761_v19, 5  ;;  %v7759_v8 = vrot.slane %v7758_v35, 4 }
 0x4d1   : > { %20799 = vmatmul.mubr.msk.bf16.gmra.mrb[120].mxu1 %vm1936_vm4, %v22714_v24  ;;  %v28062_v24 = vsel %vm23862_vm8, %v15358_v55, %v15359_v42  ;;  %v28066_v33 = vsel %vm23862_vm8, %v15361_v0, %v15362_v7  ;;  %v7773_v60 = vrot.slane %v7772_v51, 4  ;;  %v19299_v54 = vrot.slane %v19267_v58, 9  ;;  %v18332_v39 = vld [vmem:[%s23338_s9 + $0x1e0] sm:$0xf]  ;;  %v23094_v9 = vld [vmem:[%s23338_s9 + $0x1e8] sm:$0xf] }
 0x4d2   : > { %21385 = vmatmul.mubr.msk.bf16.gmra.mrb[56].mxu0 %vm1936_vm4, %v29632_v20  ;;  %20802 = vmatprep.mubr.msk.bf16.mxu1 %vm1936_vm4, %v22715_v12  ;;  %29635 = vst [vmem:[#allocation13_spill] sm:$0xff] %v28062_v24  ;;  %29636 = vst [vmem:[#allocation29_spill] sm:$0xff] %v28066_v33  ;;  %v7783_v12 = vrot.slane %v7782_v13, 4  ;;  %v15368_v47 = vrot.slane %v15366_v23, 4  ;;  %v15369_v27 = vrot.slane %v23094_v9, 5  ;;  %v22716_v42 = vld [vmem:[%s23338_s9 + $0x288] sm:$0xff]   ;;  %v7792_v0 = vor.u32 %v7791_v28, %v7787_v18 }
 0x4d3   : > { %21388 = vmatprep.mubr.msk.bf16.mxu0 %vm1936_vm4, %v29634_v53  ;;  %v23095_v43 = vld [vmem:[%s23338_s9 + $0x1dc] sm:$0x1]  ;;  %v7802_v51 = vor.u32 %v7801_v40, %v28050_v5  ;;  %v28083_v13 = vcombine.low %v7734_v14, %v7744_v49  ;;  %v7754_v58 = vsel %vm23356_vm5, %v7749_v44, %v28009_v62  ;;  %v7810_v2 = vshrl.u32 %v18332_v39, 16  ;;  %v29644_v28 = vld [vmem:[#allocation15_spill] sm:$0xff] }
 0x4d4   : > { %v28069_v31 = vpop.f32.mrb[16].mxu1  ;;  %v7805_v19 = vshll.u32 %v23095_v43, 16  ;;  %v7813_v53 = vshll.u32 %v18332_v39, 16  ;;  %v7764_v43 = vsel %vm23356_vm5, %v7759_v8, %v7763_v6  ;;  %v7778_v14 = vsel %vm23356_vm5, %v7773_v60, %v28018_v59  ;;  %v23096_v6 = vld [vmem:[%s23338_s9 + $0x1ec] sm:$0xf]  ;;  %v29643_v39 = vld [vmem:[#allocation14_spill] sm:$0xff] }
 0x4d5   : > { %29637 = vst [vmem:[#allocation30_spill] sm:$0xff] %v28069_v31  ;;  %v28073_v20 = vpop.f32.mrb[17].mxu1  ;;  %v28099_v40 = vsel %vm23862_vm8, %v19299_v54, %v15366_v23  ;;  %v7788_v62 = vsel %vm23356_vm5, %v7783_v12, %v7787_v18  ;;  %v28105_v49 = vsel %vm23862_vm8, %v15368_v47, %v15369_v27  ;;  %v15372_v8 = vrot.slane %v23096_v6, 5  ;;  %v23097_v54 = vld [vmem:[%s23338_s9 + $0x1e4] sm:$0xf]  ;;  %v29646_v47 = vld [vmem:[#allocation17_spill] sm:$0xff] }
 0x4d6   : > { %29638 = vst [vmem:[#allocation31_spill] sm:$0xff] %v28073_v20  ;;  %v28081_v55 = vpop.f32.mrb[18].mxu1  ;;  %29641 = vst [vmem:[#allocation34_spill] sm:$0xff] %v28099_v40  ;;  %v7807_v44 = vrot.slane %v7805_v19, 5  ;;  %v29645_v59 = vcombine.low %v29643_v39, %v29644_v28  ;;  %v7793_v23 = vrot.slane %v7792_v0, 4  ;;  %v7803_v60 = vrot.slane %v7802_v51, 4 }
 0x4d7   : > { %29639 = vst [vmem:[#allocation32_spill] sm:$0xff] %v28081_v55  ;;  %v28088_v9 = vpop.f32.mrb[19].mxu1  ;;  %29642 = vst [vmem:[#allocation35_spill] sm:$0xff] %v28105_v49  ;;  %v7819_v18 = vshll.u32 %v23097_v54, 16  ;;  %v7823_v12 = vshrl.u32 %v23097_v54, 16  ;;  %v29647_v19 = vld [vmem:[#allocation18_spill] sm:$0xff] }
 0x4d8   : > { %29640 = vst [vmem:[#allocation33_spill] sm:$0xff] %v28088_v9  ;;  %v29648_v6 = vld [vmem:[#allocation16_spill] sm:$0xff]  ;;  %v15371_v28 = vrot.slane %v15369_v27, 4  ;;  %v7812_v39 = vrot.slane %v7810_v2, 4  ;;  %v7815_v0 = vrot.slane %v7813_v53, 5 }
 0x4d9   : > { %20803 = vmatmul.mubr.msk.bf16.gmra.mrb[124].mxu1 %vm1936_vm4, %v22716_v42  ;;  %v29649_v7 = vcombine.low %v29647_v19, %v29648_v6  ;;  %v28120_v42 = vcombine.low %v7754_v58, %v7764_v43  ;;  %v23098_v54 = vld [vmem:[%s23338_s9 + $0x1e8] sm:$0xf]  ;;  %v15374_v6 = vrot.slane %v15372_v8, 4  ;;  %v23100_v43 = vld [vmem:[%s23338_s9 + $0x1ec] sm:$0xf]  ;;  %v7825_v51 = vrot.slane %v7823_v12, 4 }
 0x4da   : > { %21389 = vmatmul.mubr.msk.bf16.gmra.mrb[60].mxu0 %vm1936_vm4, %v29645_v59  ;;  %20872 = vmatprep.mubr.msk.bf16.mxu1 %vm1936_vm4, %v29646_v47  ;;  %v28122_v59 = vcombine.low %v7778_v14, %v7788_v62  ;;  %v7829_v35 = vshll.u32 %v23098_v54, 16  ;;  %v7833_v9 = vshrl.u32 %v23098_v54, 16  ;;  %v18337_v47 = vld [vmem:[%s23338_s9 + $0x1f4] sm:$0xf]  ;;  %v7839_v27 = vshll.u32 %v23100_v43, 16 }
 0x4db   : > { %21392 = vmatprep.mubr.msk.bf16.mxu0 %vm1936_vm4, %v29649_v7  ;;  %v23099_v7 = vld [vmem:[%s23338_s9 + $0x1f0] sm:$0x1]  ;;  %v7843_v2 = vshrl.u32 %v23100_v43, 16  ;;  %v7798_v14 = vsel %vm23356_vm5, %v7793_v23, %v28050_v5  ;;  %v7808_v62 = vsel %vm23356_vm5, %v7803_v60, %v7807_v44  ;;  %v28139_v54 = vrot.slane %v7819_v18, 5  ;;  %v23101_v20 = vld [vmem:[%s23338_s9 + $0x1f8] sm:$0xf] }
 0x4dc   : > { %29650 = vst [vmem:[#allocation14_spill] sm:$0xff] %v28122_v59  ;;  %v28128_v19 = vpop.f32.mrb[20].mxu1  ;;  %v15375_v58 = vrot.slane %v23099_v7, 5  ;;  %v7816_v55 = vor.u32 %v7815_v0, %v7812_v39  ;;  %v19268_v7 = vld [vmem:[%s23338_s9 + $0x1f4] sm:$0xe]  ;;  %v15379_v31 = vrot.slane %v23101_v20, 5  ;;  %v28152_v60 = vsel %vm23862_vm8, %v15371_v28, %v15372_v8 }
 0x4dd   : > { %29651 = vst [vmem:[#allocation15_spill] sm:$0xff] %v28128_v19  ;;  %v28132_v53 = vpop.f32.mrb[21].mxu1  ;;  %v7854_v43 = vshrl.u32 %v18337_v47, 16  ;;  %v7857_v49 = vshll.u32 %v18337_v47, 16  ;;  %v28147_v40 = vrot.slane %v7829_v35, 5  ;;  %v7835_v5 = vrot.slane %v7833_v9, 4 }
 0x4de   : > { %29652 = vst [vmem:[#allocation17_spill] sm:$0xff] %v28132_v53  ;;  %v28141_v19 = vpop.f32.mrb[22].mxu1  ;;  %v23102_v23 = vld [vmem:[%s23338_s9 + $0x1f8] sm:$0xf]  ;;  %v28156_v18 = vsel %vm23862_vm8, %v15374_v6, %v15375_v58  ;;  %v28158_v20 = vrot.slane %v7839_v27, 5  ;;  %v7845_v12 = vrot.slane %v7843_v2, 4  ;;  %v29656_v35 = vcombine.low %v27677_v25, %v27681_v11 }
 0x4df   : > { %29653 = vst [vmem:[#allocation18_spill] sm:$0xff] %v28141_v19  ;;  %v28145_v53 = vpop.f32.mrb[23].mxu1  ;;  %v7863_v59 = vshll.u32 %v23102_v23, 16  ;;  %v7867_v44 = vshrl.u32 %v23102_v23, 16  ;;  %v29655_v39 = vld [vmem:[#allocation9_spill] sm:$0xff]  ;;  %v28166_v9 = vcombine.low %v7798_v14, %v7808_v62  ;;  %v7826_v8 = vor.u32 %v7825_v51, %v28139_v54  ;;  %v29732_v37 = vld [vmem:[#allocation31_spill] sm:$0xff] }
 0x4e0   : > { %29654 = vst [vmem:[#allocation16_spill] sm:$0xff] %v28145_v53  ;;  %v19300_v28 = vrot.slane %v19268_v7, 9  ;;  %v23103_v0 = vld [vmem:[%s23338_s9 + $0x1fc] sm:$0xf]  ;;  %v29658_v6 = vcombine.low %v27703_v16, %v27727_v30  ;;  %v15381_v25 = vrot.slane %v15379_v31, 4  ;;  %v7856_v27 = vrot.slane %v7854_v43, 4 }
 0x4e1   : > { %20873 = vmatmul.mubr.msk.bf16.vlgmr.msra.gmra.mrb[64].mxu1 %vm1936_vm4, %v29655_v39  ;;  %29657 = vst [vmem:[#allocation9_spill] sm:$0xff] %v28166_v9  ;;  %v15382_v47 = vrot.slane %v23103_v0, 5  ;;  %v23104_v11 = vld [vmem:[%s23338_s9 + $0x1f0] sm:$0x1]  ;;  %v7859_v2 = vrot.slane %v7857_v49, 5  ;;  %v28177_v51 = vrot.slane %v7816_v55, 4  ;;  %v7836_v14 = vor.u32 %v7835_v5, %v28147_v40 }
 0x4e2   : > { %21393 = vmatmul.mubr.msk.bf16.gmra.mrb[64].mxu0 %vm1936_vm4, %v29656_v35  ;;  %20876 = vmatprep.mubr.msk.bf16.mxu1 %vm1936_vm4, %v27778_v29  ;;  %v7849_v58 = vshll.u32 %v23104_v11, 16  ;;  %v28180_v62 = vrot.slane %v7863_v59, 5  ;;  %v7869_v7 = vrot.slane %v7867_v44, 4  ;;  %v7846_v29 = vor.u32 %v7845_v12, %v28158_v20  ;;  %v23105_v16 = vld [vmem:[%s23338_s9 + $0x200] sm:$0xf] }
 0x4e3   : > { %21396 = vmatprep.mubr.msk.bf16.mxu0 %vm1936_vm4, %v29658_v6  ;;  %v15385_v30 = vrot.slane %v23105_v16, 5  ;;  %v23106_v39 = vld [vmem:[%s23338_s9 + $0x1fc] sm:$0xf]  ;;  %v7827_v55 = vrot.slane %v7826_v8, 4  ;;  %v28191_v49 = vsel %vm23862_vm8, %v19300_v28, %v15379_v31  ;;  %v23107_v59 = vld [vmem:[%s23338_s9 + $0x200] sm:$0xf]  ;;  %v28198_v12 = vsel %vm23862_vm8, %v15381_v25, %v15382_v47 }
 0x4e4   : > { %v28182_v23 = vpop.f32.mrb[24].mxu1  ;;  %v7873_v35 = vshll.u32 %v23106_v39, 16  ;;  %v7877_v0 = vshrl.u32 %v23106_v39, 16  ;;  %v7883_v5 = vshll.u32 %v23107_v59, 16  ;;  %v7887_v44 = vshrl.u32 %v23107_v59, 16 }
 0x4e5   : > { %29659 = vst [vmem:[#allocation36_spill] sm:$0xff] %v28182_v23  ;;  %v28187_v43 = vpop.f32.mrb[25].mxu1  ;;  %v7851_v11 = vrot.slane %v7849_v58, 5  ;;  %v15384_v16 = vrot.slane %v15382_v47, 4  ;;  %v7860_v39 = vor.u32 %v7859_v2, %v7856_v27  ;;  %v7837_v8 = vrot.slane %v7836_v14, 4 }
 0x4e6   : > { %29660 = vst [vmem:[#allocation37_spill] sm:$0xff] %v28187_v43  ;;  %v28194_v6 = vpop.f32.mrb[26].mxu1  ;;  %v23108_v23 = vld [vmem:[%s23338_s9 + $0x204] sm:$0x1]  ;;  %v7870_v31 = vor.u32 %v7869_v7, %v28180_v62  ;;  %v19269_v28 = vld [vmem:[%s23338_s9 + $0x208] sm:$0xe]  ;;  %v29662_v47 = vcombine.low %v27744_v63, %v27750_v22  ;;  %v29663_v63 = vcombine.low %v27754_v61, %v27758_v15  ;;  %v7832_v22 = vsel %vm23356_vm5, %v7827_v55, %v28147_v40 }
 0x4e7   : > { %29661 = vst [vmem:[#allocation38_spill] sm:$0xff] %v28194_v6  ;;  %v28200_v43 = vpop.f32.mrb[27].mxu1  ;;  %v15388_v53 = vrot.slane %v23108_v23, 5  ;;  %v23109_v19 = vld [vmem:[%s23338_s9 + $0x20c] sm:$0xf]  ;;  %v7847_v59 = vrot.slane %v7846_v29, 4  ;;  %v28234_v14 = vsel %vm23862_vm8, %v15384_v16, %v15385_v30  ;;  %v7842_v40 = vsel %vm23356_vm5, %v7837_v8, %v28158_v20 }
 0x4e8   : > { %v15392_v9 = vrot.slane %v23109_v19, 5  ;;  %v15387_v6 = vrot.slane %v15385_v30, 4  ;;  %v7875_v33 = vrot.slane %v7873_v35, 5  ;;  %v7879_v24 = vrot.slane %v7877_v0, 4  ;;  %v23110_v61 = vld [vmem:[%s23338_s9 + $0x210] sm:$0xf] }
 0x4e9   : > { %20877 = vmatmul.mubr.msk.bf16.gmra.mrb[68].mxu1 %vm1936_vm4, %v27782_v45  ;;  %v7822_v19 = vsel %vm23356_vm5, %v28177_v51, %v28139_v54  ;;  %v28218_v58 = vrot.slane %v7883_v5, 5  ;;  %v7889_v27 = vrot.slane %v7887_v44, 4  ;;  %v7861_v54 = vrot.slane %v7860_v39, 4  ;;  %v18342_v51 = vld [vmem:[%s23338_s9 + $0x208] sm:$0xf] }
 0x4ea   : > { %21397 = vmatmul.mubr.msk.bf16.gmra.mrb[68].mxu0 %vm1936_vm4, %v29662_v47  ;;  %20880 = vmatprep.mubr.msk.bf16.mxu1 %vm1936_vm4, %v27791_v57  ;;  %v19301_v2 = vrot.slane %v19269_v28, 9  ;;  %v7871_v57 = vrot.slane %v7870_v31, 4  ;;  %v15394_v7 = vrot.slane %v15392_v9, 4  ;;  %v15395_v15 = vrot.slane %v23110_v61, 5  ;;  %v23111_v5 = vld [vmem:[%s23338_s9 + $0x204] sm:$0x1] }
 0x4eb   : > { %21400 = vmatprep.mubr.msk.bf16.mxu0 %vm1936_vm4, %v29663_v63  ;;  %v7852_v29 = vsel %vm23356_vm5, %v7847_v59, %v7851_v11  ;;  %v28246_v35 = vsel %vm23862_vm8, %v15387_v6, %v15388_v53  ;;  %v7880_v30 = vor.u32 %v7879_v24, %v7875_v33  ;;  %v7890_v55 = vor.u32 %v7889_v27, %v28218_v58  ;;  %v23112_v53 = vld [vmem:[%s23338_s9 + $0x214] sm:$0xf]  ;;  %v23113_v47 = vld [vmem:[%s23338_s9 + $0x20c] sm:$0xf]  ;;  %v23114_v61 = vld [vmem:[%s23338_s9 + $0x218] sm:$0x1] }
 0x4ec   : > { %v28237_v23 = vpop.f32.mrb[28].mxu1  ;;  %v7893_v44 = vshll.u32 %v23111_v5, 16  ;;  %v7898_v16 = vshrl.u32 %v18342_v51, 16  ;;  %v7901_v39 = vshll.u32 %v18342_v51, 16  ;;  %v28254_v20 = vcombine.low %v7822_v19, %v7832_v22  ;;  %v19270_v5 = vld [vmem:[%s23338_s9 + $0x21c] sm:$0xe] }
 0x4ed   : > { %v28248_v0 = vpop.f32.mrb[29].mxu1  ;;  %v7866_v11 = vsel %vm23356_vm5, %v7861_v54, %v28180_v62  ;;  %v28261_v24 = vsel %vm23862_vm8, %v19301_v2, %v15392_v9  ;;  %v15398_v6 = vrot.slane %v23112_v53, 5  ;;  %v7876_v28 = vsel %vm23356_vm5, %v7871_v57, %v7875_v33  ;;  %v23125_v25 = vld [vmem:[%s23338_s9 + $0x228] sm:$0xf] }
 0x4ee   : > { %v28252_v31 = vpop.f32.mrb[30].mxu1  ;;  %v28270_v59 = vsel %vm23862_vm8, %v15394_v7, %v15395_v15  ;;  %v7907_v19 = vshll.u32 %v23113_v47, 16  ;;  %v7911_v27 = vshrl.u32 %v23113_v47, 16  ;;  %v28273_v62 = vcombine.low %v7842_v40, %v7852_v29  ;;  %v18347_v40 = vld [vmem:[%s23338_s9 + $0x21c] sm:$0xf] }
 0x4ef   : > { %v28264_v8 = vpop.f32.mrb[31].mxu1  ;;  %v7881_v63 = vrot.slane %v7880_v30, 4  ;;  %v15397_v22 = vrot.slane %v15395_v15, 4  ;;  %v29664_v33 = vcombine.low %v27805_v50, %v27817_v41  ;;  %v7891_v54 = vrot.slane %v7890_v55, 4  ;;  %v23115_v55 = vld [vmem:[%s23338_s9 + $0x210] sm:$0xf] }
 0x4f0   : > { %v7895_v2 = vrot.slane %v7893_v44, 5  ;;  %v7900_v51 = vrot.slane %v7898_v16, 4  ;;  %v7903_v57 = vrot.slane %v7901_v39, 5  ;;  %v29665_v7 = vcombine.low %v27850_v21, %v27886_v10  ;;  %v23116_v39 = vld [vmem:[%s23338_s9 + $0x214] sm:$0xf] }
 0x4f1   : > { %20881 = vmatmul.mubr.msk.bf16.gmra.mrb[72].mxu1 %vm1936_vm4, %v27813_v17  ;;  %v28289_v17 = vcombine.low %v7866_v11, %v7876_v28  ;;  %v15400_v41 = vrot.slane %v15398_v6, 4  ;;  %v15401_v15 = vrot.slane %v23114_v61, 5  ;;  %v28295_v29 = vrot.slane %v7907_v19, 5  ;;  %v23119_v50 = vld [vmem:[%s23338_s9 + $0x224] sm:$0xf] }
 0x4f2   : > { %21401 = vmatmul.mubr.msk.bf16.gmra.mrb[72].mxu0 %vm1936_vm4, %v29664_v33  ;;  %20884 = vmatprep.mubr.msk.bf16.mxu1 %vm1936_vm4, %v27949_v36  ;;  %v7913_v30 = vrot.slane %v7911_v27, 4  ;;  %v7917_v36 = vshll.u32 %v23115_v55, 16  ;;  %v7921_v21 = vshrl.u32 %v23115_v55, 16  ;;  %v7886_v44 = vsel %vm23356_vm5, %v7881_v63, %v28218_v58  ;;  %v23117_v63 = vld [vmem:[%s23338_s9 + $0x220] sm:$0xf] }
 0x4f3   : > { %21404 = vmatprep.mubr.msk.bf16.mxu0 %vm1936_vm4, %v29665_v7  ;;  %v28306_v16 = vsel %vm23862_vm8, %v15397_v22, %v15398_v6  ;;  %v7927_v11 = vshll.u32 %v23116_v39, 16  ;;  %v7931_v53 = vshrl.u32 %v23116_v39, 16  ;;  %v7896_v47 = vsel %vm23356_vm5, %v7891_v54, %v7895_v2  ;;  %v23118_v2 = vld [vmem:[%s23338_s9 + $0x220] sm:$0xf] }
 0x4f4   : > { %v28299_v10 = vpop.f32.mrb[32].mxu1  ;;  %v7904_v19 = vor.u32 %v7903_v57, %v7900_v51  ;;  %v7942_v27 = vshrl.u32 %v18347_v40, 16  ;;  %v7945_v33 = vshll.u32 %v18347_v40, 16  ;;  %v28317_v58 = vsel %vm23862_vm8, %v15400_v41, %v15401_v15 }
 0x4f5   : > { %v28309_v28 = vpop.f32.mrb[33].mxu1  ;;  %v19302_v6 = vrot.slane %v19270_v5, 9  ;;  %v7951_v22 = vshll.u32 %v23117_v63, 16  ;;  %v7955_v61 = vshrl.u32 %v23117_v63, 16  ;;  %v7914_v39 = vor.u32 %v7913_v30, %v28295_v29 }
 0x4f6   : > { %v28313_v7 = vpop.f32.mrb[34].mxu1  ;;  %v28323_v54 = vrot.slane %v7917_v36, 5  ;;  %v15405_v51 = vrot.slane %v23118_v2, 5  ;;  %v7923_v57 = vrot.slane %v7921_v21, 4  ;;  %v28326_v40 = vcombine.low %v7886_v44, %v7896_v47  ;;  %v23120_v36 = vld [vmem:[%s23338_s9 + $0x228] sm:$0xf] }
 0x4f7   : > { %v28320_v55 = vpop.f32.mrb[35].mxu1  ;;  %v15408_v9 = vrot.slane %v23119_v50, 5  ;;  %v28329_v41 = vrot.slane %v7927_v11, 5  ;;  %v7933_v15 = vrot.slane %v7931_v53, 4  ;;  %v29667_v5 = vcombine.low %v27903_v32, %v27914_v1  ;;  %v23124_v32 = vld [vmem:[%s23338_s9 + $0x234] sm:$0xf] }
 0x4f8   : > { %29666 = vst [vmem:[#allocation39_spill] sm:$0xff] %v28320_v55  ;;  %v7905_v30 = vrot.slane %v7904_v19, 4  ;;  %v15411_v63 = vrot.slane %v23120_v36, 5  ;;  %v7944_v21 = vrot.slane %v7942_v27, 4  ;;  %v7947_v44 = vrot.slane %v7945_v33, 5  ;;  %v29673_v55 = vld [vmem:[#allocation12_spill] sm:$0xff] }
 0x4f9   : > { %20885 = vmatmul.mubr.msk.bf16.gmra.mrb[76].mxu1 %vm1936_vm4, %v27951_v46  ;;  %v29668_v50 = vcombine.low %v27918_v34, %v27934_v38  ;;  %v28348_v1 = vsel %vm23862_vm8, %v19302_v6, %v15405_v51  ;;  %v28350_v46 = vrot.slane %v7951_v22, 5  ;;  %v7957_v11 = vrot.slane %v7955_v61, 4  ;;  %v23121_v19 = vld [vmem:[%s23338_s9 + $0x218] sm:$0x1]  ;;  %v23122_v6 = vld [vmem:[%s23338_s9 + $0x224] sm:$0xf] }
 0x4fa   : > { %21405 = vmatmul.mubr.msk.bf16.gmra.mrb[76].mxu0 %vm1936_vm4, %v29667_v5  ;;  %20888 = vmatprep.mubr.msk.bf16.mxu1 %vm1936_vm4, %v27957_v48  ;;  %v7915_v53 = vrot.slane %v7914_v39, 4  ;;  %v15407_v47 = vrot.slane %v15405_v51, 4  ;;  %v7924_v48 = vor.u32 %v7923_v57, %v28323_v54  ;;  %v7937_v34 = vshll.u32 %v23121_v19, 16  ;;  %v23123_v51 = vld [vmem:[%s23338_s9 + $0x22c] sm:$0x1] }
 0x4fb   : > { %21408 = vmatprep.mubr.msk.bf16.mxu0 %vm1936_vm4, %v29668_v50  ;;  %v7934_v27 = vor.u32 %v7933_v15, %v28329_v41  ;;  %v15410_v33 = vrot.slane %v15408_v9, 4  ;;  %v7961_v2 = vshll.u32 %v23122_v6, 16  ;;  %v7965_v22 = vshrl.u32 %v23122_v6, 16  ;;  %v19271_v15 = vld [vmem:[%s23338_s9 + $0x230] sm:$0xe] }
 0x4fc   : > { %v28354_v38 = vpop.f32.mrb[36].mxu1  ;;  %v7910_v61 = vsel %vm23356_vm5, %v7905_v30, %v28295_v29  ;;  %v15413_v39 = vrot.slane %v15411_v63, 4  ;;  %v15414_v57 = vrot.slane %v23123_v51, 5  ;;  %v7948_v36 = vor.u32 %v7947_v44, %v7944_v21 }
 0x4fd   : > { %29669 = vst [vmem:[#allocation40_spill] sm:$0xff] %v28354_v38  ;;  %v28358_v5 = vpop.f32.mrb[37].mxu1  ;;  %v7958_v19 = vor.u32 %v7957_v11, %v28350_v46  ;;  %v15418_v45 = vrot.slane %v23124_v32, 5  ;;  %v7971_v6 = vshll.u32 %v23125_v25, 16  ;;  %v7975_v38 = vshrl.u32 %v23125_v25, 16 }
 0x4fe   : > { %29670 = vst [vmem:[#allocation41_spill] sm:$0xff] %v28358_v5  ;;  %v28364_v50 = vpop.f32.mrb[38].mxu1  ;;  %v7920_v29 = vsel %vm23356_vm5, %v7915_v53, %v28323_v54  ;;  %v28377_v30 = vsel %vm23862_vm8, %v15407_v47, %v15408_v9  ;;  %v7925_v21 = vrot.slane %v7924_v48, 4  ;;  %v7939_v44 = vrot.slane %v7937_v34, 5 }
 0x4ff   : > { %29671 = vst [vmem:[#allocation42_spill] sm:$0xff] %v28364_v50  ;;  %v28370_v5 = vpop.f32.mrb[39].mxu1  ;;  %v7935_v11 = vrot.slane %v7934_v27, 4  ;;  %v28381_v32 = vsel %vm23862_vm8, %v15410_v33, %v15411_v63  ;;  %v7963_v51 = vrot.slane %v7961_v2, 5  ;;  %v7967_v25 = vrot.slane %v7965_v22, 4 }
 0x500   : > { %29672 = vst [vmem:[#allocation43_spill] sm:$0xff] %v28370_v5  ;;  %v18352_v50 = vld [vmem:[%s23338_s9 + $0x230] sm:$0xf]  ;;  %v29674_v54 = vcombine.low %v27983_v52, %v27996_v56  ;;  %v28392_v9 = vsel %vm23862_vm8, %v15413_v39, %v15414_v57  ;;  %v7949_v53 = vrot.slane %v7948_v36, 4  ;;  %v19303_v47 = vrot.slane %v19271_v15, 9 }
 0x501   : > { %20889 = vmatmul.mubr.msk.bf16.gmra.mrb[80].mxu1 %vm1936_vm4, %v29673_v55  ;;  %v23126_v63 = vld [vmem:[%s23338_s9 + $0x238] sm:$0xf]  ;;  %v29675_v55 = vcombine.low %v28016_v3, %v28040_v4  ;;  %v7959_v52 = vrot.slane %v7958_v19, 4  ;;  %v15420_v56 = vrot.slane %v15418_v45, 4  ;;  %v28401_v34 = vrot.slane %v7971_v6, 5 }
 0x502   : > { %21409 = vmatmul.mubr.msk.bf16.gmra.mrb[80].mxu0 %vm1936_vm4, %v29674_v54  ;;  %v15421_v48 = vrot.slane %v23126_v63, 5  ;;  %20892 = vmatprep.mubr.msk.bf16.mxu1 %vm1936_vm4, %v28083_v13  ;;  %v7977_v27 = vrot.slane %v7975_v38, 4  ;;  %v28403_v33 = vcombine.low %v7910_v61, %v7920_v29  ;;  %v7986_v22 = vshrl.u32 %v18352_v50, 16  ;;  %v23127_v13 = vld [vmem:[%s23338_s9 + $0x234] sm:$0xf] }
 0x503   : > { %21412 = vmatprep.mubr.msk.bf16.mxu0 %vm1936_vm4, %v29675_v55  ;;  %v7989_v39 = vshll.u32 %v18352_v50, 16  ;;  %v7930_v3 = vsel %vm23356_vm5, %v7925_v21, %v28329_v41  ;;  %v7968_v4 = vor.u32 %v7967_v25, %v7963_v51  ;;  %v7995_v36 = vshll.u32 %v23127_v13, 16  ;;  %v23128_v6 = vld [vmem:[%s23338_s9 + $0x22c] sm:$0x1] }
 0x504   : > { %v28407_v57 = vpop.f32.mrb[40].mxu1  ;;  %v7999_v19 = vshrl.u32 %v23127_v13, 16  ;;  %v7940_v38 = vsel %vm23356_vm5, %v7935_v11, %v7939_v44  ;;  %v28421_v50 = vsel %vm23862_vm8, %v19303_v47, %v15418_v45  ;;  %v7981_v29 = vshll.u32 %v23128_v6, 16  ;;  %v23129_v47 = vld [vmem:[%s23338_s9 + $0x23c] sm:$0xf] }
 0x505   : > { %29676 = vst [vmem:[#allocation12_spill] sm:$0xff] %v28407_v57  ;;  %v28413_v15 = vpop.f32.mrb[41].mxu1  ;;  %v7954_v21 = vsel %vm23356_vm5, %v7949_v53, %v28350_v46  ;;  %v7964_v25 = vsel %vm23356_vm5, %v7959_v52, %v7963_v51  ;;  %v28433_v44 = vsel %vm23862_vm8, %v15420_v56, %v15421_v48  ;;  %v7978_v11 = vor.u32 %v7977_v27, %v28401_v34  ;;  %v19272_v52 = vld [vmem:[%s23338_s9 + $0x244] sm:$0xe]  ;;  %v29680_v56 = vld [vmem:[#allocation13_spill] sm:$0xff] }
 0x506   : > { %29677 = vst [vmem:[#allocation44_spill] sm:$0xff] %v28413_v15  ;;  %v28424_v41 = vpop.f32.mrb[42].mxu1  ;;  %v15423_v54 = vrot.slane %v15421_v48, 4  ;;  %v15424_v63 = vrot.slane %v23129_v47, 5  ;;  %v7988_v55 = vrot.slane %v7986_v22, 4  ;;  %v7991_v13 = vrot.slane %v7989_v39, 5 }
 0x507   : > { %29678 = vst [vmem:[#allocation45_spill] sm:$0xff] %v28424_v41  ;;  %v28436_v45 = vpop.f32.mrb[43].mxu1  ;;  %v28439_v6 = vcombine.low %v7930_v3, %v7940_v38  ;;  %v28441_v46 = vrot.slane %v7968_v4, 4  ;;  %v28443_v51 = vrot.slane %v7995_v36, 5  ;;  %v8001_v53 = vrot.slane %v7999_v19, 4  ;;  %v29681_v48 = vld [vmem:[#allocation29_spill] sm:$0xff] }
 0x508   : > { %29679 = vst [vmem:[#allocation46_spill] sm:$0xff] %v28436_v45  ;;  %v29682_v27 = vcombine.low %v29680_v56, %v29681_v48  ;;  %v28452_v22 = vcombine.low %v7954_v21, %v7964_v25  ;;  %v7983_v3 = vrot.slane %v7981_v29, 5  ;;  %v23130_v4 = vld [vmem:[%s23338_s9 + $0x240] sm:$0x1]  ;;  %v29683_v38 = vld [vmem:[#allocation14_spill] sm:$0xff]  ;;  %v28468_v29 = vsel %vm23862_vm8, %v15423_v54, %v15424_v63 }
 0x509   : > { %20893 = vmatmul.mubr.msk.bf16.gmra.mrb[84].mxu1 %vm1936_vm4, %v28120_v42  ;;  %v15427_v36 = vrot.slane %v23130_v4, 5  ;;  %v29684_v19 = vld [vmem:[#allocation34_spill] sm:$0xff]  ;;  %v29685_v47 = vld [vmem:[#allocation35_spill] sm:$0xff]  ;;  %v7979_v42 = vrot.slane %v7978_v11, 4  ;;  %v23132_v21 = vld [vmem:[%s23338_s9 + $0x248] sm:$0xf]  ;;  %v8002_v11 = vor.u32 %v8001_v53, %v28443_v51 }
 0x50a   : > { %21413 = vmatmul.mubr.msk.bf16.gmra.mrb[84].mxu0 %vm1936_vm4, %v29682_v27  ;;  %20896 = vmatprep.mubr.msk.bf16.mxu1 %vm1936_vm4, %v29683_v38  ;;  %v29686_v61 = vcombine.low %v29684_v19, %v29685_v47  ;;  %v23131_v56 = vld [vmem:[%s23338_s9 + $0x238] sm:$0xf]  ;;  %v15431_v25 = vrot.slane %v23132_v21, 5  ;;  %v18357_v39 = vld [vmem:[%s23338_s9 + $0x244] sm:$0xf]  ;;  %v15426_v4 = vrot.slane %v15424_v63, 4  ;;  %v7992_v38 = vor.u32 %v7991_v13, %v7988_v55 }
 0x50b   : > { %v8005_v48 = vshll.u32 %v23131_v56, 16  ;;  %v8009_v27 = vshrl.u32 %v23131_v56, 16  ;;  %v19304_v2 = vrot.slane %v19272_v52, 9  ;;  %v23133_v47 = vld [vmem:[%s23338_s9 + $0x23c] sm:$0xf]  ;;  %v8030_v54 = vshrl.u32 %v18357_v39, 16 }
 0x50c   : > { %21416 = vmatprep.mubr.msk.bf16.mxu0 %vm1936_vm4, %v29686_v61  ;;  %v28470_v19 = vpop.f32.mrb[44].mxu1  ;;  %v7974_v61 = vsel %vm23356_vm5, %v28441_v46, %v28401_v34  ;;  %v8015_v56 = vshll.u32 %v23133_v47, 16  ;;  %v8019_v21 = vshrl.u32 %v23133_v47, 16  ;;  %v8033_v41 = vshll.u32 %v18357_v39, 16  ;;  %v23134_v63 = vld [vmem:[%s23338_s9 + $0x248] sm:$0xf] }
 0x50d   : > { %29687 = vst [vmem:[#allocation13_spill] sm:$0xff] %v28470_v19  ;;  %v28478_v45 = vpop.f32.mrb[45].mxu1  ;;  %v8039_v55 = vshll.u32 %v23134_v63, 16  ;;  %v8043_v13 = vshrl.u32 %v23134_v63, 16  ;;  %v8007_v19 = vrot.slane %v8005_v48, 5  ;;  %v15433_v15 = vrot.slane %v15431_v25, 4 }
 0x50e   : > { %29688 = vst [vmem:[#allocation29_spill] sm:$0xff] %v28478_v45  ;;  %v28481_v52 = vpop.f32.mrb[46].mxu1  ;;  %v23135_v57 = vld [vmem:[%s23338_s9 + $0x24c] sm:$0xf]  ;;  %v8011_v34 = vrot.slane %v8009_v27, 4  ;;  %v7984_v53 = vsel %vm23356_vm5, %v7979_v42, %v7983_v3  ;;  %v28490_v47 = vsel %vm23862_vm8, %v15426_v4, %v15427_v36  ;;  %v7993_v39 = vrot.slane %v7992_v38, 4 }
 0x50f   : > { %29689 = vst [vmem:[#allocation14_spill] sm:$0xff] %v28481_v52  ;;  %v15434_v5 = vrot.slane %v23135_v57, 5  ;;  %v28484_v46 = vpop.f32.mrb[47].mxu1  ;;  %v28494_v63 = vsel %vm23862_vm8, %v19304_v2, %v15431_v25  ;;  %v8003_v48 = vrot.slane %v8002_v11, 4  ;;  %v28496_v52 = vrot.slane %v8015_v56, 5 }
 0x510   : > { %29690 = vst [vmem:[#allocation34_spill] sm:$0xff] %v28484_v46  ;;  %v8021_v57 = vrot.slane %v8019_v21, 4  ;;  %v23136_v27 = vld [vmem:[%s23338_s9 + $0x240] sm:$0x1]  ;;  %v29691_v46 = vld [vmem:[#allocation9_spill] sm:$0xff]  ;;  %v29692_v3 = vcombine.low %v28152_v60, %v28156_v18  ;;  %v8032_v36 = vrot.slane %v8030_v54, 4  ;;  %v29693_v4 = vcombine.low %v28191_v49, %v28198_v12 }
 0x511   : > { %v8025_v45 = vshll.u32 %v23136_v27, 16  ;;  %20897 = vmatmul.mubr.msk.bf16.gmra.mrb[88].mxu1 %vm1936_vm4, %v29691_v46  ;;  %v8035_v42 = vrot.slane %v8033_v41, 5  ;;  %v28505_v2 = vrot.slane %v8039_v55, 5  ;;  %v8045_v25 = vrot.slane %v8043_v13, 4  ;;  %v23137_v18 = vld [vmem:[%s23338_s9 + $0x24c] sm:$0xf] }
 0x512   : > { %21417 = vmatmul.mubr.msk.bf16.gmra.mrb[88].mxu0 %vm1936_vm4, %v29692_v3  ;;  %20900 = vmatprep.mubr.msk.bf16.mxu1 %vm1936_vm4, %v28254_v20  ;;  %v28515_v38 = vsel %vm23862_vm8, %v15433_v15, %v15434_v5  ;;  %v8012_v60 = vor.u32 %v8011_v34, %v8007_v19  ;;  %v8049_v11 = vshll.u32 %v23137_v18, 16  ;;  %v8053_v41 = vshrl.u32 %v23137_v18, 16  ;;  %v23138_v21 = vld [vmem:[%s23338_s9 + $0x250] sm:$0xf] }
 0x513   : > { %21420 = vmatprep.mubr.msk.bf16.mxu0 %vm1936_vm4, %v29693_v4  ;;  %v28518_v56 = vcombine.low %v7974_v61, %v7984_v53  ;;  %v7998_v20 = vsel %vm23356_vm5, %v7993_v39, %v28443_v51  ;;  %v8059_v54 = vshll.u32 %v23138_v21, 16  ;;  %v8063_v49 = vshrl.u32 %v23138_v21, 16  ;;  %v23139_v34 = vld [vmem:[%s23338_s9 + $0x250] sm:$0xf]  ;;  %v23140_v21 = vld [vmem:[%s23338_s9 + $0x254] sm:$0x1] }
 0x514   : > { %v28524_v12 = vpop.f32.mrb[48].mxu1  ;;  %v8008_v55 = vsel %vm23356_vm5, %v8003_v48, %v8007_v19  ;;  %v8022_v15 = vor.u32 %v8021_v57, %v28496_v52  ;;  %v15436_v13 = vrot.slane %v15434_v5, 4  ;;  %v15437_v46 = vrot.slane %v23139_v34, 5 }
 0x515   : > { %v28530_v61 = vpop.f32.mrb[49].mxu1  ;;  %v8036_v39 = vor.u32 %v8035_v42, %v8032_v36  ;;  %v8046_v27 = vor.u32 %v8045_v25, %v28505_v2  ;;  %v8013_v48 = vrot.slane %v8012_v60, 4  ;;  %v8027_v57 = vrot.slane %v8025_v45, 5  ;;  %v18362_v25 = vld [vmem:[%s23338_s9 + $0x258] sm:$0xf] }
 0x516   : > { %v28537_v19 = vpop.f32.mrb[50].mxu1  ;;  %v28539_v5 = vrot.slane %v8049_v11, 5  ;;  %v8055_v3 = vrot.slane %v8053_v41, 4  ;;  %v28543_v18 = vcombine.low %v7998_v20, %v8008_v55  ;;  %v15440_v34 = vrot.slane %v23140_v21, 5  ;;  %v23141_v11 = vld [vmem:[%s23338_s9 + $0x25c] sm:$0xf] }
 0x517   : > { %29694 = vst [vmem:[#allocation35_spill] sm:$0xff] %v28537_v19  ;;  %v28541_v4 = vpop.f32.mrb[51].mxu1  ;;  %v28546_v36 = vrot.slane %v8059_v54, 5  ;;  %v8065_v42 = vrot.slane %v8063_v49, 4  ;;  %v8023_v53 = vrot.slane %v8022_v15, 4  ;;  %v28551_v45 = vsel %vm23862_vm8, %v15436_v13, %v15437_v46 }
 0x518   : > { %29695 = vst [vmem:[#allocation9_spill] sm:$0xff] %v28541_v4  ;;  %v15439_v60 = vrot.slane %v15437_v46, 4  ;;  %v15444_v41 = vrot.slane %v23141_v11, 5  ;;  %v29696_v20 = vcombine.low %v28234_v14, %v28246_v35  ;;  %v8037_v54 = vrot.slane %v8036_v39, 4  ;;  %v19273_v55 = vld [vmem:[%s23338_s9 + $0x258] sm:$0xe] }
 0x519   : > { %20901 = vmatmul.mubr.msk.bf16.gmra.mrb[92].mxu1 %vm1936_vm4, %v28273_v62  ;;  %v8047_v49 = vrot.slane %v8046_v27, 4  ;;  %v23142_v15 = vld [vmem:[%s23338_s9 + $0x260] sm:$0xf]  ;;  %v23143_v13 = vld [vmem:[%s23338_s9 + $0x254] sm:$0x1]  ;;  %v29697_v62 = vcombine.low %v28261_v24, %v28270_v59  ;;  %v8018_v14 = vsel %vm23356_vm5, %v8013_v48, %v28496_v52  ;;  %v8056_v35 = vor.u32 %v8055_v3, %v28539_v5 }
 0x51a   : > { %21421 = vmatmul.mubr.msk.bf16.gmra.mrb[92].mxu0 %vm1936_vm4, %v29696_v20  ;;  %v15447_v21 = vrot.slane %v23142_v15, 5  ;;  %v8069_v51 = vshll.u32 %v23143_v13, 16  ;;  %20904 = vmatprep.mubr.msk.bf16.mxu1 %vm1936_vm4, %v28289_v17  ;;  %v8074_v46 = vshrl.u32 %v18362_v25, 16  ;;  %v8077_v39 = vshll.u32 %v18362_v25, 16  ;;  %v23144_v11 = vld [vmem:[%s23338_s9 + $0x264] sm:$0xf] }
 0x51b   : > { %21424 = vmatprep.mubr.msk.bf16.mxu0 %vm1936_vm4, %v29697_v62  ;;  %v8066_v27 = vor.u32 %v8065_v42, %v28546_v36  ;;  %v15450_v20 = vrot.slane %v23144_v11, 5  ;;  %v23145_v15 = vld [vmem:[%s23338_s9 + $0x25c] sm:$0xf]  ;;  %v8028_v24 = vsel %vm23356_vm5, %v8023_v53, %v8027_v57  ;;  %v28582_v59 = vsel %vm23862_vm8, %v15439_v60, %v15440_v34  ;;  %v23146_v34 = vld [vmem:[%s23338_s9 + $0x268] sm:$0x1] }
 0x51c   : > { %v8083_v17 = vshll.u32 %v23145_v15, 16  ;;  %v8087_v13 = vshrl.u32 %v23145_v15, 16  ;;  %v28576_v4 = vpop.f32.mrb[52].mxu1  ;;  %v19305_v52 = vrot.slane %v19273_v55, 9  ;;  %v15446_v48 = vrot.slane %v15444_v41, 4 }
 0x51d   : > { %29698 = vst [vmem:[#allocation47_spill] sm:$0xff] %v28576_v4  ;;  %v28584_v3 = vpop.f32.mrb[53].mxu1  ;;  %v8042_v42 = vsel %vm23356_vm5, %v8037_v54, %v28505_v2  ;;  %v8052_v25 = vsel %vm23356_vm5, %v8047_v49, %v28539_v5  ;;  %v8071_v62 = vrot.slane %v8069_v51, 5  ;;  %v15449_v11 = vrot.slane %v15447_v21, 4  ;;  %v23147_v49 = vld [vmem:[%s23338_s9 + $0x260] sm:$0xf] }
 0x51e   : > { %29699 = vst [vmem:[#allocation48_spill] sm:$0xff] %v28584_v3  ;;  %v28592_v53 = vpop.f32.mrb[54].mxu1  ;;  %v8057_v57 = vrot.slane %v8056_v35, 4  ;;  %v15453_v60 = vrot.slane %v23146_v34, 5  ;;  %v8076_v55 = vrot.slane %v8074_v46, 4  ;;  %v8079_v15 = vrot.slane %v8077_v39, 5 }
 0x51f   : > { %29700 = vst [vmem:[#allocation49_spill] sm:$0xff] %v28592_v53  ;;  %v28595_v3 = vpop.f32.mrb[55].mxu1  ;;  %v8067_v4 = vrot.slane %v8066_v27, 4  ;;  %v15452_v2 = vrot.slane %v15450_v20, 4  ;;  %v28597_v54 = vrot.slane %v8083_v17, 5  ;;  %v8089_v19 = vrot.slane %v8087_v13, 4 }
 0x520   : > { %v28599_v5 = vcombine.low %v8018_v14, %v8028_v24  ;;  %v8093_v35 = vshll.u32 %v23147_v49, 16  ;;  %v8097_v53 = vshrl.u32 %v23147_v49, 16  ;;  %v29701_v46 = vcombine.low %v28306_v16, %v28317_v58  ;;  %v23148_v27 = vld [vmem:[%s23338_s9 + $0x264] sm:$0xf]  ;;  %v18367_v24 = vld [vmem:[%s23338_s9 + $0x26c] sm:$0xf] }
 0x521   : > { %20905 = vmatmul.mubr.msk.bf16.gmra.mrb[96].mxu1 %vm1936_vm4, %v28326_v40  ;;  %v28612_v39 = vsel %vm23862_vm8, %v19305_v52, %v15444_v41  ;;  %v28616_v14 = vsel %vm23862_vm8, %v15446_v48, %v15447_v21  ;;  %v8103_v17 = vshll.u32 %v23148_v27, 16  ;;  %v8107_v13 = vshrl.u32 %v23148_v27, 16  ;;  %v19274_v52 = vld [vmem:[%s23338_s9 + $0x26c] sm:$0xe] }
 0x522   : > { %21425 = vmatmul.mubr.msk.bf16.gmra.mrb[96].mxu0 %vm1936_vm4, %v29701_v46  ;;  %20908 = vmatprep.mubr.msk.bf16.mxu1 %vm1936_vm4, %v28403_v33  ;;  %v29702_v16 = vcombine.low %v28348_v1, %v28377_v30  ;;  %v28626_v58 = vcombine.low %v8042_v42, %v8052_v25  ;;  %v28630_v40 = vsel %vm23862_vm8, %v15449_v11, %v15450_v20  ;;  %v28645_v20 = vrot.slane %v8093_v35, 5 }
 0x523   : > { %v8080_v41 = vor.u32 %v8079_v15, %v8076_v55  ;;  %v8062_v21 = vsel %vm23356_vm5, %v8057_v57, %v28546_v36  ;;  %v8072_v33 = vsel %vm23356_vm5, %v8067_v4, %v8071_v62  ;;  %v28639_v1 = vsel %vm23862_vm8, %v15452_v2, %v15453_v60  ;;  %v23149_v62 = vld [vmem:[%s23338_s9 + $0x270] sm:$0xf]  ;;  %v23153_v55 = vld [vmem:[%s23338_s9 + $0x278] sm:$0xf] }
 0x524   : > { %21428 = vmatprep.mubr.msk.bf16.mxu0 %vm1936_vm4, %v29702_v16  ;;  %v8090_v30 = vor.u32 %v8089_v19, %v28597_v54  ;;  %v28643_v48 = vpop.f32.mrb[56].mxu1  ;;  %v8099_v42 = vrot.slane %v8097_v53, 4  ;;  %v8118_v25 = vshrl.u32 %v18367_v24, 16  ;;  %v8121_v11 = vshll.u32 %v18367_v24, 16  ;;  %v23150_v2 = vld [vmem:[%s23338_s9 + $0x270] sm:$0xf] }
 0x525   : > { %v28647_v34 = vpop.f32.mrb[57].mxu1  ;;  %v28649_v36 = vrot.slane %v8103_v17, 5  ;;  %v8109_v4 = vrot.slane %v8107_v13, 4  ;;  %v8127_v57 = vshll.u32 %v23149_v62, 16  ;;  %v8131_v19 = vshrl.u32 %v23149_v62, 16 }
 0x526   : > { %29703 = vst [vmem:[#allocation50_spill] sm:$0xff] %v28647_v34  ;;  %v28652_v60 = vpop.f32.mrb[58].mxu1  ;;  %v28656_v15 = vrot.slane %v8080_v41, 4  ;;  %v19306_v53 = vrot.slane %v19274_v52, 9  ;;  %v15457_v49 = vrot.slane %v23150_v2, 5  ;;  %v28661_v46 = vcombine.low %v8062_v21, %v8072_v33 }
 0x527   : > { %29704 = vst [vmem:[#allocation51_spill] sm:$0xff] %v28652_v60  ;;  %v28659_v35 = vpop.f32.mrb[59].mxu1  ;;  %v28665_v17 = vrot.slane %v8090_v30, 4  ;;  %v23151_v13 = vld [vmem:[%s23338_s9 + $0x274] sm:$0xf]  ;;  %v15463_v41 = vrot.slane %v23153_v55, 5  ;;  %v29706_v21 = vcombine.low %v28381_v32, %v28392_v9  ;;  %v8100_v33 = vor.u32 %v8099_v42, %v28645_v20 }
 0x528   : > { %29705 = vst [vmem:[#allocation52_spill] sm:$0xff] %v28659_v35  ;;  %v15460_v24 = vrot.slane %v23151_v13, 5  ;;  %v23152_v16 = vld [vmem:[%s23338_s9 + $0x268] sm:$0x1]  ;;  %v8120_v51 = vrot.slane %v8118_v25, 4  ;;  %v8123_v52 = vrot.slane %v8121_v11, 5  ;;  %v8110_v30 = vor.u32 %v8109_v4, %v28649_v36 }
 0x529   : > { %v8113_v62 = vshll.u32 %v23152_v16, 16  ;;  %20909 = vmatmul.mubr.msk.bf16.gmra.mrb[100].mxu1 %vm1936_vm4, %v28439_v6  ;;  %v28678_v2 = vrot.slane %v8127_v57, 5  ;;  %v8133_v55 = vrot.slane %v8131_v19, 4  ;;  %v29707_v6 = vcombine.low %v28421_v50, %v28433_v44  ;;  %v23154_v25 = vld [vmem:[%s23338_s9 + $0x284] sm:$0xf] }
 0x52a   : > { %21429 = vmatmul.mubr.msk.bf16.gmra.mrb[100].mxu0 %vm1936_vm4, %v29706_v21  ;;  %20912 = vmatprep.mubr.msk.bf16.mxu1 %vm1936_vm4, %v28452_v22  ;;  %v8086_v32 = vsel %vm23356_vm5, %v28656_v15, %v28597_v54  ;;  %v28692_v9 = vsel %vm23862_vm8, %v19306_v53, %v15457_v49  ;;  %v15459_v42 = vrot.slane %v15457_v49, 4  ;;  %v15470_v11 = vrot.slane %v23154_v25, 5  ;;  %v23155_v22 = vld [vmem:[%s23338_s9 + $0x27c] sm:$0x1]  ;;  %v23156_v19 = vld [vmem:[%s23338_s9 + $0x274] sm:$0xf] }
 0x52b   : > { %21432 = vmatprep.mubr.msk.bf16.mxu0 %vm1936_vm4, %v29707_v6  ;;  %v15462_v4 = vrot.slane %v15460_v24, 4  ;;  %v15466_v57 = vrot.slane %v23155_v22, 5  ;;  %v8137_v50 = vshll.u32 %v23156_v19, 16  ;;  %v19275_v44 = vld [vmem:[%s23338_s9 + $0x280] sm:$0xe]  ;;  %v8141_v13 = vshrl.u32 %v23156_v19, 16 }
 0x52c   : > { %v28698_v16 = vpop.f32.mrb[60].mxu1  ;;  %v15465_v21 = vrot.slane %v15463_v41, 4  ;;  %v8124_v6 = vor.u32 %v8123_v52, %v8120_v51  ;;  %v23157_v54 = vld [vmem:[%s23338_s9 + $0x278] sm:$0xf]  ;;  %v8101_v49 = vrot.slane %v8100_v33, 4  ;;  %v8111_v35 = vrot.slane %v8110_v30, 4 }
 0x52d   : > { %29708 = vst [vmem:[#allocation53_spill] sm:$0xff] %v28698_v16  ;;  %v8147_v15 = vshll.u32 %v23157_v54, 16  ;;  %v8151_v27 = vshrl.u32 %v23157_v54, 16  ;;  %v28701_v53 = vpop.f32.mrb[61].mxu1  ;;  %v8115_v25 = vrot.slane %v8113_v62, 5  ;;  %v8134_v60 = vor.u32 %v8133_v55, %v28678_v2 }
 0x52e   : > { %v28704_v22 = vpop.f32.mrb[62].mxu1  ;;  %v8096_v19 = vsel %vm23356_vm5, %v28665_v17, %v28645_v20  ;;  %v19307_v16 = vrot.slane %v19275_v44, 9  ;;  %v15472_v34 = vrot.slane %v15470_v11, 4  ;;  %v23158_v51 = vld [vmem:[%s23338_s9 + $0x288] sm:$0xf]  ;;  %v28715_v33 = vsel %vm23862_vm8, %v15459_v42, %v15460_v24 }
 0x52f   : > { %v15473_v52 = vrot.slane %v23158_v51, 5  ;;  %v28711_v54 = vpop.f32.mrb[63].mxu1  ;;  %v28719_v62 = vsel %vm23862_vm8, %v15462_v4, %v15463_v41  ;;  %v28721_v30 = vrot.slane %v8137_v50, 5  ;;  %v8143_v55 = vrot.slane %v8141_v13, 4 }
 0x530   : > { %v28725_v20 = vsel %vm23862_vm8, %v15465_v21, %v15466_v57  ;;  %v28727_v17 = vrot.slane %v8124_v6, 4  ;;  %v28729_v44 = vrot.slane %v8147_v15, 5  ;;  %v8153_v51 = vrot.slane %v8151_v27, 4  ;;  %v23159_v27 = vld [vmem:[%s23338_s9 + $0x27c] sm:$0x1]  ;;  %v29711_v6 = vld [vmem:[#allocation24_spill] sm:$0xff] }
 0x531   : > { %20913 = vmatmul.mubr.msk.bf16.gmra.mrb[104].mxu1 %vm1936_vm4, %v28518_v56  ;;  %v29709_v24 = vcombine.low %v28468_v29, %v28490_v47  ;;  %v8106_v41 = vsel %vm23356_vm5, %v8101_v49, %v28649_v36  ;;  %v8116_v42 = vsel %vm23356_vm5, %v8111_v35, %v8115_v25  ;;  %v28742_v4 = vrot.slane %v8134_v60, 4 }
 0x532   : > { %v8157_v57 = vshll.u32 %v23159_v27, 16  ;;  %20916 = vmatprep.mubr.msk.bf16.mxu1 %vm1936_vm4, %v28543_v18  ;;  %v29710_v29 = vcombine.low %v28494_v63, %v28515_v38  ;;  %v28751_v47 = vcombine.low %v8086_v32, %v8096_v19  ;;  %v28755_v56 = vsel %vm23862_vm8, %v19307_v16, %v15470_v11  ;;  %v23160_v38 = vld [vmem:[%s23338_s9 + $0x28c] sm:$0xf]  ;;  %v18372_v32 = vld [vmem:[%s23338_s9 + $0x280] sm:$0xf] }
 0x533   : > { %21433 = vmatmul.mubr.msk.bf16.gmra.mrb[104].mxu0 %vm1936_vm4, %v29709_v24  ;;  %v28759_v36 = vsel %vm23862_vm8, %v15472_v34, %v15473_v52  ;;  %v19368_v60 = vcombine.low %v28692_v9, %v28715_v33  ;;  %v19369_v18 = vcombine.low %v28719_v62, %v28725_v20  ;;  %v8144_v63 = vor.u32 %v8143_v55, %v28721_v30  ;;  %v28772_v11 = vld [vmem:[%s29404_s2] ss:$0 sm:$0xff]  ;;  %v29712_v24 = vld [vmem:[#allocation6_spill] sm:$0xff]  ;;  %v23161_v27 = vld [vmem:[%s23338_s9 + $0x290] sm:$0x1] }
 0x534   : > { %21436 = vmatprep.mubr.msk.bf16.mxu0 %vm1936_vm4, %v29710_v29  ;;  %v15476_v35 = vrot.slane %v23160_v38, 5  ;;  %v28774_v34 = vcombine.low %v8106_v41, %v8116_v42  ;;  %v8130_v13 = vsel %vm23356_vm5, %v28727_v17, %v28678_v2  ;;  %v8154_v16 = vor.u32 %v8153_v51, %v28729_v44  ;;  %v29713_v29 = vld [vmem:[#allocation19_spill] sm:$0xff]  ;;  %v29722_v33 = vld [vmem:[#allocation8_spill] sm:$0xff] }
 0x535   : > { %v21330_v50 = vpop.f32.mrb[0].mxu0  ;;  %v15475_v21 = vrot.slane %v15473_v52, 4  ;;  %v8140_v25 = vsel %vm23356_vm5, %v28742_v4, %v28721_v30  ;;  %v8159_v55 = vrot.slane %v8157_v57, 5  ;;  %v15479_v2 = vrot.slane %v23161_v27, 5  ;;  %v23168_v20 = vld [vmem:[%s23338_s9 + $0x2a0] sm:$0xf] }
 0x536   : > { %v21458_v15 = vadd.f32 %v21330_v50, %v29711_v6  ;;  %v15917_v49 = vpop.f32.mrb[1].mxu0  ;;  %v8162_v17 = vshrl.u32 %v18372_v32, 16  ;;  %v8165_v52 = vshll.u32 %v18372_v32, 16  ;;  %v8145_v4 = vrot.slane %v8144_v63, 4  ;;  %v29714_v6 = vld [vmem:[#allocation20_spill] sm:$0xff] }
 0x537   : > { %v21459_v41 = vadd.f32 %v15917_v49, %v29712_v24  ;;  %v21331_v42 = vpop.f32.mrb[2].mxu0  ;;  %v15478_v50 = vrot.slane %v15476_v35, 4  ;;  %v8155_v24 = vrot.slane %v8154_v16, 4  ;;  %v28800_v27 = vsel %vm23862_vm8, %v15475_v21, %v15476_v35  ;;  %v23162_v63 = vld [vmem:[%s23338_s9 + $0x284] sm:$0xf] }
 0x538   : > { %v16565_v51 = vadd.f32 %v21458_v15, %v28772_v11  ;;  %v21460_v38 = vadd.f32 %v21331_v42, %v29713_v29  ;;  %v15920_v30 = vpop.f32.mrb[3].mxu0  ;;  %v29715_v15 = vcombine.low %v28551_v45, %v28582_v59  ;;  %v8175_v42 = vshrl.u32 %v23162_v63, 16 }
 0x539   : > { %v16563_v57 = vadd.f32 %v21459_v41, %v28772_v11  ;;  %v21461_v49 = vadd.f32 %v15920_v30, %v29714_v6  ;;  %20917 = vmatmul.mubr.msk.bf16.gmra.mrb[108].mxu1 %vm1936_vm4, %v28599_v5  ;;  %v8171_v41 = vshll.u32 %v23162_v63, 16  ;;  %v29716_v21 = vcombine.low %v28612_v39, %v28616_v14  ;;  %v23163_v14 = vld [vmem:[%s23338_s9 + $0x288] sm:$0xf] }
 0x53a   : > { %v16693_v32 = vmax.f32 %v16565_v51, 0.0  ;;  %v16566_v19 = vadd.f32 %v21460_v38, %v28772_v11  ;;  %20920 = vmatprep.mubr.msk.bf16.mxu1 %vm1936_vm4, %v28626_v58  ;;  %v8164_v5 = vrot.slane %v8162_v17, 4  ;;  %v8167_v45 = vrot.slane %v8165_v52, 5 }
 0x53b   : > { %21437 = vmatmul.mubr.msk.bf16.gmra.mrb[108].mxu0 %vm1936_vm4, %v29715_v15  ;;  %v16691_v16 = vmax.f32 %v16563_v57, 0.0  ;;  %v16564_v35 = vadd.f32 %v21461_v49, %v28772_v11  ;;  %v8150_v29 = vsel %vm23356_vm5, %v8145_v4, %v28729_v44  ;;  %v28822_v38 = vsel %vm23862_vm8, %v15478_v50, %v15479_v2  ;;  %v29718_v50 = vld [vmem:[#allocation21_spill] sm:$0xff] }
 0x53c   : > { %21440 = vmatprep.mubr.msk.bf16.mxu0 %vm1936_vm4, %v29716_v21  ;;  %v19574_v59 = vpack.c.bf16 %v16693_v32, %v16693_v32  ;;  %v16694_v51 = vmax.f32 %v16566_v19, 0.0  ;;  %v8160_v39 = vsel %vm23356_vm5, %v8155_v24, %v8159_v55  ;;  %v8181_v6 = vshll.u32 %v23163_v14, 16  ;;  %v29717_v19 = vld [vmem:[#allocation23_spill] sm:$0xff] }
 0x53d   : > { %v19572_v30 = vpack.c.bf16 %v16691_v16, %v16691_v16  ;;  %v16692_v57 = vmax.f32 %v16564_v35, 0.0  ;;  %v21334_v58 = vpop.f32.mrb[4].mxu0  ;;  %v28833_v52 = vrot.slane %v8171_v41, 5  ;;  %v8177_v4 = vrot.slane %v8175_v42, 4  ;;  %v29719_v41 = vld [vmem:[#allocation22_spill] sm:$0xff] }
 0x53e   : > { %17334 = vst.msk [vmem:[%s28828_s6 + $0x8] sm:$0xf] %vm17331_vm9, %v19574_v59  ;;  %v19575_v44 = vpack.c.bf16 %v16694_v51, %v16694_v51  ;;  %v21462_v17 = vadd.f32 %v21334_v58, %v29717_v19  ;;  %v15933_v2 = vpop.f32.mrb[5].mxu0  ;;  %v28838_v32 = vcombine.low %v8130_v13, %v8140_v25  ;;  %v19371_v15 = vcombine.low %v28800_v27, %v28822_v38  ;;  %v29720_v51 = vld [vmem:[#allocation7_spill] sm:$0xff] }
 0x53f   : > { %17332 = vst.msk [vmem:[%s28828_s6] sm:$0xf] %vm17331_vm9, %v19572_v30  ;;  %v19573_v55 = vpack.c.bf16 %v16692_v57, %v16692_v57  ;;  %v21463_v49 = vadd.f32 %v15933_v2, %v29718_v50  ;;  %v21335_v24 = vpop.f32.mrb[6].mxu0  ;;  %v28846_v35 = vcombine.low %v8150_v29, %v8160_v39  ;;  %v8168_v21 = vor.u32 %v8167_v45, %v8164_v5  ;;  %v19276_v30 = vld [vmem:[%s23338_s9 + $0x294] sm:$0xe] }
 0x540   : > { %17335 = vst.msk [vmem:[%s28828_s6 + $0xc] sm:$0xf] %vm17331_vm9, %v19575_v44  ;;  %v16569_v63 = vadd.f32 %v21462_v17, %v28772_v11  ;;  %v21464_v16 = vadd.f32 %v21335_v24, %v29719_v41  ;;  %v15936_v42 = vpop.f32.mrb[7].mxu0  ;;  %v28852_v25 = vrot.slane %v8181_v6, 5  ;;  %v23164_v57 = vld [vmem:[%s23338_s9 + $0x298] sm:$0xf]  ;;  %v29721_v5 = vcombine.low %v28630_v40, %v28639_v1 }
 0x541   : > { %17333 = vst.msk [vmem:[%s28828_s6 + $0x4] sm:$0xf] %vm17331_vm9, %v19573_v55  ;;  %v16567_v59 = vadd.f32 %v21463_v49, %v28772_v11  ;;  %v21465_v13 = vadd.f32 %v15936_v42, %v29720_v51  ;;  %v15483_v58 = vrot.slane %v23164_v57, 5  ;;  %20921 = vmatmul.mubr.msk.bf16.gmra.mrb[112].mxu1 %vm1936_vm4, %v28661_v46  ;;  %v8178_v45 = vor.u32 %v8177_v4, %v28833_v52  ;;  %v23165_v46 = vld [vmem:[%s23338_s9 + $0x28c] sm:$0xf] }
 0x542   : > { %v16697_v44 = vmax.f32 %v16569_v63, 0.0  ;;  %v16570_v19 = vadd.f32 %v21464_v16, %v28772_v11  ;;  %v8185_v29 = vshrl.u32 %v23163_v14, 16  ;;  %20924 = vmatprep.mubr.msk.bf16.mxu1 %vm1936_vm4, %v28751_v47  ;;  %v8191_v40 = vshll.u32 %v23165_v46, 16  ;;  %v23166_v63 = vld [vmem:[%s23338_s9 + $0x29c] sm:$0xf] }
 0x543   : > { %21441 = vmatmul.mubr.msk.bf16.gmra.mrb[112].mxu0 %vm1936_vm4, %v29721_v5  ;;  %v16695_v39 = vmax.f32 %v16567_v59, 0.0  ;;  %v16568_v6 = vadd.f32 %v21465_v13, %v28772_v11  ;;  %v8195_v1 = vshrl.u32 %v23165_v46, 16  ;;  %v8169_v14 = vrot.slane %v8168_v21, 4  ;;  %v29723_v59 = vld [vmem:[#allocation5_spill] sm:$0xff]  ;;  %v29725_v46 = vld [vmem:[#allocation11_spill] sm:$0xff] }
 0x544   : > { %21444 = vmatprep.mubr.msk.bf16.mxu0 %vm1936_vm4, %v19368_v60  ;;  %v19578_v17 = vpack.c.bf16 %v16697_v44, %v16697_v44  ;;  %v16698_v2 = vmax.f32 %v16570_v19, 0.0  ;;  %v19308_v4 = vrot.slane %v19276_v30, 9  ;;  %v15485_v24 = vrot.slane %v15483_v58, 4  ;;  %v29724_v19 = vld [vmem:[#allocation10_spill] sm:$0xff] }
 0x545   : > { %v19576_v55 = vpack.c.bf16 %v16695_v39, %v16695_v39  ;;  %v16696_v50 = vmax.f32 %v16568_v6, 0.0  ;;  %v21338_v49 = vpop.f32.mrb[8].mxu0  ;;  %v15486_v47 = vrot.slane %v23166_v63, 5  ;;  %v8179_v16 = vrot.slane %v8178_v45, 4 }
 0x546   : > { %17338 = vst.msk [vmem:[%s28828_s6 + $0x18] sm:$0xf] %vm17331_vm9, %v19578_v17  ;;  %v19579_v9 = vpack.c.bf16 %v16698_v2, %v16698_v2  ;;  %v21466_v60 = vadd.f32 %v21338_v49, %v29722_v33  ;;  %v15949_v41 = vpop.f32.mrb[9].mxu0  ;;  %v8187_v42 = vrot.slane %v8185_v29, 4  ;;  %v28879_v30 = vrot.slane %v8191_v40, 5 }
 0x547   : > { %17336 = vst.msk [vmem:[%s28828_s6 + $0x10] sm:$0xf] %vm17331_vm9, %v19576_v55  ;;  %v19577_v21 = vpack.c.bf16 %v16696_v50, %v16696_v50  ;;  %v21467_v51 = vadd.f32 %v15949_v41, %v29723_v59  ;;  %v21339_v13 = vpop.f32.mrb[10].mxu0  ;;  %v8197_v57 = vrot.slane %v8195_v1, 4  ;;  %v8174_v45 = vsel %vm23356_vm5, %v8169_v14, %v28833_v52  ;;  %v23167_v17 = vld [vmem:[%s23338_s9 + $0x290] sm:$0x1] }
 0x548   : > { %17339 = vst.msk [vmem:[%s28828_s6 + $0x1c] sm:$0xf] %vm17331_vm9, %v19579_v9  ;;  %v16573_v44 = vadd.f32 %v21466_v60, %v28772_v11  ;;  %v21468_v5 = vadd.f32 %v21339_v13, %v29724_v19  ;;  %v15952_v39 = vpop.f32.mrb[11].mxu0  ;;  %v15484_v29 = vsel %vm23862_vm8, %v19308_v4, %v15483_v58  ;;  %v15487_v1 = vsel %vm23862_vm8, %v15485_v24, %v15486_v47  ;;  %v23169_v59 = vld [vmem:[%s23338_s9 + $0x2a4] sm:$0x1]  ;;  %s19700_s9 = sshll.u32 %s23280_s16, 13 }
 0x549   : > { %17337 = vst.msk [vmem:[%s28828_s6 + $0x14] sm:$0xf] %vm17331_vm9, %v19577_v21  ;;  %v16571_v6 = vadd.f32 %v21467_v51, %v28772_v11  ;;  %v21469_v40 = vadd.f32 %v15952_v39, %v29725_v46  ;;  %v8201_v2 = vshll.u32 %v23167_v17, 16  ;;  %20925 = vmatmul.mubr.msk.bf16.gmra.mrb[116].mxu1 %vm1936_vm4, %v28774_v34  ;;  %v8184_v52 = vsel %vm23356_vm5, %v8179_v16, %v28852_v25  ;;  %s29349_s19 = scalar_lea.hbm %s29405_s3, %s19700_s9  ;;  %s29361_s16 = scalar_lea.sflag [#allocation3], %s161_s29 }
 0x54a   : > { %v16701_v55 = vmax.f32 %v16573_v44, 0.0  ;;  %v16574_v50 = vadd.f32 %v21468_v5, %v28772_v11  ;;  %v8188_v58 = vor.u32 %v8187_v42, %v28852_v25  ;;  %20928 = vmatprep.mubr.msk.bf16.mxu1 %vm1936_vm4, %v28838_v32  ;;  %v29726_v34 = vcombine.low %v28755_v56, %v28759_v36  ;;  %v29727_v36 = vld [vmem:[#allocation25_spill] sm:$0xff] }
 0x54b   : > { %21445 = vmatmul.mubr.msk.bf16.gmra.mrb[116].mxu0 %vm1936_vm4, %v19369_v18  ;;  %v16699_v14 = vmax.f32 %v16571_v6, 0.0  ;;  %v16572_v4 = vadd.f32 %v21469_v40, %v28772_v11  ;;  %v8198_v62 = vor.u32 %v8197_v57, %v28879_v30  ;;  %v15489_v18 = vrot.slane %v23168_v20, 5  ;;  %v29730_v40 = vld [vmem:[#allocation28_spill] sm:$0xff] }
 0x54c   : > { %21448 = vmatprep.mubr.msk.bf16.mxu0 %vm1936_vm4, %v29726_v34  ;;  %v19582_v49 = vpack.c.bf16 %v16701_v55, %v16701_v55  ;;  %v16702_v25 = vmax.f32 %v16574_v50, 0.0  ;;  %v19372_v24 = vcombine.low %v15484_v29, %v15487_v1  ;;  %v15488_v63 = vrot.slane %v15486_v47, 4  ;;  %v29728_v47 = vld [vmem:[#allocation26_spill] sm:$0xff] }
 0x54d   : > { %v19580_v9 = vpack.c.bf16 %v16699_v14, %v16699_v14  ;;  %v16700_v33 = vmax.f32 %v16572_v4, 0.0  ;;  %v21342_v60 = vpop.f32.mrb[12].mxu0  ;;  %v18440_v32 = vcombine.low %v8174_v45, %v8184_v52  ;;  %v8203_v41 = vrot.slane %v8201_v2, 5  ;;  %v29729_v45 = vld [vmem:[#allocation27_spill] sm:$0xff] }
 0x54e   : > { %17342 = vst.msk [vmem:[%s28828_s6 + $0x28] sm:$0xf] %vm17331_vm9, %v19582_v49  ;;  %v19583_v56 = vpack.c.bf16 %v16702_v25, %v16702_v25  ;;  %v21470_v16 = vadd.f32 %v21342_v60, %v29727_v36  ;;  %v15965_v42 = vpop.f32.mrb[13].mxu0  ;;  %v8189_v21 = vrot.slane %v8188_v58, 4  ;;  %v15492_v51 = vrot.slane %v23169_v59, 5 }
 0x54f   : > { %17340 = vst.msk [vmem:[%s28828_s6 + $0x20] sm:$0xf] %vm17331_vm9, %v19580_v9  ;;  %v19581_v13 = vpack.c.bf16 %v16700_v33, %v16700_v33  ;;  %v21471_v57 = vadd.f32 %v15965_v42, %v29728_v47  ;;  %v21343_v44 = vpop.f32.mrb[14].mxu0  ;;  %v8199_v19 = vrot.slane %v8198_v62, 4  ;;  %v15491_v5 = vrot.slane %v15489_v18, 4  ;;  %v29731_v62 = vld [vmem:[#allocation30_spill] sm:$0xff] }
 0x550   : > { %17343 = vst.msk [vmem:[%s28828_s6 + $0x2c] sm:$0xf] %vm17331_vm9, %v19583_v56  ;;  %v16577_v39 = vadd.f32 %v21470_v16, %v28772_v11  ;;  %v21472_v29 = vadd.f32 %v21343_v44, %v29729_v45  ;;  %v15968_v6 = vpop.f32.mrb[15].mxu0  ;;  %v8194_v55 = vsel %vm23356_vm5, %v8189_v21, %v28879_v30  ;;  %v15490_v50 = vsel %vm23862_vm8, %v15488_v63, %v15489_v18  ;;  %v29733_v33 = vld [vmem:[#allocation32_spill] sm:$0xff]  ;;  %v29734_v56 = vld [vmem:[#allocation33_spill] sm:$0xff] }
 0x551   : > { %17341 = vst.msk [vmem:[%s28828_s6 + $0x24] sm:$0xf] %vm17331_vm9, %v19581_v13  ;;  %v16575_v46 = vadd.f32 %v21471_v57, %v28772_v11  ;;  %v21473_v1 = vadd.f32 %v15968_v6, %v29730_v40  ;;  %20929 = vmatmul.mubr.msk.bf16.gmra.mrb[120].mxu1 %vm1936_vm4, %v28846_v35  ;;  %v8204_v27 = vsel %vm23356_vm5, %v8199_v19, %v8203_v41  ;;  %v29736_v6 = vld [vmem:[#allocation17_spill] sm:$0xff] }
 0x552   : > { %v16705_v17 = vmax.f32 %v16577_v39, 0.0  ;;  %v16578_v2 = vadd.f32 %v21472_v29, %v28772_v11  ;;  %20932 = vmatprep.mubr.msk.bf16.mxu1 %vm1936_vm4, %v18440_v32  ;;  %v15493_v38 = vsel %vm23862_vm8, %v15491_v5, %v15492_v51  ;;  %v18441_v49 = vcombine.low %v8194_v55, %v8204_v27  ;;  %v29735_v5 = vld [vmem:[#allocation15_spill] sm:$0xff] }
 0x553   : > { %21449 = vmatmul.mubr.msk.bf16.gmra.mrb[120].mxu0 %vm1936_vm4, %v19371_v15  ;;  %v16703_v52 = vmax.f32 %v16575_v46, 0.0  ;;  %v16576_v58 = vadd.f32 %v21473_v1, %v28772_v11  ;;  %v19373_v25 = vcombine.low %v15490_v50, %v15493_v38 }
 0x554   : > { %21452 = vmatprep.mubr.msk.bf16.mxu0 %vm1936_vm4, %v19372_v24  ;;  %v19586_v15 = vpack.c.bf16 %v16705_v17, %v16705_v17  ;;  %v16706_v35 = vmax.f32 %v16578_v2, 0.0  ;;  %v29737_v17 = vld [vmem:[#allocation18_spill] sm:$0xff] }
 0x555   : > { %v19584_v30 = vpack.c.bf16 %v16703_v52, %v16703_v52  ;;  %v16704_v14 = vmax.f32 %v16576_v58, 0.0  ;;  %v21346_v4 = vpop.f32.mrb[16].mxu0  ;;  %v29738_v52 = vld [vmem:[#allocation16_spill] sm:$0xff] }
 0x556   : > { %17346 = vst.msk [vmem:[%s28828_s6 + $0x38] sm:$0xf] %vm17331_vm9, %v19586_v15  ;;  %v19587_v34 = vpack.c.bf16 %v16706_v35, %v16706_v35  ;;  %v21474_v20 = vadd.f32 %v21346_v4, %v29731_v62  ;;  %v15981_v18 = vpop.f32.mrb[17].mxu0 }
 0x557   : > { %17344 = vst.msk [vmem:[%s28828_s6 + $0x30] sm:$0xf] %vm17331_vm9, %v19584_v30  ;;  %v19585_v26 = vpack.c.bf16 %v16704_v14, %v16704_v14  ;;  %v21475_v24 = vadd.f32 %v15981_v18, %v29732_v37  ;;  %v21347_v63 = vpop.f32.mrb[18].mxu0  ;;  %v29739_v18 = vld [vmem:[#allocation36_spill] sm:$0xff]  ;;  %v29740_v37 = vld [vmem:[#allocation37_spill] sm:$0xff] }
 0x558   : > { %17347 = vst.msk [vmem:[%s28828_s6 + $0x3c] sm:$0xf] %vm17331_vm9, %v19587_v34  ;;  %v16581_v9 = vadd.f32 %v21474_v20, %v28772_v11  ;;  %v21476_v60 = vadd.f32 %v21347_v63, %v29733_v33  ;;  %v15984_v32 = vpop.f32.mrb[19].mxu0  ;;  %v29741_v33 = vld [vmem:[#allocation38_spill] sm:$0xff] }
 0x559   : > { %17345 = vst.msk [vmem:[%s28828_s6 + $0x34] sm:$0xf] %vm17331_vm9, %v19585_v26  ;;  %v16579_v41 = vadd.f32 %v21475_v24, %v28772_v11  ;;  %v21477_v36 = vadd.f32 %v15984_v32, %v29734_v56  ;;  %20933 = vmatmul.mubr.msk.bf16.gmra.mrb[124].mxu1 %vm1936_vm4, %v18441_v49 }
 0x55a   : > { %v16709_v16 = vmax.f32 %v16581_v9, 0.0  ;;  %v16582_v42 = vadd.f32 %v21476_v60, %v28772_v11 }
 0x55b   : > { %21453 = vmatmul.mubr.msk.bf16.gmra.mrb[124].mxu0 %vm1936_vm4, %v19373_v25  ;;  %v16707_v21 = vmax.f32 %v16579_v41, 0.0  ;;  %v16580_v59 = vadd.f32 %v21477_v36, %v28772_v11 }
 0x55c   : > { %v19590_v51 = vpack.c.bf16 %v16709_v16, %v16709_v16  ;;  %v16710_v13 = vmax.f32 %v16582_v42, 0.0 }
 0x55d   : > { %v19588_v47 = vpack.c.bf16 %v16707_v21, %v16707_v21  ;;  %v16708_v57 = vmax.f32 %v16580_v59, 0.0  ;;  %v21350_v44 = vpop.f32.mrb[20].mxu0 }
 0x55e   : > { %17350 = vst.msk [vmem:[%s28828_s6 + $0x48] sm:$0xf] %vm17331_vm9, %v19590_v51  ;;  %v19591_v19 = vpack.c.bf16 %v16710_v13, %v16710_v13  ;;  %v21478_v39 = vadd.f32 %v21350_v44, %v29735_v5  ;;  %v15997_v45 = vpop.f32.mrb[21].mxu0 }
 0x55f   : > { %17348 = vst.msk [vmem:[%s28828_s6 + $0x40] sm:$0xf] %vm17331_vm9, %v19588_v47  ;;  %v19589_v29 = vpack.c.bf16 %v16708_v57, %v16708_v57  ;;  %v21479_v46 = vadd.f32 %v15997_v45, %v29736_v6  ;;  %v21351_v40 = vpop.f32.mrb[22].mxu0 }
 0x560   : > { %17351 = vst.msk [vmem:[%s28828_s6 + $0x4c] sm:$0xf] %vm17331_vm9, %v19591_v19  ;;  %v16585_v1 = vadd.f32 %v21478_v39, %v28772_v11  ;;  %v21480_v2 = vadd.f32 %v21351_v40, %v29737_v17  ;;  %v16000_v55 = vpop.f32.mrb[23].mxu0 }
 0x561   : > { %17349 = vst.msk [vmem:[%s28828_s6 + $0x44] sm:$0xf] %vm17331_vm9, %v19589_v29  ;;  %v16583_v50 = vadd.f32 %v21479_v46, %v28772_v11  ;;  %v21481_v58 = vadd.f32 %v16000_v55, %v29738_v52 }
 0x562   : > { %v16713_v27 = vmax.f32 %v16585_v1, 0.0  ;;  %v16586_v38 = vadd.f32 %v21480_v2, %v28772_v11 }
 0x563   : > { %v16711_v15 = vmax.f32 %v16583_v50, 0.0  ;;  %v16584_v35 = vadd.f32 %v21481_v58, %v28772_v11 }
 0x564   : > { %v19594_v30 = vpack.c.bf16 %v16713_v27, %v16713_v27  ;;  %v16714_v14 = vmax.f32 %v16586_v38, 0.0 }
 0x565   : > { %v19592_v4 = vpack.c.bf16 %v16711_v15, %v16711_v15  ;;  %v16712_v34 = vmax.f32 %v16584_v35, 0.0  ;;  %v21354_v62 = vpop.f32.mrb[24].mxu0 }
 0x566   : > { %17354 = vst.msk [vmem:[%s28828_s6 + $0x58] sm:$0xf] %vm17331_vm9, %v19594_v30  ;;  %v19595_v20 = vpack.c.bf16 %v16714_v14, %v16714_v14  ;;  %v21482_v49 = vadd.f32 %v21354_v62, %v29739_v18  ;;  %v16013_v25 = vpop.f32.mrb[25].mxu0  ;;  %v29742_v62 = vld [vmem:[#allocation39_spill] sm:$0xff] }
 0x567   : > { %17352 = vst.msk [vmem:[%s28828_s6 + $0x50] sm:$0xf] %vm17331_vm9, %v19592_v4  ;;  %v19593_v26 = vpack.c.bf16 %v16712_v34, %v16712_v34  ;;  %v21483_v24 = vadd.f32 %v16013_v25, %v29740_v37  ;;  %v21355_v63 = vpop.f32.mrb[26].mxu0 }
 0x568   : > { %17355 = vst.msk [vmem:[%s28828_s6 + $0x5c] sm:$0xf] %vm17331_vm9, %v19595_v20  ;;  %v16589_v9 = vadd.f32 %v21482_v49, %v28772_v11  ;;  %v21484_v60 = vadd.f32 %v21355_v63, %v29741_v33  ;;  %v16016_v32 = vpop.f32.mrb[27].mxu0  ;;  %v29743_v33 = vld [vmem:[#allocation40_spill] sm:$0xff] }
 0x569   : > { %17353 = vst.msk [vmem:[%s28828_s6 + $0x54] sm:$0xf] %vm17331_vm9, %v19593_v26  ;;  %v16587_v41 = vadd.f32 %v21483_v24, %v28772_v11  ;;  %v21485_v56 = vadd.f32 %v16016_v32, %v28200_v43 }
 0x56a   : > { %v16717_v36 = vmax.f32 %v16589_v9, 0.0  ;;  %v16590_v16 = vadd.f32 %v21484_v60, %v28772_v11 }
 0x56b   : > { %v16715_v42 = vmax.f32 %v16587_v41, 0.0  ;;  %v16588_v21 = vadd.f32 %v21485_v56, %v28772_v11  ;;  %v29744_v56 = vld [vmem:[#allocation41_spill] sm:$0xff] }
 0x56c   : > { %v19598_v59 = vpack.c.bf16 %v16717_v36, %v16717_v36  ;;  %v16718_v51 = vmax.f32 %v16590_v16, 0.0 }
 0x56d   : > { %v19596_v13 = vpack.c.bf16 %v16715_v42, %v16715_v42  ;;  %v16716_v47 = vmax.f32 %v16588_v21, 0.0  ;;  %v21358_v57 = vpop.f32.mrb[28].mxu0  ;;  %v29745_v21 = vld [vmem:[#allocation42_spill] sm:$0xff] }
 0x56e   : > { %17358 = vst.msk [vmem:[%s28828_s6 + $0x68] sm:$0xf] %vm17331_vm9, %v19598_v59  ;;  %v19599_v44 = vpack.c.bf16 %v16718_v51, %v16718_v51  ;;  %v21486_v19 = vadd.f32 %v21358_v57, %v28237_v23  ;;  %v16029_v5 = vpop.f32.mrb[29].mxu0 }
 0x56f   : > { %17356 = vst.msk [vmem:[%s28828_s6 + $0x60] sm:$0xf] %vm17331_vm9, %v19596_v13  ;;  %v19597_v43 = vpack.c.bf16 %v16716_v47, %v16716_v47  ;;  %v21487_v39 = vadd.f32 %v16029_v5, %v28248_v0  ;;  %v21359_v45 = vpop.f32.mrb[30].mxu0  ;;  %v29746_v47 = vld [vmem:[#allocation43_spill] sm:$0xff] }
 0x570   : > { %17359 = vst.msk [vmem:[%s28828_s6 + $0x6c] sm:$0xf] %vm17331_vm9, %v19599_v44  ;;  %v16593_v29 = vadd.f32 %v21486_v19, %v28772_v11  ;;  %v21488_v6 = vadd.f32 %v21359_v45, %v28252_v31  ;;  %v16032_v46 = vpop.f32.mrb[31].mxu0 }
 0x571   : > { %17357 = vst.msk [vmem:[%s28828_s6 + $0x64] sm:$0xf] %vm17331_vm9, %v19597_v43  ;;  %v16591_v23 = vadd.f32 %v21487_v39, %v28772_v11  ;;  %v21489_v40 = vadd.f32 %v16032_v46, %v28264_v8 }
 0x572   : > { %v16721_v1 = vmax.f32 %v16593_v29, 0.0  ;;  %v16594_v17 = vadd.f32 %v21488_v6, %v28772_v11 }
 0x573   : > { %v16719_v0 = vmax.f32 %v16591_v23, 0.0  ;;  %v16592_v2 = vadd.f32 %v21489_v40, %v28772_v11  ;;  %v29747_v40 = vld [vmem:[#allocation12_spill] sm:$0xff] }
 0x574   : > { %v19602_v55 = vpack.c.bf16 %v16721_v1, %v16721_v1  ;;  %v16722_v50 = vmax.f32 %v16594_v17, 0.0 }
 0x575   : > { %v19600_v52 = vpack.c.bf16 %v16719_v0, %v16719_v0  ;;  %v16720_v31 = vmax.f32 %v16592_v2, 0.0  ;;  %v21362_v58 = vpop.f32.mrb[32].mxu0  ;;  %v29748_v2 = vld [vmem:[#allocation44_spill] sm:$0xff] }
 0x576   : > { %17362 = vst.msk [vmem:[%s28828_s6 + $0x78] sm:$0xf] %vm17331_vm9, %v19602_v55  ;;  %v19603_v27 = vpack.c.bf16 %v16722_v50, %v16722_v50  ;;  %v21490_v38 = vadd.f32 %v21362_v58, %v28299_v10  ;;  %v16045_v15 = vpop.f32.mrb[33].mxu0 }
 0x577   : > { %17360 = vst.msk [vmem:[%s28828_s6 + $0x70] sm:$0xf] %vm17331_vm9, %v19600_v52  ;;  %v19601_v8 = vpack.c.bf16 %v16720_v31, %v16720_v31  ;;  %v21491_v35 = vadd.f32 %v16045_v15, %v28309_v28  ;;  %v21363_v30 = vpop.f32.mrb[34].mxu0  ;;  %v29749_v31 = vld [vmem:[#allocation45_spill] sm:$0xff]  ;;  %v29750_v15 = vld [vmem:[#allocation46_spill] sm:$0xff] }
 0x578   : > { %17363 = vst.msk [vmem:[%s28828_s6 + $0x7c] sm:$0xf] %vm17331_vm9, %v19603_v27  ;;  %v16597_v14 = vadd.f32 %v21490_v38, %v28772_v11  ;;  %v21492_v4 = vadd.f32 %v21363_v30, %v28313_v7  ;;  %v16048_v34 = vpop.f32.mrb[35].mxu0 }
 0x579   : > { %17361 = vst.msk [vmem:[%s28828_s6 + $0x74] sm:$0xf] %vm17331_vm9, %v19601_v8  ;;  %v16595_v10 = vadd.f32 %v21491_v35, %v28772_v11  ;;  %v21493_v20 = vadd.f32 %v16048_v34, %v29742_v62 }
 0x57a   : > { %v16725_v18 = vmax.f32 %v16597_v14, 0.0  ;;  %v16598_v49 = vadd.f32 %v21492_v4, %v28772_v11 }
 0x57b   : > { %v16723_v28 = vmax.f32 %v16595_v10, 0.0  ;;  %v16596_v25 = vadd.f32 %v21493_v20, %v28772_v11 }
 0x57c   : > { %v19606_v26 = vpack.c.bf16 %v16725_v18, %v16725_v18  ;;  %v16726_v37 = vmax.f32 %v16598_v49, 0.0 }
 0x57d   : > { %v19604_v24 = vpack.c.bf16 %v16723_v28, %v16723_v28  ;;  %v16724_v7 = vmax.f32 %v16596_v25, 0.0  ;;  %v21366_v63 = vpop.f32.mrb[36].mxu0  ;;  %v29751_v28 = vld [vmem:[#allocation13_spill] sm:$0xff] }
 0x57e   : > { %17366 = vst.msk [vmem:[%s28828_s6 + $0x88] sm:$0xf] %vm17331_vm9, %v19606_v26  ;;  %v19607_v9 = vpack.c.bf16 %v16726_v37, %v16726_v37  ;;  %v21494_v60 = vadd.f32 %v21366_v63, %v29743_v33  ;;  %v16061_v32 = vpop.f32.mrb[37].mxu0  ;;  %v29753_v33 = vld [vmem:[#allocation14_spill] sm:$0xff] }
 0x57f   : > { %17364 = vst.msk [vmem:[%s28828_s6 + $0x80] sm:$0xf] %vm17331_vm9, %v19604_v24  ;;  %v19605_v41 = vpack.c.bf16 %v16724_v7, %v16724_v7  ;;  %v21495_v36 = vadd.f32 %v16061_v32, %v29744_v56  ;;  %v21367_v16 = vpop.f32.mrb[38].mxu0  ;;  %v29752_v24 = vld [vmem:[#allocation29_spill] sm:$0xff]  ;;  %v29754_v56 = vld [vmem:[#allocation34_spill] sm:$0xff] }
 0x580   : > { %17367 = vst.msk [vmem:[%s28828_s6 + $0x8c] sm:$0xf] %vm17331_vm9, %v19607_v9  ;;  %v16601_v42 = vadd.f32 %v21494_v60, %v28772_v11  ;;  %v21496_v59 = vadd.f32 %v21367_v16, %v29745_v21  ;;  %v16064_v51 = vpop.f32.mrb[39].mxu0 }
 0x581   : > { %17365 = vst.msk [vmem:[%s28828_s6 + $0x84] sm:$0xf] %vm17331_vm9, %v19605_v41  ;;  %v16599_v13 = vadd.f32 %v21495_v36, %v28772_v11  ;;  %v21497_v57 = vadd.f32 %v16064_v51, %v29746_v47 }
 0x582   : > { %v16729_v44 = vmax.f32 %v16601_v42, 0.0  ;;  %v16602_v19 = vadd.f32 %v21496_v59, %v28772_v11 }
 0x583   : > { %v16727_v5 = vmax.f32 %v16599_v13, 0.0  ;;  %v16600_v43 = vadd.f32 %v21497_v57, %v28772_v11 }
 0x584   : > { %v19610_v39 = vpack.c.bf16 %v16729_v44, %v16729_v44  ;;  %v16730_v45 = vmax.f32 %v16602_v19, 0.0 }
 0x585   : > { %v19608_v29 = vpack.c.bf16 %v16727_v5, %v16727_v5  ;;  %v16728_v6 = vmax.f32 %v16600_v43, 0.0  ;;  %v21370_v46 = vpop.f32.mrb[40].mxu0 }
 0x586   : > { %17370 = vst.msk [vmem:[%s28828_s6 + $0x98] sm:$0xf] %vm17331_vm9, %v19610_v39  ;;  %v19611_v23 = vpack.c.bf16 %v16730_v45, %v16730_v45  ;;  %v21498_v1 = vadd.f32 %v21370_v46, %v29747_v40  ;;  %v16077_v17 = vpop.f32.mrb[41].mxu0  ;;  %v29755_v46 = vld [vmem:[#allocation35_spill] sm:$0xff] }
 0x587   : > { %17368 = vst.msk [vmem:[%s28828_s6 + $0x90] sm:$0xf] %vm17331_vm9, %v19608_v29  ;;  %v19609_v0 = vpack.c.bf16 %v16728_v6, %v16728_v6  ;;  %v21499_v55 = vadd.f32 %v16077_v17, %v29748_v2  ;;  %v21371_v50 = vpop.f32.mrb[42].mxu0 }
 0x588   : > { %17371 = vst.msk [vmem:[%s28828_s6 + $0x9c] sm:$0xf] %vm17331_vm9, %v19611_v23  ;;  %v16605_v52 = vadd.f32 %v21498_v1, %v28772_v11  ;;  %v21500_v58 = vadd.f32 %v21371_v50, %v29749_v31  ;;  %v16080_v27 = vpop.f32.mrb[43].mxu0  ;;  %v29756_v1 = vld [vmem:[#allocation9_spill] sm:$0xff] }
 0x589   : > { %17369 = vst.msk [vmem:[%s28828_s6 + $0x94] sm:$0xf] %vm17331_vm9, %v19609_v0  ;;  %v16603_v38 = vadd.f32 %v21499_v55, %v28772_v11  ;;  %v21501_v8 = vadd.f32 %v16080_v27, %v29750_v15  ;;  %v29757_v15 = vld [vmem:[#allocation47_spill] sm:$0xff] }
 0x58a   : > { %v16733_v35 = vmax.f32 %v16605_v52, 0.0  ;;  %v16606_v30 = vadd.f32 %v21500_v58, %v28772_v11 }
 0x58b   : > { %v16731_v14 = vmax.f32 %v16603_v38, 0.0  ;;  %v16604_v4 = vadd.f32 %v21501_v8, %v28772_v11 }
 0x58c   : > { %v19614_v34 = vpack.c.bf16 %v16733_v35, %v16733_v35  ;;  %v16734_v10 = vmax.f32 %v16606_v30, 0.0 }
 0x58d   : > { %v19612_v62 = vpack.c.bf16 %v16731_v14, %v16731_v14  ;;  %v16732_v20 = vmax.f32 %v16604_v4, 0.0  ;;  %v21374_v18 = vpop.f32.mrb[44].mxu0  ;;  %v29758_v14 = vld [vmem:[#allocation48_spill] sm:$0xff] }
 0x58e   : > { %17374 = vst.msk [vmem:[%s28828_s6 + $0xa8] sm:$0xf] %vm17331_vm9, %v19614_v34  ;;  %v19615_v49 = vpack.c.bf16 %v16734_v10, %v16734_v10  ;;  %v21502_v25 = vadd.f32 %v21374_v18, %v29751_v28  ;;  %v16093_v26 = vpop.f32.mrb[45].mxu0 }
 0x58f   : > { %17372 = vst.msk [vmem:[%s28828_s6 + $0xa0] sm:$0xf] %vm17331_vm9, %v19612_v62  ;;  %v19613_v37 = vpack.c.bf16 %v16732_v20, %v16732_v20  ;;  %v21503_v7 = vadd.f32 %v16093_v26, %v29752_v24  ;;  %v21375_v63 = vpop.f32.mrb[46].mxu0  ;;  %v29759_v62 = vld [vmem:[#allocation49_spill] sm:$0xff] }
 0x590   : > { %17375 = vst.msk [vmem:[%s28828_s6 + $0xac] sm:$0xf] %vm17331_vm9, %v19615_v49  ;;  %v16609_v9 = vadd.f32 %v21502_v25, %v28772_v11  ;;  %v21504_v60 = vadd.f32 %v21375_v63, %v29753_v33  ;;  %v16096_v32 = vpop.f32.mrb[47].mxu0 }
 0x591   : > { %17373 = vst.msk [vmem:[%s28828_s6 + $0xa4] sm:$0xf] %vm17331_vm9, %v19613_v37  ;;  %v16607_v41 = vadd.f32 %v21503_v7, %v28772_v11  ;;  %v21505_v36 = vadd.f32 %v16096_v32, %v29754_v56 }
 0x592   : > { %v16737_v16 = vmax.f32 %v16609_v9, 0.0  ;;  %v16610_v42 = vadd.f32 %v21504_v60, %v28772_v11 }
 0x593   : > { %v16735_v21 = vmax.f32 %v16607_v41, 0.0  ;;  %v16608_v59 = vadd.f32 %v21505_v36, %v28772_v11  ;;  %v29760_v36 = vld [vmem:[#allocation50_spill] sm:$0xff] }
 0x594   : > { %v19618_v51 = vpack.c.bf16 %v16737_v16, %v16737_v16  ;;  %v16738_v13 = vmax.f32 %v16610_v42, 0.0 }
 0x595   : > { %v19616_v47 = vpack.c.bf16 %v16735_v21, %v16735_v21  ;;  %v16736_v57 = vmax.f32 %v16608_v59, 0.0  ;;  %v21378_v44 = vpop.f32.mrb[48].mxu0  ;;  %v29761_v59 = vld [vmem:[#allocation51_spill] sm:$0xff] }
 0x596   : > { %17378 = vst.msk [vmem:[%s28828_s6 + $0xb8] sm:$0xf] %vm17331_vm9, %v19618_v51  ;;  %v19619_v19 = vpack.c.bf16 %v16738_v13, %v16738_v13  ;;  %v21506_v5 = vadd.f32 %v21378_v44, %v28524_v12  ;;  %v16109_v43 = vpop.f32.mrb[49].mxu0 }
 0x597   : > { %17376 = vst.msk [vmem:[%s28828_s6 + $0xb0] sm:$0xf] %vm17331_vm9, %v19616_v47  ;;  %v19617_v39 = vpack.c.bf16 %v16736_v57, %v16736_v57  ;;  %v21507_v45 = vadd.f32 %v16109_v43, %v28530_v61  ;;  %v21379_v29 = vpop.f32.mrb[50].mxu0  ;;  %v29762_v47 = vld [vmem:[#allocation52_spill] sm:$0xff] }
 0x598   : > { %17379 = vst.msk [vmem:[%s28828_s6 + $0xbc] sm:$0xf] %vm17331_vm9, %v19619_v19  ;;  %v16613_v6 = vadd.f32 %v21506_v5, %v28772_v11  ;;  %v21508_v23 = vadd.f32 %v21379_v29, %v29755_v46  ;;  %v16112_v40 = vpop.f32.mrb[51].mxu0 }
 0x599   : > { %17377 = vst.msk [vmem:[%s28828_s6 + $0xb4] sm:$0xf] %vm17331_vm9, %v19617_v39  ;;  %v16611_v12 = vadd.f32 %v21507_v45, %v28772_v11  ;;  %v21509_v17 = vadd.f32 %v16112_v40, %v29756_v1  ;;  %v29763_v40 = vld [vmem:[#allocation53_spill] sm:$0xff] }
 0x59a   : > { %v16741_v0 = vmax.f32 %v16613_v6, 0.0  ;;  %v16614_v2 = vadd.f32 %v21508_v23, %v28772_v11 }
 0x59b   : > { %v16739_v61 = vmax.f32 %v16611_v12, 0.0  ;;  %v16612_v55 = vadd.f32 %v21509_v17, %v28772_v11 }
 0x59c   : > { %v19622_v50 = vpack.c.bf16 %v16741_v0, %v16741_v0  ;;  %v16742_v52 = vmax.f32 %v16614_v2, 0.0 }
 0x59d   : > { %v19620_v31 = vpack.c.bf16 %v16739_v61, %v16739_v61  ;;  %v16740_v58 = vmax.f32 %v16612_v55, 0.0  ;;  %v21382_v27 = vpop.f32.mrb[52].mxu0 }
 0x59e   : > { %17382 = vst.msk [vmem:[%s28828_s6 + $0xc8] sm:$0xf] %vm17331_vm9, %v19622_v50  ;;  %v19623_v38 = vpack.c.bf16 %v16742_v52, %v16742_v52  ;;  %v21510_v8 = vadd.f32 %v21382_v27, %v29757_v15  ;;  %v16125_v35 = vpop.f32.mrb[53].mxu0 }
 0x59f   : > { %17380 = vst.msk [vmem:[%s28828_s6 + $0xc0] sm:$0xf] %vm17331_vm9, %v19620_v31  ;;  %v19621_v30 = vpack.c.bf16 %v16740_v58, %v16740_v58  ;;  %v21511_v4 = vadd.f32 %v16125_v35, %v29758_v14  ;;  %v21383_v34 = vpop.f32.mrb[54].mxu0 }
 0x5a0   : > { %17383 = vst.msk [vmem:[%s28828_s6 + $0xcc] sm:$0xf] %vm17331_vm9, %v19623_v38  ;;  %v16617_v10 = vadd.f32 %v21510_v8, %v28772_v11  ;;  %v21512_v20 = vadd.f32 %v21383_v34, %v29759_v62  ;;  %v16128_v18 = vpop.f32.mrb[55].mxu0 }
 0x5a1   : > { %17381 = vst.msk [vmem:[%s28828_s6 + $0xc4] sm:$0xf] %vm17331_vm9, %v19621_v30  ;;  %v16615_v49 = vadd.f32 %v21511_v4, %v28772_v11  ;;  %v21513_v28 = vadd.f32 %v16128_v18, %v28595_v3 }
 0x5a2   : > { %v16745_v25 = vmax.f32 %v16617_v10, 0.0  ;;  %v16618_v26 = vadd.f32 %v21512_v20, %v28772_v11 }
 0x5a3   : > { %v16743_v37 = vmax.f32 %v16615_v49, 0.0  ;;  %v16616_v24 = vadd.f32 %v21513_v28, %v28772_v11 }
 0x5a4   : > { %v19626_v7 = vpack.c.bf16 %v16745_v25, %v16745_v25  ;;  %v16746_v63 = vmax.f32 %v16618_v26, 0.0 }
 0x5a5   : > { %v19624_v9 = vpack.c.bf16 %v16743_v37, %v16743_v37  ;;  %v16744_v33 = vmax.f32 %v16616_v24, 0.0  ;;  %v21386_v60 = vpop.f32.mrb[56].mxu0 }
 0x5a6   : > { %17386 = vst.msk [vmem:[%s28828_s6 + $0xd8] sm:$0xf] %vm17331_vm9, %v19626_v7  ;;  %v19627_v32 = vpack.c.bf16 %v16746_v63, %v16746_v63  ;;  %v21514_v41 = vadd.f32 %v21386_v60, %v28643_v48  ;;  %v16141_v56 = vpop.f32.mrb[57].mxu0 }
 0x5a7   : > { %17384 = vst.msk [vmem:[%s28828_s6 + $0xd0] sm:$0xf] %vm17331_vm9, %v19624_v9  ;;  %v19625_v3 = vpack.c.bf16 %v16744_v33, %v16744_v33  ;;  %v21515_v16 = vadd.f32 %v16141_v56, %v29760_v36  ;;  %v21387_v42 = vpop.f32.mrb[58].mxu0 }
 0x5a8   : > { %17387 = vst.msk [vmem:[%s28828_s6 + $0xdc] sm:$0xf] %vm17331_vm9, %v19627_v32  ;;  %v16621_v21 = vadd.f32 %v21514_v41, %v28772_v11  ;;  %v21516_v51 = vadd.f32 %v21387_v42, %v29761_v59  ;;  %v16144_v13 = vpop.f32.mrb[59].mxu0 }
 0x5a9   : > { %17385 = vst.msk [vmem:[%s28828_s6 + $0xd4] sm:$0xf] %vm17331_vm9, %v19625_v3  ;;  %v16619_v48 = vadd.f32 %v21515_v16, %v28772_v11  ;;  %v21517_v57 = vadd.f32 %v16144_v13, %v29762_v47 }
 0x5aa   : > { %v16749_v44 = vmax.f32 %v16621_v21, 0.0  ;;  %v16622_v19 = vadd.f32 %v21516_v51, %v28772_v11 }
 0x5ab   : > { %v16747_v5 = vmax.f32 %v16619_v48, 0.0  ;;  %v16620_v43 = vadd.f32 %v21517_v57, %v28772_v11 }
 0x5ac   : > { %v19630_v39 = vpack.c.bf16 %v16749_v44, %v16749_v44  ;;  %v16750_v45 = vmax.f32 %v16622_v19, 0.0 }
 0x5ad   : > { %v19628_v29 = vpack.c.bf16 %v16747_v5, %v16747_v5  ;;  %v16748_v6 = vmax.f32 %v16620_v43, 0.0  ;;  %v21390_v46 = vpop.f32.mrb[60].mxu0 }
 0x5ae   : > { %17390 = vst.msk [vmem:[%s28828_s6 + $0xe8] sm:$0xf] %vm17331_vm9, %v19630_v39  ;;  %v19631_v23 = vpack.c.bf16 %v16750_v45, %v16750_v45  ;;  %v21518_v12 = vadd.f32 %v21390_v46, %v29763_v40  ;;  %v16157_v1 = vpop.f32.mrb[61].mxu0 }
 0x5af   : > { %17388 = vst.msk [vmem:[%s28828_s6 + $0xe0] sm:$0xf] %vm17331_vm9, %v19628_v29  ;;  %v19629_v17 = vpack.c.bf16 %v16748_v6, %v16748_v6  ;;  %v21519_v0 = vadd.f32 %v16157_v1, %v28701_v53  ;;  %v21391_v2 = vpop.f32.mrb[62].mxu0  ;;  %v29170_v6 = vld [vmem:[%s29404_s2] ss:$0 sm:$0xff] }
 0x5b0   : > { %17391 = vst.msk [vmem:[%s28828_s6 + $0xec] sm:$0xf] %vm17331_vm9, %v19631_v23  ;;  %v16625_v61 = vadd.f32 %v21518_v12, %v28772_v11  ;;  %v21520_v55 = vadd.f32 %v21391_v2, %v28704_v22  ;;  %v16160_v50 = vpop.f32.mrb[63].mxu0 }
 0x5b1   : > { %17389 = vst.msk [vmem:[%s28828_s6 + $0xe4] sm:$0xf] %vm17331_vm9, %v19629_v17  ;;  %v16623_v52 = vadd.f32 %v21519_v0, %v28772_v11  ;;  %v21521_v31 = vadd.f32 %v16160_v50, %v28711_v54 }
 0x5b2   : > { %v16753_v58 = vmax.f32 %v16625_v61, 0.0  ;;  %v16626_v27 = vadd.f32 %v21520_v55, %v28772_v11 }
 0x5b3   : > { %v16751_v53 = vmax.f32 %v16623_v52, 0.0  ;;  %v16624_v38 = vadd.f32 %v21521_v31, %v28772_v11 }
 0x5b4   : > { %v19634_v15 = vpack.c.bf16 %v16753_v58, %v16753_v58  ;;  %v16754_v8 = vmax.f32 %v16626_v27, 0.0  ;;  %v20874_v22 = vpop.f32.mrb[64].mxu1 }
 0x5b5   : > { %v19632_v35 = vpack.c.bf16 %v16751_v53, %v16751_v53  ;;  %v16752_v30 = vmax.f32 %v16624_v38, 0.0  ;;  %v21394_v14 = vpop.f32.mrb[64].mxu0  ;;  %v8884_v54 = vpop.f32.mrb[65].mxu1 }
 0x5b6   : > { %17394 = vst.msk [vmem:[%s28828_s6 + $0xf8] sm:$0xf] %vm17331_vm9, %v19634_v15  ;;  %v19635_v4 = vpack.c.bf16 %v16754_v8, %v16754_v8  ;;  %v21522_v34 = vadd.f32 %v21394_v14, %v20874_v22  ;;  %v16173_v10 = vpop.f32.mrb[65].mxu0  ;;  %v20875_v18 = vpop.f32.mrb[66].mxu1 }
 0x5b7   : > { %17392 = vst.msk [vmem:[%s28828_s6 + $0xf0] sm:$0xf] %vm17331_vm9, %v19632_v35  ;;  %v19633_v62 = vpack.c.bf16 %v16752_v30, %v16752_v30  ;;  %v21523_v20 = vadd.f32 %v16173_v10, %v8884_v54  ;;  %v21395_v49 = vpop.f32.mrb[66].mxu0  ;;  %v8887_v26 = vpop.f32.mrb[67].mxu1 }
 0x5b8   : > { %17395 = vst.msk [vmem:[%s28828_s6 + $0xfc] sm:$0xf] %vm17331_vm9, %v19635_v4  ;;  %v16629_v28 = vadd.f32 %v21522_v34, %v28772_v11  ;;  %v21524_v25 = vadd.f32 %v21395_v49, %v20875_v18  ;;  %v16176_v37 = vpop.f32.mrb[67].mxu0 }
 0x5b9   : > { %17393 = vst.msk [vmem:[%s28828_s6 + $0xf4] sm:$0xf] %vm17331_vm9, %v19633_v62  ;;  %v16627_v24 = vadd.f32 %v21523_v20, %v28772_v11  ;;  %v21525_v7 = vadd.f32 %v16176_v37, %v8887_v26 }
 0x5ba   : > { %v16757_v63 = vmax.f32 %v16629_v28, 0.0  ;;  %v16630_v9 = vadd.f32 %v21524_v25, %v28772_v11 }
 0x5bb   : > { %v16755_v33 = vmax.f32 %v16627_v24, 0.0  ;;  %v16628_v60 = vadd.f32 %v21525_v7, %v28772_v11 }
 0x5bc   : > { %v19638_v32 = vpack.c.bf16 %v16757_v63, %v16757_v63  ;;  %v16758_v41 = vmax.f32 %v16630_v9, 0.0  ;;  %v20878_v36 = vpop.f32.mrb[68].mxu1 }
 0x5bd   : > { %v19636_v56 = vpack.c.bf16 %v16755_v33, %v16755_v33  ;;  %v16756_v3 = vmax.f32 %v16628_v60, 0.0  ;;  %v21398_v16 = vpop.f32.mrb[68].mxu0  ;;  %v8900_v59 = vpop.f32.mrb[69].mxu1 }
 0x5be   : > { %17398 = vst.msk [vmem:[%s28828_s6 + $0x108] sm:$0xf] %vm17331_vm9, %v19638_v32  ;;  %v19639_v42 = vpack.c.bf16 %v16758_v41, %v16758_v41  ;;  %v21526_v21 = vadd.f32 %v21398_v16, %v20878_v36  ;;  %v16189_v51 = vpop.f32.mrb[69].mxu0  ;;  %v20879_v47 = vpop.f32.mrb[70].mxu1 }
 0x5bf   : > { %17396 = vst.msk [vmem:[%s28828_s6 + $0x100] sm:$0xf] %vm17331_vm9, %v19636_v56  ;;  %v19637_v13 = vpack.c.bf16 %v16756_v3, %v16756_v3  ;;  %v21527_v48 = vadd.f32 %v16189_v51, %v8900_v59  ;;  %v21399_v57 = vpop.f32.mrb[70].mxu0  ;;  %v8903_v5 = vpop.f32.mrb[71].mxu1 }
 0x5c0   : > { %17399 = vst.msk [vmem:[%s28828_s6 + $0x10c] sm:$0xf] %vm17331_vm9, %v19639_v42  ;;  %v16633_v44 = vadd.f32 %v21526_v21, %v28772_v11  ;;  %v21528_v19 = vadd.f32 %v21399_v57, %v20879_v47  ;;  %v16192_v43 = vpop.f32.mrb[71].mxu0 }
 0x5c1   : > { %17397 = vst.msk [vmem:[%s28828_s6 + $0x104] sm:$0xf] %vm17331_vm9, %v19637_v13  ;;  %v16631_v39 = vadd.f32 %v21527_v48, %v28772_v11  ;;  %v21529_v45 = vadd.f32 %v16192_v43, %v8903_v5 }
 0x5c2   : > { %v16761_v29 = vmax.f32 %v16633_v44, 0.0  ;;  %v16634_v46 = vadd.f32 %v29170_v6, %v21528_v19 }
 0x5c3   : > { %v16759_v23 = vmax.f32 %v16631_v39, 0.0  ;;  %v16632_v40 = vadd.f32 %v29170_v6, %v21529_v45 }
 0x5c4   : > { %v19642_v12 = vpack.c.bf16 %v16761_v29, %v16761_v29  ;;  %v16762_v1 = vmax.f32 %v16634_v46, 0.0  ;;  %v20882_v2 = vpop.f32.mrb[72].mxu1 }
 0x5c5   : > { %v19640_v17 = vpack.c.bf16 %v16759_v23, %v16759_v23  ;;  %v16760_v0 = vmax.f32 %v16632_v40, 0.0  ;;  %v21402_v11 = vpop.f32.mrb[72].mxu0  ;;  %v8916_v50 = vpop.f32.mrb[73].mxu1 }
 0x5c6   : > { %17402 = vst.msk [vmem:[%s28828_s6 + $0x118] sm:$0xf] %vm17331_vm9, %v19642_v12  ;;  %v19643_v61 = vpack.c.bf16 %v16762_v1, %v16762_v1  ;;  %v21530_v55 = vadd.f32 %v21402_v11, %v20882_v2  ;;  %v16205_v52 = vpop.f32.mrb[73].mxu0  ;;  %v20883_v27 = vpop.f32.mrb[74].mxu1 }
 0x5c7   : > { %17400 = vst.msk [vmem:[%s28828_s6 + $0x110] sm:$0xf] %vm17331_vm9, %v19640_v17  ;;  %v19641_v31 = vpack.c.bf16 %v16760_v0, %v16760_v0  ;;  %v21531_v58 = vadd.f32 %v16205_v52, %v8916_v50  ;;  %v21403_v53 = vpop.f32.mrb[74].mxu0  ;;  %v8919_v8 = vpop.f32.mrb[75].mxu1 }
 0x5c8   : > { %17403 = vst.msk [vmem:[%s28828_s6 + $0x11c] sm:$0xf] %vm17331_vm9, %v19643_v61  ;;  %v16637_v38 = vadd.f32 %v29170_v6, %v21530_v55  ;;  %v21532_v15 = vadd.f32 %v21403_v53, %v20883_v27  ;;  %v16208_v35 = vpop.f32.mrb[75].mxu0 }
 0x5c9   : > { %17401 = vst.msk [vmem:[%s28828_s6 + $0x114] sm:$0xf] %vm17331_vm9, %v19641_v31  ;;  %v16635_v30 = vadd.f32 %v29170_v6, %v21531_v58  ;;  %v21533_v22 = vadd.f32 %v16208_v35, %v8919_v8 }
 0x5ca   : > { %v16765_v14 = vmax.f32 %v16637_v38, 0.0  ;;  %v16638_v4 = vadd.f32 %v29170_v6, %v21532_v15 }
 0x5cb   : > { %v16763_v34 = vmax.f32 %v16635_v30, 0.0  ;;  %v16636_v54 = vadd.f32 %v29170_v6, %v21533_v22 }
 0x5cc   : > { %v19646_v10 = vpack.c.bf16 %v16765_v14, %v16765_v14  ;;  %v16766_v62 = vmax.f32 %v16638_v4, 0.0  ;;  %v20886_v49 = vpop.f32.mrb[76].mxu1 }
 0x5cd   : > { %v19644_v20 = vpack.c.bf16 %v16763_v34, %v16763_v34  ;;  %v16764_v18 = vmax.f32 %v16636_v54, 0.0  ;;  %v21406_v28 = vpop.f32.mrb[76].mxu0  ;;  %v8932_v37 = vpop.f32.mrb[77].mxu1 }
 0x5ce   : > { %17406 = vst.msk [vmem:[%s28828_s6 + $0x128] sm:$0xf] %vm17331_vm9, %v19646_v10  ;;  %v19647_v25 = vpack.c.bf16 %v16766_v62, %v16766_v62  ;;  %v21534_v26 = vadd.f32 %v21406_v28, %v20886_v49  ;;  %v16221_v24 = vpop.f32.mrb[77].mxu0  ;;  %v20887_v9 = vpop.f32.mrb[78].mxu1 }
 0x5cf   : > { %17404 = vst.msk [vmem:[%s28828_s6 + $0x120] sm:$0xf] %vm17331_vm9, %v19644_v20  ;;  %v19645_v7 = vpack.c.bf16 %v16764_v18, %v16764_v18  ;;  %v21535_v63 = vadd.f32 %v16221_v24, %v8932_v37  ;;  %v21407_v33 = vpop.f32.mrb[78].mxu0  ;;  %v8935_v41 = vpop.f32.mrb[79].mxu1 }
 0x5d0   : > { %17407 = vst.msk [vmem:[%s28828_s6 + $0x12c] sm:$0xf] %vm17331_vm9, %v19647_v25  ;;  %v16641_v60 = vadd.f32 %v29170_v6, %v21534_v26  ;;  %v21536_v32 = vadd.f32 %v21407_v33, %v20887_v9  ;;  %v16224_v56 = vpop.f32.mrb[79].mxu0 }
 0x5d1   : > { %17405 = vst.msk [vmem:[%s28828_s6 + $0x124] sm:$0xf] %vm17331_vm9, %v19645_v7  ;;  %v16639_v3 = vadd.f32 %v29170_v6, %v21535_v63  ;;  %v21537_v36 = vadd.f32 %v16224_v56, %v8935_v41 }
 0x5d2   : > { %v16769_v16 = vmax.f32 %v16641_v60, 0.0  ;;  %v16642_v42 = vadd.f32 %v29170_v6, %v21536_v32 }
 0x5d3   : > { %v16767_v21 = vmax.f32 %v16639_v3, 0.0  ;;  %v16640_v59 = vadd.f32 %v29170_v6, %v21537_v36 }
 0x5d4   : > { %v19650_v51 = vpack.c.bf16 %v16769_v16, %v16769_v16  ;;  %v16770_v13 = vmax.f32 %v16642_v42, 0.0  ;;  %v20890_v57 = vpop.f32.mrb[80].mxu1 }
 0x5d5   : > { %v19648_v48 = vpack.c.bf16 %v16767_v21, %v16767_v21  ;;  %v16768_v47 = vmax.f32 %v16640_v59, 0.0  ;;  %v21410_v44 = vpop.f32.mrb[80].mxu0  ;;  %v8948_v43 = vpop.f32.mrb[81].mxu1 }
 0x5d6   : > { %17410 = vst.msk [vmem:[%s28828_s6 + $0x138] sm:$0xf] %vm17331_vm9, %v19650_v51  ;;  %v19651_v19 = vpack.c.bf16 %v16770_v13, %v16770_v13  ;;  %v21538_v5 = vadd.f32 %v21410_v44, %v20890_v57  ;;  %v16237_v39 = vpop.f32.mrb[81].mxu0  ;;  %v20891_v46 = vpop.f32.mrb[82].mxu1 }
 0x5d7   : > { %17408 = vst.msk [vmem:[%s28828_s6 + $0x130] sm:$0xf] %vm17331_vm9, %v19648_v48  ;;  %v19649_v45 = vpack.c.bf16 %v16768_v47, %v16768_v47  ;;  %v21539_v29 = vadd.f32 %v16237_v39, %v8948_v43  ;;  %v21411_v23 = vpop.f32.mrb[82].mxu0  ;;  %v8951_v1 = vpop.f32.mrb[83].mxu1 }
 0x5d8   : > { %17411 = vst.msk [vmem:[%s28828_s6 + $0x13c] sm:$0xf] %vm17331_vm9, %v19651_v19  ;;  %v16645_v40 = vadd.f32 %v29170_v6, %v21538_v5  ;;  %v21540_v12 = vadd.f32 %v21411_v23, %v20891_v46  ;;  %v16240_v17 = vpop.f32.mrb[83].mxu0 }
 0x5d9   : > { %17409 = vst.msk [vmem:[%s28828_s6 + $0x134] sm:$0xf] %vm17331_vm9, %v19649_v45  ;;  %v16643_v0 = vadd.f32 %v29170_v6, %v21539_v29  ;;  %v21541_v2 = vadd.f32 %v16240_v17, %v8951_v1 }
 0x5da   : > { %v16773_v11 = vmax.f32 %v16645_v40, 0.0  ;;  %v16646_v61 = vadd.f32 %v29170_v6, %v21540_v12 }
 0x5db   : > { %v16771_v55 = vmax.f32 %v16643_v0, 0.0  ;;  %v16644_v50 = vadd.f32 %v29170_v6, %v21541_v2 }
 0x5dc   : > { %v19654_v52 = vpack.c.bf16 %v16773_v11, %v16773_v11  ;;  %v16774_v31 = vmax.f32 %v16646_v61, 0.0  ;;  %v20894_v53 = vpop.f32.mrb[84].mxu1 }
 0x5dd   : > { %v19652_v58 = vpack.c.bf16 %v16771_v55, %v16771_v55  ;;  %v16772_v27 = vmax.f32 %v16644_v50, 0.0  ;;  %v21414_v38 = vpop.f32.mrb[84].mxu0  ;;  %v8964_v35 = vpop.f32.mrb[85].mxu1 }
 0x5de   : > { %17414 = vst.msk [vmem:[%s28828_s6 + $0x148] sm:$0xf] %vm17331_vm9, %v19654_v52  ;;  %v19655_v15 = vpack.c.bf16 %v16774_v31, %v16774_v31  ;;  %v21542_v8 = vadd.f32 %v21414_v38, %v20894_v53  ;;  %v16253_v30 = vpop.f32.mrb[85].mxu0  ;;  %v20895_v4 = vpop.f32.mrb[86].mxu1 }
 0x5df   : > { %17412 = vst.msk [vmem:[%s28828_s6 + $0x140] sm:$0xf] %vm17331_vm9, %v19652_v58  ;;  %v19653_v22 = vpack.c.bf16 %v16772_v27, %v16772_v27  ;;  %v21543_v14 = vadd.f32 %v16253_v30, %v8964_v35  ;;  %v21415_v34 = vpop.f32.mrb[86].mxu0  ;;  %v8967_v62 = vpop.f32.mrb[87].mxu1 }
 0x5e0   : > { %17415 = vst.msk [vmem:[%s28828_s6 + $0x14c] sm:$0xf] %vm17331_vm9, %v19655_v15  ;;  %v16649_v54 = vadd.f32 %v29170_v6, %v21542_v8  ;;  %v21544_v10 = vadd.f32 %v21415_v34, %v20895_v4  ;;  %v16256_v20 = vpop.f32.mrb[87].mxu0 }
 0x5e1   : > { %17413 = vst.msk [vmem:[%s28828_s6 + $0x144] sm:$0xf] %vm17331_vm9, %v19653_v22  ;;  %v16647_v18 = vadd.f32 %v29170_v6, %v21543_v14  ;;  %v21545_v49 = vadd.f32 %v16256_v20, %v8967_v62 }
 0x5e2   : > { %v16777_v28 = vmax.f32 %v16649_v54, 0.0  ;;  %v16650_v25 = vadd.f32 %v29170_v6, %v21544_v10 }
 0x5e3   : > { %v16775_v26 = vmax.f32 %v16647_v18, 0.0  ;;  %v16648_v37 = vadd.f32 %v29170_v6, %v21545_v49 }
 0x5e4   : > { %v19658_v24 = vpack.c.bf16 %v16777_v28, %v16777_v28  ;;  %v16778_v7 = vmax.f32 %v16650_v25, 0.0  ;;  %v20898_v33 = vpop.f32.mrb[88].mxu1 }
 0x5e5   : > { %v19656_v63 = vpack.c.bf16 %v16775_v26, %v16775_v26  ;;  %v16776_v9 = vmax.f32 %v16648_v37, 0.0  ;;  %v21418_v60 = vpop.f32.mrb[88].mxu0  ;;  %v8980_v56 = vpop.f32.mrb[89].mxu1 }
 0x5e6   : > { %17418 = vst.msk [vmem:[%s28828_s6 + $0x158] sm:$0xf] %vm17331_vm9, %v19658_v24  ;;  %v19659_v32 = vpack.c.bf16 %v16778_v7, %v16778_v7  ;;  %v21546_v41 = vadd.f32 %v21418_v60, %v20898_v33  ;;  %v16269_v3 = vpop.f32.mrb[89].mxu0  ;;  %v20899_v42 = vpop.f32.mrb[90].mxu1 }
 0x5e7   : > { %17416 = vst.msk [vmem:[%s28828_s6 + $0x150] sm:$0xf] %vm17331_vm9, %v19656_v63  ;;  %v19657_v36 = vpack.c.bf16 %v16776_v9, %v16776_v9  ;;  %v21547_v16 = vadd.f32 %v16269_v3, %v8980_v56  ;;  %v21419_v21 = vpop.f32.mrb[90].mxu0  ;;  %v8983_v13 = vpop.f32.mrb[91].mxu1 }
 0x5e8   : > { %17419 = vst.msk [vmem:[%s28828_s6 + $0x15c] sm:$0xf] %vm17331_vm9, %v19659_v32  ;;  %v16653_v59 = vadd.f32 %v29170_v6, %v21546_v41  ;;  %v21548_v51 = vadd.f32 %v21419_v21, %v20899_v42  ;;  %v16272_v48 = vpop.f32.mrb[91].mxu0 }
 0x5e9   : > { %17417 = vst.msk [vmem:[%s28828_s6 + $0x154] sm:$0xf] %vm17331_vm9, %v19657_v36  ;;  %v16651_v47 = vadd.f32 %v29170_v6, %v21547_v16  ;;  %v21549_v57 = vadd.f32 %v16272_v48, %v8983_v13 }
 0x5ea   : > { %v16781_v44 = vmax.f32 %v16653_v59, 0.0  ;;  %v16654_v19 = vadd.f32 %v29170_v6, %v21548_v51 }
 0x5eb   : > { %v16779_v5 = vmax.f32 %v16651_v47, 0.0  ;;  %v16652_v43 = vadd.f32 %v29170_v6, %v21549_v57 }
 0x5ec   : > { %v19662_v39 = vpack.c.bf16 %v16781_v44, %v16781_v44  ;;  %v16782_v45 = vmax.f32 %v16654_v19, 0.0  ;;  %v20902_v23 = vpop.f32.mrb[92].mxu1 }
 0x5ed   : > { %v19660_v29 = vpack.c.bf16 %v16779_v5, %v16779_v5  ;;  %v16780_v46 = vmax.f32 %v16652_v43, 0.0  ;;  %v21422_v40 = vpop.f32.mrb[92].mxu0  ;;  %v8996_v17 = vpop.f32.mrb[93].mxu1 }
 0x5ee   : > { %17422 = vst.msk [vmem:[%s28828_s6 + $0x168] sm:$0xf] %vm17331_vm9, %v19662_v39  ;;  %v19663_v12 = vpack.c.bf16 %v16782_v45, %v16782_v45  ;;  %v21550_v1 = vadd.f32 %v21422_v40, %v20902_v23  ;;  %v16285_v0 = vpop.f32.mrb[93].mxu0  ;;  %v20903_v61 = vpop.f32.mrb[94].mxu1 }
 0x5ef   : > { %17420 = vst.msk [vmem:[%s28828_s6 + $0x160] sm:$0xf] %vm17331_vm9, %v19660_v29  ;;  %v19661_v2 = vpack.c.bf16 %v16780_v46, %v16780_v46  ;;  %v21551_v11 = vadd.f32 %v16285_v0, %v8996_v17  ;;  %v21423_v55 = vpop.f32.mrb[94].mxu0  ;;  %v8999_v31 = vpop.f32.mrb[95].mxu1 }
 0x5f0   : > { %17423 = vst.msk [vmem:[%s28828_s6 + $0x16c] sm:$0xf] %vm17331_vm9, %v19663_v12  ;;  %v16657_v50 = vadd.f32 %v29170_v6, %v21550_v1  ;;  %v21552_v52 = vadd.f32 %v21423_v55, %v20903_v61  ;;  %v16288_v58 = vpop.f32.mrb[95].mxu0 }
 0x5f1   : > { %17421 = vst.msk [vmem:[%s28828_s6 + $0x164] sm:$0xf] %vm17331_vm9, %v19661_v2  ;;  %v16655_v27 = vadd.f32 %v29170_v6, %v21551_v11  ;;  %v21553_v53 = vadd.f32 %v16288_v58, %v8999_v31 }
 0x5f2   : > { %v16785_v38 = vmax.f32 %v16657_v50, 0.0  ;;  %v16658_v15 = vadd.f32 %v29170_v6, %v21552_v52 }
 0x5f3   : > { %v16783_v8 = vmax.f32 %v16655_v27, 0.0  ;;  %v16656_v35 = vadd.f32 %v29170_v6, %v21553_v53 }
 0x5f4   : > { %v19666_v30 = vpack.c.bf16 %v16785_v38, %v16785_v38  ;;  %v16786_v22 = vmax.f32 %v16658_v15, 0.0  ;;  %v20906_v34 = vpop.f32.mrb[96].mxu1 }
 0x5f5   : > { %v19664_v14 = vpack.c.bf16 %v16783_v8, %v16783_v8  ;;  %v16784_v4 = vmax.f32 %v16656_v35, 0.0  ;;  %v21426_v54 = vpop.f32.mrb[96].mxu0  ;;  %v9012_v20 = vpop.f32.mrb[97].mxu1 }
 0x5f6   : > { %17426 = vst.msk [vmem:[%s28828_s6 + $0x178] sm:$0xf] %vm17331_vm9, %v19666_v30  ;;  %v19667_v10 = vpack.c.bf16 %v16786_v22, %v16786_v22  ;;  %v21554_v62 = vadd.f32 %v21426_v54, %v20906_v34  ;;  %v16301_v18 = vpop.f32.mrb[97].mxu0  ;;  %v20907_v25 = vpop.f32.mrb[98].mxu1 }
 0x5f7   : > { %17424 = vst.msk [vmem:[%s28828_s6 + $0x170] sm:$0xf] %vm17331_vm9, %v19664_v14  ;;  %v19665_v49 = vpack.c.bf16 %v16784_v4, %v16784_v4  ;;  %v21555_v28 = vadd.f32 %v16301_v18, %v9012_v20  ;;  %v21427_v26 = vpop.f32.mrb[98].mxu0  ;;  %v9015_v7 = vpop.f32.mrb[99].mxu1 }
 0x5f8   : > { %17427 = vst.msk [vmem:[%s28828_s6 + $0x17c] sm:$0xf] %vm17331_vm9, %v19667_v10  ;;  %v16661_v37 = vadd.f32 %v29170_v6, %v21554_v62  ;;  %v21556_v24 = vadd.f32 %v21427_v26, %v20907_v25  ;;  %v16304_v63 = vpop.f32.mrb[99].mxu0 }
 0x5f9   : > { %17425 = vst.msk [vmem:[%s28828_s6 + $0x174] sm:$0xf] %vm17331_vm9, %v19665_v49  ;;  %v16659_v9 = vadd.f32 %v29170_v6, %v21555_v28  ;;  %v21557_v33 = vadd.f32 %v16304_v63, %v9015_v7 }
 0x5fa   : > { %v16789_v60 = vmax.f32 %v16661_v37, 0.0  ;;  %v16662_v32 = vadd.f32 %v29170_v6, %v21556_v24 }
 0x5fb   : > { %v16787_v41 = vmax.f32 %v16659_v9, 0.0  ;;  %v16660_v56 = vadd.f32 %v29170_v6, %v21557_v33 }
 0x5fc   : > { %v19670_v3 = vpack.c.bf16 %v16789_v60, %v16789_v60  ;;  %v16790_v36 = vmax.f32 %v16662_v32, 0.0  ;;  %v20910_v21 = vpop.f32.mrb[100].mxu1 }
 0x5fd   : > { %v19668_v16 = vpack.c.bf16 %v16787_v41, %v16787_v41  ;;  %v16788_v42 = vmax.f32 %v16660_v56, 0.0  ;;  %v21430_v59 = vpop.f32.mrb[100].mxu0  ;;  %v9028_v48 = vpop.f32.mrb[101].mxu1 }
 0x5fe   : > { %17430 = vst.msk [vmem:[%s28828_s6 + $0x188] sm:$0xf] %vm17331_vm9, %v19670_v3  ;;  %v19671_v51 = vpack.c.bf16 %v16790_v36, %v16790_v36  ;;  %v21558_v13 = vadd.f32 %v21430_v59, %v20910_v21  ;;  %v16317_v47 = vpop.f32.mrb[101].mxu0  ;;  %v20911_v19 = vpop.f32.mrb[102].mxu1 }
 0x5ff   : > { %17428 = vst.msk [vmem:[%s28828_s6 + $0x180] sm:$0xf] %vm17331_vm9, %v19668_v16  ;;  %v19669_v57 = vpack.c.bf16 %v16788_v42, %v16788_v42  ;;  %v21559_v44 = vadd.f32 %v16317_v47, %v9028_v48  ;;  %v21431_v5 = vpop.f32.mrb[102].mxu0  ;;  %v9031_v45 = vpop.f32.mrb[103].mxu1 }
 0x600   : > { %17431 = vst.msk [vmem:[%s28828_s6 + $0x18c] sm:$0xf] %vm17331_vm9, %v19671_v51  ;;  %v16665_v43 = vadd.f32 %v29170_v6, %v21558_v13  ;;  %v21560_v39 = vadd.f32 %v21431_v5, %v20911_v19  ;;  %v16320_v29 = vpop.f32.mrb[103].mxu0 }
 0x601   : > { %17429 = vst.msk [vmem:[%s28828_s6 + $0x184] sm:$0xf] %vm17331_vm9, %v19669_v57  ;;  %v16663_v46 = vadd.f32 %v29170_v6, %v21559_v44  ;;  %v21561_v23 = vadd.f32 %v16320_v29, %v9031_v45 }
 0x602   : > { %v16793_v40 = vmax.f32 %v16665_v43, 0.0  ;;  %v16666_v12 = vadd.f32 %v29170_v6, %v21560_v39 }
 0x603   : > { %v16791_v1 = vmax.f32 %v16663_v46, 0.0  ;;  %v16664_v17 = vadd.f32 %v29170_v6, %v21561_v23 }
 0x604   : > { %v19674_v0 = vpack.c.bf16 %v16793_v40, %v16793_v40  ;;  %v16794_v2 = vmax.f32 %v16666_v12, 0.0  ;;  %v20914_v55 = vpop.f32.mrb[104].mxu1 }
 0x605   : > { %v19672_v11 = vpack.c.bf16 %v16791_v1, %v16791_v1  ;;  %v16792_v61 = vmax.f32 %v16664_v17, 0.0  ;;  %v9044_v58 = vpop.f32.mrb[105].mxu1 }
 0x606   : > { %v21434_v50 = vpop.f32.mrb[104].mxu0  ;;  %17434 = vst.msk [vmem:[%s28828_s6 + $0x198] sm:$0xf] %vm17331_vm9, %v19674_v0  ;;  %v19675_v52 = vpack.c.bf16 %v16794_v2, %v16794_v2  ;;  %v20915_v15 = vpop.f32.mrb[106].mxu1 }
 0x607   : > { %v21562_v31 = vadd.f32 %v21434_v50, %v20914_v55  ;;  %v16333_v27 = vpop.f32.mrb[105].mxu0  ;;  %17432 = vst.msk [vmem:[%s28828_s6 + $0x190] sm:$0xf] %vm17331_vm9, %v19672_v11  ;;  %v19673_v53 = vpack.c.bf16 %v16792_v61, %v16792_v61  ;;  %v9047_v22 = vpop.f32.mrb[107].mxu1 }
 0x608   : > { %v21563_v38 = vadd.f32 %v16333_v27, %v9044_v58  ;;  %v21435_v8 = vpop.f32.mrb[106].mxu0  ;;  %17435 = vst.msk [vmem:[%s28828_s6 + $0x19c] sm:$0xf] %vm17331_vm9, %v19675_v52 }
 0x609   : > { %v16669_v35 = vadd.f32 %v29170_v6, %v21562_v31  ;;  %v21564_v30 = vadd.f32 %v21435_v8, %v20915_v15  ;;  %v16336_v14 = vpop.f32.mrb[107].mxu0  ;;  %17433 = vst.msk [vmem:[%s28828_s6 + $0x194] sm:$0xf] %vm17331_vm9, %v19673_v53 }
 0x60a   : > { %v16667_v4 = vadd.f32 %v29170_v6, %v21563_v38  ;;  %v21565_v34 = vadd.f32 %v16336_v14, %v9047_v22 }
 0x60b   : > { %v16797_v54 = vmax.f32 %v16669_v35, 0.0  ;;  %v16670_v10 = vadd.f32 %v29170_v6, %v21564_v30 }
 0x60c   : > { %v16795_v62 = vmax.f32 %v16667_v4, 0.0  ;;  %v16668_v20 = vadd.f32 %v29170_v6, %v21565_v34  ;;  %v20918_v26 = vpop.f32.mrb[108].mxu1 }
 0x60d   : > { %v19678_v18 = vpack.c.bf16 %v16797_v54, %v16797_v54  ;;  %v16798_v49 = vmax.f32 %v16670_v10, 0.0  ;;  %v9060_v63 = vpop.f32.mrb[109].mxu1 }
 0x60e   : > { %v19676_v28 = vpack.c.bf16 %v16795_v62, %v16795_v62  ;;  %v16796_v25 = vmax.f32 %v16668_v20, 0.0  ;;  %v21438_v37 = vpop.f32.mrb[108].mxu0  ;;  %v20919_v32 = vpop.f32.mrb[110].mxu1 }
 0x60f   : > { %17438 = vst.msk [vmem:[%s28828_s6 + $0x1a8] sm:$0xf] %vm17331_vm9, %v19678_v18  ;;  %v19679_v24 = vpack.c.bf16 %v16798_v49, %v16798_v49  ;;  %v21566_v7 = vadd.f32 %v21438_v37, %v20918_v26  ;;  %v16349_v9 = vpop.f32.mrb[109].mxu0  ;;  %v9063_v36 = vpop.f32.mrb[111].mxu1 }
 0x610   : > { %17436 = vst.msk [vmem:[%s28828_s6 + $0x1a0] sm:$0xf] %vm17331_vm9, %v19676_v28  ;;  %v19677_v33 = vpack.c.bf16 %v16796_v25, %v16796_v25  ;;  %v21567_v60 = vadd.f32 %v16349_v9, %v9060_v63  ;;  %v21439_v41 = vpop.f32.mrb[110].mxu0 }
 0x611   : > { %17439 = vst.msk [vmem:[%s28828_s6 + $0x1ac] sm:$0xf] %vm17331_vm9, %v19679_v24  ;;  %v16673_v56 = vadd.f32 %v29170_v6, %v21566_v7  ;;  %v21568_v3 = vadd.f32 %v21439_v41, %v20919_v32  ;;  %v16352_v16 = vpop.f32.mrb[111].mxu0 }
 0x612   : > { %17437 = vst.msk [vmem:[%s28828_s6 + $0x1a4] sm:$0xf] %vm17331_vm9, %v19677_v33  ;;  %v16671_v42 = vadd.f32 %v29170_v6, %v21567_v60  ;;  %v21569_v21 = vadd.f32 %v16352_v16, %v9063_v36 }
 0x613   : > { %v16801_v59 = vmax.f32 %v16673_v56, 0.0  ;;  %v16674_v51 = vadd.f32 %v29170_v6, %v21568_v3 }
 0x614   : > { %v16799_v13 = vmax.f32 %v16671_v42, 0.0  ;;  %v16672_v48 = vadd.f32 %v29170_v6, %v21569_v21  ;;  %v20922_v5 = vpop.f32.mrb[112].mxu1 }
 0x615   : > { %v19682_v47 = vpack.c.bf16 %v16801_v59, %v16801_v59  ;;  %v16802_v57 = vmax.f32 %v16674_v51, 0.0  ;;  %v9076_v29 = vpop.f32.mrb[113].mxu1 }
 0x616   : > { %v19680_v44 = vpack.c.bf16 %v16799_v13, %v16799_v13  ;;  %v16800_v19 = vmax.f32 %v16672_v48, 0.0  ;;  %v21442_v43 = vpop.f32.mrb[112].mxu0  ;;  %v20923_v12 = vpop.f32.mrb[114].mxu1 }
 0x617   : > { %17442 = vst.msk [vmem:[%s28828_s6 + $0x1b8] sm:$0xf] %vm17331_vm9, %v19682_v47  ;;  %v19683_v39 = vpack.c.bf16 %v16802_v57, %v16802_v57  ;;  %v21570_v45 = vadd.f32 %v21442_v43, %v20922_v5  ;;  %v16365_v46 = vpop.f32.mrb[113].mxu0  ;;  %v9079_v2 = vpop.f32.mrb[115].mxu1 }
 0x618   : > { %17440 = vst.msk [vmem:[%s28828_s6 + $0x1b0] sm:$0xf] %vm17331_vm9, %v19680_v44  ;;  %v19681_v23 = vpack.c.bf16 %v16800_v19, %v16800_v19  ;;  %v21571_v40 = vadd.f32 %v16365_v46, %v9076_v29  ;;  %v21443_v1 = vpop.f32.mrb[114].mxu0 }
 0x619   : > { %17443 = vst.msk [vmem:[%s28828_s6 + $0x1bc] sm:$0xf] %vm17331_vm9, %v19683_v39  ;;  %v16677_v17 = vadd.f32 %v29170_v6, %v21570_v45  ;;  %v21572_v0 = vadd.f32 %v21443_v1, %v20923_v12  ;;  %v16368_v11 = vpop.f32.mrb[115].mxu0 }
 0x61a   : > { %17441 = vst.msk [vmem:[%s28828_s6 + $0x1b4] sm:$0xf] %vm17331_vm9, %v19681_v23  ;;  %v16675_v61 = vadd.f32 %v29170_v6, %v21571_v40  ;;  %v21573_v55 = vadd.f32 %v16368_v11, %v9079_v2 }
 0x61b   : > { %v16805_v50 = vmax.f32 %v16677_v17, 0.0  ;;  %v16678_v52 = vadd.f32 %v29170_v6, %v21572_v0 }
 0x61c   : > { %v16803_v31 = vmax.f32 %v16675_v61, 0.0  ;;  %v16676_v58 = vadd.f32 %v29170_v6, %v21573_v55  ;;  %v20926_v8 = vpop.f32.mrb[116].mxu1 }
 0x61d   : > { %v19686_v27 = vpack.c.bf16 %v16805_v50, %v16805_v50  ;;  %v16806_v53 = vmax.f32 %v16678_v52, 0.0  ;;  %v9092_v14 = vpop.f32.mrb[117].mxu1 }
 0x61e   : > { %v19684_v38 = vpack.c.bf16 %v16803_v31, %v16803_v31  ;;  %v16804_v15 = vmax.f32 %v16676_v58, 0.0  ;;  %v21446_v35 = vpop.f32.mrb[116].mxu0  ;;  %v20927_v10 = vpop.f32.mrb[118].mxu1 }
 0x61f   : > { %17446 = vst.msk [vmem:[%s28828_s6 + $0x1c8] sm:$0xf] %vm17331_vm9, %v19686_v27  ;;  %v19687_v30 = vpack.c.bf16 %v16806_v53, %v16806_v53  ;;  %v21574_v22 = vadd.f32 %v21446_v35, %v20926_v8  ;;  %v16381_v4 = vpop.f32.mrb[117].mxu0  ;;  %v9095_v49 = vpop.f32.mrb[119].mxu1 }
 0x620   : > { %17444 = vst.msk [vmem:[%s28828_s6 + $0x1c0] sm:$0xf] %vm17331_vm9, %v19684_v38  ;;  %v19685_v34 = vpack.c.bf16 %v16804_v15, %v16804_v15  ;;  %v21575_v54 = vadd.f32 %v16381_v4, %v9092_v14  ;;  %v21447_v62 = vpop.f32.mrb[118].mxu0 }
 0x621   : > { %17447 = vst.msk [vmem:[%s28828_s6 + $0x1cc] sm:$0xf] %vm17331_vm9, %v19687_v30  ;;  %v16681_v20 = vadd.f32 %v29170_v6, %v21574_v22  ;;  %v21576_v18 = vadd.f32 %v21447_v62, %v20927_v10  ;;  %v16384_v28 = vpop.f32.mrb[119].mxu0 }
 0x622   : > { %17445 = vst.msk [vmem:[%s28828_s6 + $0x1c4] sm:$0xf] %vm17331_vm9, %v19685_v34  ;;  %v16679_v25 = vadd.f32 %v29170_v6, %v21575_v54  ;;  %v21577_v26 = vadd.f32 %v16384_v28, %v9095_v49 }
 0x623   : > { %v16809_v37 = vmax.f32 %v16681_v20, 0.0  ;;  %v16682_v24 = vadd.f32 %v29170_v6, %v21576_v18 }
 0x624   : > { %v16807_v7 = vmax.f32 %v16679_v25, 0.0  ;;  %v16680_v63 = vadd.f32 %v29170_v6, %v21577_v26  ;;  %v20930_v41 = vpop.f32.mrb[120].mxu1 }
 0x625   : > { %v19690_v9 = vpack.c.bf16 %v16809_v37, %v16809_v37  ;;  %v16810_v33 = vmax.f32 %v16682_v24, 0.0  ;;  %v9108_v16 = vpop.f32.mrb[121].mxu1 }
 0x626   : > { %v19688_v60 = vpack.c.bf16 %v16807_v7, %v16807_v7  ;;  %v16808_v32 = vmax.f32 %v16680_v63, 0.0  ;;  %v21450_v56 = vpop.f32.mrb[120].mxu0  ;;  %v20931_v51 = vpop.f32.mrb[122].mxu1 }
 0x627   : > { %17450 = vst.msk [vmem:[%s28828_s6 + $0x1d8] sm:$0xf] %vm17331_vm9, %v19690_v9  ;;  %v19691_v3 = vpack.c.bf16 %v16810_v33, %v16810_v33  ;;  %v21578_v36 = vadd.f32 %v21450_v56, %v20930_v41  ;;  %v16397_v42 = vpop.f32.mrb[121].mxu0  ;;  %v9111_v57 = vpop.f32.mrb[123].mxu1 }
 0x628   : > { %17448 = vst.msk [vmem:[%s28828_s6 + $0x1d0] sm:$0xf] %vm17331_vm9, %v19688_v60  ;;  %v19689_v21 = vpack.c.bf16 %v16808_v32, %v16808_v32  ;;  %v21579_v59 = vadd.f32 %v16397_v42, %v9108_v16  ;;  %v21451_v13 = vpop.f32.mrb[122].mxu0 }
 0x629   : > { %17451 = vst.msk [vmem:[%s28828_s6 + $0x1dc] sm:$0xf] %vm17331_vm9, %v19691_v3  ;;  %v16685_v48 = vadd.f32 %v29170_v6, %v21578_v36  ;;  %v21580_v47 = vadd.f32 %v21451_v13, %v20931_v51  ;;  %v16400_v44 = vpop.f32.mrb[123].mxu0 }
 0x62a   : > { %17449 = vst.msk [vmem:[%s28828_s6 + $0x1d4] sm:$0xf] %vm17331_vm9, %v19689_v21  ;;  %v16683_v19 = vadd.f32 %v29170_v6, %v21579_v59  ;;  %v21581_v5 = vadd.f32 %v16400_v44, %v9111_v57 }
 0x62b   : > { %v16813_v43 = vmax.f32 %v16685_v48, 0.0  ;;  %v16686_v39 = vadd.f32 %v29170_v6, %v21580_v47 }
 0x62c   : > { %v16811_v45 = vmax.f32 %v16683_v19, 0.0  ;;  %v16684_v29 = vadd.f32 %v29170_v6, %v21581_v5  ;;  %v20934_v1 = vpop.f32.mrb[124].mxu1 }
 0x62d   : > { %v19694_v46 = vpack.c.bf16 %v16813_v43, %v16813_v43  ;;  %v16814_v23 = vmax.f32 %v16686_v39, 0.0  ;;  %v9124_v11 = vpop.f32.mrb[125].mxu1 }
 0x62e   : > { %v19692_v40 = vpack.c.bf16 %v16811_v45, %v16811_v45  ;;  %v16812_v12 = vmax.f32 %v16684_v29, 0.0  ;;  %v21454_v17 = vpop.f32.mrb[124].mxu0  ;;  %v20935_v52 = vpop.f32.mrb[126].mxu1 }
 0x62f   : > { %17454 = vst.msk [vmem:[%s28828_s6 + $0x1e8] sm:$0xf] %vm17331_vm9, %v19694_v46  ;;  %v19695_v0 = vpack.c.bf16 %v16814_v23, %v16814_v23  ;;  %v21582_v2 = vadd.f32 %v21454_v17, %v20934_v1  ;;  %v16413_v61 = vpop.f32.mrb[125].mxu0  ;;  %v9127_v53 = vpop.f32.mrb[127].mxu1 }
 0x630   : > { %17452 = vst.msk [vmem:[%s28828_s6 + $0x1e0] sm:$0xf] %vm17331_vm9, %v19692_v40  ;;  %v19693_v55 = vpack.c.bf16 %v16812_v12, %v16812_v12  ;;  %v21583_v50 = vadd.f32 %v16413_v61, %v9124_v11  ;;  %v21455_v31 = vpop.f32.mrb[126].mxu0 }
 0x631   : > { %17455 = vst.msk [vmem:[%s28828_s6 + $0x1ec] sm:$0xf] %vm17331_vm9, %v19695_v0  ;;  %v16689_v58 = vadd.f32 %v29170_v6, %v21582_v2  ;;  %v21584_v27 = vadd.f32 %v21455_v31, %v20935_v52  ;;  %v16416_v38 = vpop.f32.mrb[127].mxu0 }
 0x632   : > { %17453 = vst.msk [vmem:[%s28828_s6 + $0x1e4] sm:$0xf] %vm17331_vm9, %v19693_v55  ;;  %v16687_v15 = vadd.f32 %v29170_v6, %v21583_v50  ;;  %v21585_v8 = vadd.f32 %v16416_v38, %v9127_v53 }
 0x633   : > { %v16817_v35 = vmax.f32 %v16689_v58, 0.0  ;;  %v16690_v30 = vadd.f32 %v29170_v6, %v21584_v27 }
 0x634   : > { %v16815_v22 = vmax.f32 %v16687_v15, 0.0  ;;  %v16688_v14 = vadd.f32 %v29170_v6, %v21585_v8 }
 0x635   : > { %v19698_v4 = vpack.c.bf16 %v16817_v35, %v16817_v35  ;;  %v16818_v34 = vmax.f32 %v16690_v30, 0.0 }
 0x636   : > { %v19696_v54 = vpack.c.bf16 %v16815_v22, %v16815_v22  ;;  %v16816_v10 = vmax.f32 %v16688_v14, 0.0 }
 0x637   : > { %17458 = vst.msk [vmem:[%s28828_s6 + $0x1f8] sm:$0xf] %vm17331_vm9, %v19698_v4  ;;  %v19699_v62 = vpack.c.bf16 %v16818_v34, %v16818_v34 }
 0x638   : > { %17456 = vst.msk [vmem:[%s28828_s6 + $0x1f0] sm:$0xf] %vm17331_vm9, %v19696_v54  ;;  %v19697_v6 = vpack.c.bf16 %v16816_v10, %v16816_v10 }
 0x639   : > { %17459 = vst.msk [vmem:[%s28828_s6 + $0x1fc] sm:$0xf] %vm17331_vm9, %v19699_v62 }
 0x63a   : > { %17457 = vst.msk [vmem:[%s28828_s6 + $0x1f4] sm:$0xf] %vm17331_vm9, %v19697_v6 }
 0x63b   : > { %23184 = shalt.err (!%p23181_p3)
}
 0x63c   : > { %s23185_s27 = scalar_lea.hbm %s29349_s19, 8192  ;;  %s23189_s30 = scalar_lea.hbm %s29405_s3, 16384 }
 0x63d   : > { %p23186_p4 = scmp.ne.s32.totalorder %s29349_s19, %s23185_s27  ;;  %p23190_p9 = scmp.lt.u32.totalorder %s29349_s19, %s29405_s3 }
 0x63e   : > { %p23191_p10 = scmp.lt.u32.totalorder %s23189_s30, %s23185_s27  ;;  %p23193_p12 = scmp.lt.u32.totalorder %s23185_s27, %s29349_s19 }
 0x63f   : > { %p23187_p7 = pnand %p23186_p4, %p23297_p5 }
 0x640   : > { %p23192_p11 = por %p23191_p10, %p23190_p9 }
 0x641   : > { %p23188_p8 = pneg %p23187_p7 }
 0x642   : > { %p23194_p13 = por %p23193_p12, %p23192_p11 }
 0x644   : > { %p23195_p0 = pnand %p23194_p13, %p23188_p8 }
 0x646   : > { %23198 = shalt.err (!%p23195_p0)
}
 0x647   : > { %s23237_s6 = smov 64   ;;  %s23238_s7 = smov 4  }
 0x648   : > { %22483 = dma.vmem_to_hbm [thread:$0]  (%p23297_p5), %s29351_s10, 8192, %s29349_s19, %s29361_s16, %s23237_s6, %s23237_s6, %s23238_s7  }
 0x649 PF: > { %p22489_p1 = scmp.ge.s32.totalorder %s23233_s15, 2  ;;  %s17489_s8 = sand.u32 1, %s23221_s12  }
 0x64a   : > { %s17490_s9 = scalar_lea.sflag [#allocation3], %s17489_s8 }
 0x64b   : > { %p22486_p2 = pnand %p22489_p1, %p23301_p6 }
 0x64d   : > { %23216 = dma.done.wait (!%p22486_p2), %s17490_s9, 8192  }
 0x64e   : > { %23218 = vsyncadd (!%p22486_p2), %s17490_s9, 4294959104  ;;  %p13_p3 = scmp.ge.s32.totalorder %s23284_s18, 4   ;;  %s29764_s12 = smov %s23225_s13 }
 0x64f   : > { %s29765_s13 = smov %s23229_s14  ;;  %s29766_s14 = smov %s23295_s21 }
 0x650   : > { %s29767_s15 = smov %s23284_s18  ;;  %15 = sbr.rel (!%p13_p3) target bundleno = 3 (0x3), region = 77 }
 0x657   :  { %17495 = vsyncpa [#allocation3], 1 }
 0x658   :  { %17497 = vsyncpa [#allocation3 + $0x1], 1 }

</bundles_post_ra>
